<compile_context>
chip_gen: v7x
topology: tpu7x:2x2x1
jax: 0.10.0
libtpu: 0.0.40
codegen_flags: <defaults>
</compile_context>

<pallas_src>
import jax
import jax.numpy as jnp
from jax import lax
from jax.experimental import pallas as pl
from jax.experimental.pallas import tpu as pltpu

# ---- constants matching the PyTorch module -----------------------------------
D_BERT = 1024
D_CONV = 128
DILATIONS = (1, 3, 5)
NTAP = 9 * D_CONV                    # 3 dilations x 3 taps
H = 128                              # LSTM hidden
NG = 8 * H                           # 4 gates x 2 directions = 1024
K = 31                               # total_kinds
KPAD = 128                           # tag dim padded to a full lane register
KNEXT = 32                           # tag dim padded to one sublane group for Viterbi
HALO = 16                            # >= max dilated-conv shift (10), multiple of 8
TARGET_PAD = 31
CONTEXT_PAD = 0
NEG = -1e9


def _sigmoid(x):
    # one EUP op instead of exp + reciprocal (EUP slot is the scarce one in the recurrence)
    return 0.5 * (jnp.tanh(0.5 * x) + 1.0)


# ---- kernel 1: dilated convs + hoisted LSTM input projection -------------------
def _make_conv_gates_kernel(TS, TB, ns):
    multi = ns > 1

    def kernel(x_ref, wbig_ref, cbias_ref, wconv_ref, gbias_ref, out_ref, carry_ref):
        # x_ref:     (TS, TB, 1024) bf16 time-major bert hidden states for this tile
        # wbig_ref:  (1024, 9*128 + 1024) bf16  [9 conv taps | W_ih bert rows, fwd+bwd]
        # cbias_ref: (1, 384)  f32  conv biases [conv1 | conv3 | conv5]
        # wconv_ref: (384, 1024) bf16 W_ih conv rows, fwd+bwd
        # gbias_ref: (1, 1024) f32  b_ih + b_hh, fwd+bwd
        # out_ref:   (TS, TB, 1024) bf16 time-major gate pre-activations (x part)
        # carry_ref: (HALO, TB, NTAP) f32 last rows of the previous S-tile's tap outputs
        s = pl.program_id(1)

        # one wide MXU matmul, explicitly flattened to 2-D (M = TS*TB)
        xb = x_ref[...]
        if TB % 16 == 0:
            x2d = xb.reshape(TS * TB, D_BERT)
        else:
            # bf16 packs 16 rows/sublane-tile; go through f32 so the merge is layout-clean
            x2d = xb.astype(jnp.float32).reshape(TS * TB, D_BERT).astype(jnp.bfloat16)
        y2d = jnp.dot(x2d, wbig_ref[...],
                      preferred_element_type=jnp.float32)            # (TS*TB, 2176)
        y_tap = y2d[:, :NTAP].reshape(TS, TB, NTAP)                   # conv taps, time-major
        g_bert = y2d[:, NTAP:]                                        # (TS*TB, 1024)

        if multi:
            @pl.when(s == 0)
            def _():
                carry_ref[...] = jnp.zeros_like(carry_ref)
            prev = carry_ref[...]                                     # previous tile's tail

        # causal dilated convs: conv[t, dil d] = bias_d + sum_j y_tap[d, j][t - d*(2-j)]
        # register accumulation of whole-row time shifts (no RMW scratch passes)
        parts = []
        for di, d in enumerate(DILATIONS):
            acc = None
            for j in range(3):
                sh = d * (2 - j)                                      # static shift in [0, 10]
                c0 = (di * 3 + j) * D_CONV
                slab = y_tap[:, :, c0:c0 + D_CONV]
                if sh == 0:
                    sl = slab
                elif multi:
                    sl = jnp.concatenate(
                        [prev[HALO - sh:, :, c0:c0 + D_CONV], slab[:TS - sh]], axis=0)
                elif sh < TS:
                    sl = jnp.concatenate(
                        [jnp.zeros((sh, TB, D_CONV), jnp.float32), slab[:TS - sh]], axis=0)
                else:
                    continue                      # tap only ever reads the left zero-padding
                acc = sl if acc is None else acc + sl
            if acc is None:
                acc = jnp.zeros((TS, TB, D_CONV), jnp.float32)
            parts.append(acc)
        conv_val = jnp.concatenate(parts, axis=-1) + cbias_ref[...]   # (TS, TB, 384)

        if multi:
            carry_ref[...] = y_tap[TS - HALO:]                        # halo for next S-tile

        # gates_x = bert @ W_ih_bert + conv @ W_ih_conv + (b_ih + b_hh), flattened matmul
        g_conv = jnp.dot(conv_val.reshape(TS * TB, 3 * D_CONV).astype(jnp.bfloat16),
                         wconv_ref[...], preferred_element_type=jnp.float32)
        gates = g_bert + g_conv + gbias_ref[...]
        out_ref[...] = gates.reshape(TS, TB, NG).astype(out_ref.dtype)

    return kernel


# ---- kernel 2: interleaved bidirectional LSTM recurrence + fused FC head -------
def _make_lstm_fc_kernel(S, TB):
    G = 4 * H

    def kernel(gx_ref, whh_ref, fcw_ref, fcb_ref, out_ref, h_sc):
        # gx_ref:  (S, TB, 1024) bf16 time-major x@W_ih + b, [fwd 4H | bwd 4H]
        # whh_ref: (256, 1024)   bf16 block-diag [[whh_f, 0], [0, whh_b]] (gate order i,f,g,o)
        # fcw_ref: (256, 128)    bf16 Linear(256->31), zero-padded to 128 tags
        # fcb_ref: (1, 128)      f32  bias, padded tags = -1e9
        # out_ref: (S, TB, 128)  f32  time-major logits
        # h_sc:    (S, TB, 256)  f32  [forward h | backward h]
        whh = whh_ref[...]

        def cell(g, c):
            i_g = _sigmoid(g[:, 0:H])
            f_g = _sigmoid(g[:, H:2 * H])
            g_g = jnp.tanh(g[:, 2 * H:3 * H])
            o_g = _sigmoid(g[:, 3 * H:4 * H])
            c_new = f_g * c + i_g * g_g
            return o_g * jnp.tanh(c_new), c_new

        def step(i, carry):
            # forward at t=i, backward at t=S-1-i, one fused MXU push per step
            h_cat, c_f, c_b = carry                                   # h_cat = [h_f | h_b]
            tbk = S - 1 - i
            rec = jnp.dot(h_cat.astype(jnp.bfloat16), whh,
                          preferred_element_type=jnp.float32)         # (TB, 1024)
            g_f = gx_ref[i][:, 0:G].astype(jnp.float32) + rec[:, 0:G]
            g_b = gx_ref[tbk][:, G:2 * G].astype(jnp.float32) + rec[:, G:2 * G]
            h_f, c_f = cell(g_f, c_f)
            h_b, c_b = cell(g_b, c_b)
            h_sc[pl.ds(i, 1), :, 0:H] = h_f[None]
            h_sc[pl.ds(tbk, 1), :, H:2 * H] = h_b[None]
            return jnp.concatenate([h_f, h_b], axis=-1), c_f, c_b

        z = jnp.zeros((TB, H), jnp.float32)
        lax.fori_loop(0, S, step, (jnp.zeros((TB, 2 * H), jnp.float32), z, z))

        # TODO(synk): nn.Dropout(p=0.3) is identity at inference time; not modeled.
        # fused FC head, flattened to a single (S*TB, 256) matmul, lane-dense 128-wide store
        h2d = h_sc[...].reshape(S * TB, 2 * H).astype(jnp.bfloat16)
        logits = jnp.dot(h2d, fcw_ref[...],
                         preferred_element_type=jnp.float32) + fcb_ref[...]
        out_ref[...] = logits.reshape(S, TB, KPAD)

    return kernel


# ---- kernel 3: CRF Viterbi decode on logits[:, 1:, :] ---------------------------
def viterbi_kernel(lg_ref, mask_ref, start_ref, end_ref, transT_ref, tags_ref, hist_sc):
    # lg_ref:     (S, TB, 128) f32 time-major logits; emissions = logits[1:]
    # mask_ref:   (T, TB, 128) f32 label mask, pre-broadcast (lane-dense loads)
    # start_ref:  (1, 128) f32 (padded tags = -1e9); end_ref: (1, 128) f32 (pads = 0)
    # transT_ref: (32, 32)  f32 transitions TRANSPOSED [next, prev], pads = 0
    # tags_ref:   (T, TB, 128) int32 best tag broadcast across lanes (host takes lane 0)
    # hist_sc:    (T, TB, 32) int32 Viterbi backpointers
    S_, TB_, KP = lg_ref.shape
    T = S_ - 1
    transT = transT_ref[...]
    # loop-invariant iotas hoisted out of the serial loops (broadcast_in_dim is not CSE'd)
    iota_prev = lax.broadcasted_iota(jnp.int32, (TB_, KNEXT, KNEXT), 2)
    iota_tag = lax.broadcasted_iota(jnp.int32, (TB_, KNEXT), 1)

    score0 = (start_ref[...] + lg_ref[1])[:, 0:KNEXT]                 # (TB, 32); pad ~ -2e9

    def fwd(i, score):
        # candidates over prev tag, shrunk to the 31 real tags (+1 pad): (TB, 32, 32)
        cand = transT[None, :, :] + score[:, None, :]
        nmax = jnp.max(cand, axis=-1)                                 # (TB, 32)
        amax = jnp.min(jnp.where(cand == nmax[:, :, None], iota_prev, KNEXT),
                       axis=-1).astype(jnp.int32)                     # first-occurrence argmax
        hist_sc[pl.ds(i - 1, 1)] = amax[None]
        nscore = nmax + lg_ref[i + 1][:, 0:KNEXT]                     # emission indep. of prev
        m = mask_ref[i][:, 0:KNEXT]
        return jnp.where(m > 0, nscore, score)

    score = lax.fori_loop(1, T, fwd, score0)
    score = score + end_ref[...][:, 0:KNEXT]

    mfin = jnp.max(score, axis=-1, keepdims=True)
    best = jnp.min(jnp.where(score == mfin, iota_tag, KNEXT),
                   axis=-1, keepdims=True).astype(jnp.int32)          # (TB, 1)
    tags_ref[pl.ds(T - 1, 1)] = jnp.broadcast_to(best, (TB_, KP))[None]

    def back(j, best_tag):
        t = T - 2 - j
        hist_t = hist_sc[t]                                           # (TB, 32)
        sel = iota_tag == best_tag
        nb = jnp.sum(jnp.where(sel, hist_t, 0), axis=-1, keepdims=True)
        tags_ref[pl.ds(t, 1)] = jnp.broadcast_to(nb, (TB_, KP))[None]  # lane-dense store
        return nb

    # TODO(synk): backtrace assumes full-length sequences (mask all ones); torchcrf's
    # ragged variable-length list output is returned as a fixed (T, B) tag array.
    lax.fori_loop(0, T - 1, back, best)


# ---- wrapper: full forward (is_train=False / decode path) ----------------------
def _tile_b(Bp):
    # prefer >= 2 batch tiles (shards the "parallel" axis across v7x's two TensorCores)
    # while keeping full-S LSTM/Viterbi blocks small enough for v7x's 64 MiB VMEM.
    for tb in (16, 8):
        if Bp % tb == 0 and Bp // tb >= 2:
            return tb
    return Bp


def _tile_s(S):
    # sequence tile for the conv/gate kernel; >= HALO when tiled so the carry covers
    # the largest dilated-conv shift (10).
    if S <= 64:
        return S
    for ts in (64, 32, 16):
        if S % ts == 0:
            return ts
    return S


def _vmem_limit(nbytes):
    # re-derived per-kernel budget with headroom, clamped for v7x's 64 MiB physical VMEM
    return int(min(max(nbytes * 3 // 2, 16 << 20), 64 << 20))


def my_ner_forward(tokens, labels, params):
    B, S = tokens.shape
    T = S - 1
    Bp = ((B + 7) // 8) * 8                       # pad batch so sublane dims are dense
    tokens_p = jnp.pad(tokens, ((0, Bp - B), (0, 0)))
    labels_p = jnp.pad(labels, ((0, Bp - B), (0, 0)))

    # `mask = tokens != CONTEXT_PAD` is only consumed by BERT's attention; not modeled here.
    # TODO(synk): BertModel.from_pretrained (pretrained transformer) has no in-script
    # equivalent; replaced with a deterministic embedding lookup, gathered time-major.
    bert_tm = params['emb'][tokens_p.T].astype(jnp.bfloat16)          # (S, Bp, 1024)

    TB = _tile_b(Bp)
    TS = _tile_s(S)
    nb, ns = Bp // TB, S // TS
    n_big = NTAP + NG                                                  # 2176

    # ---- kernel 1: convs + gate projection, tiled over (batch, sequence) -------
    k1_bytes = (2 * TS * TB * D_BERT * 2 + 2 * TS * TB * NG * 2
                + TS * TB * n_big * 4 + 2 * D_BERT * n_big * 2
                + 2 * 3 * D_CONV * NG * 2 + HALO * TB * NTAP * 4)
    gates_tm = pl.pallas_call(
        _make_conv_gates_kernel(TS, TB, ns),
        grid=(nb, ns),
        in_specs=[
            pl.BlockSpec((TS, TB, D_BERT), lambda b, s: (s, b, 0)),
            pl.BlockSpec((D_BERT, n_big), lambda b, s: (0, 0)),
            pl.BlockSpec((1, 3 * D_CONV), lambda b, s: (0, 0)),
            pl.BlockSpec((3 * D_CONV, NG), lambda b, s: (0, 0)),
            pl.BlockSpec((1, NG), lambda b, s: (0, 0)),
        ],
        out_specs=pl.BlockSpec((TS, TB, NG), lambda b, s: (s, b, 0)),
        out_shape=jax.ShapeDtypeStruct((S, Bp, NG), jnp.bfloat16),
        scratch_shapes=[pltpu.VMEM((HALO, TB, NTAP), jnp.float32)],
        compiler_params=pltpu.CompilerParams(
            dimension_semantics=("parallel", "arbitrary"),
            vmem_limit_bytes=_vmem_limit(k1_bytes)),
        cost_estimate=pl.CostEstimate(
            flops=2 * Bp * S * (D_BERT * n_big + 3 * D_CONV * NG),
            transcendentals=0,
            bytes_accessed=2 * Bp * S * (D_BERT + NG) + 2 * D_BERT * n_big),
    )(bert_tm, params['w_big'], params['conv_b'],
      params['wih_conv'], params['b_gate'])                            # (S, Bp, 1024) bf16

    # ---- kernel 2: bidirectional LSTM recurrence + fused FC head ---------------
    k2_bytes = (2 * S * TB * NG * 2 + S * TB * 2 * H * 4 + 2 * S * TB * KPAD * 4
                + 2 * 2 * H * NG * 2 + 2 * H * KPAD * 2)
    logits_tm = pl.pallas_call(
        _make_lstm_fc_kernel(S, TB),
        grid=(nb,),
        in_specs=[
            pl.BlockSpec((S, TB, NG), lambda b: (0, b, 0)),
            pl.BlockSpec((2 * H, NG), lambda b: (0, 0)),
            pl.BlockSpec((2 * H, KPAD), lambda b: (0, 0)),
            pl.BlockSpec((1, KPAD), lambda b: (0, 0)),
        ],
        out_specs=pl.BlockSpec((S, TB, KPAD), lambda b: (0, b, 0)),
        out_shape=jax.ShapeDtypeStruct((S, Bp, KPAD), jnp.float32),
        scratch_shapes=[pltpu.VMEM((S, TB, 2 * H), jnp.float32)],
        compiler_params=pltpu.CompilerParams(
            dimension_semantics=("parallel",),
            vmem_limit_bytes=_vmem_limit(k2_bytes)),
    )(gates_tm, params['whh_blk'], params['fc_w'], params['fc_b'])     # (S, Bp, 128) f32

    # ---- kernel 3: CRF Viterbi decode -------------------------------------------
    # lane-dense label mask: avoids 1-lane masked loads inside the serial Viterbi loop
    label_mask = (labels_p[:, 1:] != TARGET_PAD)
    mask_tm = jnp.broadcast_to(label_mask.T[:, :, None], (T, Bp, KPAD)).astype(jnp.float32)

    k3_bytes = (2 * S * TB * KPAD * 4 + 2 * T * TB * KPAD * 4
                + T * TB * KNEXT * 4 + 2 * T * TB * KPAD * 4)
    tags_tm = pl.pallas_call(
        viterbi_kernel,
        grid=(nb,),
        in_specs=[
            pl.BlockSpec((S, TB, KPAD), lambda b: (0, b, 0)),
            pl.BlockSpec((T, TB, KPAD), lambda b: (0, b, 0)),
            pl.BlockSpec((1, KPAD), lambda b: (0, 0)),
            pl.BlockSpec((1, KPAD), lambda b: (0, 0)),
            pl.BlockSpec((KNEXT, KNEXT), lambda b: (0, 0)),
        ],
        out_specs=pl.BlockSpec((T, TB, KPAD), lambda b: (0, b, 0)),
        out_shape=jax.ShapeDtypeStruct((T, Bp, KPAD), jnp.int32),
        scratch_shapes=[pltpu.VMEM((T, TB, KNEXT), jnp.int32)],
        compiler_params=pltpu.CompilerParams(
            dimension_semantics=("parallel",),
            vmem_limit_bytes=_vmem_limit(k3_bytes)),
    )(logits_tm, mask_tm, params['crf_start'], params['crf_end'],
      params['crf_transT'])

    # best tag is broadcast across lanes inside the kernel; take lane 0, drop batch pad
    return tags_tm[:, :B, 0].T                                         # (B, S-1) decoded tags


if __name__ == "__main__":
    B, S, VOCAB = 2, 8, 100
    key = jax.random.PRNGKey(0)
    ks = jax.random.split(key, 20)

    def u(k, shape, scale):
        return jax.random.uniform(k, shape, jnp.float32, -scale, scale)

    # torch-equivalent parameters (random stand-ins; re-packed into kernel layouts)
    conv_scale = (6.0 / (3 * D_BERT + 3 * D_CONV)) ** 0.5              # xavier-uniform-ish
    conv_w = u(ks[1], (3, 3, D_BERT, D_CONV), conv_scale)              # (dil, tap, Cin, Cout)
    conv_b = u(ks[2], (3, D_CONV), 1.0 / (3 * D_BERT) ** 0.5)
    ls = 1.0 / H ** 0.5
    wih_bert = u(ks[3], (D_BERT, NG), ls)        # W_ih rows for bert channels, [fwd | bwd]
    wih_conv = u(ks[4], (3 * D_CONV, NG), ls)    # W_ih rows for conv channels, [fwd | bwd]
    b_gate = u(ks[5], (1, NG), ls) + u(ks[6], (1, NG), ls)             # b_ih + b_hh folded
    whh_f = u(ks[7], (H, 4 * H), ls)
    whh_b = u(ks[8], (H, 4 * H), ls)
    fs = 1.0 / (2 * H) ** 0.5
    fc_w = u(ks[9], (2 * H, K), fs)
    fc_b = u(ks[10], (1, K), fs)
    crf_start = u(ks[11], (K,), 0.1)             # torchcrf init: uniform(-0.1, 0.1)
    crf_end = u(ks[12], (K,), 0.1)
    crf_trans = u(ks[13], (K, K), 0.1)

    # pack: 9 conv taps (tap index di*3+j) + bert rows of W_ih into one wide bf16 matrix;
    # block-diag recurrent weights; pad the tag dimension (padded tags forced to -1e9).
    conv_w9 = conv_w.reshape(9, D_BERT, D_CONV).transpose(1, 0, 2).reshape(D_BERT, NTAP)
    whh_blk = (jnp.zeros((2 * H, NG), jnp.float32)
               .at[:H, :4 * H].set(whh_f)
               .at[H:, 4 * H:].set(whh_b))
    params = {
        'emb': jax.random.normal(ks[0], (VOCAB, D_BERT), jnp.float32) * 0.1,
        'w_big': jnp.concatenate([conv_w9, wih_bert], axis=1).astype(jnp.bfloat16),
        'conv_b': conv_b.reshape(1, 3 * D_CONV),
        'wih_conv': wih_conv.astype(jnp.bfloat16),
        'b_gate': b_gate,
        'whh_blk': whh_blk.astype(jnp.bfloat16),
        'fc_w': jnp.zeros((2 * H, KPAD), jnp.float32).at[:, :K].set(fc_w).astype(jnp.bfloat16),
        'fc_b': jnp.full((1, KPAD), NEG, jnp.float32).at[0, :K].set(fc_b[0]),
        'crf_start': jnp.full((1, KPAD), NEG, jnp.float32).at[0, :K].set(crf_start),
        'crf_end': jnp.zeros((1, KPAD), jnp.float32).at[0, :K].set(crf_end),
        'crf_transT': jnp.zeros((KNEXT, KNEXT), jnp.float32).at[:K, :K].set(crf_trans.T),
    }

    tokens = jax.random.randint(ks[14], (B, S), 1, VOCAB, dtype=jnp.int32)   # no CONTEXT_PAD
    labels = jax.random.randint(ks[15], (B, S), 0, K, dtype=jnp.int32)       # no TARGET_PAD

    pred = jax.jit(my_ner_forward)(tokens, labels, params)
    jax.block_until_ready(pred)
    assert pred.shape == (B, S - 1)
    print("KERNEL_OK")
</pallas_src>

<mosaic_0001>
module attributes {stable_mosaic.version = 11 : i64} {
  func.func @kernel(%arg0: i32, %arg1: i32, %arg2: memref<8x8x1024xbf16, #tpu.memory_space<vmem>>, %arg3: memref<1024x2176xbf16, #tpu.memory_space<vmem>>, %arg4: memref<1x384xf32, #tpu.memory_space<vmem>>, %arg5: memref<384x1024xbf16, #tpu.memory_space<vmem>>, %arg6: memref<1x1024xf32, #tpu.memory_space<vmem>>, %arg7: memref<8x8x1024xbf16, #tpu.memory_space<vmem>>, %arg8: memref<16x8x1152xf32, #tpu.memory_space<vmem>>) attributes {dimension_semantics = [#tpu.dimension_semantics<parallel>, #tpu.dimension_semantics<arbitrary>], iteration_bounds = array<i64: 1, 1>, scalar_prefetch = 0 : i64, scratch_operands = 1 : i64, tpu.core_type = #tpu.core_type<tc>, window_params = [{transform_indices = @transform_0, window_bounds = array<i64: 8, 8, 1024>}, {pipeline_mode = #tpu.pipeline_mode<synchronous>, transform_indices = @transform_1, window_bounds = array<i64: 1024, 2176>}, {pipeline_mode = #tpu.pipeline_mode<synchronous>, transform_indices = @transform_2, window_bounds = array<i64: 1, 384>}, {pipeline_mode = #tpu.pipeline_mode<synchronous>, transform_indices = @transform_3, window_bounds = array<i64: 384, 1024>}, {pipeline_mode = #tpu.pipeline_mode<synchronous>, transform_indices = @transform_4, window_bounds = array<i64: 1, 1024>}, {transform_indices = @transform_5, window_bounds = array<i64: 8, 8, 1024>}]} {
    %c0 = arith.constant 0 : index
    %c0_0 = arith.constant 0 : index
    %c0_1 = arith.constant 0 : index
    %0 = vector.load %arg2[%c0, %c0_0, %c0_1] : memref<8x8x1024xbf16, #tpu.memory_space<vmem>>, vector<8x8x1024xbf16>
    %1 = arith.extf %0 : vector<8x8x1024xbf16> to vector<8x8x1024xf32>
    %2 = vector.shape_cast %1 : vector<8x8x1024xf32> to vector<64x1024xf32>
    %3 = arith.truncf %2 : vector<64x1024xf32> to vector<64x1024xbf16>
    %c0_2 = arith.constant 0 : index
    %c0_3 = arith.constant 0 : index
    %4 = vector.load %arg3[%c0_2, %c0_3] : memref<1024x2176xbf16, #tpu.memory_space<vmem>>, vector<1024x2176xbf16>
    %cst = arith.constant dense<0.000000e+00> : vector<64x2176xf32>
    %5 = tpu.matmul %3, %4, %cst {dimension_numbers = #tpu.dot_dimension_numbers<[1], [0], [0], [1], [0, 0, 1, 1], [], []>} : vector<64x1024xbf16>, vector<1024x2176xbf16>, vector<64x2176xf32> -> vector<64x2176xf32>
    %6 = vector.extract_strided_slice %5 {offsets = [0, 0], sizes = [64, 1152], strides = [1, 1]} : vector<64x2176xf32> to vector<64x1152xf32>
    %7 = vector.shape_cast %6 : vector<64x1152xf32> to vector<8x8x1152xf32>
    %8 = vector.extract_strided_slice %5 {offsets = [0, 1152], sizes = [64, 1024], strides = [1, 1]} : vector<64x2176xf32> to vector<64x1024xf32>
    %9 = vector.extract_strided_slice %7 {offsets = [0, 0, 0], sizes = [8, 8, 128], strides = [1, 1, 1]} : vector<8x8x1152xf32> to vector<8x8x128xf32>
    %cst_4 = arith.constant 0.000000e+00 : f32
    %10 = vector.broadcast %cst_4 : f32 to vector<2x8x128xf32>
    %11 = vector.extract_strided_slice %9 {offsets = [0, 0, 0], sizes = [6, 8, 128], strides = [1, 1, 1]} : vector<8x8x128xf32> to vector<6x8x128xf32>
    %12 = tpu.concatenate %10, %11 in 0 : vector<2x8x128xf32>, vector<6x8x128xf32> -> vector<8x8x128xf32>
    %13 = vector.extract_strided_slice %7 {offsets = [0, 0, 128], sizes = [8, 8, 128], strides = [1, 1, 1]} : vector<8x8x1152xf32> to vector<8x8x128xf32>
    %cst_5 = arith.constant 0.000000e+00 : f32
    %14 = vector.broadcast %cst_5 : f32 to vector<1x8x128xf32>
    %15 = vector.extract_strided_slice %13 {offsets = [0, 0, 0], sizes = [7, 8, 128], strides = [1, 1, 1]} : vector<8x8x128xf32> to vector<7x8x128xf32>
    %16 = tpu.concatenate %14, %15 in 0 : vector<1x8x128xf32>, vector<7x8x128xf32> -> vector<8x8x128xf32>
    %17 = arith.addf %12, %16 : vector<8x8x128xf32>
    %18 = vector.extract_strided_slice %7 {offsets = [0, 0, 256], sizes = [8, 8, 128], strides = [1, 1, 1]} : vector<8x8x1152xf32> to vector<8x8x128xf32>
    %19 = arith.addf %17, %18 : vector<8x8x128xf32>
    %20 = vector.extract_strided_slice %7 {offsets = [0, 0, 384], sizes = [8, 8, 128], strides = [1, 1, 1]} : vector<8x8x1152xf32> to vector<8x8x128xf32>
    %cst_6 = arith.constant 0.000000e+00 : f32
    %21 = vector.broadcast %cst_6 : f32 to vector<6x8x128xf32>
    %22 = vector.extract_strided_slice %20 {offsets = [0, 0, 0], sizes = [2, 8, 128], strides = [1, 1, 1]} : vector<8x8x128xf32> to vector<2x8x128xf32>
    %23 = tpu.concatenate %21, %22 in 0 : vector<6x8x128xf32>, vector<2x8x128xf32> -> vector<8x8x128xf32>
    %24 = vector.extract_strided_slice %7 {offsets = [0, 0, 512], sizes = [8, 8, 128], strides = [1, 1, 1]} : vector<8x8x1152xf32> to vector<8x8x128xf32>
    %cst_7 = arith.constant 0.000000e+00 : f32
    %25 = vector.broadcast %cst_7 : f32 to vector<3x8x128xf32>
    %26 = vector.extract_strided_slice %24 {offsets = [0, 0, 0], sizes = [5, 8, 128], strides = [1, 1, 1]} : vector<8x8x128xf32> to vector<5x8x128xf32>
    %27 = tpu.concatenate %25, %26 in 0 : vector<3x8x128xf32>, vector<5x8x128xf32> -> vector<8x8x128xf32>
    %28 = arith.addf %23, %27 : vector<8x8x128xf32>
    %29 = vector.extract_strided_slice %7 {offsets = [0, 0, 640], sizes = [8, 8, 128], strides = [1, 1, 1]} : vector<8x8x1152xf32> to vector<8x8x128xf32>
    %30 = arith.addf %28, %29 : vector<8x8x128xf32>
    %31 = vector.extract_strided_slice %7 {offsets = [0, 0, 896], sizes = [8, 8, 128], strides = [1, 1, 1]} : vector<8x8x1152xf32> to vector<8x8x128xf32>
    %cst_8 = arith.constant 0.000000e+00 : f32
    %32 = vector.broadcast %cst_8 : f32 to vector<5x8x128xf32>
    %33 = vector.extract_strided_slice %31 {offsets = [0, 0, 0], sizes = [3, 8, 128], strides = [1, 1, 1]} : vector<8x8x128xf32> to vector<3x8x128xf32>
    %34 = tpu.concatenate %32, %33 in 0 : vector<5x8x128xf32>, vector<3x8x128xf32> -> vector<8x8x128xf32>
    %35 = vector.extract_strided_slice %7 {offsets = [0, 0, 1024], sizes = [8, 8, 128], strides = [1, 1, 1]} : vector<8x8x1152xf32> to vector<8x8x128xf32>
    %36 = arith.addf %34, %35 : vector<8x8x128xf32>
    %37 = tpu.concatenate %19, %30, %36 in 2 : vector<8x8x128xf32>, vector<8x8x128xf32>, vector<8x8x128xf32> -> vector<8x8x384xf32>
    %c0_9 = arith.constant 0 : index
    %c0_10 = arith.constant 0 : index
    %38 = vector.load %arg4[%c0_9, %c0_10] : memref<1x384xf32, #tpu.memory_space<vmem>>, vector<1x384xf32>
    %39 = vector.shape_cast %38 : vector<1x384xf32> to vector<1x1x384xf32>
    %40 = vector.broadcast %39 : vector<1x1x384xf32> to vector<8x8x384xf32>
    %41 = arith.addf %37, %40 : vector<8x8x384xf32>
    %42 = vector.shape_cast %41 : vector<8x8x384xf32> to vector<64x384xf32>
    %43 = arith.truncf %42 : vector<64x384xf32> to vector<64x384xbf16>
    %c0_11 = arith.constant 0 : index
    %c0_12 = arith.constant 0 : index
    %44 = vector.load %arg5[%c0_11, %c0_12] : memref<384x1024xbf16, #tpu.memory_space<vmem>>, vector<384x1024xbf16>
    %cst_13 = arith.constant dense<0.000000e+00> : vector<64x1024xf32>
    %45 = tpu.matmul %43, %44, %cst_13 {dimension_numbers = #tpu.dot_dimension_numbers<[1], [0], [0], [1], [0, 0, 1, 1], [], []>} : vector<64x384xbf16>, vector<384x1024xbf16>, vector<64x1024xf32> -> vector<64x1024xf32>
    %46 = arith.addf %8, %45 : vector<64x1024xf32>
    %c0_14 = arith.constant 0 : index
    %c0_15 = arith.constant 0 : index
    %47 = vector.load %arg6[%c0_14, %c0_15] : memref<1x1024xf32, #tpu.memory_space<vmem>>, vector<1x1024xf32>
    %48 = vector.broadcast %47 : vector<1x1024xf32> to vector<64x1024xf32>
    %49 = arith.addf %46, %48 : vector<64x1024xf32>
    %50 = vector.shape_cast %49 : vector<64x1024xf32> to vector<8x8x1024xf32>
    %51 = arith.truncf %50 : vector<8x8x1024xf32> to vector<8x8x1024xbf16>
    %c0_16 = arith.constant 0 : index
    %c0_17 = arith.constant 0 : index
    %c0_18 = arith.constant 0 : index
    %52 = vector.load %arg7[%c0_16, %c0_17, %c0_18] : memref<8x8x1024xbf16, #tpu.memory_space<vmem>>, vector<8x8x1024xbf16>
    tpu.vector_store %arg7[%c0_16, %c0_17, %c0_18], %51 {strides = array<i32>} : memref<8x8x1024xbf16, #tpu.memory_space<vmem>>, vector<8x8x1024xbf16>,
    return
  }
  func.func @transform_0(%arg0: i32, %arg1: i32) -> (i32, i32, i32) {
    %c0_i32 = arith.constant 0 : i32
    %c0_i32_0 = arith.constant 0 : i32
    return %arg1, %arg0, %c0_i32 : i32, i32, i32
  }
  func.func @transform_1(%arg0: i32, %arg1: i32) -> (i32, i32) {
    %c0_i32 = arith.constant 0 : i32
    %c0_i32_0 = arith.constant 0 : i32
    %c0_i32_1 = arith.constant 0 : i32
    return %c0_i32, %c0_i32_0 : i32, i32
  }
  func.func @transform_2(%arg0: i32, %arg1: i32) -> (i32, i32) {
    %c0_i32 = arith.constant 0 : i32
    %c0_i32_0 = arith.constant 0 : i32
    %c0_i32_1 = arith.constant 0 : i32
    return %c0_i32, %c0_i32_0 : i32, i32
  }
  func.func @transform_3(%arg0: i32, %arg1: i32) -> (i32, i32) {
    %c0_i32 = arith.constant 0 : i32
    %c0_i32_0 = arith.constant 0 : i32
    %c0_i32_1 = arith.constant 0 : i32
    return %c0_i32, %c0_i32_0 : i32, i32
  }
  func.func @transform_4(%arg0: i32, %arg1: i32) -> (i32, i32) {
    %c0_i32 = arith.constant 0 : i32
    %c0_i32_0 = arith.constant 0 : i32
    %c0_i32_1 = arith.constant 0 : i32
    return %c0_i32, %c0_i32_0 : i32, i32
  }
  func.func @transform_5(%arg0: i32, %arg1: i32) -> (i32, i32, i32) {
    %c0_i32 = arith.constant 0 : i32
    %c0_i32_0 = arith.constant 0 : i32
    return %arg1, %arg0, %c0_i32 : i32, i32, i32
  }
}

module attributes {stable_mosaic.version = 11 : i64} {
  func.func @kernel(%arg0: i32, %arg1: memref<8x8x1024xbf16, #tpu.memory_space<vmem>>, %arg2: memref<256x1024xbf16, #tpu.memory_space<vmem>>, %arg3: memref<256x128xbf16, #tpu.memory_space<vmem>>, %arg4: memref<1x128xf32, #tpu.memory_space<vmem>>, %arg5: memref<8x8x128xf32, #tpu.memory_space<vmem>>, %arg6: memref<8x8x256xf32, #tpu.memory_space<vmem>>) attributes {dimension_semantics = [#tpu.dimension_semantics<parallel>], iteration_bounds = array<i64: 1>, scalar_prefetch = 0 : i64, scratch_operands = 1 : i64, tpu.core_type = #tpu.core_type<tc>, window_params = [{transform_indices = @transform_0, window_bounds = array<i64: 8, 8, 1024>}, {pipeline_mode = #tpu.pipeline_mode<synchronous>, transform_indices = @transform_1, window_bounds = array<i64: 256, 1024>}, {pipeline_mode = #tpu.pipeline_mode<synchronous>, transform_indices = @transform_2, window_bounds = array<i64: 256, 128>}, {pipeline_mode = #tpu.pipeline_mode<synchronous>, transform_indices = @transform_3, window_bounds = array<i64: 1, 128>}, {transform_indices = @transform_4, window_bounds = array<i64: 8, 8, 128>}]} {
    %c0 = arith.constant 0 : index
    %c0_0 = arith.constant 0 : index
    %0 = vector.load %arg2[%c0, %c0_0] : memref<256x1024xbf16, #tpu.memory_space<vmem>>, vector<256x1024xbf16>
    %cst = arith.constant 0.000000e+00 : f32
    %1 = vector.broadcast %cst : f32 to vector<8x128xf32>
    %cst_1 = arith.constant 0.000000e+00 : f32
    %2 = vector.broadcast %cst_1 : f32 to vector<8x256xf32>
    %c0_i32 = arith.constant 0 : i32
    %c8_i32 = arith.constant 8 : i32
    %3 = arith.addi %c0_i32, %c8_i32 : i32
    %c1_i32 = arith.constant 1 : i32
    %4:3 = scf.for %arg7 = %c0_i32 to %3 step %c1_i32 iter_args(%arg8 = %2, %arg9 = %1, %arg10 = %1) -> (vector<8x256xf32>, vector<8x128xf32>, vector<8x128xf32>)  : i32 {
      %c7_i32 = arith.constant 7 : i32
      %15 = arith.subi %c7_i32, %arg7 : i32
      %16 = arith.truncf %arg8 : vector<8x256xf32> to vector<8x256xbf16>
      %cst_14 = arith.constant dense<0.000000e+00> : vector<8x1024xf32>
      %17 = tpu.matmul %16, %0, %cst_14 {dimension_numbers = #tpu.dot_dimension_numbers<[1], [0], [0], [1], [0, 0, 1, 1], [], []>} : vector<8x256xbf16>, vector<256x1024xbf16>, vector<8x1024xf32> -> vector<8x1024xf32>
      %18 = arith.index_cast %arg7 : i32 to index
      %c0_15 = arith.constant 0 : index
      %c0_16 = arith.constant 0 : index
      %19 = vector.load %arg1[%18, %c0_15, %c0_16] : memref<8x8x1024xbf16, #tpu.memory_space<vmem>>, vector<1x8x1024xbf16>
      %20 = vector.shape_cast %19 : vector<1x8x1024xbf16> to vector<8x1024xbf16>
      %21 = vector.extract_strided_slice %20 {offsets = [0, 0], sizes = [8, 512], strides = [1, 1]} : vector<8x1024xbf16> to vector<8x512xbf16>
      %22 = arith.extf %21 : vector<8x512xbf16> to vector<8x512xf32>
      %23 = vector.extract_strided_slice %17 {offsets = [0, 0], sizes = [8, 512], strides = [1, 1]} : vector<8x1024xf32> to vector<8x512xf32>
      %24 = arith.addf %22, %23 : vector<8x512xf32>
      %25 = arith.index_cast %15 : i32 to index
      %c0_17 = arith.constant 0 : index
      %c0_18 = arith.constant 0 : index
      %26 = vector.load %arg1[%25, %c0_17, %c0_18] : memref<8x8x1024xbf16, #tpu.memory_space<vmem>>, vector<1x8x1024xbf16>
      %27 = vector.shape_cast %26 : vector<1x8x1024xbf16> to vector<8x1024xbf16>
      %28 = vector.extract_strided_slice %27 {offsets = [0, 512], sizes = [8, 512], strides = [1, 1]} : vector<8x1024xbf16> to vector<8x512xbf16>
      %29 = arith.extf %28 : vector<8x512xbf16> to vector<8x512xf32>
      %30 = vector.extract_strided_slice %17 {offsets = [0, 512], sizes = [8, 512], strides = [1, 1]} : vector<8x1024xf32> to vector<8x512xf32>
      %31 = arith.addf %29, %30 : vector<8x512xf32>
      %32 = vector.extract_strided_slice %24 {offsets = [0, 0], sizes = [8, 128], strides = [1, 1]} : vector<8x512xf32> to vector<8x128xf32>
      %cst_19 = arith.constant 5.000000e-01 : f32
      %33 = vector.broadcast %cst_19 : f32 to vector<8x128xf32>
      %34 = arith.mulf %33, %32 : vector<8x128xf32>
      %35 = math.tanh %34 : vector<8x128xf32>
      %cst_20 = arith.constant 1.000000e+00 : f32
      %36 = vector.broadcast %cst_20 : f32 to vector<8x128xf32>
      %37 = arith.addf %35, %36 : vector<8x128xf32>
      %cst_21 = arith.constant 5.000000e-01 : f32
      %38 = vector.broadcast %cst_21 : f32 to vector<8x128xf32>
      %39 = arith.mulf %38, %37 : vector<8x128xf32>
      %40 = vector.extract_strided_slice %24 {offsets = [0, 128], sizes = [8, 128], strides = [1, 1]} : vector<8x512xf32> to vector<8x128xf32>
      %cst_22 = arith.constant 5.000000e-01 : f32
      %41 = vector.broadcast %cst_22 : f32 to vector<8x128xf32>
      %42 = arith.mulf %41, %40 : vector<8x128xf32>
      %43 = math.tanh %42 : vector<8x128xf32>
      %cst_23 = arith.constant 1.000000e+00 : f32
      %44 = vector.broadcast %cst_23 : f32 to vector<8x128xf32>
      %45 = arith.addf %43, %44 : vector<8x128xf32>
      %cst_24 = arith.constant 5.000000e-01 : f32
      %46 = vector.broadcast %cst_24 : f32 to vector<8x128xf32>
      %47 = arith.mulf %46, %45 : vector<8x128xf32>
      %48 = vector.extract_strided_slice %24 {offsets = [0, 256], sizes = [8, 128], strides = [1, 1]} : vector<8x512xf32> to vector<8x128xf32>
      %49 = math.tanh %48 : vector<8x128xf32>
      %50 = vector.extract_strided_slice %24 {offsets = [0, 384], sizes = [8, 128], strides = [1, 1]} : vector<8x512xf32> to vector<8x128xf32>
      %cst_25 = arith.constant 5.000000e-01 : f32
      %51 = vector.broadcast %cst_25 : f32 to vector<8x128xf32>
      %52 = arith.mulf %51, %50 : vector<8x128xf32>
      %53 = math.tanh %52 : vector<8x128xf32>
      %cst_26 = arith.constant 1.000000e+00 : f32
      %54 = vector.broadcast %cst_26 : f32 to vector<8x128xf32>
      %55 = arith.addf %53, %54 : vector<8x128xf32>
      %cst_27 = arith.constant 5.000000e-01 : f32
      %56 = vector.broadcast %cst_27 : f32 to vector<8x128xf32>
      %57 = arith.mulf %56, %55 : vector<8x128xf32>
      %58 = arith.mulf %47, %arg9 : vector<8x128xf32>
      %59 = arith.mulf %39, %49 : vector<8x128xf32>
      %60 = arith.addf %58, %59 : vector<8x128xf32>
      %61 = math.tanh %60 : vector<8x128xf32>
      %62 = arith.mulf %57, %61 : vector<8x128xf32>
      %63 = vector.extract_strided_slice %31 {offsets = [0, 0], sizes = [8, 128], strides = [1, 1]} : vector<8x512xf32> to vector<8x128xf32>
      %cst_28 = arith.constant 5.000000e-01 : f32
      %64 = vector.broadcast %cst_28 : f32 to vector<8x128xf32>
      %65 = arith.mulf %64, %63 : vector<8x128xf32>
      %66 = math.tanh %65 : vector<8x128xf32>
      %cst_29 = arith.constant 1.000000e+00 : f32
      %67 = vector.broadcast %cst_29 : f32 to vector<8x128xf32>
      %68 = arith.addf %66, %67 : vector<8x128xf32>
      %cst_30 = arith.constant 5.000000e-01 : f32
      %69 = vector.broadcast %cst_30 : f32 to vector<8x128xf32>
      %70 = arith.mulf %69, %68 : vector<8x128xf32>
      %71 = vector.extract_strided_slice %31 {offsets = [0, 128], sizes = [8, 128], strides = [1, 1]} : vector<8x512xf32> to vector<8x128xf32>
      %cst_31 = arith.constant 5.000000e-01 : f32
      %72 = vector.broadcast %cst_31 : f32 to vector<8x128xf32>
      %73 = arith.mulf %72, %71 : vector<8x128xf32>
      %74 = math.tanh %73 : vector<8x128xf32>
      %cst_32 = arith.constant 1.000000e+00 : f32
      %75 = vector.broadcast %cst_32 : f32 to vector<8x128xf32>
      %76 = arith.addf %74, %75 : vector<8x128xf32>
      %cst_33 = arith.constant 5.000000e-01 : f32
      %77 = vector.broadcast %cst_33 : f32 to vector<8x128xf32>
      %78 = arith.mulf %77, %76 : vector<8x128xf32>
      %79 = vector.extract_strided_slice %31 {offsets = [0, 256], sizes = [8, 128], strides = [1, 1]} : vector<8x512xf32> to vector<8x128xf32>
      %80 = math.tanh %79 : vector<8x128xf32>
      %81 = vector.extract_strided_slice %31 {offsets = [0, 384], sizes = [8, 128], strides = [1, 1]} : vector<8x512xf32> to vector<8x128xf32>
      %cst_34 = arith.constant 5.000000e-01 : f32
      %82 = vector.broadcast %cst_34 : f32 to vector<8x128xf32>
      %83 = arith.mulf %82, %81 : vector<8x128xf32>
      %84 = math.tanh %83 : vector<8x128xf32>
      %cst_35 = arith.constant 1.000000e+00 : f32
      %85 = vector.broadcast %cst_35 : f32 to vector<8x128xf32>
      %86 = arith.addf %84, %85 : vector<8x128xf32>
      %cst_36 = arith.constant 5.000000e-01 : f32
      %87 = vector.broadcast %cst_36 : f32 to vector<8x128xf32>
      %88 = arith.mulf %87, %86 : vector<8x128xf32>
      %89 = arith.mulf %78, %arg10 : vector<8x128xf32>
      %90 = arith.mulf %70, %80 : vector<8x128xf32>
      %91 = arith.addf %89, %90 : vector<8x128xf32>
      %92 = math.tanh %91 : vector<8x128xf32>
      %93 = arith.mulf %88, %92 : vector<8x128xf32>
      %94 = vector.shape_cast %62 : vector<8x128xf32> to vector<1x8x128xf32>
      %95 = arith.index_cast %arg7 : i32 to index
      %c0_37 = arith.constant 0 : index
      %c0_38 = arith.constant 0 : index
      %96 = vector.load %arg6[%95, %c0_37, %c0_38] : memref<8x8x256xf32, #tpu.memory_space<vmem>>, vector<1x8x128xf32>
      tpu.vector_store %arg6[%95, %c0_37, %c0_38], %94 {strides = array<i32>} : memref<8x8x256xf32, #tpu.memory_space<vmem>>, vector<1x8x128xf32>,
      %97 = vector.shape_cast %93 : vector<8x128xf32> to vector<1x8x128xf32>
      %98 = arith.index_cast %15 : i32 to index
      %c0_39 = arith.constant 0 : index
      %c128 = arith.constant 128 : index
      %99 = vector.load %arg6[%98, %c0_39, %c128] : memref<8x8x256xf32, #tpu.memory_space<vmem>>, vector<1x8x128xf32>
      tpu.vector_store %arg6[%98, %c0_39, %c128], %97 {strides = array<i32>} : memref<8x8x256xf32, #tpu.memory_space<vmem>>, vector<1x8x128xf32>,
      %100 = tpu.concatenate %62, %93 in 1 : vector<8x128xf32>, vector<8x128xf32> -> vector<8x256xf32>
      scf.yield %100, %60, %91 : vector<8x256xf32>, vector<8x128xf32>, vector<8x128xf32>
    }
    %c8_i32_2 = arith.constant 8 : i32
    %c0_3 = arith.constant 0 : index
    %c0_4 = arith.constant 0 : index
    %c0_5 = arith.constant 0 : index
    %5 = vector.load %arg6[%c0_3, %c0_4, %c0_5] : memref<8x8x256xf32, #tpu.memory_space<vmem>>, vector<8x8x256xf32>
    %6 = vector.shape_cast %5 : vector<8x8x256xf32> to vector<64x256xf32>
    %7 = arith.truncf %6 : vector<64x256xf32> to vector<64x256xbf16>
    %c0_6 = arith.constant 0 : index
    %c0_7 = arith.constant 0 : index
    %8 = vector.load %arg3[%c0_6, %c0_7] : memref<256x128xbf16, #tpu.memory_space<vmem>>, vector<256x128xbf16>
    %cst_8 = arith.constant dense<0.000000e+00> : vector<64x128xf32>
    %9 = tpu.matmul %7, %8, %cst_8 {dimension_numbers = #tpu.dot_dimension_numbers<[1], [0], [0], [1], [0, 0, 1, 1], [], []>} : vector<64x256xbf16>, vector<256x128xbf16>, vector<64x128xf32> -> vector<64x128xf32>
    %c0_9 = arith.constant 0 : index
    %c0_10 = arith.constant 0 : index
    %10 = vector.load %arg4[%c0_9, %c0_10] : memref<1x128xf32, #tpu.memory_space<vmem>>, vector<1x128xf32>
    %11 = vector.broadcast %10 : vector<1x128xf32> to vector<64x128xf32>
    %12 = arith.addf %9, %11 : vector<64x128xf32>
    %13 = vector.shape_cast %12 : vector<64x128xf32> to vector<8x8x128xf32>
    %c0_11 = arith.constant 0 : index
    %c0_12 = arith.constant 0 : index
    %c0_13 = arith.constant 0 : index
    %14 = vector.load %arg5[%c0_11, %c0_12, %c0_13] : memref<8x8x128xf32, #tpu.memory_space<vmem>>, vector<8x8x128xf32>
    tpu.vector_store %arg5[%c0_11, %c0_12, %c0_13], %13 {strides = array<i32>} : memref<8x8x128xf32, #tpu.memory_space<vmem>>, vector<8x8x128xf32>,
    return
  }
  func.func @transform_0(%arg0: i32) -> (i32, i32, i32) {
    %c0_i32 = arith.constant 0 : i32
    %c0_i32_0 = arith.constant 0 : i32
    %c0_i32_1 = arith.constant 0 : i32
    return %c0_i32, %arg0, %c0_i32_0 : i32, i32, i32
  }
  func.func @transform_1(%arg0: i32) -> (i32, i32) {
    %c0_i32 = arith.constant 0 : i32
    %c0_i32_0 = arith.constant 0 : i32
    %c0_i32_1 = arith.constant 0 : i32
    return %c0_i32, %c0_i32_0 : i32, i32
  }
  func.func @transform_2(%arg0: i32) -> (i32, i32) {
    %c0_i32 = arith.constant 0 : i32
    %c0_i32_0 = arith.constant 0 : i32
    %c0_i32_1 = arith.constant 0 : i32
    return %c0_i32, %c0_i32_0 : i32, i32
  }
  func.func @transform_3(%arg0: i32) -> (i32, i32) {
    %c0_i32 = arith.constant 0 : i32
    %c0_i32_0 = arith.constant 0 : i32
    %c0_i32_1 = arith.constant 0 : i32
    return %c0_i32, %c0_i32_0 : i32, i32
  }
  func.func @transform_4(%arg0: i32) -> (i32, i32, i32) {
    %c0_i32 = arith.constant 0 : i32
    %c0_i32_0 = arith.constant 0 : i32
    %c0_i32_1 = arith.constant 0 : i32
    return %c0_i32, %arg0, %c0_i32_0 : i32, i32, i32
  }
}

module attributes {stable_mosaic.version = 11 : i64} {
  func.func @viterbi_kernel(%arg0: i32, %arg1: memref<8x8x128xf32, #tpu.memory_space<vmem>>, %arg2: memref<7x8x128xf32, #tpu.memory_space<vmem>>, %arg3: memref<1x128xf32, #tpu.memory_space<vmem>>, %arg4: memref<1x128xf32, #tpu.memory_space<vmem>>, %arg5: memref<32x32xf32, #tpu.memory_space<vmem>>, %arg6: memref<7x8x128xi32, #tpu.memory_space<vmem>>, %arg7: memref<7x8x32xi32, #tpu.memory_space<vmem>>) attributes {dimension_semantics = [#tpu.dimension_semantics<parallel>], iteration_bounds = array<i64: 1>, scalar_prefetch = 0 : i64, scratch_operands = 1 : i64, tpu.core_type = #tpu.core_type<tc>, window_params = [{transform_indices = @transform_0, window_bounds = array<i64: 8, 8, 128>}, {transform_indices = @transform_1, window_bounds = array<i64: 7, 8, 128>}, {pipeline_mode = #tpu.pipeline_mode<synchronous>, transform_indices = @transform_2, window_bounds = array<i64: 1, 128>}, {pipeline_mode = #tpu.pipeline_mode<synchronous>, transform_indices = @transform_3, window_bounds = array<i64: 1, 128>}, {pipeline_mode = #tpu.pipeline_mode<synchronous>, transform_indices = @transform_4, window_bounds = array<i64: 32, 32>}, {transform_indices = @transform_5, window_bounds = array<i64: 7, 8, 128>}]} {
    %c0 = arith.constant 0 : index
    %c0_0 = arith.constant 0 : index
    %0 = vector.load %arg5[%c0, %c0_0] : memref<32x32xf32, #tpu.memory_space<vmem>>, vector<32x32xf32>
    %1 = tpu.iota {dimensions = array<i32: 2>} : vector<8x32x32xi32>
    %2 = tpu.iota {dimensions = array<i32: 1>} : vector<8x32xi32>
    %c0_1 = arith.constant 0 : index
    %c0_2 = arith.constant 0 : index
    %3 = vector.load %arg3[%c0_1, %c0_2] : memref<1x128xf32, #tpu.memory_space<vmem>>, vector<1x128xf32>
    %c1 = arith.constant 1 : index
    %c0_3 = arith.constant 0 : index
    %c0_4 = arith.constant 0 : index
    %4 = vector.load %arg1[%c1, %c0_3, %c0_4] : memref<8x8x128xf32, #tpu.memory_space<vmem>>, vector<1x8x128xf32>
    %5 = vector.shape_cast %4 : vector<1x8x128xf32> to vector<8x128xf32>
    %6 = vector.broadcast %3 : vector<1x128xf32> to vector<8x128xf32>
    %7 = arith.addf %6, %5 : vector<8x128xf32>
    %8 = vector.extract_strided_slice %7 {offsets = [0, 0], sizes = [8, 32], strides = [1, 1]} : vector<8x128xf32> to vector<8x32xf32>
    %c1_i32 = arith.constant 1 : i32
    %c6_i32 = arith.constant 6 : i32
    %9 = arith.addi %c1_i32, %c6_i32 : i32
    %c1_i32_5 = arith.constant 1 : i32
    %10 = scf.for %arg8 = %c1_i32 to %9 step %c1_i32_5 iter_args(%arg9 = %8) -> (vector<8x32xf32>)  : i32 {
      %29 = vector.shape_cast %0 : vector<32x32xf32> to vector<1x32x32xf32>
      %30 = vector.shape_cast %arg9 : vector<8x32xf32> to vector<8x1x32xf32>
      %31 = vector.broadcast %29 : vector<1x32x32xf32> to vector<8x32x32xf32>
      %32 = vector.broadcast %30 : vector<8x1x32xf32> to vector<8x32x32xf32>
      %33 = arith.addf %31, %32 : vector<8x32x32xf32>
      %cst_15 = arith.constant dense<0xFF800000> : vector<8x32xf32>
      %34 = vector.multi_reduction <maximumf>, %33, %cst_15 [2] : vector<8x32x32xf32> to vector<8x32xf32>
      %35 = vector.shape_cast %34 : vector<8x32xf32> to vector<8x32x1xf32>
      %36 = vector.broadcast %35 : vector<8x32x1xf32> to vector<8x32x32xf32>
      %37 = arith.cmpf oeq, %33, %36 : vector<8x32x32xf32>
      %c32_i32_16 = arith.constant 32 : i32
      %38 = vector.broadcast %c32_i32_16 : i32 to vector<8x32x32xi32>
      %39 = arith.select %37, %1, %38 : vector<8x32x32xi1>, vector<8x32x32xi32>
      %cst_17 = arith.constant dense<2147483647> : vector<8x32xi32>
      %40 = vector.multi_reduction <minsi>, %39, %cst_17 [2] : vector<8x32x32xi32> to vector<8x32xi32>
      %41 = vector.shape_cast %40 : vector<8x32xi32> to vector<1x8x32xi32>
      %c1_i32_18 = arith.constant 1 : i32
      %42 = arith.subi %arg8, %c1_i32_18 : i32
      %43 = arith.index_cast %42 : i32 to index
      %c0_19 = arith.constant 0 : index
      %c0_20 = arith.constant 0 : index
      %44 = vector.load %arg7[%43, %c0_19, %c0_20] : memref<7x8x32xi32, #tpu.memory_space<vmem>>, vector<1x8x32xi32>
      tpu.vector_store %arg7[%43, %c0_19, %c0_20], %41 {strides = array<i32>} : memref<7x8x32xi32, #tpu.memory_space<vmem>>, vector<1x8x32xi32>,
      %c1_i32_21 = arith.constant 1 : i32
      %45 = arith.addi %arg8, %c1_i32_21 : i32
      %46 = arith.index_cast %45 : i32 to index
      %c0_22 = arith.constant 0 : index
      %c0_23 = arith.constant 0 : index
      %47 = vector.load %arg1[%46, %c0_22, %c0_23] : memref<8x8x128xf32, #tpu.memory_space<vmem>>, vector<1x8x128xf32>
      %48 = vector.shape_cast %47 : vector<1x8x128xf32> to vector<8x128xf32>
      %49 = vector.extract_strided_slice %48 {offsets = [0, 0], sizes = [8, 32], strides = [1, 1]} : vector<8x128xf32> to vector<8x32xf32>
      %50 = arith.addf %34, %49 : vector<8x32xf32>
      %51 = arith.index_cast %arg8 : i32 to index
      %c0_24 = arith.constant 0 : index
      %c0_25 = arith.constant 0 : index
      %52 = vector.load %arg2[%51, %c0_24, %c0_25] : memref<7x8x128xf32, #tpu.memory_space<vmem>>, vector<1x8x128xf32>
      %53 = vector.shape_cast %52 : vector<1x8x128xf32> to vector<8x128xf32>
      %54 = vector.extract_strided_slice %53 {offsets = [0, 0], sizes = [8, 32], strides = [1, 1]} : vector<8x128xf32> to vector<8x32xf32>
      %cst_26 = arith.constant 0.000000e+00 : f32
      %55 = vector.broadcast %cst_26 : f32 to vector<8x32xf32>
      %56 = arith.cmpf ogt, %54, %55 : vector<8x32xf32>
      %57 = arith.select %56, %50, %arg9 : vector<8x32xi1>, vector<8x32xf32>
      scf.yield %57 : vector<8x32xf32>
    }
    %c6_i32_6 = arith.constant 6 : i32
    %c0_7 = arith.constant 0 : index
    %c0_8 = arith.constant 0 : index
    %11 = vector.load %arg4[%c0_7, %c0_8] : memref<1x128xf32, #tpu.memory_space<vmem>>, vector<1x128xf32>
    %12 = vector.extract_strided_slice %11 {offsets = [0, 0], sizes = [1, 32], strides = [1, 1]} : vector<1x128xf32> to vector<1x32xf32>
    %13 = vector.broadcast %12 : vector<1x32xf32> to vector<8x32xf32>
    %14 = arith.addf %10, %13 : vector<8x32xf32>
    %cst = arith.constant dense<0xFF800000> : vector<8xf32>
    %15 = vector.multi_reduction <maximumf>, %14, %cst [1] : vector<8x32xf32> to vector<8xf32>
    %16 = vector.shape_cast %15 : vector<8xf32> to vector<8x1xf32>
    %17 = vector.broadcast %16 : vector<8x1xf32> to vector<8x32xf32>
    %18 = arith.cmpf oeq, %14, %17 : vector<8x32xf32>
    %c32_i32 = arith.constant 32 : i32
    %19 = vector.broadcast %c32_i32 : i32 to vector<8x32xi32>
    %20 = arith.select %18, %2, %19 : vector<8x32xi1>, vector<8x32xi32>
    %cst_9 = arith.constant dense<2147483647> : vector<8xi32>
    %21 = vector.multi_reduction <minsi>, %20, %cst_9 [1] : vector<8x32xi32> to vector<8xi32>
    %22 = vector.shape_cast %21 : vector<8xi32> to vector<8x1xi32>
    %23 = vector.shape_cast %22 : vector<8x1xi32> to vector<8x1xi32>
    %24 = vector.broadcast %23 : vector<8x1xi32> to vector<8x128xi32>
    %25 = vector.shape_cast %24 : vector<8x128xi32> to vector<1x8x128xi32>
    %c6 = arith.constant 6 : index
    %c0_10 = arith.constant 0 : index
    %c0_11 = arith.constant 0 : index
    %26 = vector.load %arg6[%c6, %c0_10, %c0_11] : memref<7x8x128xi32, #tpu.memory_space<vmem>>, vector<1x8x128xi32>
    tpu.vector_store %arg6[%c6, %c0_10, %c0_11], %25 {strides = array<i32>} : memref<7x8x128xi32, #tpu.memory_space<vmem>>, vector<1x8x128xi32>,
    %c0_i32 = arith.constant 0 : i32
    %c6_i32_12 = arith.constant 6 : i32
    %27 = arith.addi %c0_i32, %c6_i32_12 : i32
    %c1_i32_13 = arith.constant 1 : i32
    %28 = scf.for %arg8 = %c0_i32 to %27 step %c1_i32_13 iter_args(%arg9 = %22) -> (vector<8x1xi32>)  : i32 {
      %c5_i32 = arith.constant 5 : i32
      %29 = arith.subi %c5_i32, %arg8 : i32
      %30 = arith.index_cast %29 : i32 to index
      %c0_15 = arith.constant 0 : index
      %c0_16 = arith.constant 0 : index
      %31 = vector.load %arg7[%30, %c0_15, %c0_16] : memref<7x8x32xi32, #tpu.memory_space<vmem>>, vector<1x8x32xi32>
      %32 = vector.shape_cast %31 : vector<1x8x32xi32> to vector<8x32xi32>
      %33 = vector.broadcast %arg9 : vector<8x1xi32> to vector<8x32xi32>
      %34 = arith.cmpi eq, %2, %33 : vector<8x32xi32>
      %c0_i32_17 = arith.constant 0 : i32
      %35 = vector.broadcast %c0_i32_17 : i32 to vector<8x32xi32>
      %36 = arith.select %34, %32, %35 : vector<8x32xi1>, vector<8x32xi32>
      %cst_18 = arith.constant dense<0> : vector<8xi32>
      %37 = vector.multi_reduction <add>, %36, %cst_18 [1] : vector<8x32xi32> to vector<8xi32>
      %38 = vector.shape_cast %37 : vector<8xi32> to vector<8x1xi32>
      %39 = vector.shape_cast %38 : vector<8x1xi32> to vector<8x1xi32>
      %40 = vector.broadcast %39 : vector<8x1xi32> to vector<8x128xi32>
      %41 = vector.shape_cast %40 : vector<8x128xi32> to vector<1x8x128xi32>
      %42 = arith.index_cast %29 : i32 to index
      %c0_19 = arith.constant 0 : index
      %c0_20 = arith.constant 0 : index
      %43 = vector.load %arg6[%42, %c0_19, %c0_20] : memref<7x8x128xi32, #tpu.memory_space<vmem>>, vector<1x8x128xi32>
      tpu.vector_store %arg6[%42, %c0_19, %c0_20], %41 {strides = array<i32>} : memref<7x8x128xi32, #tpu.memory_space<vmem>>, vector<1x8x128xi32>,
      scf.yield %38 : vector<8x1xi32>
    }
    %c6_i32_14 = arith.constant 6 : i32
    return
  }
  func.func @transform_0(%arg0: i32) -> (i32, i32, i32) {
    %c0_i32 = arith.constant 0 : i32
    %c0_i32_0 = arith.constant 0 : i32
    %c0_i32_1 = arith.constant 0 : i32
    return %c0_i32, %arg0, %c0_i32_0 : i32, i32, i32
  }
  func.func @transform_1(%arg0: i32) -> (i32, i32, i32) {
    %c0_i32 = arith.constant 0 : i32
    %c0_i32_0 = arith.constant 0 : i32
    %c0_i32_1 = arith.constant 0 : i32
    return %c0_i32, %arg0, %c0_i32_0 : i32, i32, i32
  }
  func.func @transform_2(%arg0: i32) -> (i32, i32) {
    %c0_i32 = arith.constant 0 : i32
    %c0_i32_0 = arith.constant 0 : i32
    %c0_i32_1 = arith.constant 0 : i32
    return %c0_i32, %c0_i32_0 : i32, i32
  }
  func.func @transform_3(%arg0: i32) -> (i32, i32) {
    %c0_i32 = arith.constant 0 : i32
    %c0_i32_0 = arith.constant 0 : i32
    %c0_i32_1 = arith.constant 0 : i32
    return %c0_i32, %c0_i32_0 : i32, i32
  }
  func.func @transform_4(%arg0: i32) -> (i32, i32) {
    %c0_i32 = arith.constant 0 : i32
    %c0_i32_0 = arith.constant 0 : i32
    %c0_i32_1 = arith.constant 0 : i32
    return %c0_i32, %c0_i32_0 : i32, i32
  }
  func.func @transform_5(%arg0: i32) -> (i32, i32, i32) {
    %c0_i32 = arith.constant 0 : i32
    %c0_i32_0 = arith.constant 0 : i32
    %c0_i32_1 = arith.constant 0 : i32
    return %c0_i32, %arg0, %c0_i32_0 : i32, i32, i32
  }
}

</mosaic_0001>

<bundles_post_ra>
// kernel: my_ner_forward.5
= control target key start
LH: loop header
LB: loop body
LE: loop exit
PB: predicated region body
PF: predicated region fallthrough
CT: control target
= control target key end

     0   :  { %v2858_v0 = vlaneseq  ;;  %s1727_s30 = smov 1   ;;  %s2852_s0 = inlined_call_operand.vmem [shape: f32[8,8,128], index: 0, kind: input, shape index: {}]   ;;  %s2853_s1 = inlined_call_operand.vmem [shape: f32[7,8,128], index: 1, kind: input, shape index: {}]   ;;  %s2854_s2 = inlined_call_operand.vmem [shape: f32[1,128], index: 2, kind: input, shape index: {}]   ;;  %s2855_s3 = inlined_call_operand.vmem [shape: f32[1,128], index: 3, kind: input, shape index: {}]   ;;  %s2856_s4 = inlined_call_operand.vmem [shape: f32[32,32], index: 4, kind: input, shape index: {}]   ;;  %s2857_s5 = inlined_call_operand.vmem [shape: s32[7,8,128], index: 5, kind: output, shape index: {}]  }
   0x1   :  { %v1699_v1 = vld [vmem:[%s2856_s4] sm:$0xff]  ;;  %v1704_v2 = vld [vmem:[%s2856_s4 + $0x8] sm:$0xff]  ;;  %v1709_v3 = vld [vmem:[%s2856_s4 + $0x10] sm:$0xff] }
   0x2   :  { %2930 = vst [vmem:[#allocation3_spill] sm:$0xff] %v1699_v1  ;;  %2931 = vst [vmem:[#allocation4_spill] sm:$0xff] %v1704_v2  ;;  %v1714_v4 = vld [vmem:[%s2856_s4 + $0x18] sm:$0xff]  ;;  %v1717_v5 = vand.u32 127, %v2858_v0  ;;  %v1587_v6 = vld [vmem:[%s2854_s2] ss:$0 sm:$0xff] }
   0x3   :  { %2932 = vst [vmem:[#allocation5_spill] sm:$0xff] %v1709_v3  ;;  %2933 = vst [vmem:[#allocation6_spill] sm:$0xff] %v1714_v4  ;;  %v1586_v7 = vld [vmem:[%s2852_s0 + $0x8] sm:$0xff] }
   0x4   :  { %2934 = vst [vmem:[#allocation7_spill] sm:$0xff] %v1717_v5  ;;  %v35_v8 = vadd.f32 %v1587_v6, %v1586_v7  }
   0x5 LB: > { %2940 = vst [vmem:[#allocation8_spill] sm:$0xff] %v1650_v8  ;;  %v1664_v9 = vmov 1966171168   ;;  %v2941_v0 = vlaneseq  ;;  %vm165_vm0 = vcmask 261120   ;;  %v44_v38 = vcombine.high %v1650_v8, %v1650_v8  ;;  %s1590_s2 = sshll.u32 %s1654_s30, 3  ;;  %s1588_s8 = sadd.s32 4294967295, %s1654_s30  ;;  %v1650_v8 = vphi %v35_v8, %v3070_v8   ;;  %s1654_s30 = sphi %s1727_s30, %s41_s30  }
   0x6   : > { %v46_v10 = vunpack.c.l.s4 %v1664_v9  ;;  %s1562_s7 = scalar_lea.vmem %s2852_s0, %s1590_s2  ;;  %s1589_s9 = sshll.u32 %s1588_s8, 3 }
   0x7   : > { %v1736_v11 = vshrl.u32 %v2941_v0, 7  ;;  %s980_s10 = scalar_lea.vmem [#allocation2], %s1589_s9  ;;  %s1204_s13 = scalar_lea.vmem %s2853_s1, %s1590_s2 }
   0x8   : > { %v47_v12 = vunpack.c.0.s8 %v46_v10  ;;  %s41_s30 = sadd.s32 1, %s1654_s30  }
   0x9   : > { %v2938_v2 = vld [vmem:[#allocation4_spill] sm:$0xff]  ;;  %v2939_v1 = vld [vmem:[#allocation3_spill] sm:$0xff]  ;;  %2942 = vst [vmem:[#allocation9_spill] sm:$0xff] %v1736_v11  ;;  %v1744_v15 = vsub.s32 0, %v1736_v11  ;;  %p38_p0 = scmp.ge.s32.totalorder %s41_s30, 7  }
   0xa   : > { %v2936_v4 = vld [vmem:[#allocation6_spill] sm:$0xff]  ;;  %v2937_v3 = vld [vmem:[#allocation5_spill] sm:$0xff]  ;;  %v1739_v13 = vsub.s32 %v47_v12, %v1736_v11 }
   0xb   : > { %v2935_v5 = vld [vmem:[#allocation7_spill] sm:$0xff] }
   0xc   : > { %v51_v14 = vrot.slane %v1650_v8, %v1739_v13  ;;  %v58_v44 = vrot.slane %v44_v38, %v1739_v13 }
   0xe   : > { %v67_v16 = vrot.slane %v51_v14, %v1739_v13  ;;  %v59_v17 = vcombine.high %v51_v14, %v51_v14  ;;  %v74_v49 = vrot.slane %v58_v44, %v1739_v13  ;;  %v60_v55 = vcombine.high %v58_v44, %v58_v44 }
  0x10   : > { %v96_v18 = vrot.slane %v67_v16, %v1744_v15  ;;  %v81_v19 = vrot.slane %v59_v17, %v1739_v13  ;;  %v89_v27 = vcombine.high %v67_v16, %v67_v16  ;;  %v112_v54 = vrot.slane %v74_v49, %v1744_v15 }
  0x11   : > { %v88_v6 = vrot.slane %v60_v55, %v1739_v13  ;;  %v90_v16 = vcombine.high %v74_v49, %v74_v49 }
  0x12   : > { %v1750_v20 = vadd.f32 %v96_v18, %v2937_v3  ;;  %v1753_v21 = vadd.f32 %v96_v18, %v2939_v1  ;;  %v1756_v22 = vadd.f32 %v96_v18, %v2936_v4  ;;  %v1759_v23 = vadd.f32 %v96_v18, %v2938_v2 }
  0x13   : > { %v100_v24 = vrot.slane %v81_v19, %v1744_v15  ;;  %v104_v32 = vrot.slane %v89_v27, %v1744_v15  ;;  %v91_v37 = vcombine.high %v81_v19, %v81_v19  ;;  %v1834_v60 = vadd.f32 %v112_v54, %v2938_v2 }
  0x14   : > { %v172_v25 = vsel %vm165_vm0, %v1750_v20, -inf  ;;  %v166_v26 = vsel %vm165_vm0, %v1753_v21, -inf  ;;  %v175_v28 = vsel %vm165_vm0, %v1756_v22, -inf  ;;  %v169_v29 = vsel %vm165_vm0, %v1759_v23, -inf }
  0x15   : > { %173 = vmax.xlane.f32.xlu1 %v172_v25  ;;  %167 = vmax.xlane.f32.xlu0 %v166_v26  ;;  %v1771_v30 = vadd.f32 %v100_v24, %v2938_v2  ;;  %v1774_v31 = vadd.f32 %v100_v24, %v2939_v1  ;;  %v1782_v35 = vadd.f32 %v100_v24, %v2936_v4  ;;  %v217_v7 = vsel %vm165_vm0, %v1834_v60, -inf }
  0x16   : > { %v1785_v36 = vadd.f32 %v100_v24, %v2937_v3  ;;  %v1794_v41 = vadd.f32 %v104_v32, %v2938_v2  ;;  %v1797_v42 = vadd.f32 %v104_v32, %v2939_v1  ;;  %v1800_v43 = vadd.f32 %v104_v32, %v2936_v4 }
  0x17   : > { %v181_v33 = vsel %vm165_vm0, %v1771_v30, -inf  ;;  %v178_v34 = vsel %vm165_vm0, %v1774_v31, -inf  ;;  %v187_v39 = vsel %vm165_vm0, %v1782_v35, -inf  ;;  %v1808_v47 = vadd.f32 %v104_v32, %v2937_v3 }
  0x18   : > { %v184_v40 = vsel %vm165_vm0, %v1785_v36, -inf  ;;  %v193_v45 = vsel %vm165_vm0, %v1794_v41, -inf  ;;  %v190_v46 = vsel %vm165_vm0, %v1797_v42, -inf  ;;  %v108_v48 = vrot.slane %v91_v37, %v1744_v15 }
  0x19   : > { %176 = vmax.xlane.f32.xlu1 %v175_v28  ;;  %170 = vmax.xlane.f32.xlu0 %v169_v29  ;;  %v199_v50 = vsel %vm165_vm0, %v1800_v43, -inf  ;;  %v196_v51 = vsel %vm165_vm0, %v1808_v47, -inf  ;;  %v1841_v63 = vadd.f32 %v112_v54, %v2939_v1  ;;  %v1849_v10 = vadd.f32 %v112_v54, %v2936_v4 }
  0x1a   : > { %v1817_v52 = vadd.f32 %v108_v48, %v2938_v2  ;;  %v1820_v53 = vadd.f32 %v108_v48, %v2939_v1  ;;  %v1828_v58 = vadd.f32 %v108_v48, %v2936_v4  ;;  %v1831_v59 = vadd.f32 %v108_v48, %v2937_v3 }
  0x1b   : > { %v214_v9 = vsel %vm165_vm0, %v1841_v63, -inf  ;;  %v1852_v12 = vadd.f32 %v112_v54, %v2937_v3  ;;  %v116_v14 = vrot.slane %v88_v6, %v1744_v15  ;;  %v223_v13 = vsel %vm165_vm0, %v1849_v10, -inf }
  0x1c   : > { %v205_v56 = vsel %vm165_vm0, %v1817_v52, -inf  ;;  %v202_v57 = vsel %vm165_vm0, %v1820_v53, -inf  ;;  %v211_v61 = vsel %vm165_vm0, %v1828_v58, -inf  ;;  %v208_v62 = vsel %vm165_vm0, %v1831_v59, -inf }
  0x1d   : > { %182 = vmax.xlane.f32.xlu1 %v181_v33  ;;  %179 = vmax.xlane.f32.xlu0 %v178_v34  ;;  %v220_v17 = vsel %vm165_vm0, %v1852_v12, -inf  ;;  %v1860_v18 = vadd.f32 %v116_v14, %v2938_v2  ;;  %v1863_v19 = vadd.f32 %v116_v14, %v2939_v1  ;;  %v120_v24 = vrot.slane %v90_v16, %v1744_v15 }
  0x1e   : > { %v1869_v26 = vadd.f32 %v116_v14, %v2936_v4  ;;  %v1874_v28 = vadd.f32 %v116_v14, %v2937_v3  ;;  %v92_v29 = vcombine.high %v88_v6, %v88_v6  ;;  %v1027_v16 = vsub.s32 2, %v1736_v11 }
  0x1f   : > { %v229_v25 = vsel %vm165_vm0, %v1860_v18, -inf  ;;  %v226_v27 = vsel %vm165_vm0, %v1863_v19, -inf  ;;  %v1879_v33 = vadd.f32 %v120_v24, %v2938_v2  ;;  %v1884_v37 = vadd.f32 %v120_v24, %v2939_v1 }
  0x20   : > { %v235_v32 = vsel %vm165_vm0, %v1869_v26, -inf  ;;  %v232_v34 = vsel %vm165_vm0, %v1874_v28, -inf  ;;  %v1887_v38 = vadd.f32 %v120_v24, %v2936_v4 }
  0x21   : > { %188 = vmax.xlane.f32.xlu1 %v187_v39  ;;  %185 = vmax.xlane.f32.xlu0 %v184_v40  ;;  %v241_v39 = vsel %vm165_vm0, %v1879_v33, -inf  ;;  %v124_v40 = vrot.slane %v92_v29, %v1744_v15  ;;  %v238_v44 = vsel %vm165_vm0, %v1884_v37, -inf }
  0x23   : > { %v1900_v48 = vadd.f32 %v124_v40, %v2938_v2  ;;  %v1910_v54 = vadd.f32 %v124_v40, %v2936_v4 }
  0x25   : > { %194 = vmax.xlane.f32.xlu1 %v193_v45  ;;  %191 = vmax.xlane.f32.xlu0 %v190_v46  ;;  %v1895_v45 = vadd.f32 %v120_v24, %v2937_v3  ;;  %v247_v46 = vsel %vm165_vm0, %v1887_v38, -inf  ;;  %v1065_v24 = vsub.s32 4, %v1736_v11 }
  0x27   : > { %v244_v49 = vsel %vm165_vm0, %v1895_v45, -inf }
  0x29   : > { %200 = vmax.xlane.f32.xlu1 %v199_v50  ;;  %197 = vmax.xlane.f32.xlu0 %v196_v51  ;;  %v1905_v50 = vadd.f32 %v124_v40, %v2939_v1  ;;  %v253_v51 = vsel %vm165_vm0, %v1900_v48, -inf }
  0x2b   : > { %v250_v55 = vsel %vm165_vm0, %v1905_v50, -inf }
  0x2d   : > { %206 = vmax.xlane.f32.xlu1 %v205_v56  ;;  %203 = vmax.xlane.f32.xlu0 %v202_v57  ;;  %v1915_v56 = vadd.f32 %v124_v40, %v2937_v3  ;;  %v259_v57 = vsel %vm165_vm0, %v1910_v54, -inf }
  0x31   : > { %212 = vmax.xlane.f32.xlu1 %v211_v61  ;;  %209 = vmax.xlane.f32.xlu0 %v208_v62  ;;  %v256_v61 = vsel %vm165_vm0, %v1915_v56, -inf  ;;  %v1591_v62 = vld [vmem:[%s1562_s7 + $0x8] sm:$0xff] }
  0x32   : > { %v1928_v6 = vrot.slane %v1591_v62, %v1744_v15  ;;  %v1939_v15 = vrot.slane %v1591_v62, %v1027_v16 }
  0x35   : > { %218 = vmax.xlane.f32.xlu1 %v217_v7  ;;  %215 = vmax.xlane.f32.xlu0 %v214_v9  ;;  %v1665_v7 = vmov 0   ;;  %v1008_v9 = vsub.s32 1, %v1736_v11 }
  0x36   : > { %1631 = vset.pattern.permute.xlu1 %v1665_v7  ;;  %1630 = vset.pattern.permute.xlu0 %v1665_v7 }
  0x37   : > { %v1934_v14 = vrot.slane %v1591_v62, %v1008_v9 }
  0x39   : > { %224 = vmax.xlane.f32.xlu1 %v223_v13  ;;  %221 = vmax.xlane.f32.xlu0 %v220_v17  ;;  %v1046_v13 = vsub.s32 3, %v1736_v11 }
  0x3b   : > { %v1944_v17 = vrot.slane %v1591_v62, %v1046_v13 }
  0x3d   : > { %230 = vmax.xlane.f32.xlu1 %v229_v25  ;;  %227 = vmax.xlane.f32.xlu0 %v226_v27  ;;  %v1949_v25 = vrot.slane %v1591_v62, %v1065_v24  ;;  %v1084_v27 = vsub.s32 5, %v1736_v11 }
  0x3f   : > { %v1954_v29 = vrot.slane %v1591_v62, %v1084_v27 }
  0x41   : > { %236 = vmax.xlane.f32.xlu1 %v235_v32  ;;  %233 = vmax.xlane.f32.xlu0 %v232_v34  ;;  %v1103_v32 = vsub.s32 6, %v1736_v11 }
  0x43   : > { %v1959_v34 = vrot.slane %v1591_v62, %v1103_v32 }
  0x45   : > { %242 = vmax.xlane.f32.xlu1 %v241_v39  ;;  %239 = vmax.xlane.f32.xlu0 %v238_v44  ;;  %v1122_v39 = vsub.s32 7, %v1736_v11 }
  0x47   : > { %v1964_v40 = vrot.slane %v1591_v62, %v1122_v39 }
  0x49   : > { %248 = vmax.xlane.f32.xlu1 %v247_v46  ;;  %245 = vmax.xlane.f32.xlu0 %v244_v49 }
  0x4d   : > { %254 = vmax.xlane.f32.xlu1 %v253_v51  ;;  %251 = vmax.xlane.f32.xlu0 %v250_v55 }
  0x51   : > { %260 = vmax.xlane.f32.xlu1 %v259_v57  ;;  %257 = vmax.xlane.f32.xlu0 %v256_v61 }
  0x62   : > { %996 = vbcast.lane.b32.xlu1 %v1928_v6, 264 }
  0x66   : > { %1000 = vbcast.lane.b32.xlu1 %v1928_v6, 272 }
  0x6a   : > { %1004 = vbcast.lane.b32.xlu1 %v1928_v6, 280 }
  0x6e   : > { %1015 = vbcast.lane.b32.xlu1 %v1934_v14, 264 }
  0x72   : > { %1023 = vbcast.lane.b32.xlu1 %v1934_v14, 280 }
  0x76   : > { %1034 = vbcast.lane.b32.xlu1 %v1939_v15, 264 }
  0x7a   : > { %1042 = vbcast.lane.b32.xlu1 %v1939_v15, 280 }
  0x7e   : > { %1053 = vbcast.lane.b32.xlu1 %v1944_v17, 264 }
  0x82   : > { %1061 = vbcast.lane.b32.xlu1 %v1944_v17, 280 }
  0x86   : > { %1072 = vbcast.lane.b32.xlu1 %v1949_v25, 264 }
  0x8a   : > { %1080 = vbcast.lane.b32.xlu1 %v1949_v25, 280 }
  0x8e   : > { %1091 = vbcast.lane.b32.xlu1 %v1954_v29, 264 }
  0x92   : > { %1099 = vbcast.lane.b32.xlu1 %v1954_v29, 280 }
  0x96   : > { %1110 = vbcast.lane.b32.xlu1 %v1959_v34, 264 }
  0x9a   : > { %1118 = vbcast.lane.b32.xlu1 %v1959_v34, 280 }
  0x9e   : > { %1129 = vbcast.lane.b32.xlu1 %v1964_v40, 264 }
  0xa2   : > { %v1967_v44 = vpop.xlane.xlu1 %173  ;;  %v1969_v46 = vpop.xlane.xlu0 %167  ;;  %1137 = vbcast.lane.b32.xlu1 %v1964_v40, 280 }
  0xa3   : > { %vm264_vm1 = vcmp.eq.f32.partialorder %v1750_v20, %v1967_v44  ;;  %vm262_vm2 = vcmp.eq.f32.partialorder %v1753_v21, %v1969_v46 }
  0xa4   : > { %v294_v49 = vsel %vm262_vm2, %v2935_v5, 32  ;;  %v296_v55 = vsel %vm264_vm1, %v2935_v5, 32 }
  0xa5   : > { %v1978_v51 = vsel %vm165_vm0, %v294_v49, 2147483647  ;;  %v1997_v9 = vsel %vm165_vm0, %v296_v55, 2147483647 }
  0xa6   : > { %2943 = vst [vmem:[#allocation10_spill] sm:$0xff] %v1978_v51  ;;  %v1981_v57 = vpop.xlane.xlu1 %176  ;;  %v1983_v61 = vpop.xlane.xlu0 %170  ;;  %v328_v62 = vshra.s32 %v1978_v51, 16  ;;  %2946 = vst [vmem:[#allocation13_spill] sm:$0xff] %v1997_v9  ;;  %v358_v27 = vshra.s32 %v1997_v9, 16 }
  0xa7   : > { %vm265_vm3 = vcmp.eq.f32.partialorder %v1756_v22, %v1981_v57  ;;  %vm263_vm4 = vcmp.eq.f32.partialorder %v1759_v23, %v1983_v61 }
  0xa8   : > { %v295_v20 = vsel %vm263_vm4, %v2935_v5, 32  ;;  %v1991_v21 = vcvt.s32.f32 %v328_v62  ;;  %v297_v16 = vsel %vm265_vm3, %v2935_v5, 32  ;;  %v2017_v55 = vcvt.s32.f32 %v358_v27 }
  0xa9   : > { %v1994_v7 = vsel %vm165_vm0, %v295_v20, 2147483647  ;;  %v2010_v32 = vsel %vm165_vm0, %v297_v16, 2147483647 }
  0xaa   : > { %2944 = vst [vmem:[#allocation11_spill] sm:$0xff] %v1991_v21  ;;  %2945 = vst [vmem:[#allocation12_spill] sm:$0xff] %v1994_v7  ;;  %v2000_v13 = vpop.xlane.xlu1 %182  ;;  %v2002_v24 = vpop.xlane.xlu0 %179  ;;  %331 = vmin.xlane.f32.xlu0 %v1991_v21  ;;  %v343_v22 = vshra.s32 %v1994_v7, 16  ;;  %v373_v62 = vshra.s32 %v2010_v32, 16 }
  0xab   : > { %2948 = vst [vmem:[#allocation15_spill] sm:$0xff] %v2010_v32  ;;  %2949 = vst [vmem:[#allocation16_spill] sm:$0xff] %v2017_v55  ;;  %vm266_vm9 = vcmp.eq.f32.partialorder %v1774_v31, %v2002_v24  ;;  %vm267_vm10 = vcmp.eq.f32.partialorder %v1771_v30, %v2000_v13 }
  0xac   : > { %v2006_v23 = vcvt.s32.f32 %v343_v22  ;;  %v2025_v22 = vcvt.s32.f32 %v373_v62  ;;  %v299_v31 = vsel %vm267_vm10, %v2935_v5, 32 }
  0xae   : > { %2947 = vst [vmem:[#allocation14_spill] sm:$0xff] %v2006_v23  ;;  %v2012_v39 = vpop.xlane.xlu1 %188  ;;  %v2014_v49 = vpop.xlane.xlu0 %185  ;;  %346 = vmin.xlane.f32.xlu0 %v2006_v23  ;;  %2950 = vst [vmem:[#allocation17_spill] sm:$0xff] %v2025_v22 }
  0xaf   : > { %vm268_vm11 = vcmp.eq.f32.partialorder %v1785_v36, %v2014_v49  ;;  %vm269_vm12 = vcmp.eq.f32.partialorder %v1782_v35, %v2012_v39 }
  0xb0   : > { %v300_v30 = vsel %vm268_vm11, %v2935_v5, 32 }
  0xb1   : > { %v2118_v36 = vsel %vm165_vm0, %v300_v30, 2147483647 }
  0xb2   : > { %v2020_v20 = vpop.xlane.xlu1 %194  ;;  %v2022_v0 = vpop.xlane.xlu0 %191  ;;  %361 = vmin.xlane.f32.xlu0 %v2017_v55  ;;  %2970 = vst [vmem:[#allocation37_spill] sm:$0xff] %v2118_v36  ;;  %v418_v35 = vshra.s32 %v2118_v36, 16 }
  0xb3   : > { %vm270_vm13 = vcmp.eq.f32.partialorder %v1797_v42, %v2022_v0  ;;  %vm271_vm14 = vcmp.eq.f32.partialorder %v1794_v41, %v2020_v20 }
  0xb4   : > { %v303_v36 = vsel %vm271_vm14, %v2935_v5, 32 }
  0xb6   : > { %v2027_v16 = vpop.xlane.xlu1 %200  ;;  %v2029_v1 = vpop.xlane.xlu0 %197  ;;  %376 = vmin.xlane.f32.xlu0 %v2025_v22 }
  0xb7   : > { %vm272_vm15 = vcmp.eq.f32.partialorder %v1808_v47, %v2029_v1  ;;  %vm273_vm1 = vcmp.eq.f32.partialorder %v1800_v43, %v2027_v16 }
  0xba   : > { %v2032_v2 = vpop.xlane.xlu1 %206  ;;  %v2034_v27 = vpop.xlane.xlu0 %203 }
  0xbb   : > { %vm275_vm10 = vcmp.eq.f32.partialorder %v1817_v52, %v2032_v2 }
  0xbe   : > { %v2036_v3 = vpop.xlane.xlu1 %212  ;;  %v2038_v4 = vpop.xlane.xlu0 %209 }
  0xbf   : > { %2951 = vst [vmem:[#allocation18_spill] sm:$0xff] %v2036_v3  ;;  %vm276_vm11 = vcmp.eq.f32.partialorder %v1831_v59, %v2038_v4 }
  0xc2   : > { %v2040_v8 = vpop.xlane.xlu1 %218  ;;  %v2042_v11 = vpop.xlane.xlu0 %215 }
  0xc3   : > { %2952 = vst [vmem:[#allocation19_spill] sm:$0xff] %v2042_v11  ;;  %vm279_vm5 = vcmp.eq.f32.partialorder %v1834_v60, %v2040_v8  ;;  %vm278_vm6 = vcmp.eq.f32.partialorder %v1841_v63, %v2042_v11 }
  0xc4   : > { %v311_v62 = vsel %vm279_vm5, %v2935_v5, 32  ;;  %v310_v22 = vsel %vm278_vm6, %v2935_v5, 32 }
  0xc5   : > { %v2051_v32 = vsel %vm165_vm0, %v310_v22, 2147483647  ;;  %v2054_v55 = vsel %vm165_vm0, %v311_v62, 2147483647 }
  0xc6   : > { %2953 = vst [vmem:[#allocation20_spill] sm:$0xff] %v2051_v32  ;;  %2954 = vst [vmem:[#allocation21_spill] sm:$0xff] %v2054_v55  ;;  %v2056_v9 = vpop.xlane.xlu1 %224  ;;  %v2058_v23 = vpop.xlane.xlu0 %221  ;;  %v568_v7 = vshra.s32 %v2051_v32, 16  ;;  %v583_v60 = vshra.s32 %v2054_v55, 16 }
  0xc7   : > { %2955 = vst [vmem:[#allocation22_spill] sm:$0xff] %v2056_v9  ;;  %2956 = vst [vmem:[#allocation23_spill] sm:$0xff] %v2058_v23  ;;  %vm281_vm7 = vcmp.eq.f32.partialorder %v1849_v10, %v2056_v9  ;;  %vm280_vm8 = vcmp.eq.f32.partialorder %v1852_v12, %v2058_v23 }
  0xc8   : > { %v313_v63 = vsel %vm281_vm7, %v2935_v5, 32  ;;  %v312_v22 = vsel %vm280_vm8, %v2935_v5, 32  ;;  %v2068_v62 = vcvt.s32.f32 %v568_v7  ;;  %v2076_v55 = vcvt.s32.f32 %v583_v60 }
  0xc9   : > { %v2071_v21 = vsel %vm165_vm0, %v312_v22, 2147483647  ;;  %v2082_v12 = vsel %vm165_vm0, %v313_v63, 2147483647  ;;  %v298_v7 = vsel %vm266_vm9, %v2935_v5, 32  ;;  %vm274_vm9 = vcmp.eq.f32.partialorder %v1820_v53, %v2034_v27 }
  0xca   : > { %2957 = vst [vmem:[#allocation24_spill] sm:$0xff] %v2068_v62  ;;  %2958 = vst [vmem:[#allocation25_spill] sm:$0xff] %v2071_v21  ;;  %v2073_v51 = vpop.xlane.xlu1 %230  ;;  %571 = vmin.xlane.f32.xlu0 %v2068_v62  ;;  %v598_v10 = vshra.s32 %v2071_v21, 16  ;;  %v613_v62 = vshra.s32 %v2082_v12, 16  ;;  %v2094_v60 = vsel %vm165_vm0, %v298_v7, 2147483647  ;;  %v2157_v9 = vpop.xlane.xlu0 %227 }
  0xcb   : > { %2959 = vst [vmem:[#allocation26_spill] sm:$0xff] %v2073_v51  ;;  %2960 = vst [vmem:[#allocation27_spill] sm:$0xff] %v2076_v55  ;;  %vm282_vm2 = vcmp.eq.f32.partialorder %v1863_v19, %v2157_v9  ;;  %vm283_vm3 = vcmp.eq.f32.partialorder %v1860_v18, %v2073_v51 }
  0xcc   : > { %2961 = vst [vmem:[#allocation28_spill] sm:$0xff] %v2082_v12  ;;  %v2088_v22 = vcvt.s32.f32 %v598_v10  ;;  %2964 = vst [vmem:[#allocation31_spill] sm:$0xff] %v2094_v60  ;;  %v2100_v21 = vcvt.s32.f32 %v613_v62  ;;  %v388_v10 = vshra.s32 %v2094_v60, 16  ;;  %v2106_v12 = vsel %vm165_vm0, %v299_v31, 2147483647 }
  0xcd   : > { %2967 = vst [vmem:[#allocation34_spill] sm:$0xff] %v2106_v12  ;;  %v403_v62 = vshra.s32 %v2106_v12, 16  ;;  %v301_v60 = vsel %vm269_vm12, %v2935_v5, 32  ;;  %v302_v12 = vsel %vm270_vm13, %v2935_v5, 32  ;;  %2979 = vst [vmem:[#allocation46_spill] sm:$0xff] %v2157_v9  ;;  %v314_v43 = vsel %vm282_vm2, %v2935_v5, 32 }
  0xce   : > { %v2085_v32 = vpop.xlane.xlu1 %236  ;;  %586 = vmin.xlane.f32.xlu0 %v2076_v55  ;;  %2963 = vst [vmem:[#allocation30_spill] sm:$0xff] %v2088_v22  ;;  %2966 = vst [vmem:[#allocation33_spill] sm:$0xff] %v2100_v21  ;;  %v2182_v19 = vpop.xlane.xlu0 %233  ;;  %vm277_vm12 = vcmp.eq.f32.partialorder %v1828_v58, %v2036_v3 }
  0xcf   : > { %2962 = vst [vmem:[#allocation29_spill] sm:$0xff] %v2085_v32  ;;  %2982 = vst [vmem:[#allocation49_spill] sm:$0xff] %v2182_v19  ;;  %vm284_vm4 = vcmp.eq.f32.partialorder %v1874_v28, %v2182_v19  ;;  %vm285_vm5 = vcmp.eq.f32.partialorder %v1869_v26, %v2085_v32  ;;  %v307_v32 = vsel %vm275_vm10, %v2935_v5, 32 }
  0xd2   : > { %v2097_v63 = vpop.xlane.xlu1 %242  ;;  %601 = vmin.xlane.f32.xlu0 %v2088_v22  ;;  %v2114_v22 = vcvt.s32.f32 %v388_v10  ;;  %v2130_v10 = vsel %vm165_vm0, %v301_v60, 2147483647  ;;  %v2207_v19 = vpop.xlane.xlu0 %239 }
  0xd3   : > { %2965 = vst [vmem:[#allocation32_spill] sm:$0xff] %v2097_v63  ;;  %2973 = vst [vmem:[#allocation40_spill] sm:$0xff] %v2130_v10  ;;  %v433_v42 = vshra.s32 %v2130_v10, 16  ;;  %vm286_vm6 = vcmp.eq.f32.partialorder %v1884_v37, %v2207_v19  ;;  %vm287_vm7 = vcmp.eq.f32.partialorder %v1879_v33, %v2097_v63 }
  0xd4   : > { %2969 = vst [vmem:[#allocation36_spill] sm:$0xff] %v2114_v22  ;;  %2983 = vst [vmem:[#allocation50_spill] sm:$0xff] %v2207_v19  ;;  %v308_v19 = vsel %vm276_vm11, %v2935_v5, 32 }
  0xd5   : > { %v2149_v55 = vcvt.s32.f32 %v433_v42  ;;  %v2284_v59 = vsel %vm165_vm0, %v308_v19, 2147483647 }
  0xd6   : > { %v2109_v7 = vpop.xlane.xlu1 %248  ;;  %616 = vmin.xlane.f32.xlu0 %v2100_v21  ;;  %v2126_v21 = vcvt.s32.f32 %v403_v62  ;;  %v2142_v62 = vsel %vm165_vm0, %v302_v12, 2147483647  ;;  %v304_v12 = vsel %vm272_vm15, %v2935_v5, 32  ;;  %v538_v58 = vshra.s32 %v2284_v59, 16 }
  0xd7   : > { %2968 = vst [vmem:[#allocation35_spill] sm:$0xff] %v2109_v7  ;;  %2976 = vst [vmem:[#allocation43_spill] sm:$0xff] %v2142_v62  ;;  %v448_v41 = vshra.s32 %v2142_v62, 16  ;;  %v2229_v62 = vpop.xlane.xlu0 %245  ;;  %vm289_vm13 = vcmp.eq.f32.partialorder %v1887_v38, %v2109_v7 }
  0xd8   : > { %2972 = vst [vmem:[#allocation39_spill] sm:$0xff] %v2126_v21  ;;  %2977 = vst [vmem:[#allocation44_spill] sm:$0xff] %v2149_v55  ;;  %vm288_vm8 = vcmp.eq.f32.partialorder %v1895_v45, %v2229_v62  ;;  %v321_v9 = vsel %vm289_vm13, %v2935_v5, 32  ;;  %v2303_v19 = vcvt.s32.f32 %v538_v58 }
  0xd9   : > { %2984 = vst [vmem:[#allocation51_spill] sm:$0xff] %v2229_v62  ;;  %v320_v63 = vsel %vm288_vm8, %v2935_v5, 32  ;;  %v2301_v38 = vsel %vm165_vm0, %v321_v9, 2147483647 }
  0xda   : > { %v2121_v31 = vpop.xlane.xlu1 %254  ;;  %391 = vmin.xlane.f32.xlu0 %v2114_v22  ;;  %v2138_v22 = vcvt.s32.f32 %v418_v35  ;;  %v2153_v35 = vsel %vm165_vm0, %v303_v36, 2147483647  ;;  %v305_v36 = vsel %vm273_vm1, %v2935_v5, 32  ;;  %v2252_v45 = vsel %vm165_vm0, %v320_v63, 2147483647 }
  0xdb   : > { %2971 = vst [vmem:[#allocation38_spill] sm:$0xff] %v2121_v31  ;;  %2978 = vst [vmem:[#allocation45_spill] sm:$0xff] %v2153_v35  ;;  %v463_v42 = vshra.s32 %v2153_v35, 16  ;;  %v718_v62 = vshra.s32 %v2252_v45, 16  ;;  %v2272_v63 = vsel %vm165_vm0, %v307_v32, 2147483647  ;;  %vm291_vm15 = vcmp.eq.f32.partialorder %v1900_v48, %v2121_v31 }
  0xdc   : > { %2975 = vst [vmem:[#allocation42_spill] sm:$0xff] %v2138_v22  ;;  %v309_v32 = vsel %vm277_vm12, %v2935_v5, 32  ;;  %v323_v9 = vsel %vm291_vm15, %v2935_v5, 32 }
  0xdd   : > { %v2266_v53 = vcvt.s32.f32 %v718_v62  ;;  %v523_v62 = vshra.s32 %v2272_v63, 16  ;;  %v2326_v31 = vsel %vm165_vm0, %v323_v9, 2147483647 }
  0xde   : > { %v2133_v30 = vpop.xlane.xlu1 %260  ;;  %406 = vmin.xlane.f32.xlu0 %v2126_v21 }
  0xdf   : > { %2974 = vst [vmem:[#allocation41_spill] sm:$0xff] %v2133_v30  ;;  %v2291_v51 = vcvt.s32.f32 %v523_v62  ;;  %vm293_vm2 = vcmp.eq.f32.partialorder %v1910_v54, %v2133_v30 }
  0xe2   : > { %v997_v60 = vpop.permute.xlu1 %996  ;;  %421 = vmin.xlane.f32.xlu0 %v2138_v22 }
  0xe3   : > { %v1172_v21 = vadd.f32 %v997_v60, %v1983_v61  ;;  %v2162_v61 = vcvt.s32.f32 %v448_v41  ;;  %v2172_v60 = vcvt.s32.f32 %v463_v42  ;;  %v2185_v41 = vsel %vm165_vm0, %v314_v43, 2147483647 }
  0xe4   : > { %v628_v18 = vshra.s32 %v2185_v41, 16  ;;  %v316_v43 = vsel %vm284_vm4, %v2935_v5, 32 }
  0xe5   : > { %1243 = vperm.xlu1 %1631, %v1172_v21   ;;  %2980 = vst [vmem:[#allocation47_spill] sm:$0xff] %v2162_v61  ;;  %v2168_v21 = vsel %vm165_vm0, %v304_v12, 2147483647  ;;  %2981 = vst [vmem:[#allocation48_spill] sm:$0xff] %v2172_v60  ;;  %v315_v12 = vsel %vm283_vm3, %v2935_v5, 32 }
  0xe6   : > { %v1001_v10 = vpop.permute.xlu1 %1000  ;;  %436 = vmin.xlane.f32.xlu0 %v2149_v55  ;;  %v2210_v35 = vsel %vm165_vm0, %v316_v43, 2147483647  ;;  %v319_v55 = vsel %vm287_vm7, %v2935_v5, 32 }
  0xe7   : > { %v1173_v47 = vadd.f32 %v1001_v10, %v1967_v44  ;;  %v478_v44 = vshra.s32 %v2168_v21, 16  ;;  %v2179_v10 = vsel %vm165_vm0, %v305_v36, 2147483647  ;;  %v2196_v36 = vsel %vm165_vm0, %v315_v12, 2147483647 }
  0xe8   : > { %v493_v42 = vshra.s32 %v2179_v10, 16  ;;  %v643_v28 = vshra.s32 %v2196_v36, 16  ;;  %v317_v12 = vsel %vm285_vm5, %v2935_v5, 32  ;;  %v658_v26 = vshra.s32 %v2210_v35, 16 }
  0xe9   : > { %1246 = vperm.xlu1 %1631, %v1173_v47   ;;  %v2188_v47 = vcvt.s32.f32 %v478_v44  ;;  %v2204_v44 = vcvt.s32.f32 %v628_v18  ;;  %v2220_v18 = vsel %vm165_vm0, %v317_v12, 2147483647 }
  0xea   : > { %451 = vmin.xlane.f32.xlu0 %v2162_v61  ;;  %v318_v61 = vsel %vm286_vm6, %v2935_v5, 32  ;;  %v2226_v43 = vcvt.s32.f32 %v658_v26  ;;  %v673_v37 = vshra.s32 %v2220_v18, 16  ;;  %v2242_v26 = vsel %vm165_vm0, %v319_v55, 2147483647 }
  0xeb   : > { %v703_v22 = vshra.s32 %v2242_v26, 16 }
  0xec   : > { %v2238_v12 = vcvt.s32.f32 %v673_v37  ;;  %v306_v37 = vsel %vm274_vm9, %v2935_v5, 32 }
  0xed   : > { %v2256_v55 = vcvt.s32.f32 %v703_v22 }
  0xee   : > { %466 = vmin.xlane.f32.xlu0 %v2172_v60  ;;  %v2198_v60 = vcvt.s32.f32 %v493_v42  ;;  %v2216_v42 = vcvt.s32.f32 %v643_v28  ;;  %v2232_v28 = vsel %vm165_vm0, %v318_v61, 2147483647 }
  0xef   : > { %v688_v33 = vshra.s32 %v2232_v28, 16 }
  0xf1   : > { %v2246_v61 = vcvt.s32.f32 %v688_v33  ;;  %v2262_v33 = vsel %vm165_vm0, %v306_v37, 2147483647  ;;  %v2288_v37 = vpop.xlane.xlu0 %251 }
  0xf2   : > { %481 = vmin.xlane.f32.xlu0 %v2188_v47  ;;  %v508_v22 = vshra.s32 %v2262_v33, 16  ;;  %2985 = vst [vmem:[#allocation52_spill] sm:$0xff] %v2288_v37  ;;  %vm290_vm14 = vcmp.eq.f32.partialorder %v1905_v50, %v2288_v37 }
  0xf3   : > { %v322_v62 = vsel %vm290_vm14, %v2935_v5, 32 }
  0xf4   : > { %v2278_v52 = vcvt.s32.f32 %v508_v22  ;;  %v2295_v22 = vsel %vm165_vm0, %v309_v32, 2147483647  ;;  %v733_v32 = vshra.s32 %v2301_v38, 16  ;;  %v2314_v50 = vsel %vm165_vm0, %v322_v62, 2147483647 }
  0xf5   : > { %v553_v7 = vshra.s32 %v2295_v22, 16  ;;  %v2311_v23 = vpop.xlane.xlu0 %257  ;;  %v748_v48 = vshra.s32 %v2314_v50, 16 }
  0xf6   : > { %496 = vmin.xlane.f32.xlu0 %v2198_v60  ;;  %2986 = vst [vmem:[#allocation53_spill] sm:$0xff] %v2311_v23  ;;  %vm292_vm1 = vcmp.eq.f32.partialorder %v1915_v56, %v2311_v23  ;;  %v2322_v37 = vcvt.s32.f32 %v733_v32  ;;  %v763_v56 = vshra.s32 %v2326_v31, 16  ;;  %v325_v32 = vsel %vm293_vm2, %v2935_v5, 32 }
  0xf7   : > { %v2317_v58 = vcvt.s32.f32 %v553_v7  ;;  %v324_v3 = vsel %vm292_vm1, %v2935_v5, 32  ;;  %v2332_v7 = vcvt.s32.f32 %v748_v48  ;;  %v2344_v11 = vsel %vm165_vm0, %v325_v32, 2147483647 }
  0xf8   : > { %v2336_v62 = vsel %vm165_vm0, %v324_v3, 2147483647  ;;  %v2340_v9 = vcvt.s32.f32 %v763_v56  ;;  %v793_v48 = vshra.s32 %v2344_v11, 16 }
  0xf9   : > { %v778_v23 = vshra.s32 %v2336_v62, 16 }
  0xfa   : > { %631 = vmin.xlane.f32.xlu0 %v2204_v44  ;;  %v2351_v3 = vcvt.s32.f32 %v793_v48 }
  0xfb   : > { %v2347_v54 = vcvt.s32.f32 %v778_v23 }
  0xfe   : > { %646 = vmin.xlane.f32.xlu0 %v2216_v42 }
 0x102   : > { %661 = vmin.xlane.f32.xlu0 %v2226_v43 }
 0x106   : > { %676 = vmin.xlane.f32.xlu0 %v2238_v12 }
 0x10a   : > { %691 = vmin.xlane.f32.xlu0 %v2246_v61 }
 0x10e   : > { %706 = vmin.xlane.f32.xlu0 %v2256_v55 }
 0x112   : > { %721 = vmin.xlane.f32.xlu0 %v2266_v53 }
 0x116   : > { %511 = vmin.xlane.f32.xlu0 %v2278_v52 }
 0x11a   : > { %526 = vmin.xlane.f32.xlu0 %v2291_v51 }
 0x11e   : > { %541 = vmin.xlane.f32.xlu0 %v2303_v19 }
 0x122   : > { %556 = vmin.xlane.f32.xlu0 %v2317_v58 }
 0x126   : > { %736 = vmin.xlane.f32.xlu0 %v2322_v37 }
 0x12a   : > { %751 = vmin.xlane.f32.xlu0 %v2332_v7 }
 0x12e   : > { %766 = vmin.xlane.f32.xlu0 %v2340_v9 }
 0x132   : > { %781 = vmin.xlane.f32.xlu0 %v2347_v54 }
 0x136   : > { %796 = vmin.xlane.f32.xlu0 %v2351_v3 }
 0x137   : > { %v2354_v5 = vpop.xlane.xlu0 %331 }
 0x138   : > { %2987 = vst [vmem:[#allocation54_spill] sm:$0xff] %v2354_v5 }
 0x13b   : > { %v2356_v56 = vpop.xlane.xlu0 %346 }
 0x13f   : > { %v2359_v32 = vpop.xlane.xlu0 %361 }
 0x140   : > { %2988 = vst [vmem:[#allocation55_spill] sm:$0xff] %v2359_v32 }
 0x143   : > { %v2362_v23 = vpop.xlane.xlu0 %376 }
 0x14c   : > { %992 = vbcast.lane.b32.xlu0 %v1928_v6, 256 }
 0x150   : > { %1011 = vbcast.lane.b32.xlu0 %v1934_v14, 256 }
 0x154   : > { %1019 = vbcast.lane.b32.xlu0 %v1934_v14, 272 }
 0x157   : > { %v2365_v30 = vpop.xlane.xlu0 %571 }
 0x158   : > { %2989 = vst [vmem:[#allocation56_spill] sm:$0xff] %v2365_v30  ;;  %1030 = vbcast.lane.b32.xlu0 %v1939_v15, 256 }
 0x15b   : > { %v2368_v48 = vpop.xlane.xlu0 %586 }
 0x15c   : > { %1038 = vbcast.lane.b32.xlu0 %v1939_v15, 272 }
 0x15f   : > { %v2371_v5 = vpop.xlane.xlu0 %601 }
 0x160   : > { %2990 = vst [vmem:[#allocation57_spill] sm:$0xff] %v2371_v5  ;;  %1049 = vbcast.lane.b32.xlu0 %v1944_v17, 256 }
 0x163   : > { %v2374_v6 = vpop.xlane.xlu0 %616 }
 0x164   : > { %1057 = vbcast.lane.b32.xlu0 %v1944_v17, 272  ;;  %v477_v17 = vand.u32 65535, %v2168_v21 }
 0x167   : > { %v2377_v32 = vpop.xlane.xlu0 %391 }
 0x168   : > { %2991 = vst [vmem:[#allocation58_spill] sm:$0xff] %v2377_v32  ;;  %1068 = vbcast.lane.b32.xlu0 %v1949_v25, 256 }
 0x16b   : > { %v2380_v14 = vpop.xlane.xlu0 %406 }
 0x16c   : > { %2992 = vst [vmem:[#allocation59_spill] sm:$0xff] %v2380_v14  ;;  %1076 = vbcast.lane.b32.xlu0 %v1949_v25, 272  ;;  %v492_v25 = vand.u32 65535, %v2179_v10  ;;  %v642_v10 = vand.u32 65535, %v2196_v36 }
 0x16e   : > { %v494_v21 = vcvt.s32.f32 %v492_v25 }
 0x16f   : > { %v2383_v30 = vpop.xlane.xlu0 %421 }
 0x170   : > { %2993 = vst [vmem:[#allocation60_spill] sm:$0xff] %v2383_v30  ;;  %1087 = vbcast.lane.b32.xlu0 %v1954_v29, 256  ;;  %v479_v30 = vcvt.s32.f32 %v477_v17 }
 0x173   : > { %v2386_v15 = vpop.xlane.xlu0 %436 }
 0x174   : > { %2994 = vst [vmem:[#allocation61_spill] sm:$0xff] %v2386_v15  ;;  %1095 = vbcast.lane.b32.xlu0 %v1954_v29, 272 }
 0x177   : > { %v2389_v5 = vpop.xlane.xlu0 %451 }
 0x178   : > { %2995 = vst [vmem:[#allocation62_spill] sm:$0xff] %v2389_v5  ;;  %1106 = vbcast.lane.b32.xlu0 %v1959_v34, 256  ;;  %v627_v5 = vand.u32 65535, %v2185_v41  ;;  %v657_v41 = vand.u32 65535, %v2210_v35  ;;  %v687_v35 = vand.u32 65535, %v2232_v28  ;;  %v717_v28 = vand.u32 65535, %v2252_v45 }
 0x179   : > { %v522_v45 = vand.u32 65535, %v2272_v63  ;;  %v552_v63 = vand.u32 65535, %v2295_v22  ;;  %v747_v22 = vand.u32 65535, %v2314_v50  ;;  %v777_v50 = vand.u32 65535, %v2336_v62 }
 0x17b   : > { %v2393_v32 = vpop.xlane.xlu0 %466 }
 0x17c   : > { %1114 = vbcast.lane.b32.xlu0 %v1959_v34, 272 }
 0x17f   : > { %v2397_v14 = vpop.xlane.xlu0 %481 }
 0x180   : > { %2996 = vst [vmem:[#allocation63_spill] sm:$0xff] %v2397_v14  ;;  %vm483_vm3 = vcmp.eq.f32.partialorder %v2188_v47, %v2397_v14  ;;  %1125 = vbcast.lane.b32.xlu0 %v1964_v40, 256  ;;  %v629_v47 = vcvt.s32.f32 %v627_v5  ;;  %v644_v14 = vcvt.s32.f32 %v642_v10  ;;  %v659_v5 = vcvt.s32.f32 %v657_v41 }
 0x181   : > { %v2402_v29 = vsel %vm483_vm3, %v479_v30, inf }
 0x183   : > { %v2405_v15 = vpop.xlane.xlu0 %496 }
 0x184   : > { %vm498_vm4 = vcmp.eq.f32.partialorder %v2198_v60, %v2405_v15  ;;  %1133 = vbcast.lane.b32.xlu0 %v1964_v40, 272  ;;  %v672_v60 = vand.u32 65535, %v2220_v18  ;;  %v702_v18 = vand.u32 65535, %v2242_v26  ;;  %v507_v26 = vand.u32 65535, %v2262_v33 }
 0x185   : > { %v2410_v34 = vsel %vm498_vm4, %v494_v21, inf  ;;  %v537_v33 = vand.u32 65535, %v2284_v59  ;;  %v732_v59 = vand.u32 65535, %v2301_v38  ;;  %v762_v38 = vand.u32 65535, %v2326_v31 }
 0x186   : > { %v674_v10 = vcvt.s32.f32 %v672_v60  ;;  %v704_v60 = vcvt.s32.f32 %v702_v18  ;;  %v509_v18 = vcvt.s32.f32 %v507_v26 }
 0x187   : > { %v2413_v17 = vpop.xlane.xlu0 %631  ;;  %v539_v26 = vcvt.s32.f32 %v537_v33  ;;  %v734_v33 = vcvt.s32.f32 %v732_v59  ;;  %v764_v59 = vcvt.s32.f32 %v762_v38 }
 0x188   : > { %vm633_vm5 = vcmp.eq.f32.partialorder %v2204_v44, %v2413_v17 }
 0x189   : > { %v2417_v30 = vsel %vm633_vm5, %v629_v47, inf  ;;  %v689_v47 = vcvt.s32.f32 %v687_v35  ;;  %v719_v35 = vcvt.s32.f32 %v717_v28  ;;  %v524_v28 = vcvt.s32.f32 %v522_v45 }
 0x18a   : > { %v554_v45 = vcvt.s32.f32 %v552_v63  ;;  %v749_v63 = vcvt.s32.f32 %v747_v22 }
 0x18b   : > { %v2420_v25 = vpop.xlane.xlu0 %646 }
 0x18c   : > { %vm648_vm6 = vcmp.eq.f32.partialorder %v2216_v42, %v2420_v25 }
 0x18d   : > { %v2424_v40 = vsel %vm648_vm6, %v644_v14, inf }
 0x18f   : > { %v2427_v36 = vpop.xlane.xlu0 %661 }
 0x190   : > { %vm663_vm7 = vcmp.eq.f32.partialorder %v2226_v43, %v2427_v36 }
 0x191   : > { %v2431_v44 = vsel %vm663_vm7, %v659_v5, inf }
 0x193   : > { %v2434_v21 = vpop.xlane.xlu0 %676 }
 0x194   : > { %vm678_vm8 = vcmp.eq.f32.partialorder %v2238_v12, %v2434_v21 }
 0x195   : > { %v2438_v42 = vsel %vm678_vm8, %v674_v10, inf }
 0x197   : > { %v2441_v14 = vpop.xlane.xlu0 %691 }
 0x198   : > { %vm693_vm9 = vcmp.eq.f32.partialorder %v2246_v61, %v2441_v14 }
 0x199   : > { %v2445_v43 = vsel %vm693_vm9, %v689_v47, inf }
 0x19b   : > { %v2448_v41 = vpop.xlane.xlu0 %706 }
 0x19c   : > { %vm708_vm10 = vcmp.eq.f32.partialorder %v2256_v55, %v2448_v41 }
 0x19d   : > { %v2452_v12 = vsel %vm708_vm10, %v704_v60, inf }
 0x19f   : > { %v2455_v5 = vpop.xlane.xlu0 %721 }
 0x1a0   : > { %vm723_vm11 = vcmp.eq.f32.partialorder %v2266_v53, %v2455_v5 }
 0x1a1   : > { %v2459_v61 = vsel %vm723_vm11, %v719_v35, inf }
 0x1a3   : > { %v2462_v10 = vpop.xlane.xlu0 %511 }
 0x1a4   : > { %2997 = vst [vmem:[#allocation64_spill] sm:$0xff] %v2462_v10  ;;  %vm513_vm12 = vcmp.eq.f32.partialorder %v2278_v52, %v2462_v10 }
 0x1a5   : > { %v2466_v55 = vsel %vm513_vm12, %v509_v18, inf  ;;  %v1005_v18 = vpop.permute.xlu1 %1004 }
 0x1a7   : > { %v2469_v47 = vpop.xlane.xlu0 %526 }
 0x1a8   : > { %2998 = vst [vmem:[#allocation65_spill] sm:$0xff] %v2469_v47  ;;  %vm528_vm13 = vcmp.eq.f32.partialorder %v2291_v51, %v2469_v47 }
 0x1a9   : > { %v2473_v53 = vsel %vm528_vm13, %v524_v28, inf }
 0x1ab   : > { %v2476_v60 = vpop.xlane.xlu0 %541 }
 0x1ac   : > { %2999 = vst [vmem:[#allocation66_spill] sm:$0xff] %v2476_v60  ;;  %vm543_vm14 = vcmp.eq.f32.partialorder %v2303_v19, %v2476_v60  ;;  %v779_v60 = vcvt.s32.f32 %v777_v50 }
 0x1ad   : > { %v2480_v52 = vsel %vm543_vm14, %v539_v26, inf }
 0x1af   : > { %v2483_v35 = vpop.xlane.xlu0 %556 }
 0x1b0   : > { %3000 = vst [vmem:[#allocation67_spill] sm:$0xff] %v2483_v35  ;;  %vm558_vm15 = vcmp.eq.f32.partialorder %v2317_v58, %v2483_v35  ;;  %v1016_v58 = vpop.permute.xlu1 %1015 }
 0x1b1   : > { %v2487_v51 = vsel %vm558_vm15, %v554_v45, inf }
 0x1b3   : > { %v2490_v28 = vpop.xlane.xlu0 %736 }
 0x1b4   : > { %vm738_vm1 = vcmp.eq.f32.partialorder %v2322_v37, %v2490_v28  ;;  %v1024_v31 = vpop.permute.xlu1 %1023 }
 0x1b5   : > { %v2494_v19 = vsel %vm738_vm1, %v734_v33, inf  ;;  %v792_v33 = vand.u32 65535, %v2344_v11 }
 0x1b7   : > { %v2497_v26 = vpop.xlane.xlu0 %751 }
 0x1b8   : > { %3001 = vst [vmem:[#allocation68_spill] sm:$0xff] %v2497_v26  ;;  %vm753_vm2 = vcmp.eq.f32.partialorder %v2332_v7, %v2497_v26  ;;  %v1174_v26 = vadd.f32 %v1005_v18, %v1981_v57 }
 0x1b9   : > { %v2501_v45 = vsel %vm753_vm2, %v749_v63, inf  ;;  %v794_v63 = vcvt.s32.f32 %v792_v33  ;;  %v1176_v33 = vadd.f32 %v1016_v58, %v2000_v13 }
 0x1bb   : > { %v2504_v35 = vpop.xlane.xlu0 %766 }
 0x1bc   : > { %3002 = vst [vmem:[#allocation69_spill] sm:$0xff] %v2504_v35  ;;  %vm768_vm3 = vcmp.eq.f32.partialorder %v2340_v9, %v2504_v35  ;;  %v1035_v9 = vpop.permute.xlu1 %1034 }
 0x1bd   : > { %v2508_v37 = vsel %vm768_vm3, %v764_v59, inf }
 0x1bf   : > { %v2511_v22 = vpop.xlane.xlu0 %781 }
 0x1c0   : > { %3003 = vst [vmem:[#allocation70_spill] sm:$0xff] %v2511_v22  ;;  %vm783_vm4 = vcmp.eq.f32.partialorder %v2347_v54, %v2511_v22  ;;  %v1043_v35 = vpop.permute.xlu1 %1042 }
 0x1c1   : > { %v2515_v7 = vsel %vm783_vm4, %v779_v60, inf }
 0x1c3   : > { %v2517_v62 = vpop.xlane.xlu0 %796 }
 0x1c4   : > { %3004 = vst [vmem:[#allocation71_spill] sm:$0xff] %v2517_v62  ;;  %vm798_vm5 = vcmp.eq.f32.partialorder %v2351_v3, %v2517_v62  ;;  %v1054_v62 = vpop.permute.xlu1 %1053 }
 0x1c5   : > { %v2521_v38 = vsel %vm798_vm5, %v794_v63, inf  ;;  %vm816_vm5 = vcmask 130112  }
 0x1c7   : > { %v993_v59 = vpop.permute.xlu0 %992 }
 0x1c8   : > { %v1171_v11 = vadd.f32 %v993_v59, %v1969_v46  ;;  %v1178_v46 = vadd.f32 %v1024_v31, %v2012_v39  ;;  %v1062_v57 = vpop.permute.xlu1 %1061 }
 0x1ca   : > { %1240 = vperm.xlu0 %1630, %v1171_v11  }
 0x1cb   : > { %v1012_v50 = vpop.permute.xlu0 %1011 }
 0x1cc   : > { %v1175_v54 = vadd.f32 %v1012_v50, %v2002_v24  ;;  %v1180_v24 = vadd.f32 %v1035_v9, %v2020_v20  ;;  %v1073_v11 = vpop.permute.xlu1 %1072  ;;  %v3005_v50 = vld [vmem:[#allocation19_spill] sm:$0xff] }
 0x1ce   : > { %1249 = vperm.xlu0 %1630, %v1174_v26   ;;  %1252 = vperm.xlu1 %1631, %v1175_v54  }
 0x1cf   : > { %v1020_v60 = vpop.permute.xlu0 %1019 }
 0x1d0   : > { %v1177_v3 = vadd.f32 %v1020_v60, %v2014_v49  ;;  %v1182_v49 = vadd.f32 %v1043_v35, %v2027_v16  ;;  %v1081_v20 = vpop.permute.xlu1 %1080  ;;  %v3007_v60 = vld [vmem:[#allocation23_spill] sm:$0xff] }
 0x1d2   : > { %1255 = vperm.xlu0 %1630, %v1176_v33   ;;  %1258 = vperm.xlu1 %1631, %v1177_v3  }
 0x1d3   : > { %v1031_v63 = vpop.permute.xlu0 %1030 }
 0x1d4   : > { %v1179_v59 = vadd.f32 %v1031_v63, %v2022_v0  ;;  %v1184_v0 = vadd.f32 %v1054_v62, %v2032_v2  ;;  %v1092_v3 = vpop.permute.xlu1 %1091  ;;  %v3009_v63 = vld [vmem:[#allocation46_spill] sm:$0xff] }
 0x1d6   : > { %1261 = vperm.xlu0 %1630, %v1178_v46   ;;  %1264 = vperm.xlu1 %1631, %v1179_v59  }
 0x1d7   : > { %v1039_v18 = vpop.permute.xlu0 %1038 }
 0x1d8   : > { %v1181_v26 = vadd.f32 %v1039_v18, %v2029_v1  ;;  %v1188_v1 = vadd.f32 %v1073_v11, %v2040_v8  ;;  %v1100_v8 = vpop.permute.xlu1 %1099  ;;  %v3010_v18 = vld [vmem:[#allocation22_spill] sm:$0xff]  ;;  %v3012_v11 = vld [vmem:[#allocation29_spill] sm:$0xff] }
 0x1da   : > { %1267 = vperm.xlu0 %1630, %v1180_v24   ;;  %1270 = vperm.xlu1 %1631, %v1181_v26   ;;  %v1190_v24 = vadd.f32 %v1081_v20, %v3010_v18  ;;  %v3014_v20 = vld [vmem:[#allocation35_spill] sm:$0xff] }
 0x1db   : > { %v1050_v13 = vpop.permute.xlu0 %1049 }
 0x1dc   : > { %v1183_v58 = vadd.f32 %v1050_v13, %v2034_v27  ;;  %v3006_v27 = vld [vmem:[#allocation18_spill] sm:$0xff] }
 0x1dd   : > { %v1186_v35 = vadd.f32 %v1062_v57, %v3006_v27  ;;  %v3011_v57 = vld [vmem:[#allocation50_spill] sm:$0xff]  ;;  %v3015_v27 = vld [vmem:[#allocation41_spill] sm:$0xff] }
 0x1de   : > { %1273 = vperm.xlu0 %1630, %v1182_v49   ;;  %1276 = vperm.xlu1 %1631, %v1183_v58   ;;  %v2546_v49 = vpop.permute.xlu1 %1110 }
 0x1df   : > { %v1058_v39 = vpop.permute.xlu0 %1057 }
 0x1e0   : > { %v1185_v31 = vadd.f32 %v1058_v39, %v2038_v4  ;;  %v3008_v4 = vld [vmem:[#allocation26_spill] sm:$0xff]  ;;  %v1194_v39 = vadd.f32 %v1100_v8, %v3012_v11  ;;  %v3023_v11 = vld [vmem:[#allocation16_spill] sm:$0xff] }
 0x1e1   : > { %v1192_v62 = vadd.f32 %v1092_v3, %v3008_v4  ;;  %v3017_v3 = vld [vmem:[#allocation54_spill] sm:$0xff] }
 0x1e2   : > { %1279 = vperm.xlu0 %1630, %v1184_v0   ;;  %1282 = vperm.xlu1 %1631, %v1185_v31   ;;  %v1119_v0 = vpop.permute.xlu1 %1118  ;;  %v3020_v8 = vld [vmem:[#allocation14_spill] sm:$0xff] }
 0x1e3   : > { %v1069_v9 = vpop.permute.xlu0 %1068  ;;  %vm348_vm7 = vcmp.eq.f32.partialorder %v3020_v8, %v2356_v56 }
 0x1e4   : > { %v1187_v54 = vadd.f32 %v1069_v9, %v3005_v50  ;;  %v3013_v9 = vld [vmem:[#allocation52_spill] sm:$0xff] }
 0x1e6   : > { %1291 = vperm.xlu1 %1631, %v1188_v1   ;;  %1288 = vperm.xlu0 %1630, %v1187_v54   ;;  %v2552_v50 = vpop.permute.xlu1 %1129  ;;  %v1198_v54 = vadd.f32 %v1119_v0, %v3014_v20  ;;  %v3024_v0 = vld [vmem:[#allocation15_spill] sm:$0xff] }
 0x1e7   : > { %v1077_v16 = vpop.permute.xlu0 %1076 }
 0x1e8   : > { %v1189_v33 = vadd.f32 %v1077_v16, %v3007_v60  ;;  %v3016_v60 = vld [vmem:[#allocation10_spill] sm:$0xff] }
 0x1ea   : > { %1285 = vperm.xlu0 %1630, %v1186_v35   ;;  %1294 = vperm.xlu1 %1631, %v1189_v33   ;;  %v1138_v16 = vpop.permute.xlu1 %1137  ;;  %v327_v33 = vand.u32 65535, %v3016_v60  ;;  %v3028_v60 = vld [vmem:[#allocation24_spill] sm:$0xff] }
 0x1eb   : > { %v1088_v2 = vpop.permute.xlu0 %1087  ;;  %v1202_v35 = vadd.f32 %v1138_v16, %v3015_v27 }
 0x1ec   : > { %v1191_v46 = vadd.f32 %v1088_v2, %v3009_v63  ;;  %v3018_v2 = vld [vmem:[#allocation11_spill] sm:$0xff]  ;;  %v329_v4 = vcvt.s32.f32 %v327_v33  ;;  %v3029_v33 = vld [vmem:[#allocation21_spill] sm:$0xff] }
 0x1ed   : > { %vm333_vm6 = vcmp.eq.f32.partialorder %v3018_v2, %v3017_v3  ;;  %v582_v2 = vand.u32 65535, %v3029_v33  ;;  %v3039_v33 = vld [vmem:[#allocation34_spill] sm:$0xff] }
 0x1ee   : > { %1303 = vperm.xlu1 %1631, %v1192_v62   ;;  %1300 = vperm.xlu0 %1630, %v1191_v46   ;;  %v3019_v62 = vld [vmem:[#allocation12_spill] sm:$0xff]  ;;  %v334_v46 = vsel %vm333_vm6, %v329_v4, inf  ;;  %vm823_vm6 = vcmask 195712  }
 0x1ef   : > { %v2542_v59 = vpop.permute.xlu0 %1095  ;;  %v342_v63 = vand.u32 65535, %v3019_v62 }
 0x1f1   : > { %v344_v18 = vcvt.s32.f32 %v342_v63  ;;  %v3030_v63 = vld [vmem:[#allocation27_spill] sm:$0xff] }
 0x1f2   : > { %1297 = vperm.xlu0 %1630, %v1190_v24   ;;  %v3021_v24 = vld [vmem:[#allocation13_spill] sm:$0xff]  ;;  %vm588_vm11 = vcmp.eq.f32.partialorder %v3030_v63, %v2368_v48  ;;  %v3040_v63 = vld [vmem:[#allocation59_spill] sm:$0xff] }
 0x1f3   : > { %v1107_v26 = vpop.permute.xlu0 %1106 }
 0x1f4   : > { %v1195_v13 = vadd.f32 %v1107_v26, %v3011_v57  ;;  %v357_v26 = vand.u32 65535, %v3021_v24  ;;  %v349_v57 = vsel %vm348_vm7, %v344_v18, inf  ;;  %v584_v18 = vcvt.s32.f32 %v582_v2 }
 0x1f5   : > { %v402_v2 = vand.u32 65535, %v3039_v33  ;;  %vm830_vm7 = vcmask 261312  }
 0x1f6   : > { %1312 = vperm.xlu0 %1630, %v1195_v13   ;;  %v3022_v13 = vld [vmem:[#allocation55_spill] sm:$0xff]  ;;  %v589_v24 = vsel %vm588_vm11, %v584_v18, inf  ;;  %vm971_vm11 = vcmask 1044484  }
 0x1f7   : > { %v2548_v58 = vpop.permute.xlu0 %1114  ;;  %vm363_vm8 = vcmp.eq.f32.partialorder %v3023_v11, %v3022_v13  ;;  %v3034_v11 = vld [vmem:[#allocation28_spill] sm:$0xff] }
 0x1fa   : > { %1309 = vperm.xlu0 %1630, %v1194_v39   ;;  %v359_v39 = vcvt.s32.f32 %v357_v26  ;;  %v3032_v26 = vld [vmem:[#allocation57_spill] sm:$0xff] }
 0x1fb   : > { %v1126_v31 = vpop.permute.xlu0 %1125 }
 0x1fc   : > { %v1199_v1 = vadd.f32 %v1126_v31, %v3013_v9  ;;  %v372_v31 = vand.u32 65535, %v3024_v0  ;;  %v364_v9 = vsel %vm363_vm8, %v359_v39, inf  ;;  %v612_v39 = vand.u32 65535, %v3034_v11  ;;  %v3043_v11 = vld [vmem:[#allocation60_spill] sm:$0xff] }
 0x1fd   : > { %vm965_vm8 = vcmask 1041409  }
 0x1fe   : > { %1324 = vperm.xlu0 %1630, %v1199_v1   ;;  %v3025_v1 = vld [vmem:[#allocation17_spill] sm:$0xff]  ;;  %v374_v20 = vcvt.s32.f32 %v372_v31 }
 0x1ff   : > { %vm378_vm9 = vcmp.eq.f32.partialorder %v3025_v1, %v2362_v23  ;;  %v3036_v1 = vld [vmem:[#allocation31_spill] sm:$0xff] }
 0x200   : > { %v379_v27 = vsel %vm378_vm9, %v374_v20, inf  ;;  %v387_v20 = vand.u32 65535, %v3036_v1  ;;  %vm967_vm9 = vcmask 1042434  }
 0x202   : > { %1321 = vperm.xlu0 %1630, %v1198_v54   ;;  %v3026_v54 = vld [vmem:[#allocation20_spill] sm:$0xff] }
 0x203   : > { %v567_v16 = vand.u32 65535, %v3026_v54  ;;  %v614_v54 = vcvt.s32.f32 %v612_v39  ;;  %v3044_v39 = vld [vmem:[#allocation42_spill] sm:$0xff] }
 0x204   : > { %vm423_vm1 = vcmp.eq.f32.partialorder %v3044_v39, %v3043_v11  ;;  %v1244_v39 = vpop.permute.xlu1 %1243 }
 0x205   : > { %v569_v4 = vcvt.s32.f32 %v567_v16 }
 0x206   : > { %1333 = vperm.xlu0 %1630, %v1202_v35   ;;  %v3027_v35 = vld [vmem:[#allocation56_spill] sm:$0xff] }
 0x207   : > { %vm573_vm10 = vcmp.eq.f32.partialorder %v3028_v60, %v3027_v35  ;;  %v3038_v60 = vld [vmem:[#allocation36_spill] sm:$0xff] }
 0x208   : > { %v574_v62 = vsel %vm573_vm10, %v569_v4, inf  ;;  %v389_v4 = vcvt.s32.f32 %v387_v20  ;;  %v3047_v20 = vld [vmem:[#allocation44_spill] sm:$0xff]  ;;  %vm969_vm10 = vcmask 1043459  }
 0x212   : > { %335 = vmin.xlane.f32.xlu1 %v334_v46  ;;  %v3031_v46 = vld [vmem:[#allocation25_spill] sm:$0xff] }
 0x213   : > { %v597_v8 = vand.u32 65535, %v3031_v46  ;;  %v3041_v46 = vld [vmem:[#allocation39_spill] sm:$0xff] }
 0x214   : > { %vm408_vm15 = vcmp.eq.f32.partialorder %v3041_v46, %v3040_v63  ;;  %v3051_v46 = vld [vmem:[#allocation45_spill] sm:$0xff] }
 0x215   : > { %v599_v0 = vcvt.s32.f32 %v597_v8  ;;  %v3042_v8 = vld [vmem:[#allocation37_spill] sm:$0xff] }
 0x216   : > { %350 = vmin.xlane.f32.xlu1 %v349_v57  ;;  %v3033_v57 = vld [vmem:[#allocation30_spill] sm:$0xff]  ;;  %v417_v18 = vand.u32 65535, %v3042_v8  ;;  %v462_v8 = vand.u32 65535, %v3051_v46 }
 0x217   : > { %vm603_vm12 = vcmp.eq.f32.partialorder %v3033_v57, %v3032_v26 }
 0x218   : > { %v604_v31 = vsel %vm603_vm12, %v599_v0, inf  ;;  %v3045_v0 = vld [vmem:[#allocation40_spill] sm:$0xff]  ;;  %vm973_vm12 = vcmask 1045509  }
 0x21a   : > { %365 = vmin.xlane.f32.xlu1 %v364_v9  ;;  %v3035_v9 = vld [vmem:[#allocation33_spill] sm:$0xff] }
 0x21b   : > { %vm618_vm13 = vcmp.eq.f32.partialorder %v3035_v9, %v2374_v6  ;;  %v419_v9 = vcvt.s32.f32 %v417_v18  ;;  %v3052_v18 = vld [vmem:[#allocation48_spill] sm:$0xff] }
 0x21c   : > { %v619_v16 = vsel %vm618_vm13, %v614_v54, inf  ;;  %v3046_v54 = vld [vmem:[#allocation61_spill] sm:$0xff]  ;;  %vm468_vm4 = vcmp.eq.f32.partialorder %v3052_v18, %v2393_v32  ;;  %vm975_vm13 = vcmask 1046534  }
 0x21d   : > { %v424_v1 = vsel %vm423_vm1, %v419_v9, inf  ;;  %vm438_vm2 = vcmp.eq.f32.partialorder %v3047_v20, %v3046_v54  ;;  %v2598_v9 = vpop.permute.xlu0 %1133 }
 0x21e   : > { %380 = vmin.xlane.f32.xlu1 %v379_v27  ;;  %v3037_v27 = vld [vmem:[#allocation58_spill] sm:$0xff] }
 0x21f   : > { %vm393_vm14 = vcmp.eq.f32.partialorder %v3038_v60, %v3037_v27 }
 0x222   : > { %575 = vmin.xlane.f32.xlu1 %v574_v62  ;;  %v394_v62 = vsel %vm393_vm14, %v389_v4, inf  ;;  %vm977_vm14 = vcmask 1047559  }
 0x226   : > { %590 = vmin.xlane.f32.xlu1 %v589_v24  ;;  %v404_v24 = vcvt.s32.f32 %v402_v2  ;;  %v3050_v2 = vld [vmem:[#allocation47_spill] sm:$0xff] }
 0x228   : > { %v409_v57 = vsel %vm408_vm15, %v404_v24, inf }
 0x22a   : > { %605 = vmin.xlane.f32.xlu1 %v604_v31  ;;  %v432_v31 = vand.u32 65535, %v3045_v0  ;;  %v464_v0 = vcvt.s32.f32 %v462_v8 }
 0x22c   : > { %v434_v33 = vcvt.s32.f32 %v432_v31  ;;  %v1247_v31 = vpop.permute.xlu1 %1246 }
 0x22e   : > { %620 = vmin.xlane.f32.xlu1 %v619_v16  ;;  %v3048_v16 = vld [vmem:[#allocation43_spill] sm:$0xff]  ;;  %v439_v4 = vsel %vm438_vm2, %v434_v33, inf }
 0x22f   : > { %v447_v60 = vand.u32 65535, %v3048_v16  ;;  %v3053_v16 = vld [vmem:[#allocation7_spill] sm:$0xff] }
 0x230   : > { %v811_v33 = vadd.s32 4294967288, %v3053_v16  ;;  %v825_v46 = vadd.s32 4294967272, %v3053_v16 }
 0x231   : > { %v449_v24 = vcvt.s32.f32 %v447_v60  ;;  %v3054_v60 = vld [vmem:[#allocation9_spill] sm:$0xff] }
 0x232   : > { %395 = vmin.xlane.f32.xlu1 %v394_v62  ;;  %v3049_v62 = vld [vmem:[#allocation62_spill] sm:$0xff] }
 0x233   : > { %vm453_vm3 = vcmp.eq.f32.partialorder %v3050_v2, %v3049_v62  ;;  %v2605_v2 = vsub.s32 %v3053_v16, %v3054_v60 }
 0x236   : > { %410 = vmin.xlane.f32.xlu1 %v409_v57  ;;  %v454_v57 = vsel %vm453_vm3, %v449_v24, inf }
 0x23a   : > { %425 = vmin.xlane.f32.xlu1 %v424_v1  ;;  %v469_v1 = vsel %vm468_vm4, %v464_v0, inf  ;;  %v2617_v0 = vsub.s32 %v825_v46, %v3054_v60 }
 0x23e   : > { %440 = vmin.xlane.f32.xlu1 %v439_v4  ;;  %v818_v4 = vadd.s32 4294967280, %v3053_v16 }
 0x240   : > { %v2613_v18 = vsub.s32 %v818_v4, %v3054_v60 }
 0x242   : > { %455 = vmin.xlane.f32.xlu1 %v454_v57  ;;  %v2609_v57 = vsub.s32 %v811_v33, %v3054_v60  ;;  %v1347_v60 = vrot.slane %v1247_v31, %v2613_v18 }
 0x244   : > { %v1342_v16 = vrot.slane %v1244_v39, %v2609_v57 }
 0x246   : > { %470 = vmin.xlane.f32.xlu1 %v469_v1 }
 0x249   : > { %v1241_v20 = vpop.permute.xlu0 %1240 }
 0x24a   : > { %485 = vmin.xlane.f32.xlu1 %v2402_v29  ;;  %v1338_v29 = vrot.slane %v1241_v20, %v2605_v2 }
 0x24d   : > { %v1253_v24 = vpop.permute.xlu1 %1252  ;;  %v1250_v8 = vpop.permute.xlu0 %1249 }
 0x24e   : > { %500 = vmin.xlane.f32.xlu1 %v2410_v34  ;;  %v1357_v47 = vrot.slane %v1253_v24, %v2605_v2  ;;  %v1343_v34 = vsel %vm816_vm5, %v1342_v16, %v1338_v29  ;;  %v1352_v20 = vrot.slane %v1250_v8, %v2617_v0 }
 0x251   : > { %v1259_v1 = vpop.permute.xlu1 %1258  ;;  %v1256_v22 = vpop.permute.xlu0 %1255 }
 0x252   : > { %v1366_v33 = vrot.slane %v1259_v1, %v2613_v18  ;;  %v1361_v10 = vrot.slane %v1256_v22, %v2609_v57  ;;  %635 = vmin.xlane.f32.xlu1 %v2417_v30  ;;  %v1348_v30 = vsel %vm823_vm6, %v1347_v60, %v1343_v34 }
 0x253   : > { %v1353_v22 = vsel %vm830_vm7, %v1352_v20, %v1348_v30 }
 0x254   : > { %v1362_v4 = vsel %vm816_vm5, %v1361_v10, %v1357_v47 }
 0x255   : > { %v1265_v46 = vpop.permute.xlu1 %1264  ;;  %v1367_v39 = vsel %vm823_vm6, %v1366_v33, %v1362_v4  ;;  %v1262_v24 = vpop.permute.xlu0 %1261 }
 0x256   : > { %v1371_v1 = vrot.slane %v1262_v24, %v2617_v0  ;;  %650 = vmin.xlane.f32.xlu1 %v2424_v40  ;;  %v1376_v29 = vrot.slane %v1265_v46, %v2605_v2 }
 0x258   : > { %v1372_v8 = vsel %vm830_vm7, %v1371_v1, %v1367_v39 }
 0x259   : > { %v1487_v10 = vsel %vm965_vm8, %v1372_v8, %v1353_v22  ;;  %v1271_v47 = vpop.permute.xlu1 %1270  ;;  %v1268_v31 = vpop.permute.xlu0 %1267 }
 0x25a   : > { %v1385_v16 = vrot.slane %v1271_v47, %v2613_v18  ;;  %v1380_v33 = vrot.slane %v1268_v31, %v2609_v57  ;;  %665 = vmin.xlane.f32.xlu1 %v2431_v44 }
 0x25c   : > { %v1381_v40 = vsel %vm816_vm5, %v1380_v33, %v1376_v29 }
 0x25d   : > { %v1277_v4 = vpop.permute.xlu1 %1276  ;;  %v1386_v34 = vsel %vm823_vm6, %v1385_v16, %v1381_v40  ;;  %v1274_v20 = vpop.permute.xlu0 %1273 }
 0x25e   : > { %v1390_v60 = vrot.slane %v1274_v20, %v2617_v0  ;;  %680 = vmin.xlane.f32.xlu1 %v2438_v42  ;;  %v1395_v30 = vrot.slane %v1277_v4, %v2605_v2 }
 0x260   : > { %v1391_v39 = vsel %vm830_vm7, %v1390_v60, %v1386_v34 }
 0x261   : > { %v1488_v46 = vsel %vm967_vm9, %v1391_v39, %v1487_v10  ;;  %v1283_v24 = vpop.permute.xlu1 %1282  ;;  %v1280_v1 = vpop.permute.xlu0 %1279 }
 0x262   : > { %v1404_v44 = vrot.slane %v1283_v24, %v2613_v18  ;;  %v1399_v22 = vrot.slane %v1280_v1, %v2609_v57  ;;  %695 = vmin.xlane.f32.xlu1 %v2445_v43 }
 0x264   : > { %v1400_v8 = vsel %vm816_vm5, %v1399_v22, %v1395_v30  ;;  %v338_v30 = vcvt.f32.s32 %v3017_v3 }
 0x265   : > { %v1292_v47 = vpop.permute.xlu1 %1291  ;;  %v1289_v31 = vpop.permute.xlu0 %1288  ;;  %v1405_v42 = vsel %vm823_vm6, %v1404_v44, %v1400_v8  ;;  %v3056_v44 = vld [vmem:[#allocation32_spill] sm:$0xff] }
 0x266   : > { %710 = vmin.xlane.f32.xlu1 %v2452_v12  ;;  %v1418_v10 = vrot.slane %v1292_v47, %v2609_v57  ;;  %v1414_v29 = vrot.slane %v1289_v31, %v2605_v2  ;;  %v3057_v31 = vld [vmem:[#allocation51_spill] sm:$0xff] }
 0x268   : > { %v1419_v43 = vsel %vm816_vm5, %v1418_v10, %v1414_v29 }
 0x269   : > { %v1295_v16 = vpop.permute.xlu1 %1294  ;;  %v1286_v33 = vpop.permute.xlu0 %1285 }
 0x26a   : > { %v1423_v40 = vrot.slane %v1295_v16, %v2613_v18  ;;  %v1409_v4 = vrot.slane %v1286_v33, %v2617_v0  ;;  %725 = vmin.xlane.f32.xlu1 %v2459_v61 }
 0x26c   : > { %v1424_v34 = vsel %vm823_vm6, %v1423_v40, %v1419_v43  ;;  %v1410_v20 = vsel %vm830_vm7, %v1409_v4, %v1405_v42 }
 0x26d   : > { %v1489_v12 = vsel %vm969_vm10, %v1410_v20, %v1488_v46  ;;  %v2661_v60 = vpop.permute.xlu0 %1300 }
 0x26e   : > { %740 = vmin.xlane.f32.xlu1 %v2494_v19  ;;  %v3055_v19 = vld [vmem:[#allocation49_spill] sm:$0xff] }
 0x26f   : > { %v1193_v46 = vadd.f32 %v2542_v59, %v3055_v19  ;;  %v1197_v59 = vadd.f32 %v2548_v58, %v3057_v31 }
 0x271   : > { %v1298_v39 = vpop.permute.xlu0 %1297 }
 0x272   : > { %v1428_v24 = vrot.slane %v1298_v39, %v2617_v0  ;;  %515 = vmin.xlane.f32.xlu1 %v2466_v55  ;;  %v2677_v55 = vpop.permute.xlu1 %1303  ;;  %v578_v39 = vcvt.f32.s32 %v3027_v35 }
 0x274   : > { %v1429_v61 = vsel %vm830_vm7, %v1428_v24, %v1424_v34 }
 0x275   : > { %v2668_v1 = vsel %vm971_vm11, %v1429_v61, %v1489_v12  ;;  %v3059_v12 = vld [vmem:[#allocation53_spill] sm:$0xff] }
 0x276   : > { %530 = vmin.xlane.f32.xlu1 %v2473_v53 }
 0x27a   : > { %545 = vmin.xlane.f32.xlu1 %v2480_v52  ;;  %v353_v52 = vcvt.f32.s32 %v2356_v56  ;;  %v383_v56 = vcvt.f32.s32 %v2362_v23  ;;  %v1201_v23 = vadd.f32 %v2598_v9, %v3059_v12 }
 0x27c   : > { %v384_v58 = vshll.u32 %v383_v56, 16  ;;  %v398_v56 = vcvt.f32.s32 %v3037_v27 }
 0x27e   : > { %560 = vmin.xlane.f32.xlu1 %v2487_v51 }
 0x282   : > { %755 = vmin.xlane.f32.xlu1 %v2501_v45  ;;  %v1196_v45 = vadd.f32 %v2546_v49, %v3056_v44 }
 0x286   : > { %770 = vmin.xlane.f32.xlu1 %v2508_v37  ;;  %v339_v37 = vshll.u32 %v338_v30, 16 }
 0x28a   : > { %785 = vmin.xlane.f32.xlu1 %v2515_v7  ;;  %v368_v7 = vcvt.f32.s32 %v3022_v13  ;;  %v3058_v13 = vld [vmem:[#allocation38_spill] sm:$0xff] }
 0x28b   : > { %v1200_v33 = vadd.f32 %v2552_v50, %v3058_v13  ;;  %v593_v50 = vcvt.f32.s32 %v2368_v48 }
 0x28c   : > { %v369_v42 = vshll.u32 %v368_v7, 16 }
 0x28e   : > { %800 = vmin.xlane.f32.xlu1 %v2521_v38  ;;  %v354_v38 = vshll.u32 %v353_v52, 16 }
 0x29f   : > { %v336_v53 = vpop.xlane.xlu1 %335  ;;  %1306 = vperm.xlu1 %1631, %v1193_v46  }
 0x2a0   : > { %v337_v51 = vcvt.f32.s32 %v336_v53  ;;  %v579_v53 = vshll.u32 %v578_v39, 16 }
 0x2a2   : > { %v340_v8 = vadd.s32 %v339_v37, %v337_v51  ;;  %v608_v51 = vcvt.f32.s32 %v3032_v26 }
 0x2a3   : > { %v351_v22 = vpop.xlane.xlu1 %350  ;;  %1315 = vperm.xlu1 %1631, %v1196_v45   ;;  %v594_v45 = vshll.u32 %v593_v50, 16 }
 0x2a4   : > { %v352_v47 = vcvt.f32.s32 %v351_v22  ;;  %v810_v29 = vrot.slane %v340_v8, %v2605_v2  ;;  %v609_v7 = vshll.u32 %v608_v51, 16 }
 0x2a6   : > { %v355_v3 = vadd.s32 %v354_v38, %v352_v47  ;;  %v623_v38 = vcvt.f32.s32 %v2374_v6  ;;  %v413_v6 = vcvt.f32.s32 %v3040_v63 }
 0x2a7   : > { %v366_v10 = vpop.xlane.xlu1 %365  ;;  %1318 = vperm.xlu1 %1631, %v1197_v59  }
 0x2a8   : > { %v815_v49 = vrot.slane %v355_v3, %v2609_v57  ;;  %v367_v16 = vcvt.f32.s32 %v366_v10 }
 0x2aa   : > { %v817_v40 = vsel %vm816_vm5, %v815_v49, %v810_v29  ;;  %v370_v4 = vadd.s32 %v369_v42, %v367_v16  ;;  %v624_v42 = vshll.u32 %v623_v38, 16 }
 0x2ab   : > { %v381_v43 = vpop.xlane.xlu1 %380  ;;  %1327 = vperm.xlu1 %1631, %v1200_v33  }
 0x2ac   : > { %v822_v34 = vrot.slane %v370_v4, %v2613_v18  ;;  %v382_v20 = vcvt.f32.s32 %v381_v43  ;;  %v428_v43 = vcvt.f32.s32 %v3043_v11 }
 0x2ae   : > { %v824_v24 = vsel %vm823_vm6, %v822_v34, %v817_v40  ;;  %v385_v61 = vadd.s32 %v384_v58, %v382_v20  ;;  %v399_v40 = vshll.u32 %v398_v56, 16  ;;  %v414_v34 = vshll.u32 %v413_v6, 16 }
 0x2af   : > { %v576_v19 = vpop.xlane.xlu1 %575  ;;  %1330 = vperm.xlu1 %1631, %v1201_v23   ;;  %v429_v23 = vshll.u32 %v428_v43, 16  ;;  %v503_v56 = vcvt.f32.s32 %v2405_v15  ;;  %v638_v43 = vcvt.f32.s32 %v2413_v17  ;;  %v653_v15 = vcvt.f32.s32 %v2420_v25 }
 0x2b0   : > { %v829_v46 = vrot.slane %v385_v61, %v2617_v0  ;;  %v577_v30 = vcvt.f32.s32 %v576_v19  ;;  %v683_v25 = vcvt.f32.s32 %v2434_v21  ;;  %v713_v21 = vcvt.f32.s32 %v2448_v41 }
 0x2b2   : > { %v831_v52 = vsel %vm830_vm7, %v829_v46, %v824_v24  ;;  %v580_v9 = vadd.s32 %v579_v53, %v577_v30  ;;  %v443_v24 = vcvt.f32.s32 %v3046_v54  ;;  %v473_v54 = vcvt.f32.s32 %v2393_v32 }
 0x2b3   : > { %v591_v44 = vpop.xlane.xlu1 %590 }
 0x2b4   : > { %v592_v37 = vcvt.f32.s32 %v591_v44  ;;  %v892_v8 = vrot.slane %v580_v9, %v2605_v2  ;;  %v444_v53 = vshll.u32 %v443_v24, 16  ;;  %v458_v44 = vcvt.f32.s32 %v3049_v62 }
 0x2b5   : > { %v668_v24 = vcvt.f32.s32 %v2427_v36 }
 0x2b6   : > { %v595_v35 = vadd.s32 %v594_v45, %v592_v37 }
 0x2b7   : > { %v606_v22 = vpop.xlane.xlu1 %605 }
 0x2b8   : > { %v896_v48 = vrot.slane %v595_v35, %v2609_v57  ;;  %v607_v47 = vcvt.f32.s32 %v606_v22  ;;  %v459_v22 = vshll.u32 %v458_v44, 16 }
 0x2ba   : > { %v897_v31 = vsel %vm816_vm5, %v896_v48, %v892_v8  ;;  %v610_v59 = vadd.s32 %v609_v7, %v607_v47  ;;  %v3060_v8 = vld [vmem:[#allocation63_spill] sm:$0xff] }
 0x2bb   : > { %v621_v3 = vpop.xlane.xlu1 %620  ;;  %v488_v48 = vcvt.f32.s32 %v3060_v8 }
 0x2bc   : > { %v901_v26 = vrot.slane %v610_v59, %v2613_v18  ;;  %v622_v10 = vcvt.f32.s32 %v621_v3  ;;  %v474_v59 = vshll.u32 %v473_v54, 16 }
 0x2be   : > { %v902_v29 = vsel %vm823_vm6, %v901_v26, %v897_v31  ;;  %v625_v49 = vadd.s32 %v624_v42, %v622_v10  ;;  %v489_v26 = vshll.u32 %v488_v48, 16 }
 0x2bf   : > { %v396_v16 = vpop.xlane.xlu1 %395 }
 0x2c0   : > { %v906_v13 = vrot.slane %v625_v49, %v2617_v0  ;;  %v397_v33 = vcvt.f32.s32 %v396_v16 }
 0x2c2   : > { %v2713_v4 = vsel %vm830_vm7, %v906_v13, %v902_v29  ;;  %v400_v20 = vadd.s32 %v399_v40, %v397_v33  ;;  %v504_v33 = vshll.u32 %v503_v56, 16 }
 0x2c3   : > { %v411_v58 = vpop.xlane.xlu1 %410 }
 0x2c4   : > { %v412_v12 = vcvt.f32.s32 %v411_v58  ;;  %v835_v63 = vrot.slane %v400_v20, %v2605_v2 }
 0x2c6   : > { %v415_v27 = vadd.s32 %v414_v34, %v412_v12 }
 0x2c7   : > { %v426_v39 = vpop.xlane.xlu1 %425 }
 0x2c8   : > { %v839_v61 = vrot.slane %v415_v27, %v2609_v57  ;;  %v427_v19 = vcvt.f32.s32 %v426_v39 }
 0x2ca   : > { %v840_v50 = vsel %vm816_vm5, %v839_v61, %v835_v63  ;;  %v430_v46 = vadd.s32 %v429_v23, %v427_v19  ;;  %v639_v23 = vshll.u32 %v638_v43, 16  ;;  %v654_v19 = vshll.u32 %v653_v15, 16  ;;  %v3061_v43 = vld [vmem:[#allocation64_spill] sm:$0xff] }
 0x2cb   : > { %v441_v30 = vpop.xlane.xlu1 %440 }
 0x2cc   : > { %v844_v11 = vrot.slane %v430_v46, %v2613_v18  ;;  %v442_v51 = vcvt.f32.s32 %v441_v30  ;;  %v669_v30 = vshll.u32 %v668_v24, 16 }
 0x2ce   : > { %v845_v45 = vsel %vm823_vm6, %v844_v11, %v840_v50  ;;  %v445_v9 = vadd.s32 %v444_v53, %v442_v51 }
 0x2cf   : > { %v456_v37 = vpop.xlane.xlu1 %455 }
 0x2d0   : > { %v849_v35 = vrot.slane %v445_v9, %v2617_v0  ;;  %v457_v7 = vcvt.f32.s32 %v456_v37  ;;  %v684_v37 = vshll.u32 %v683_v25, 16 }
 0x2d2   : > { %v850_v38 = vsel %vm830_vm7, %v849_v35, %v845_v45  ;;  %v460_v3 = vadd.s32 %v459_v22, %v457_v7  ;;  %v698_v7 = vcvt.f32.s32 %v2441_v14 }
 0x2d3   : > { %v966_v47 = vsel %vm965_vm8, %v850_v38, %v831_v52  ;;  %v471_v31 = vpop.xlane.xlu1 %470 }
 0x2d4   : > { %v472_v62 = vcvt.f32.s32 %v471_v31  ;;  %v854_v32 = vrot.slane %v460_v3, %v2605_v2  ;;  %v699_v31 = vshll.u32 %v698_v7, 16  ;;  %v728_v3 = vcvt.f32.s32 %v2455_v5 }
 0x2d6   : > { %v475_v42 = vadd.s32 %v474_v59, %v472_v62  ;;  %v729_v56 = vshll.u32 %v728_v3, 16  ;;  %v3066_v3 = vld [vmem:[#allocation69_spill] sm:$0xff] }
 0x2d7   : > { %v486_v10 = vpop.xlane.xlu1 %485 }
 0x2d8   : > { %v858_v29 = vrot.slane %v475_v42, %v2609_v57  ;;  %v487_v49 = vcvt.f32.s32 %v486_v10  ;;  %v714_v42 = vshll.u32 %v713_v21, 16 }
 0x2da   : > { %v859_v16 = vsel %vm816_vm5, %v858_v29, %v854_v32  ;;  %v490_v6 = vadd.s32 %v489_v26, %v487_v49  ;;  %v743_v29 = vcvt.f32.s32 %v2490_v28  ;;  %v3062_v28 = vld [vmem:[#allocation65_spill] sm:$0xff] }
 0x2db   : > { %v501_v13 = vpop.xlane.xlu1 %500 }
 0x2dc   : > { %v863_v52 = vrot.slane %v490_v6, %v2613_v18  ;;  %v502_v40 = vcvt.f32.s32 %v501_v13 }
 0x2de   : > { %v864_v58 = vsel %vm823_vm6, %v863_v52, %v859_v16  ;;  %v505_v34 = vadd.s32 %v504_v33, %v502_v40  ;;  %v744_v52 = vshll.u32 %v743_v29, 16 }
 0x2df   : > { %v636_v20 = vpop.xlane.xlu1 %635 }
 0x2e0   : > { %v868_v12 = vrot.slane %v505_v34, %v2617_v0  ;;  %v637_v27 = vcvt.f32.s32 %v636_v20 }
 0x2e2   : > { %v869_v39 = vsel %vm830_vm7, %v868_v12, %v864_v58  ;;  %v640_v17 = vadd.s32 %v639_v23, %v637_v27  ;;  %v518_v58 = vcvt.f32.s32 %v3061_v43  ;;  %v533_v12 = vcvt.f32.s32 %v3062_v28 }
 0x2e3   : > { %v2740_v63 = vsel %vm967_vm9, %v869_v39, %v966_v47  ;;  %v651_v61 = vpop.xlane.xlu1 %650 }
 0x2e4   : > { %v652_v50 = vcvt.f32.s32 %v651_v61  ;;  %v911_v11 = vrot.slane %v640_v17, %v2605_v2  ;;  %v519_v39 = vshll.u32 %v518_v58, 16  ;;  %v3063_v61 = vld [vmem:[#allocation66_spill] sm:$0xff] }
 0x2e6   : > { %v655_v46 = vadd.s32 %v654_v19, %v652_v50  ;;  %v548_v19 = vcvt.f32.s32 %v3063_v61  ;;  %v534_v50 = vshll.u32 %v533_v12, 16 }
 0x2e7   : > { %v666_v53 = vpop.xlane.xlu1 %665 }
 0x2e8   : > { %v915_v51 = vrot.slane %v655_v46, %v2609_v57  ;;  %v667_v44 = vcvt.f32.s32 %v666_v53  ;;  %v549_v25 = vshll.u32 %v548_v19, 16  ;;  %v1433_v19 = vrot.slane %v2661_v60, %v2605_v2 }
 0x2ea   : > { %v916_v45 = vsel %vm816_vm5, %v915_v51, %v911_v11  ;;  %v670_v36 = vadd.s32 %v669_v30, %v667_v44  ;;  %v3064_v51 = vld [vmem:[#allocation67_spill] sm:$0xff] }
 0x2eb   : > { %v681_v9 = vpop.xlane.xlu1 %680  ;;  %v563_v44 = vcvt.f32.s32 %v3064_v51 }
 0x2ec   : > { %v920_v54 = vrot.slane %v670_v36, %v2613_v18  ;;  %v682_v35 = vcvt.f32.s32 %v681_v9 }
 0x2ed   : > { %v564_v7 = vshll.u32 %v563_v44, 16 }
 0x2ee   : > { %v921_v22 = vsel %vm823_vm6, %v920_v54, %v916_v45  ;;  %v685_v38 = vadd.s32 %v684_v37, %v682_v35 }
 0x2ef   : > { %v696_v8 = vpop.xlane.xlu1 %695 }
 0x2f0   : > { %v925_v48 = vrot.slane %v685_v38, %v2617_v0  ;;  %v697_v47 = vcvt.f32.s32 %v696_v8  ;;  %v3065_v8 = vld [vmem:[#allocation68_spill] sm:$0xff] }
 0x2f1   : > { %v758_v21 = vcvt.f32.s32 %v3065_v8 }
 0x2f2   : > { %v2752_v59 = vsel %vm830_vm7, %v925_v48, %v921_v22  ;;  %v700_v26 = vadd.s32 %v699_v31, %v697_v47 }
 0x2f3   : > { %v711_v62 = vpop.xlane.xlu1 %710 }
 0x2f4   : > { %v712_v10 = vcvt.f32.s32 %v711_v62  ;;  %v930_v41 = vrot.slane %v700_v26, %v2605_v2  ;;  %v773_v62 = vcvt.f32.s32 %v3066_v3  ;;  %v1205_v3 = vld [vmem:[%s1204_s13] sm:$0xff] }
 0x2f5   : > { %vm1206_vm15 = vcmp.gt.f32.partialorder %v1205_v3, 0.0 }
 0x2f6   : > { %v715_v14 = vadd.s32 %v714_v42, %v712_v10  ;;  %v759_v10 = vshll.u32 %v758_v21, 16 }
 0x2f7   : > { %v726_v32 = vpop.xlane.xlu1 %725 }
 0x2f8   : > { %v934_v49 = vrot.slane %v715_v14, %v2609_v57  ;;  %v727_v16 = vcvt.f32.s32 %v726_v32 }
 0x2fa   : > { %v935_v6 = vsel %vm816_vm5, %v934_v49, %v930_v41  ;;  %v730_v13 = vadd.s32 %v729_v56, %v727_v16  ;;  %v3067_v56 = vld [vmem:[#allocation70_spill] sm:$0xff]  ;;  %v774_v49 = vshll.u32 %v773_v62, 16 }
 0x2fb   : > { %v741_v33 = vpop.xlane.xlu1 %740  ;;  %v788_v32 = vcvt.f32.s32 %v3067_v56 }
 0x2fc   : > { %v939_v5 = vrot.slane %v730_v13, %v2613_v18  ;;  %v742_v40 = vcvt.f32.s32 %v741_v33 }
 0x2fd   : > { %v789_v43 = vshll.u32 %v788_v32, 16 }
 0x2fe   : > { %v940_v34 = vsel %vm823_vm6, %v939_v5, %v935_v6  ;;  %v745_v20 = vadd.s32 %v744_v52, %v742_v40  ;;  %v1313_v52 = vpop.permute.xlu0 %1312 }
 0x2ff   : > { %v516_v15 = vpop.xlane.xlu1 %515 }
 0x300   : > { %v944_v27 = vrot.slane %v745_v20, %v2617_v0  ;;  %v517_v23 = vcvt.f32.s32 %v516_v15 }
 0x302   : > { %v945_v24 = vsel %vm830_vm7, %v944_v27, %v940_v34  ;;  %v520_v46 = vadd.s32 %v519_v39, %v517_v23  ;;  %v3068_v34 = vld [vmem:[#allocation71_spill] sm:$0xff] }
 0x303   : > { %v531_v17 = vpop.xlane.xlu1 %530 }
 0x304   : > { %v532_v30 = vcvt.f32.s32 %v531_v17  ;;  %v873_v45 = vrot.slane %v520_v46, %v2605_v2 }
 0x306   : > { %v535_v53 = vadd.s32 %v534_v50, %v532_v30 }
 0x307   : > { %v546_v11 = vpop.xlane.xlu1 %545 }
 0x308   : > { %v877_v36 = vrot.slane %v535_v53, %v2609_v57  ;;  %v547_v9 = vcvt.f32.s32 %v546_v11 }
 0x30a   : > { %v878_v37 = vsel %vm816_vm5, %v877_v36, %v873_v45  ;;  %v550_v54 = vadd.s32 %v549_v25, %v547_v9 }
 0x30b   : > { %v561_v35 = vpop.xlane.xlu1 %560 }
 0x30c   : > { %v882_v22 = vrot.slane %v550_v54, %v2613_v18  ;;  %v562_v38 = vcvt.f32.s32 %v561_v35 }
 0x30e   : > { %v883_v48 = vsel %vm823_vm6, %v882_v22, %v878_v37  ;;  %v565_v47 = vadd.s32 %v564_v7, %v562_v38  ;;  %v1452_v22 = vrot.slane %v1313_v52, %v2605_v2 }
 0x30f   : > { %v756_v31 = vpop.xlane.xlu1 %755 }
 0x310   : > { %v887_v42 = vrot.slane %v565_v47, %v2617_v0  ;;  %v757_v26 = vcvt.f32.s32 %v756_v31 }
 0x312   : > { %v888_v14 = vsel %vm830_vm7, %v887_v42, %v883_v48  ;;  %v760_v6 = vadd.s32 %v759_v10, %v757_v26 }
 0x313   : > { %v970_v29 = vsel %vm969_vm10, %v888_v14, %v2740_v63  ;;  %v771_v41 = vpop.xlane.xlu1 %770  ;;  %v803_v63 = vcvt.f32.s32 %v3068_v34 }
 0x314   : > { %v972_v16 = vsel %vm971_vm11, %v2713_v4, %v970_v29  ;;  %v772_v13 = vcvt.f32.s32 %v771_v41  ;;  %v949_v20 = vrot.slane %v760_v6, %v2605_v2  ;;  %v3071_v6 = vld [vmem:[#allocation7_spill] sm:$0xff] (%p38_p0) }
 0x315   : > { %v974_v33 = vsel %vm973_vm12, %v2752_v59, %v972_v16  ;;  %v804_v23 = vshll.u32 %v803_v63, 16  ;;  %v1310_v59 = vpop.permute.xlu0 %1309 }
 0x316   : > { %v775_v5 = vadd.s32 %v774_v49, %v772_v13  ;;  %v976_v40 = vsel %vm975_vm13, %v945_v24, %v974_v33  ;;  %v1437_v24 = vrot.slane %v2677_v55, %v2609_v57  ;;  %v1447_v11 = vrot.slane %v1310_v59, %v2617_v0 }
 0x317   : > { %v786_v58 = vpop.xlane.xlu1 %785 }
 0x318   : > { %v953_v15 = vrot.slane %v775_v5, %v2609_v57  ;;  %v787_v28 = vcvt.f32.s32 %v786_v58  ;;  %v1438_v25 = vsel %vm816_vm5, %v1437_v24, %v1433_v19 }
 0x319   : > { %v1325_v51 = vpop.permute.xlu0 %1324 }
 0x31a   : > { %v954_v4 = vsel %vm816_vm5, %v953_v15, %v949_v20  ;;  %v790_v12 = vadd.s32 %v789_v43, %v787_v28  ;;  %v1471_v31 = vrot.slane %v1325_v51, %v2605_v2  ;;  %v3069_v2 = vld [vmem:[#allocation8_spill] sm:$0xff] }
 0x31b   : > { %v801_v27 = vpop.xlane.xlu1 %800 }
 0x31c   : > { %v958_v39 = vrot.slane %v790_v12, %v2613_v18  ;;  %v802_v61 = vcvt.f32.s32 %v801_v27 }
 0x31d   : > { %v1322_v54 = vpop.permute.xlu0 %1321 }
 0x31e   : > { %v959_v17 = vsel %vm823_vm6, %v958_v39, %v954_v4  ;;  %v805_v50 = vadd.s32 %v804_v23, %v802_v61  ;;  %v1466_v48 = vrot.slane %v1322_v54, %v2617_v0 }
 0x31f   : > { %v1307_v46 = vpop.permute.xlu1 %1306 }
 0x320   : > { %v963_v30 = vrot.slane %v805_v50, %v2617_v0  ;;  %v1442_v53 = vrot.slane %v1307_v46, %v2613_v18 }
 0x321   : > { %v1334_v47 = vpop.permute.xlu0 %1333 }
 0x322   : > { %v964_v55 = vsel %vm830_vm7, %v963_v30, %v959_v17  ;;  %v1443_v60 = vsel %vm823_vm6, %v1442_v53, %v1438_v25  ;;  %v1485_v10 = vrot.slane %v1334_v47, %v2617_v0 }
 0x323   : > { %v978_v44 = vsel %vm977_vm14, %v964_v55, %v976_v40  ;;  %v1448_v45 = vsel %vm830_vm7, %v1447_v11, %v1443_v60  ;;  %v1316_v36 = vpop.permute.xlu1 %1315 }
 0x324   : > { %981 = vst.msk [vmem:[%s980_s10] sm:$0xff] %vm165_vm0, %v978_v44  ;;  %v1491_v9 = vsel %vm973_vm12, %v1448_v45, %v2668_v1  ;;  %v1456_v35 = vrot.slane %v1316_v36, %v2609_v57 }
 0x326   : > { %v1457_v8 = vsel %vm816_vm5, %v1456_v35, %v1452_v22 }
 0x327   : > { %v1319_v37 = vpop.permute.xlu1 %1318 }
 0x328   : > { %v1461_v7 = vrot.slane %v1319_v37, %v2613_v18 }
 0x32a   : > { %v1462_v21 = vsel %vm823_vm6, %v1461_v7, %v1457_v8 }
 0x32b   : > { %v1328_v38 = vpop.permute.xlu1 %1327  ;;  %v1467_v42 = vsel %vm830_vm7, %v1466_v48, %v1462_v21 }
 0x32c   : > { %v1475_v1 = vrot.slane %v1328_v38, %v2609_v57  ;;  %v1492_v57 = vsel %vm975_vm13, %v1467_v42, %v1491_v9 }
 0x32e   : > { %v1476_v14 = vsel %vm816_vm5, %v1475_v1, %v1471_v31 }
 0x32f   : > { %v1331_v62 = vpop.permute.xlu1 %1330 }
 0x330   : > { %v1480_v26 = vrot.slane %v1331_v62, %v2613_v18  ;;  %40 = sbr.rel (!%p38_p0) target bundleno = 5 (0x5), region = 61  ;;  %v1593_v18 = vld [vmem:[%s2855_s3] ss:$0 sm:$0xff] (%p38_p0)  ;;  %s2842_s3 = smov (%p38_p0), 0  }
 0x332   : > { %v1481_v56 = vsel %vm823_vm6, %v1480_v26, %v1476_v14 }
 0x333   : > { %v1486_v32 = vsel %vm830_vm7, %v1485_v10, %v1481_v56 }
 0x334   : > { %v1493_v29 = vsel %vm977_vm14, %v1486_v32, %v1492_v57 }
 0x335   : > { %v1495_v41 = vsel %vm1206_vm15, %v1493_v29, %v3069_v2  }
 0x336   : > { %v3070_v8 = vmov %v1495_v41  ;;  %v1503_v0 = vadd.f32 (%p38_p0), %v1593_v18, %v1495_v41 }
 0x338   :  { %v1505_v49 = vsel %vm165_vm0, %v1503_v0, -inf }
 0x339   :  { %1506 = vmax.xlane.f32.xlu0 %v1505_v49 }
 0x3c6   :  { %v1507_v16 = vpop.xlane.xlu0 %1506 }
 0x3c7   :  { %vm1508_vm1 = vcmp.eq.f32.partialorder %v1503_v0, %v1507_v16 }
 0x3c8   :  { %v1509_v13 = vsel %vm1508_vm1, %v3071_v6, 32 }
 0x3c9   :  { %v1510_v33 = vsel %vm165_vm0, %v1509_v13, 2147483647 }
 0x3ca   :  { %v1512_v52 = vshra.s32 %v1510_v33, 16  ;;  %v1511_v40 = vand.u32 65535, %v1510_v33 }
 0x3cc   :  { %v1514_v5 = vcvt.s32.f32 %v1512_v52  ;;  %v1513_v58 = vcvt.s32.f32 %v1511_v40 }
 0x3ce   :  { %1515 = vmin.xlane.f32.xlu0 %v1514_v5 }
 0x45b   :  { %v1516_v43 = vpop.xlane.xlu0 %1515 }
 0x45c   :  { %vm1517_vm2 = vcmp.eq.f32.partialorder %v1514_v5, %v1516_v43  ;;  %v1522_v63 = vcvt.f32.s32 %v1516_v43 }
 0x45d   :  { %v1518_v34 = vsel %vm1517_vm2, %v1513_v58, inf }
 0x45e   :  { %1519 = vmin.xlane.f32.xlu1 %v1518_v34  ;;  %v1523_v15 = vshll.u32 %v1522_v63, 16 }
 0x4eb   :  { %v1520_v20 = vpop.xlane.xlu1 %1519 }
 0x4ec   :  { %v1521_v28 = vcvt.f32.s32 %v1520_v20 }
 0x4ee   :  { %v1524_v4 = vadd.s32 %v1523_v15, %v1521_v28  }
 0x4f0   :  { %1594 = vst [vmem:[%s2857_s5 + $0x30] sm:$0xff] %v1524_v4  ;;  %v1656_v12 = vmov %v1524_v4  }
 0x4f1 LB: > { %s1534_s16 = ssub.s32 5, %s1662_s3  ;;  %v3072_v27 = vld [vmem:[#allocation7_spill] sm:$0xff]  ;;  %s1532_s3 = sadd.s32 1, %s1662_s3   ;;  %s1662_s3 = sphi %s2842_s3, %s1532_s3   ;;  %v1658_v12 = vphi %v1656_v12, %v1552_v12  }
 0x4f2   : > { %s1595_s17 = sshll.u32 %s1534_s16, 3  ;;  %vm1538_vm3 = vcmp.eq.s32.totalorder %v3072_v27, %v1658_v12  ;;  %p1529_p1 = scmp.ge.s32.totalorder %s1532_s3, 6  }
 0x4f3   : > { %s1536_s18 = scalar_lea.vmem [#allocation2], %s1595_s17  ;;  %s1553_s21 = scalar_lea.vmem %s2857_s5, %s1595_s17 }
 0x4f4   : > { %v1537_v23 = vld [vmem:[%s1536_s18] sm:$0xff] }
 0x4f5   : > { %v1539_v59 = vsel %vm1538_vm3, %v1537_v23, 0 }
 0x4f6   : > { %v1540_v39 = vsel %vm165_vm0, %v1539_v59, 0 }
 0x4f7   : > { %v1542_v61 = vshrl.u32 %v1540_v39, 16  ;;  %v1541_v24 = vand.u32 65535, %v1540_v39 }
 0x4f9   : > { %v1544_v19 = vcvt.s32.f32 %v1542_v61  ;;  %v1543_v17 = vcvt.s32.f32 %v1541_v24 }
 0x4fb   : > { %1547 = vadd.xlane.f32.xlu0 %v1544_v19 }
 0x4ff   : > { %1545 = vadd.xlane.f32.xlu0 %v1543_v17 }
 0x588   : > { %v1548_v50 = vpop.xlane.xlu0 %1547 }
 0x589   : > { %v1550_v46 = vcvt.f32.s32 %v1548_v50 }
 0x58b   : > { %v1551_v53 = vshll.u32 %v1550_v46, 16  ;;  %1531 = sbr.rel (!%p1529_p1) target bundleno = 1265 (0x4f1), region = 72 }
 0x58c   : > { %v1546_v30 = vpop.xlane.xlu0 %1545 }
 0x58d   : > { %v1549_v25 = vcvt.f32.s32 %v1546_v30 }
 0x58f   : > { %v1552_v12 = vadd.s32 %v1551_v53, %v1549_v25  }
 0x591   : > { %1554 = vst [vmem:[%s1553_s21] sm:$0xff] %v1552_v12 }

// kernel: my_ner_forward.4
= control target key start
LH: loop header
LB: loop body
LE: loop exit
PB: predicated region body
PF: predicated region fallthrough
CT: control target
= control target key end

     0   :  { %s2296_s11 = smov 0   ;;  %s2682_s0 = inlined_call_operand.vmem [shape: bf16[8,8,1024], index: 0, kind: input, shape index: {}]   ;;  %s2683_s1 = inlined_call_operand.vmem [shape: bf16[256,1024], index: 1, kind: input, shape index: {}]   ;;  %s2684_s2 = inlined_call_operand.vmem [shape: bf16[256,128], index: 2, kind: input, shape index: {}]   ;;  %s2685_s3 = inlined_call_operand.vmem [shape: f32[1,128], index: 3, kind: input, shape index: {}]   ;;  %s2686_s4 = inlined_call_operand.vmem [shape: f32[8,8,128], index: 4, kind: output, shape index: {}]  }
   0x1   :  { %v1651_v0 = vld [vmem:[%s2683_s1] sm:$0xff]  ;;  %v1656_v1 = vld [vmem:[%s2683_s1 + $0x8] sm:$0xff]  ;;  %v1661_v2 = vld [vmem:[%s2683_s1 + $0x10] sm:$0xff] }
   0x2   :  { %2848 = vst [vmem:[#allocation3_spill] sm:$0xff] %v1651_v0  ;;  %2849 = vst [vmem:[#allocation4_spill] sm:$0xff] %v1656_v1  ;;  %v1666_v3 = vld [vmem:[%s2683_s1 + $0x18] sm:$0xff]  ;;  %v1671_v4 = vld [vmem:[%s2683_s1 + $0x20] sm:$0xff] }
   0x3   :  { %2850 = vst [vmem:[#allocation5_spill] sm:$0xff] %v1661_v2  ;;  %2851 = vst [vmem:[#allocation6_spill] sm:$0xff] %v1666_v3  ;;  %v1676_v5 = vld [vmem:[%s2683_s1 + $0x28] sm:$0xff]  ;;  %v1681_v6 = vld [vmem:[%s2683_s1 + $0x30] sm:$0xff] }
   0x4   :  { %2852 = vst [vmem:[#allocation7_spill] sm:$0xff] %v1671_v4  ;;  %2853 = vst [vmem:[#allocation8_spill] sm:$0xff] %v1676_v5  ;;  %v1686_v7 = vld [vmem:[%s2683_s1 + $0x38] sm:$0xff]  ;;  %v1691_v8 = vld [vmem:[%s2683_s1 + $0x40] sm:$0xff] }
   0x5   :  { %2854 = vst [vmem:[#allocation9_spill] sm:$0xff] %v1681_v6  ;;  %2855 = vst [vmem:[#allocation10_spill] sm:$0xff] %v1686_v7  ;;  %v1696_v9 = vld [vmem:[%s2683_s1 + $0x48] sm:$0xff]  ;;  %v1701_v10 = vld [vmem:[%s2683_s1 + $0x50] sm:$0xff] }
   0x6   :  { %2856 = vst [vmem:[#allocation11_spill] sm:$0xff] %v1691_v8  ;;  %2857 = vst [vmem:[#allocation12_spill] sm:$0xff] %v1696_v9  ;;  %v1706_v11 = vld [vmem:[%s2683_s1 + $0x58] sm:$0xff]  ;;  %v1711_v12 = vld [vmem:[%s2683_s1 + $0x60] sm:$0xff] }
   0x7   :  { %2858 = vst [vmem:[#allocation13_spill] sm:$0xff] %v1701_v10  ;;  %2859 = vst [vmem:[#allocation14_spill] sm:$0xff] %v1706_v11  ;;  %v1716_v13 = vld [vmem:[%s2683_s1 + $0x68] sm:$0xff]  ;;  %v1721_v14 = vld [vmem:[%s2683_s1 + $0x70] sm:$0xff] }
   0x8   :  { %2860 = vst [vmem:[#allocation15_spill] sm:$0xff] %v1711_v12  ;;  %2861 = vst [vmem:[#allocation16_spill] sm:$0xff] %v1716_v13  ;;  %v1726_v15 = vld [vmem:[%s2683_s1 + $0x78] sm:$0xff]  ;;  %v1731_v16 = vld [vmem:[%s2683_s1 + $0x80] sm:$0xff] }
   0x9   :  { %2862 = vst [vmem:[#allocation17_spill] sm:$0xff] %v1721_v14  ;;  %2863 = vst [vmem:[#allocation18_spill] sm:$0xff] %v1726_v15  ;;  %v1736_v17 = vld [vmem:[%s2683_s1 + $0x88] sm:$0xff]  ;;  %v1741_v18 = vld [vmem:[%s2683_s1 + $0x90] sm:$0xff] }
   0xa   :  { %2864 = vst [vmem:[#allocation19_spill] sm:$0xff] %v1731_v16  ;;  %2865 = vst [vmem:[#allocation20_spill] sm:$0xff] %v1736_v17  ;;  %v1746_v19 = vld [vmem:[%s2683_s1 + $0x98] sm:$0xff]  ;;  %v1751_v20 = vld [vmem:[%s2683_s1 + $0xa0] sm:$0xff] }
   0xb   :  { %2866 = vst [vmem:[#allocation21_spill] sm:$0xff] %v1741_v18  ;;  %2867 = vst [vmem:[#allocation22_spill] sm:$0xff] %v1746_v19  ;;  %v1756_v21 = vld [vmem:[%s2683_s1 + $0xa8] sm:$0xff]  ;;  %v1761_v22 = vld [vmem:[%s2683_s1 + $0xb0] sm:$0xff] }
   0xc   :  { %2868 = vst [vmem:[#allocation23_spill] sm:$0xff] %v1751_v20  ;;  %2869 = vst [vmem:[#allocation24_spill] sm:$0xff] %v1756_v21  ;;  %v1766_v23 = vld [vmem:[%s2683_s1 + $0xb8] sm:$0xff]  ;;  %v1771_v24 = vld [vmem:[%s2683_s1 + $0xc0] sm:$0xff] }
   0xd   :  { %2870 = vst [vmem:[#allocation25_spill] sm:$0xff] %v1761_v22  ;;  %2871 = vst [vmem:[#allocation26_spill] sm:$0xff] %v1766_v23  ;;  %v1776_v25 = vld [vmem:[%s2683_s1 + $0xc8] sm:$0xff]  ;;  %v1781_v26 = vld [vmem:[%s2683_s1 + $0xd0] sm:$0xff] }
   0xe   :  { %2872 = vst [vmem:[#allocation27_spill] sm:$0xff] %v1771_v24  ;;  %2873 = vst [vmem:[#allocation28_spill] sm:$0xff] %v1781_v26  ;;  %v1786_v27 = vld [vmem:[%s2683_s1 + $0xd8] sm:$0xff]  ;;  %v1791_v28 = vld [vmem:[%s2683_s1 + $0xe0] sm:$0xff] }
   0xf   :  { %2874 = vst [vmem:[#allocation29_spill] sm:$0xff] %v1786_v27  ;;  %v1796_v29 = vld [vmem:[%s2683_s1 + $0xe8] sm:$0xff]  ;;  %v1801_v30 = vld [vmem:[%s2683_s1 + $0xf0] sm:$0xff]  ;;  %v1806_v31 = vld [vmem:[%s2683_s1 + $0xf8] sm:$0xff] }
  0x10   :  { %2875 = vst [vmem:[#allocation30_spill] sm:$0xff] %v1801_v30  ;;  %2876 = vst [vmem:[#allocation31_spill] sm:$0xff] %v1806_v31  ;;  %v1811_v32 = vld [vmem:[%s2683_s1 + $0x100] sm:$0xff]  ;;  %v1816_v33 = vld [vmem:[%s2683_s1 + $0x108] sm:$0xff] }
  0x11   :  { %v1821_v34 = vld [vmem:[%s2683_s1 + $0x110] sm:$0xff]  ;;  %v1826_v35 = vld [vmem:[%s2683_s1 + $0x118] sm:$0xff]  ;;  %v1831_v36 = vld [vmem:[%s2683_s1 + $0x120] sm:$0xff] }
  0x12   :  { %2877 = vst [vmem:[#allocation32_spill] sm:$0xff] %v1821_v34  ;;  %2878 = vst [vmem:[#allocation33_spill] sm:$0xff] %v1826_v35  ;;  %v1836_v37 = vld [vmem:[%s2683_s1 + $0x128] sm:$0xff]  ;;  %v1841_v38 = vld [vmem:[%s2683_s1 + $0x130] sm:$0xff] }
  0x13   :  { %2879 = vst [vmem:[#allocation34_spill] sm:$0xff] %v1841_v38  ;;  %v1846_v39 = vld [vmem:[%s2683_s1 + $0x138] sm:$0xff]  ;;  %v1851_v40 = vld [vmem:[%s2683_s1 + $0x140] sm:$0xff]  ;;  %v1856_v41 = vld [vmem:[%s2683_s1 + $0x148] sm:$0xff] }
  0x14   :  { %2880 = vst [vmem:[#allocation35_spill] sm:$0xff] %v1846_v39  ;;  %v1861_v42 = vld [vmem:[%s2683_s1 + $0x150] sm:$0xff]  ;;  %v1866_v43 = vld [vmem:[%s2683_s1 + $0x158] sm:$0xff]  ;;  %v1871_v44 = vld [vmem:[%s2683_s1 + $0x160] sm:$0xff] }
  0x15   :  { %2881 = vst [vmem:[#allocation36_spill] sm:$0xff] %v1861_v42  ;;  %2882 = vst [vmem:[#allocation37_spill] sm:$0xff] %v1866_v43  ;;  %v1876_v45 = vld [vmem:[%s2683_s1 + $0x168] sm:$0xff]  ;;  %v1881_v46 = vld [vmem:[%s2683_s1 + $0x170] sm:$0xff] }
  0x16   :  { %2883 = vst [vmem:[#allocation38_spill] sm:$0xff] %v1881_v46  ;;  %v1886_v47 = vld [vmem:[%s2683_s1 + $0x178] sm:$0xff]  ;;  %v1891_v48 = vld [vmem:[%s2683_s1 + $0x180] sm:$0xff]  ;;  %v1896_v49 = vld [vmem:[%s2683_s1 + $0x188] sm:$0xff] }
  0x17   :  { %2884 = vst [vmem:[#allocation39_spill] sm:$0xff] %v1886_v47  ;;  %v1901_v50 = vld [vmem:[%s2683_s1 + $0x190] sm:$0xff]  ;;  %v1906_v51 = vld [vmem:[%s2683_s1 + $0x198] sm:$0xff]  ;;  %v1911_v52 = vld [vmem:[%s2683_s1 + $0x1a0] sm:$0xff] }
  0x18   :  { %2885 = vst [vmem:[#allocation40_spill] sm:$0xff] %v1901_v50  ;;  %2886 = vst [vmem:[#allocation41_spill] sm:$0xff] %v1906_v51  ;;  %v1916_v53 = vld [vmem:[%s2683_s1 + $0x1a8] sm:$0xff]  ;;  %v1921_v54 = vld [vmem:[%s2683_s1 + $0x1b0] sm:$0xff] }
  0x19   :  { %2887 = vst [vmem:[#allocation42_spill] sm:$0xff] %v1921_v54  ;;  %v1926_v55 = vld [vmem:[%s2683_s1 + $0x1b8] sm:$0xff]  ;;  %v1931_v56 = vld [vmem:[%s2683_s1 + $0x1c0] sm:$0xff]  ;;  %v1936_v57 = vld [vmem:[%s2683_s1 + $0x1c8] sm:$0xff] }
  0x1a   :  { %2888 = vst [vmem:[#allocation43_spill] sm:$0xff] %v1926_v55  ;;  %v1941_v58 = vld [vmem:[%s2683_s1 + $0x1d0] sm:$0xff]  ;;  %v1946_v59 = vld [vmem:[%s2683_s1 + $0x1d8] sm:$0xff]  ;;  %v1951_v60 = vld [vmem:[%s2683_s1 + $0x1e0] sm:$0xff] }
  0x1b   :  { %2889 = vst [vmem:[#allocation44_spill] sm:$0xff] %v1941_v58  ;;  %2890 = vst [vmem:[#allocation45_spill] sm:$0xff] %v1946_v59  ;;  %v1956_v61 = vld [vmem:[%s2683_s1 + $0x1e8] sm:$0xff]  ;;  %v1961_v62 = vld [vmem:[%s2683_s1 + $0x1f0] sm:$0xff] }
  0x1c   :  { %2891 = vst [vmem:[#allocation46_spill] sm:$0xff] %v1961_v62  ;;  %v1966_v63 = vld [vmem:[%s2683_s1 + $0x1f8] sm:$0xff]  ;;  %v1971_v59 = vld [vmem:[%s2683_s1 + $0x200] sm:$0xff]  ;;  %v1976_v58 = vld [vmem:[%s2683_s1 + $0x208] sm:$0xff] }
  0x1d   :  { %2892 = vst [vmem:[#allocation47_spill] sm:$0xff] %v1966_v63  ;;  %v1981_v51 = vld [vmem:[%s2683_s1 + $0x210] sm:$0xff]  ;;  %v1986_v62 = vld [vmem:[%s2683_s1 + $0x218] sm:$0xff]  ;;  %v1991_v63 = vld [vmem:[%s2683_s1 + $0x220] sm:$0xff] }
  0x1e   :  { %2893 = vst [vmem:[#allocation48_spill] sm:$0xff] %v1981_v51  ;;  %2894 = vst [vmem:[#allocation49_spill] sm:$0xff] %v1986_v62  ;;  %v1996_v55 = vld [vmem:[%s2683_s1 + $0x228] sm:$0xff]  ;;  %v2001_v50 = vld [vmem:[%s2683_s1 + $0x230] sm:$0xff] }
  0x1f   :  { %2895 = vst [vmem:[#allocation50_spill] sm:$0xff] %v2001_v50  ;;  %v2006_v51 = vld [vmem:[%s2683_s1 + $0x238] sm:$0xff]  ;;  %v2011_v62 = vld [vmem:[%s2683_s1 + $0x240] sm:$0xff]  ;;  %v2016_v54 = vld [vmem:[%s2683_s1 + $0x248] sm:$0xff] }
  0x20   :  { %2896 = vst [vmem:[#allocation51_spill] sm:$0xff] %v2006_v51  ;;  %v2021_v43 = vld [vmem:[%s2683_s1 + $0x250] sm:$0xff]  ;;  %v2026_v50 = vld [vmem:[%s2683_s1 + $0x258] sm:$0xff]  ;;  %v2031_v51 = vld [vmem:[%s2683_s1 + $0x260] sm:$0xff] }
  0x21   :  { %2897 = vst [vmem:[#allocation52_spill] sm:$0xff] %v2021_v43  ;;  %2898 = vst [vmem:[#allocation53_spill] sm:$0xff] %v2026_v50  ;;  %v2036_v47 = vld [vmem:[%s2683_s1 + $0x268] sm:$0xff]  ;;  %v2041_v42 = vld [vmem:[%s2683_s1 + $0x270] sm:$0xff] }
  0x22   :  { %2899 = vst [vmem:[#allocation54_spill] sm:$0xff] %v2041_v42  ;;  %v2046_v43 = vld [vmem:[%s2683_s1 + $0x278] sm:$0xff]  ;;  %v2051_v50 = vld [vmem:[%s2683_s1 + $0x280] sm:$0xff]  ;;  %v2056_v46 = vld [vmem:[%s2683_s1 + $0x288] sm:$0xff] }
  0x23   :  { %2900 = vst [vmem:[#allocation55_spill] sm:$0xff] %v2046_v43  ;;  %v2061_v35 = vld [vmem:[%s2683_s1 + $0x290] sm:$0xff]  ;;  %v2066_v42 = vld [vmem:[%s2683_s1 + $0x298] sm:$0xff]  ;;  %v2071_v43 = vld [vmem:[%s2683_s1 + $0x2a0] sm:$0xff] }
  0x24   :  { %2901 = vst [vmem:[#allocation56_spill] sm:$0xff] %v2061_v35  ;;  %2902 = vst [vmem:[#allocation57_spill] sm:$0xff] %v2066_v42  ;;  %v2076_v39 = vld [vmem:[%s2683_s1 + $0x2a8] sm:$0xff]  ;;  %v2081_v34 = vld [vmem:[%s2683_s1 + $0x2b0] sm:$0xff] }
  0x25   :  { %2903 = vst [vmem:[#allocation58_spill] sm:$0xff] %v2081_v34  ;;  %v2086_v35 = vld [vmem:[%s2683_s1 + $0x2b8] sm:$0xff]  ;;  %v2091_v42 = vld [vmem:[%s2683_s1 + $0x2c0] sm:$0xff]  ;;  %v2096_v38 = vld [vmem:[%s2683_s1 + $0x2c8] sm:$0xff] }
  0x26   :  { %2904 = vst [vmem:[#allocation59_spill] sm:$0xff] %v2086_v35  ;;  %v2101_v27 = vld [vmem:[%s2683_s1 + $0x2d0] sm:$0xff]  ;;  %v2106_v34 = vld [vmem:[%s2683_s1 + $0x2d8] sm:$0xff]  ;;  %v2111_v35 = vld [vmem:[%s2683_s1 + $0x2e0] sm:$0xff] }
  0x27   :  { %2905 = vst [vmem:[#allocation60_spill] sm:$0xff] %v2101_v27  ;;  %2906 = vst [vmem:[#allocation61_spill] sm:$0xff] %v2106_v34  ;;  %v2116_v31 = vld [vmem:[%s2683_s1 + $0x2e8] sm:$0xff]  ;;  %v2121_v26 = vld [vmem:[%s2683_s1 + $0x2f0] sm:$0xff] }
  0x28   :  { %2907 = vst [vmem:[#allocation62_spill] sm:$0xff] %v2121_v26  ;;  %v2126_v27 = vld [vmem:[%s2683_s1 + $0x2f8] sm:$0xff]  ;;  %v2131_v34 = vld [vmem:[%s2683_s1 + $0x300] sm:$0xff]  ;;  %v2136_v30 = vld [vmem:[%s2683_s1 + $0x308] sm:$0xff] }
  0x29   :  { %2908 = vst [vmem:[#allocation63_spill] sm:$0xff] %v2126_v27  ;;  %v2141_v19 = vld [vmem:[%s2683_s1 + $0x310] sm:$0xff]  ;;  %v2146_v26 = vld [vmem:[%s2683_s1 + $0x318] sm:$0xff]  ;;  %v2151_v27 = vld [vmem:[%s2683_s1 + $0x320] sm:$0xff] }
  0x2a   :  { %2909 = vst [vmem:[#allocation64_spill] sm:$0xff] %v2141_v19  ;;  %2910 = vst [vmem:[#allocation65_spill] sm:$0xff] %v2146_v26  ;;  %v2156_v23 = vld [vmem:[%s2683_s1 + $0x328] sm:$0xff]  ;;  %v2161_v18 = vld [vmem:[%s2683_s1 + $0x330] sm:$0xff] }
  0x2b   :  { %2911 = vst [vmem:[#allocation66_spill] sm:$0xff] %v2156_v23  ;;  %2912 = vst [vmem:[#allocation67_spill] sm:$0xff] %v2161_v18  ;;  %v2166_v19 = vld [vmem:[%s2683_s1 + $0x338] sm:$0xff]  ;;  %v2171_v26 = vld [vmem:[%s2683_s1 + $0x340] sm:$0xff] }
  0x2c   :  { %2913 = vst [vmem:[#allocation68_spill] sm:$0xff] %v2166_v19  ;;  %v2176_v22 = vld [vmem:[%s2683_s1 + $0x348] sm:$0xff]  ;;  %v2181_v11 = vld [vmem:[%s2683_s1 + $0x350] sm:$0xff]  ;;  %v2186_v18 = vld [vmem:[%s2683_s1 + $0x358] sm:$0xff] }
  0x2d   :  { %2914 = vst [vmem:[#allocation69_spill] sm:$0xff] %v2176_v22  ;;  %2915 = vst [vmem:[#allocation70_spill] sm:$0xff] %v2181_v11  ;;  %v2191_v19 = vld [vmem:[%s2683_s1 + $0x360] sm:$0xff]  ;;  %v2196_v15 = vld [vmem:[%s2683_s1 + $0x368] sm:$0xff] }
  0x2e   :  { %2916 = vst [vmem:[#allocation71_spill] sm:$0xff] %v2186_v18  ;;  %2917 = vst [vmem:[#allocation72_spill] sm:$0xff] %v2191_v19  ;;  %v2201_v10 = vld [vmem:[%s2683_s1 + $0x370] sm:$0xff]  ;;  %v2206_v11 = vld [vmem:[%s2683_s1 + $0x378] sm:$0xff] }
  0x2f   :  { %2918 = vst [vmem:[#allocation73_spill] sm:$0xff] %v2196_v15  ;;  %2919 = vst [vmem:[#allocation74_spill] sm:$0xff] %v2201_v10  ;;  %v2211_v18 = vld [vmem:[%s2683_s1 + $0x380] sm:$0xff]  ;;  %v2216_v14 = vld [vmem:[%s2683_s1 + $0x388] sm:$0xff] }
  0x30   :  { %2920 = vst [vmem:[#allocation75_spill] sm:$0xff] %v2206_v11  ;;  %2921 = vst [vmem:[#allocation76_spill] sm:$0xff] %v2211_v18  ;;  %v2221_v3 = vld [vmem:[%s2683_s1 + $0x390] sm:$0xff]  ;;  %v2226_v10 = vld [vmem:[%s2683_s1 + $0x398] sm:$0xff]  ;;  %v2294_v18 = vmov 0.0  }
  0x31   :  { %2922 = vst [vmem:[#allocation77_spill] sm:$0xff] %v2216_v14  ;;  %2923 = vst [vmem:[#allocation78_spill] sm:$0xff] %v2221_v3  ;;  %v2231_v11 = vld [vmem:[%s2683_s1 + $0x3a0] sm:$0xff]  ;;  %v2236_v7 = vld [vmem:[%s2683_s1 + $0x3a8] sm:$0xff] }
  0x32   :  { %2924 = vst [vmem:[#allocation79_spill] sm:$0xff] %v2226_v10  ;;  %2925 = vst [vmem:[#allocation80_spill] sm:$0xff] %v2231_v11  ;;  %v2241_v2 = vld [vmem:[%s2683_s1 + $0x3b0] sm:$0xff]  ;;  %v2246_v3 = vld [vmem:[%s2683_s1 + $0x3b8] sm:$0xff] }
  0x33   :  { %2926 = vst [vmem:[#allocation81_spill] sm:$0xff] %v2236_v7  ;;  %2927 = vst [vmem:[#allocation82_spill] sm:$0xff] %v2241_v2  ;;  %v2251_v10 = vld [vmem:[%s2683_s1 + $0x3c0] sm:$0xff]  ;;  %v2256_v6 = vld [vmem:[%s2683_s1 + $0x3c8] sm:$0xff]  ;;  %v2290_v7 = vmov 0.0  }
  0x34   :  { %2928 = vst [vmem:[#allocation83_spill] sm:$0xff] %v2246_v3  ;;  %2929 = vst [vmem:[#allocation84_spill] sm:$0xff] %v2251_v10  ;;  %v2261_v14 = vld [vmem:[%s2683_s1 + $0x3d0] sm:$0xff]  ;;  %v2266_v2 = vld [vmem:[%s2683_s1 + $0x3d8] sm:$0xff] }
  0x35   :  { %2930 = vst [vmem:[#allocation85_spill] sm:$0xff] %v2256_v6  ;;  %2931 = vst [vmem:[#allocation86_spill] sm:$0xff] %v2261_v14  ;;  %v2271_v3 = vld [vmem:[%s2683_s1 + $0x3e0] sm:$0xff]  ;;  %v2276_v10 = vld [vmem:[%s2683_s1 + $0x3e8] sm:$0xff] }
  0x36   :  { %2932 = vst [vmem:[#allocation87_spill] sm:$0xff] %v2266_v2  ;;  %2933 = vst [vmem:[#allocation88_spill] sm:$0xff] %v2271_v3  ;;  %v2281_v6 = vld [vmem:[%s2683_s1 + $0x3f0] sm:$0xff]  ;;  %v2286_v14 = vld [vmem:[%s2683_s1 + $0x3f8] sm:$0xff]  ;;  %v2288_v2 = vmov 0.0   ;;  %v2292_v3 = vmov 0.0  }
  0x37   :  { %2934 = vst [vmem:[#allocation89_spill] sm:$0xff] %v2276_v10  ;;  %2935 = vst [vmem:[#allocation90_spill] sm:$0xff] %v2281_v6 }
  0x38   :  { %2936 = vst [vmem:[#allocation91_spill] sm:$0xff] %v2286_v14 }
  0x39 LB: > { %v2937_v24 = vld [vmem:[#allocation27_spill] sm:$0xff]  ;;  %v2938_v23 = vld [vmem:[#allocation66_spill] sm:$0xff]  ;;  %v2939_v22 = vld [vmem:[#allocation69_spill] sm:$0xff]  ;;  %2954 = vst [vmem:[#allocation92_spill] sm:$0xff] %v1605_v2  ;;  %s1447_s1 = sshll.u32 %s1621_s11, 5  ;;  %s1449_s15 = sshll.u32 %s1621_s11, 4  ;;  %v1609_v7 = vphi %v2290_v7, %v1004_v7   ;;  %v1605_v2 = vphi %v2288_v2, %v1022_v2   ;;  %s1621_s11 = sphi %s2296_s11, %s151_s11   ;;  %v1617_v18 = vphi %v2294_v18, %v1006_v18   ;;  %v1613_v3 = vphi %v2292_v3, %v1024_v3  }
  0x3a   : > { %v2940_v21 = vld [vmem:[#allocation24_spill] sm:$0xff]  ;;  %v2941_v20 = vld [vmem:[#allocation23_spill] sm:$0xff]  ;;  %v2945_v15 = vld [vmem:[#allocation73_spill] sm:$0xff]  ;;  %2955 = vst [vmem:[#allocation93_spill] sm:$0xff] %v1609_v7  ;;  %s965_s14 = scalar_lea.vmem %s2682_s0, %s1447_s1  ;;  %s1027_s16 = scalar_lea.vmem [#allocation2], %s1449_s15 }
  0x3b   : > { %v2942_v19 = vld [vmem:[#allocation72_spill] sm:$0xff]  ;;  %v2944_v16 = vld [vmem:[#allocation19_spill] sm:$0xff]  ;;  %2956 = vst [vmem:[#allocation94_spill] sm:$0xff] %v1617_v18  ;;  %s156_s17 = ssub.s32 7, %s1621_s11  ;;  %s151_s11 = sadd.s32 1, %s1621_s11  }
  0x3c   : > { %v2943_v17 = vld [vmem:[#allocation20_spill] sm:$0xff]  ;;  %v2947_v12 = vld [vmem:[#allocation15_spill] sm:$0xff]  ;;  %s1448_s18 = sshll.u32 %s156_s17, 5  ;;  %s1450_s22 = sshll.u32 %s156_s17, 4 }
  0x3d   : > { %v2946_v13 = vld [vmem:[#allocation16_spill] sm:$0xff]  ;;  %v2949_v8 = vld [vmem:[#allocation11_spill] sm:$0xff]  ;;  %s978_s21 = scalar_lea.vmem %s2682_s0, %s1448_s18  ;;  %s1031_s23 = scalar_lea.vmem [#allocation2], %s1450_s22 }
  0x3e   : > { %v2948_v9 = vld [vmem:[#allocation12_spill] sm:$0xff]  ;;  %v2952_v4 = vld [vmem:[#allocation7_spill] sm:$0xff]  ;;  %v1303_v10 = vcombine.high %v2949_v8, %v2947_v12  ;;  %v1302_v11 = vcombine.low %v2949_v8, %v2947_v12  ;;  %p148_p0 = scmp.ge.s32.totalorder %s151_s11, 8  }
  0x3f   : > { %v2950_v5 = vld [vmem:[#allocation8_spill] sm:$0xff]  ;;  %v2953_v0 = vld [vmem:[#allocation3_spill] sm:$0xff]  ;;  %v1305_v18 = vcombine.high %v2948_v9, %v2946_v13 }
  0x40   : > { %v2951_v1 = vld [vmem:[#allocation4_spill] sm:$0xff]  ;;  %v1295_v14 = vcombine.high %v2953_v0, %v2952_v4  ;;  %v1294_v6 = vcombine.low %v2953_v0, %v2952_v4  ;;  %v1304_v0 = vcombine.low %v2948_v9, %v2946_v13  ;;  %v1311_v4 = vcombine.high %v2944_v16, %v2941_v20  ;;  %v2961_v9 = vld [vmem:[#allocation77_spill] sm:$0xff] }
  0x41   : > { %v1297_v2 = vcombine.high %v2951_v1, %v2950_v5  ;;  %v1296_v7 = vcombine.low %v2951_v1, %v2950_v5  ;;  %v1313_v1 = vcombine.high %v2943_v17, %v2940_v21  ;;  %v2959_v5 = vld [vmem:[#allocation76_spill] sm:$0xff] }
  0x42   : > { %799 = vmatprep.subr.bf16.mxu0 %v1295_v14  ;;  %v1318_v14 = vcombine.low %v2937_v24, %v1791_v28  ;;  %v2963_v13 = vld [vmem:[#allocation84_spill] sm:$0xff] }
  0x43   : > { %840 = vmatprep.subr.bf16.mxu1 %v1297_v2  ;;  %800 = vmatpush1.bf16.msra.mxu0 %v1294_v6  ;;  %v1310_v2 = vcombine.low %v2944_v16, %v2941_v20  ;;  %v1312_v6 = vcombine.low %v2943_v17, %v2940_v21  ;;  %v2965_v16 = vld [vmem:[#allocation85_spill] sm:$0xff] }
  0x44   : > { %841 = vmatpush1.bf16.msra.mxu1 %v1296_v7  ;;  %801 = vmatprep.subr.bf16.mxu0 %v1303_v10  ;;  %v1319_v7 = vcombine.high %v2937_v24, %v1791_v28  ;;  %v1321_v10 = vcombine.high %v1776_v25, %v1796_v29  ;;  %v1574_v28 = vld [vmem:[%s2684_s2 + $0x18] sm:$0xff] (%p148_p0)  }
  0x45   : > { %842 = vmatprep.subr.bf16.mxu1 %v1305_v18  ;;  %v1328_v18 = vcombine.low %v1816_v33, %v1836_v37 }
  0x47   : > { %802 = vmatpush1.bf16.msra.mxu0 %v1302_v11  ;;  %v1320_v11 = vcombine.low %v1776_v25, %v1796_v29  ;;  %v1571_v25 = vld [vmem:[%s2684_s2 + $0x50] sm:$0xff] (%p148_p0)   ;;  %v1575_v29 = vld [vmem:[%s2684_s2 + $0x60] sm:$0xff] (%p148_p0)  }
  0x48   : > { %843 = vmatpush1.bf16.msra.mxu1 %v1304_v0  ;;  %803 = vmatprep.subr.bf16.mxu0 %v1311_v4  ;;  %v1327_v0 = vcombine.high %v1811_v32, %v1831_v36  ;;  %v1329_v4 = vcombine.high %v1816_v33, %v1836_v37 }
  0x49   : > { %844 = vmatprep.subr.bf16.mxu1 %v1313_v1  ;;  %v1326_v1 = vcombine.low %v1811_v32, %v1831_v36 }
  0x4b   : > { %804 = vmatpush1.bf16.msra.mxu0 %v1310_v2  ;;  %v1335_v2 = vcombine.high %v1851_v40, %v1871_v44 }
  0x4c   : > { %845 = vmatpush1.bf16.msra.mxu1 %v1312_v6  ;;  %805 = vmatprep.subr.bf16.mxu0 %v1319_v7  ;;  %v1337_v6 = vcombine.high %v1856_v41, %v1876_v45  ;;  %v2355_v7 = vpack.c.bf16 %v1613_v3, %v1613_v3  ;;  %v1342_v3 = vcombine.low %v1891_v48, %v1911_v52 }
  0x4d   : > { %846 = vmatprep.subr.bf16.mxu1 %v1321_v10  ;;  %v1334_v10 = vcombine.low %v1851_v40, %v1871_v44  ;;  %v1580_v40 = vld [vmem:[%s2684_s2 + $0x30] sm:$0xff] (%p148_p0)  }
  0x4e   : > { %831 = vmatprep.mubr.bf16.mxu0 %v2355_v7  ;;  %872 = vmatprep.mubr.bf16.mxu1 %v2355_v7 }
  0x4f   : > { %806 = vmatpush1.bf16.msra.mxu0 %v1318_v14  ;;  %v1336_v14 = vcombine.low %v1856_v41, %v1876_v45  ;;  %v1581_v41 = vld [vmem:[%s2684_s2 + $0x78] sm:$0xff] (%p148_p0)  }
  0x50   : > { %847 = vmatpush1.bf16.msra.mxu1 %v1320_v11  ;;  %807 = vmatprep.subr.bf16.mxu0 %v1327_v0  ;;  %v1343_v11 = vcombine.high %v1891_v48, %v1911_v52  ;;  %v1345_v0 = vcombine.high %v1896_v49, %v1916_v53 }
  0x51   : > { %848 = vmatprep.subr.bf16.mxu1 %v1329_v4  ;;  %v1344_v4 = vcombine.low %v1896_v49, %v1916_v53 }
  0x53   : > { %808 = vmatpush1.bf16.msra.mxu0 %v1326_v1  ;;  %v1351_v1 = vcombine.high %v1931_v56, %v1951_v60 }
  0x54   : > { %849 = vmatpush1.bf16.msra.mxu1 %v1328_v18  ;;  %809 = vmatprep.subr.bf16.mxu0 %v1335_v2  ;;  %v1353_v18 = vcombine.high %v1936_v57, %v1956_v61  ;;  %v1350_v2 = vcombine.low %v1931_v56, %v1951_v60 }
  0x55   : > { %850 = vmatprep.subr.bf16.mxu1 %v1337_v6  ;;  %v1352_v6 = vcombine.low %v1936_v57, %v1956_v61 }
  0x57   : > { %810 = vmatpush1.bf16.msra.mxu0 %v1334_v10  ;;  %v1359_v10 = vcombine.high %v1971_v59, %v1991_v63 }
  0x58   : > { %851 = vmatpush1.bf16.msra.mxu1 %v1336_v14  ;;  %811 = vmatprep.subr.bf16.mxu0 %v1343_v11  ;;  %v1361_v14 = vcombine.high %v1976_v58, %v1996_v55  ;;  %v1358_v11 = vcombine.low %v1971_v59, %v1991_v63  ;;  %v1430_v63 = vld [vmem:[%s2685_s3] ss:$0 sm:$0xff] (%p148_p0) }
  0x59   : > { %852 = vmatprep.subr.bf16.mxu1 %v1345_v0  ;;  %v1360_v0 = vcombine.low %v1976_v58, %v1996_v55 }
  0x5b   : > { %812 = vmatpush1.bf16.msra.mxu0 %v1342_v3  ;;  %v1367_v3 = vcombine.high %v2011_v62, %v2031_v51 }
  0x5c   : > { %853 = vmatpush1.bf16.msra.mxu1 %v1344_v4  ;;  %813 = vmatprep.subr.bf16.mxu0 %v1351_v1  ;;  %v1369_v4 = vcombine.high %v2016_v54, %v2036_v47  ;;  %v1366_v1 = vcombine.low %v2011_v62, %v2031_v51 }
  0x5d   : > { %854 = vmatprep.subr.bf16.mxu1 %v1353_v18  ;;  %v1368_v18 = vcombine.low %v2016_v54, %v2036_v47 }
  0x5f   : > { %814 = vmatpush1.bf16.msra.mxu0 %v1350_v2  ;;  %v1375_v2 = vcombine.high %v2051_v50, %v2071_v43 }
  0x60   : > { %855 = vmatpush1.bf16.msra.mxu1 %v1352_v6  ;;  %815 = vmatprep.subr.bf16.mxu0 %v1359_v10  ;;  %v1377_v6 = vcombine.high %v2056_v46, %v2076_v39  ;;  %v1374_v10 = vcombine.low %v2051_v50, %v2071_v43 }
  0x61   : > { %856 = vmatprep.subr.bf16.mxu1 %v1361_v14  ;;  %v1376_v14 = vcombine.low %v2056_v46, %v2076_v39  ;;  %v1579_v39 = vld [vmem:[%s2684_s2 + $0x70] sm:$0xff] (%p148_p0)  }
  0x63   : > { %816 = vmatpush1.bf16.msra.mxu0 %v1358_v11  ;;  %v1383_v11 = vcombine.high %v2091_v42, %v2111_v35 }
  0x64   : > { %857 = vmatpush1.bf16.msra.mxu1 %v1360_v0  ;;  %817 = vmatprep.subr.bf16.mxu0 %v1367_v3  ;;  %v1385_v0 = vcombine.high %v2096_v38, %v2116_v31  ;;  %v1382_v3 = vcombine.low %v2091_v42, %v2111_v35  ;;  %v1582_v42 = vld [vmem:[%s2684_s2 + $0x38] sm:$0xff] (%p148_p0)  }
  0x65   : > { %858 = vmatprep.subr.bf16.mxu1 %v1369_v4  ;;  %v1384_v4 = vcombine.low %v2096_v38, %v2116_v31  ;;  %v1577_v31 = vld [vmem:[%s2684_s2 + $0x68] sm:$0xff] (%p148_p0)  }
  0x66   :  { %v1578_v38 = vld [vmem:[%s2684_s2 + $0x28] sm:$0xff] (%p148_p0)  }
  0x67   : > { %818 = vmatpush1.bf16.msra.mxu0 %v1366_v1  ;;  %v1391_v1 = vcombine.high %v2131_v34, %v2151_v27 }
  0x68   : > { %859 = vmatpush1.bf16.msra.mxu1 %v1368_v18  ;;  %819 = vmatprep.subr.bf16.mxu0 %v1375_v2  ;;  %v1393_v18 = vcombine.high %v2136_v30, %v2938_v23  ;;  %v1390_v2 = vcombine.low %v2131_v34, %v2151_v27  ;;  %v1573_v27 = vld [vmem:[%s2684_s2 + $0x58] sm:$0xff] (%p148_p0)  }
  0x69   : > { %860 = vmatprep.subr.bf16.mxu1 %v1377_v6  ;;  %v1392_v6 = vcombine.low %v2136_v30, %v2938_v23  ;;  %v1576_v30 = vld [vmem:[%s2684_s2 + $0x20] sm:$0xff] (%p148_p0)  }
  0x6b   : > { %820 = vmatpush1.bf16.msra.mxu0 %v1374_v10  ;;  %v1399_v10 = vcombine.high %v2171_v26, %v2942_v19 }
  0x6c   : > { %861 = vmatpush1.bf16.msra.mxu1 %v1376_v14  ;;  %821 = vmatprep.subr.bf16.mxu0 %v1383_v11  ;;  %v1401_v14 = vcombine.high %v2939_v22, %v2945_v15  ;;  %v1398_v11 = vcombine.low %v2171_v26, %v2942_v19  ;;  %v1572_v26 = vld [vmem:[%s2684_s2 + $0x10] sm:$0xff] (%p148_p0)  }
  0x6d   : > { %862 = vmatprep.subr.bf16.mxu1 %v1385_v0  ;;  %v1400_v0 = vcombine.low %v2939_v22, %v2945_v15 }
  0x6f   : > { %822 = vmatpush1.bf16.msra.mxu0 %v1382_v3  ;;  %v2957_v3 = vld [vmem:[#allocation80_spill] sm:$0xff] }
  0x70   : > { %863 = vmatpush1.bf16.msra.mxu1 %v1384_v4  ;;  %823 = vmatprep.subr.bf16.mxu0 %v1391_v1  ;;  %v2958_v4 = vmov %v2957_v3  ;;  %v1407_v8 = vcombine.high %v2959_v5, %v2957_v3  ;;  %v2960_v1 = vld [vmem:[#allocation81_spill] sm:$0xff] }
  0x71   : > { %864 = vmatprep.subr.bf16.mxu1 %v1393_v18  ;;  %v1409_v12 = vcombine.high %v2961_v9, %v2960_v1  ;;  %v1406_v18 = vcombine.low %v2959_v5, %v2958_v4  ;;  %v2968_v4 = vld [vmem:[#allocation10_spill] sm:$0xff] }
  0x72   : > { %v2969_v5 = vld [vmem:[#allocation6_spill] sm:$0xff] }
  0x73   : > { %824 = vmatpush1.bf16.msra.mxu0 %v1390_v2  ;;  %v1408_v2 = vcombine.low %v2961_v9, %v2960_v1  ;;  %v2967_v1 = vld [vmem:[#allocation5_spill] sm:$0xff]  ;;  %v1301_v9 = vcombine.high %v2969_v5, %v2968_v4 }
  0x74   : > { %865 = vmatpush1.bf16.msra.mxu1 %v1392_v6  ;;  %825 = vmatprep.subr.bf16.mxu0 %v1399_v10  ;;  %v2962_v6 = vld [vmem:[#allocation88_spill] sm:$0xff]  ;;  %v2964_v10 = vld [vmem:[#allocation89_spill] sm:$0xff] }
  0x75   : > { %866 = vmatprep.subr.bf16.mxu1 %v1401_v14  ;;  %v1415_v15 = vcombine.high %v2963_v13, %v2962_v6  ;;  %v1417_v3 = vcombine.high %v2965_v16, %v2964_v10  ;;  %v1414_v14 = vcombine.low %v2963_v13, %v2962_v6  ;;  %v2974_v13 = vld [vmem:[#allocation18_spill] sm:$0xff] }
  0x77   : > { %826 = vmatpush1.bf16.msra.mxu0 %v1398_v11  ;;  %v1416_v11 = vcombine.low %v2965_v16, %v2964_v10  ;;  %v2975_v16 = vld [vmem:[#allocation14_spill] sm:$0xff] }
  0x78   : > { %867 = vmatpush1.bf16.msra.mxu1 %v1400_v0  ;;  %827 = vmatprep.subr.bf16.mxu0 %v1407_v8  ;;  %v2966_v0 = vld [vmem:[#allocation9_spill] sm:$0xff]  ;;  %v1309_v19 = vcombine.high %v2975_v16, %v2974_v13 }
  0x79   : > { %868 = vmatprep.subr.bf16.mxu1 %v1409_v12  ;;  %v1299_v8 = vcombine.high %v2967_v1, %v2966_v0  ;;  %v2970_v12 = vld [vmem:[#allocation94_spill] sm:$0xff] }
  0x7a   : > { %v2449_v17 = vpack.c.bf16 %v2970_v12, %v2970_v12  ;;  %v2977_v12 = vld [vmem:[#allocation21_spill] sm:$0xff] }
  0x7b   : > { %828 = vmatpush1.bf16.msra.mxu0 %v1406_v18  ;;  %v1298_v18 = vcombine.low %v2967_v1, %v2966_v0  ;;  %v2979_v0 = vld [vmem:[#allocation22_spill] sm:$0xff] }
  0x7c   : > { %869 = vmatpush1.bf16.msra.mxu1 %v1408_v2  ;;  %829 = vmatprep.subr.bf16.mxu0 %v1415_v15  ;;  %v1300_v2 = vcombine.low %v2969_v5, %v2968_v4  ;;  %v2971_v15 = vld [vmem:[#allocation17_spill] sm:$0xff]  ;;  %v2981_v4 = vld [vmem:[#allocation28_spill] sm:$0xff] }
  0x7d   : > { %870 = vmatprep.subr.bf16.mxu1 %v1417_v3  ;;  %v2972_v3 = vld [vmem:[#allocation13_spill] sm:$0xff] }
  0x7e   : > { %v2973_v6 = vmov %v2972_v3  ;;  %v1307_v10 = vcombine.high %v2972_v3, %v2971_v15 }
  0x7f   : > { %830 = vmatpush1.bf16.msra.mxu0 %v1414_v14  ;;  %v1306_v14 = vcombine.low %v2973_v6, %v2971_v15  ;;  %v2983_v6 = vld [vmem:[#allocation29_spill] sm:$0xff] }
  0x80   : > { %871 = vmatpush1.bf16.msra.mxu1 %v1416_v11  ;;  %881 = vmatprep.subr.bf16.mxu0 %v1299_v8  ;;  %v1308_v11 = vcombine.low %v2975_v16, %v2974_v13  ;;  %v2976_v8 = vld [vmem:[#allocation25_spill] sm:$0xff] }
  0x81   : > { %922 = vmatprep.subr.bf16.mxu1 %v1301_v9  ;;  %v1315_v3 = vcombine.high %v2977_v12, %v2976_v8  ;;  %v2978_v9 = vld [vmem:[#allocation26_spill] sm:$0xff]  ;;  %v2993_v16 = vld [vmem:[#allocation37_spill] sm:$0xff] }
  0x82   : > { %832 = vmatmul.mubr.bf16.vlgmr.msra.gmra.mrb[0].mxu0 %v2449_v17  ;;  %v1317_v1 = vcombine.high %v2979_v0, %v2978_v9 }
  0x83   : > { %873 = vmatmul.mubr.bf16.vlgmr.msra.gmra.mrb[0].mxu1 %v2449_v17  ;;  %882 = vmatpush1.bf16.msra.mxu0 %v1298_v18  ;;  %v1314_v18 = vcombine.low %v2977_v12, %v2976_v8  ;;  %v2985_v8 = vld [vmem:[#allocation32_spill] sm:$0xff]  ;;  %v2988_v12 = vld [vmem:[#allocation33_spill] sm:$0xff] }
  0x84   : > { %923 = vmatpush1.bf16.msra.mxu1 %v1300_v2  ;;  %883 = vmatprep.subr.bf16.mxu0 %v1307_v10  ;;  %v1316_v2 = vcombine.low %v2979_v0, %v2978_v9  ;;  %v2980_v10 = vld [vmem:[#allocation30_spill] sm:$0xff] }
  0x85   : > { %924 = vmatprep.subr.bf16.mxu1 %v1309_v19  ;;  %913 = vmatprep.mubr.bf16.mxu0 %v2355_v7  ;;  %v1323_v5 = vcombine.high %v2981_v4, %v2980_v10  ;;  %v2982_v19 = vld [vmem:[#allocation31_spill] sm:$0xff] }
  0x86   : > { %954 = vmatprep.mubr.bf16.mxu1 %v2355_v7  ;;  %v1325_v13 = vcombine.high %v2983_v6, %v2982_v19  ;;  %v1322_v7 = vcombine.low %v2981_v4, %v2980_v10  ;;  %v2991_v10 = vld [vmem:[#allocation36_spill] sm:$0xff] }
  0x87   : > { %884 = vmatpush1.bf16.msra.mxu0 %v1306_v14  ;;  %v1324_v14 = vcombine.low %v2983_v6, %v2982_v19 }
  0x88   : > { %925 = vmatpush1.bf16.msra.mxu1 %v1308_v11  ;;  %885 = vmatprep.subr.bf16.mxu0 %v1315_v3  ;;  %v2984_v11 = vld [vmem:[#allocation34_spill] sm:$0xff]  ;;  %v2986_v3 = vld [vmem:[#allocation35_spill] sm:$0xff] }
  0x89   : > { %926 = vmatprep.subr.bf16.mxu1 %v1317_v1  ;;  %v1331_v0 = vcombine.high %v2985_v8, %v2984_v11  ;;  %v2987_v9 = vmov %v2986_v3  ;;  %v1333_v15 = vcombine.high %v2988_v12, %v2986_v3  ;;  %v1330_v1 = vcombine.low %v2985_v8, %v2984_v11  ;;  %v2995_v3 = vld [vmem:[#allocation40_spill] sm:$0xff]  ;;  %v2998_v11 = vld [vmem:[#allocation41_spill] sm:$0xff] }
  0x8a   : > { %v2996_v8 = vmov %v2995_v3 }
  0x8b   : > { %886 = vmatpush1.bf16.msra.mxu0 %v1314_v18  ;;  %v1332_v18 = vcombine.low %v2988_v12, %v2987_v9  ;;  %v3003_v12 = vld [vmem:[#allocation45_spill] sm:$0xff] }
  0x8c   : > { %927 = vmatpush1.bf16.msra.mxu1 %v1316_v2  ;;  %887 = vmatprep.subr.bf16.mxu0 %v1323_v5  ;;  %v2989_v2 = vld [vmem:[#allocation38_spill] sm:$0xff]  ;;  %v2992_v5 = vld [vmem:[#allocation39_spill] sm:$0xff] }
  0x8d   : > { %928 = vmatprep.subr.bf16.mxu1 %v1325_v13  ;;  %v2990_v4 = vmov %v2989_v2  ;;  %v1339_v6 = vcombine.high %v2991_v10, %v2989_v2  ;;  %v1341_v19 = vcombine.high %v2993_v16, %v2992_v5 }
  0x8e   : > { %v1338_v13 = vcombine.low %v2991_v10, %v2990_v4  ;;  %v3001_v10 = vld [vmem:[#allocation44_spill] sm:$0xff] }
  0x8f   : > { %888 = vmatpush1.bf16.msra.mxu0 %v1322_v7  ;;  %v1340_v7 = vcombine.low %v2993_v16, %v2992_v5  ;;  %v3032_v16 = vld [vmem:[#allocation78_spill] sm:$0xff] }
  0x90   : > { %929 = vmatpush1.bf16.msra.mxu1 %v1324_v14  ;;  %889 = vmatprep.subr.bf16.mxu0 %v1331_v0  ;;  %v2994_v14 = vld [vmem:[#allocation42_spill] sm:$0xff]  ;;  %v2997_v0 = vld [vmem:[#allocation43_spill] sm:$0xff] }
  0x91   : > { %930 = vmatprep.subr.bf16.mxu1 %v1333_v15  ;;  %v1347_v9 = vcombine.high %v2995_v3, %v2994_v14  ;;  %v1349_v2 = vcombine.high %v2998_v11, %v2997_v0  ;;  %v1346_v15 = vcombine.low %v2996_v8, %v2994_v14  ;;  %v3006_v14 = vld [vmem:[#allocation48_spill] sm:$0xff] }
  0x93   : > { %890 = vmatpush1.bf16.msra.mxu0 %v1330_v1  ;;  %v1348_v1 = vcombine.low %v2998_v11, %v2997_v0  ;;  %v3008_v11 = vld [vmem:[#allocation49_spill] sm:$0xff] }
  0x94   : > { %931 = vmatpush1.bf16.msra.mxu1 %v1332_v18  ;;  %891 = vmatprep.subr.bf16.mxu0 %v1339_v6  ;;  %v2999_v18 = vld [vmem:[#allocation46_spill] sm:$0xff]  ;;  %v3002_v6 = vld [vmem:[#allocation47_spill] sm:$0xff] }
  0x95   : > { %932 = vmatprep.subr.bf16.mxu1 %v1341_v19  ;;  %v3000_v4 = vmov %v2999_v18  ;;  %v1355_v5 = vcombine.high %v3001_v10, %v2999_v18  ;;  %v1357_v3 = vcombine.high %v3003_v12, %v3002_v6 }
  0x96   : > { %v1354_v19 = vcombine.low %v3001_v10, %v3000_v4  ;;  %v3010_v4 = vld [vmem:[#allocation52_spill] sm:$0xff]  ;;  %v3012_v10 = vld [vmem:[#allocation53_spill] sm:$0xff] }
  0x97   : > { %892 = vmatpush1.bf16.msra.mxu0 %v1338_v13  ;;  %v1356_v13 = vcombine.low %v3003_v12, %v3002_v6 }
  0x98   : > { %933 = vmatpush1.bf16.msra.mxu1 %v1340_v7  ;;  %893 = vmatprep.subr.bf16.mxu0 %v1347_v9  ;;  %v3004_v7 = vld [vmem:[#allocation50_spill] sm:$0xff]  ;;  %v3007_v9 = vld [vmem:[#allocation51_spill] sm:$0xff] }
  0x99   : > { %934 = vmatprep.subr.bf16.mxu1 %v1349_v2  ;;  %v3005_v8 = vmov %v3004_v7  ;;  %v1363_v0 = vcombine.high %v3006_v14, %v3004_v7  ;;  %v1365_v18 = vcombine.high %v3008_v11, %v3007_v9 }
  0x9a   : > { %v1362_v2 = vcombine.low %v3006_v14, %v3005_v8  ;;  %v3014_v8 = vld [vmem:[#allocation56_spill] sm:$0xff]  ;;  %v3027_v14 = vld [vmem:[#allocation70_spill] sm:$0xff] }
  0x9b   : > { %894 = vmatpush1.bf16.msra.mxu0 %v1346_v15  ;;  %v1364_v15 = vcombine.low %v3008_v11, %v3007_v9  ;;  %v3016_v11 = vld [vmem:[#allocation57_spill] sm:$0xff] }
  0x9c   : > { %935 = vmatpush1.bf16.msra.mxu1 %v1348_v1  ;;  %895 = vmatprep.subr.bf16.mxu0 %v1355_v5  ;;  %v3009_v1 = vld [vmem:[#allocation54_spill] sm:$0xff]  ;;  %v3011_v5 = vld [vmem:[#allocation55_spill] sm:$0xff] }
  0x9d   : > { %936 = vmatprep.subr.bf16.mxu1 %v1357_v3  ;;  %v1371_v6 = vcombine.high %v3010_v4, %v3009_v1  ;;  %v1373_v7 = vcombine.high %v3012_v10, %v3011_v5  ;;  %v1370_v3 = vcombine.low %v3010_v4, %v3009_v1  ;;  %v3018_v1 = vld [vmem:[#allocation60_spill] sm:$0xff] }
  0x9f   : > { %896 = vmatpush1.bf16.msra.mxu0 %v1354_v19  ;;  %v1372_v19 = vcombine.low %v3012_v10, %v3011_v5  ;;  %v3020_v5 = vld [vmem:[#allocation61_spill] sm:$0xff] }
  0xa0   : > { %937 = vmatpush1.bf16.msra.mxu1 %v1356_v13  ;;  %897 = vmatprep.subr.bf16.mxu0 %v1363_v0  ;;  %v3013_v13 = vld [vmem:[#allocation58_spill] sm:$0xff]  ;;  %v3015_v0 = vld [vmem:[#allocation59_spill] sm:$0xff] }
  0xa1   : > { %938 = vmatprep.subr.bf16.mxu1 %v1365_v18  ;;  %v1379_v9 = vcombine.high %v3014_v8, %v3013_v13  ;;  %v1381_v12 = vcombine.high %v3016_v11, %v3015_v0  ;;  %v1378_v18 = vcombine.low %v3014_v8, %v3013_v13  ;;  %v3022_v8 = vld [vmem:[#allocation64_spill] sm:$0xff] }
  0xa3   : > { %898 = vmatpush1.bf16.msra.mxu0 %v1362_v2  ;;  %v1380_v2 = vcombine.low %v3016_v11, %v3015_v0  ;;  %v3024_v11 = vld [vmem:[#allocation65_spill] sm:$0xff] }
  0xa4   : > { %939 = vmatpush1.bf16.msra.mxu1 %v1364_v15  ;;  %899 = vmatprep.subr.bf16.mxu0 %v1371_v6  ;;  %v3017_v15 = vld [vmem:[#allocation62_spill] sm:$0xff]  ;;  %v3019_v6 = vld [vmem:[#allocation63_spill] sm:$0xff] }
  0xa5   : > { %940 = vmatprep.subr.bf16.mxu1 %v1373_v7  ;;  %v1387_v4 = vcombine.high %v3018_v1, %v3017_v15  ;;  %v1389_v10 = vcombine.high %v3020_v5, %v3019_v6  ;;  %v1386_v7 = vcombine.low %v3018_v1, %v3017_v15 }
  0xa7   : > { %900 = vmatpush1.bf16.msra.mxu0 %v1370_v3  ;;  %v1388_v3 = vcombine.low %v3020_v5, %v3019_v6  ;;  %v3029_v6 = vld [vmem:[#allocation71_spill] sm:$0xff] }
  0xa8   : > { %941 = vmatpush1.bf16.msra.mxu1 %v1372_v19  ;;  %901 = vmatprep.subr.bf16.mxu0 %v1379_v9  ;;  %v3021_v19 = vld [vmem:[#allocation67_spill] sm:$0xff]  ;;  %v3023_v9 = vld [vmem:[#allocation68_spill] sm:$0xff] }
  0xa9   : > { %942 = vmatprep.subr.bf16.mxu1 %v1381_v12  ;;  %v1395_v0 = vcombine.high %v3022_v8, %v3021_v19  ;;  %v1397_v13 = vcombine.high %v3024_v11, %v3023_v9  ;;  %v1394_v12 = vcombine.low %v3022_v8, %v3021_v19 }
  0xab   : > { %902 = vmatpush1.bf16.msra.mxu0 %v1378_v18  ;;  %v1396_v18 = vcombine.low %v3024_v11, %v3023_v9  ;;  %v3034_v11 = vld [vmem:[#allocation79_spill] sm:$0xff] }
  0xac   : > { %943 = vmatpush1.bf16.msra.mxu1 %v1380_v2  ;;  %903 = vmatprep.subr.bf16.mxu0 %v1387_v4  ;;  %v3025_v2 = vld [vmem:[#allocation74_spill] sm:$0xff]  ;;  %v3028_v4 = vld [vmem:[#allocation75_spill] sm:$0xff] }
  0xad   : > { %944 = vmatprep.subr.bf16.mxu1 %v1389_v10  ;;  %v3026_v1 = vmov %v3025_v2  ;;  %v1403_v5 = vcombine.high %v3027_v14, %v3025_v2  ;;  %v1405_v15 = vcombine.high %v3029_v6, %v3028_v4 }
  0xae   : > { %v1402_v10 = vcombine.low %v3027_v14, %v3026_v1 }
  0xaf   : > { %904 = vmatpush1.bf16.msra.mxu0 %v1386_v7  ;;  %v1404_v7 = vcombine.low %v3029_v6, %v3028_v4  ;;  %v3037_v4 = vld [vmem:[#allocation86_spill] sm:$0xff]  ;;  %v3038_v6 = vld [vmem:[#allocation91_spill] sm:$0xff] }
  0xb0   : > { %945 = vmatpush1.bf16.msra.mxu1 %v1388_v3  ;;  %905 = vmatprep.subr.bf16.mxu0 %v1395_v0  ;;  %v3030_v3 = vld [vmem:[#allocation82_spill] sm:$0xff]  ;;  %v3033_v0 = vld [vmem:[#allocation83_spill] sm:$0xff] }
  0xb1   : > { %946 = vmatprep.subr.bf16.mxu1 %v1397_v13  ;;  %v3031_v8 = vmov %v3030_v3  ;;  %v1411_v9 = vcombine.high %v3032_v16, %v3030_v3  ;;  %v1413_v2 = vcombine.high %v3034_v11, %v3033_v0  ;;  %v3039_v3 = vld [vmem:[#allocation87_spill] sm:$0xff] }
  0xb2   : > { %v1410_v13 = vcombine.low %v3032_v16, %v3031_v8  ;;  %v3040_v14 = vmov %v3039_v3 }
  0xb3   : > { %906 = vmatpush1.bf16.msra.mxu0 %v1394_v12  ;;  %v1412_v12 = vcombine.low %v3034_v11, %v3033_v0 }
  0xb4   : > { %947 = vmatpush1.bf16.msra.mxu1 %v1396_v18  ;;  %907 = vmatprep.subr.bf16.mxu0 %v1403_v5  ;;  %v3035_v18 = vld [vmem:[#allocation90_spill] sm:$0xff] }
  0xb5   : > { %948 = vmatprep.subr.bf16.mxu1 %v1405_v15  ;;  %v3036_v1 = vmov %v3035_v18  ;;  %v1419_v5 = vcombine.high %v3037_v4, %v3035_v18  ;;  %v1421_v15 = vcombine.high %v3039_v3, %v3038_v6 }
  0xb7   : > { %908 = vmatpush1.bf16.msra.mxu0 %v1402_v10  ;;  %v1418_v10 = vcombine.low %v3037_v4, %v3036_v1 }
  0xb8   : > { %949 = vmatpush1.bf16.msra.mxu1 %v1404_v7  ;;  %909 = vmatprep.subr.bf16.mxu0 %v1411_v9  ;;  %v1420_v7 = vcombine.low %v3040_v14, %v3038_v6  ;;  %v966_v9 = vld [vmem:[%s965_s14] sm:$0xff] }
  0xb9   : > { %950 = vmatprep.subr.bf16.mxu1 %v1413_v2  ;;  %v967_v2 = vld [vmem:[%s965_s14 + $0x8] sm:$0xff] }
  0xba   : > { %v970_v18 = vunpack.c.l.bf16 %v967_v2  ;;  %v971_v16 = vunpack.c.h.bf16 %v967_v2 }
  0xbb   : > { %910 = vmatpush1.bf16.msra.mxu0 %v1410_v13  ;;  %v968_v13 = vunpack.c.l.bf16 %v966_v9 }
  0xbc   : > { %951 = vmatpush1.bf16.msra.mxu1 %v1412_v12  ;;  %911 = vmatprep.subr.bf16.mxu0 %v1419_v5  ;;  %v969_v12 = vunpack.c.h.bf16 %v966_v9 }
  0xbd   : > { %952 = vmatprep.subr.bf16.mxu1 %v1421_v15 }
  0xbf   : > { %912 = vmatpush1.bf16.msra.mxu0 %v1418_v10 }
  0xc0   : > { %953 = vmatpush1.bf16.msra.mxu1 %v1420_v7 }
  0xc2   : > { %914 = vmatmul.mubr.bf16.vlgmr.msra.gmra.mrb[4].mxu0 %v2449_v17 }
  0xc3   : > { %955 = vmatmul.mubr.bf16.vlgmr.msra.gmra.mrb[4].mxu1 %v2449_v17 }
 0x155   : > { %v833_v3 = vpop.f32.mrb[0].mxu0 }
 0x156   : > { %v874_v0 = vpop.f32.mrb[0].mxu1  ;;  %v972_v5 = vadd.f32 %v968_v13, %v833_v3  ;;  %v835_v15 = vpop.f32.mrb[1].mxu0 }
 0x157   : > { %v876_v10 = vpop.f32.mrb[1].mxu1  ;;  %v973_v7 = vadd.f32 %v969_v12, %v835_v15  ;;  %v837_v1 = vpop.f32.mrb[2].mxu0  ;;  %v974_v8 = vadd.f32 %v970_v18, %v874_v0 }
 0x158   : > { %v878_v4 = vpop.f32.mrb[2].mxu1  ;;  %v989_v6 = vmul.f32 0.5, %v972_v5  ;;  %v838_v17 = vpop.f32.mrb[3].mxu0  ;;  %v975_v19 = vadd.f32 %v971_v16, %v876_v10 }
 0x159   : > { %v879_v11 = vpop.f32.mrb[3].mxu1  ;;  %v993_v14 = vmul.f32 0.5, %v973_v7 }
 0x15a   : > { %1547 = vtanh.f32 %v989_v6  ;;  %v998_v9 = vmul.f32 0.5, %v975_v19  ;;  %v3041_v11 = vld [vmem:[#allocation93_spill] sm:$0xff] }
 0x15b   : > { %1549 = vtanh.f32 %v993_v14 }
 0x15c   : > { %1551 = vtanh.f32 %v974_v8 }
 0x15d   : > { %1553 = vtanh.f32 %v998_v9 }
 0x164   : > { %v1548_v20 = vpop.eup %1547 }
 0x165   : > { %v1550_v21 = vpop.eup %1549  ;;  %v991_v13 = vadd.f32 1.0, %v1548_v20  ;;  %v979_v20 = vld [vmem:[%s978_s21 + $0x10] sm:$0xff] }
 0x166   : > { %v1552_v3 = vpop.eup %1551  ;;  %v995_v22 = vadd.f32 1.0, %v1550_v21  ;;  %v980_v21 = vld [vmem:[%s978_s21 + $0x18] sm:$0xff]  ;;  %v982_v19 = vunpack.c.h.bf16 %v979_v20 }
 0x167   : > { %v992_v1 = vmul.f32 0.5, %v991_v13  ;;  %v1554_v14 = vpop.eup %1553  ;;  %v983_v2 = vunpack.c.l.bf16 %v980_v21 }
 0x168   : > { %v996_v4 = vmul.f32 0.5, %v995_v22  ;;  %v1000_v8 = vadd.f32 1.0, %v1554_v14  ;;  %v981_v22 = vunpack.c.l.bf16 %v979_v20 }
 0x169   : > { %v1003_v0 = vmul.f32 %v1552_v3, %v992_v1 }
 0x16a   : > { %v1002_v12 = vmul.f32 %v3041_v11, %v996_v4  ;;  %v1001_v16 = vmul.f32 0.5, %v1000_v8  ;;  %v984_v8 = vunpack.c.h.bf16 %v980_v21 }
 0x16c   : > { %v1004_v7 = vadd.f32 %v1003_v0, %v1002_v12  }
 0x16e   : > { %1555 = vtanh.f32 %v1004_v7 }
 0x178   : > { %v1556_v6 = vpop.eup %1555 }
 0x179   : > { %v1006_v18 = vmul.f32 %v1556_v6, %v1001_v16  }
 0x17b   : > { %1028 = vst [vmem:[%s1027_s16] sm:$0xff] %v1006_v18  ;;  %v1570_v18 = vld [vmem:[%s2684_s2 + $0x8] sm:$0xff] (%p148_p0)  }
 0x195   : > { %v915_v5 = vpop.f32.mrb[4].mxu0 }
 0x196   : > { %v956_v15 = vpop.f32.mrb[4].mxu1  ;;  %v985_v10 = vadd.f32 %v981_v22, %v915_v5  ;;  %v917_v17 = vpop.f32.mrb[5].mxu0 }
 0x197   : > { %v958_v9 = vpop.f32.mrb[5].mxu1  ;;  %v986_v13 = vadd.f32 %v982_v19, %v917_v17  ;;  %v919_v3 = vpop.f32.mrb[6].mxu0  ;;  %v987_v11 = vadd.f32 %v983_v2, %v956_v15 }
 0x198   : > { %v960_v1 = vpop.f32.mrb[6].mxu1  ;;  %v1007_v4 = vmul.f32 0.5, %v985_v10  ;;  %v920_v0 = vpop.f32.mrb[7].mxu0  ;;  %v988_v16 = vadd.f32 %v984_v8, %v958_v9  ;;  %v3042_v3 = vld [vmem:[#allocation92_spill] sm:$0xff] }
 0x199   : > { %v961_v12 = vpop.f32.mrb[7].mxu1  ;;  %v1011_v14 = vmul.f32 0.5, %v986_v13  ;;  %v1569_v1 = vld [vmem:[%s2684_s2 + $0x48] sm:$0xff] (%p148_p0)  }
 0x19a   : > { %1557 = vtanh.f32 %v1007_v4  ;;  %v1016_v6 = vmul.f32 0.5, %v988_v16 }
 0x19b   : > { %1559 = vtanh.f32 %v1011_v14 }
 0x19c   : > { %1561 = vtanh.f32 %v987_v11 }
 0x19d   : > { %1563 = vtanh.f32 %v1016_v6 }
 0x1a4   : > { %v1558_v20 = vpop.eup %1557 }
 0x1a5   : > { %v1560_v23 = vpop.eup %1559  ;;  %v1009_v22 = vadd.f32 1.0, %v1558_v20 }
 0x1a6   : > { %v1562_v5 = vpop.eup %1561  ;;  %v1013_v24 = vadd.f32 1.0, %v1560_v23  ;;  %v1567_v23 = vld [vmem:[%s2684_s2 + $0x40] sm:$0xff] (%p148_p0)  }
 0x1a7   : > { %v1010_v19 = vmul.f32 0.5, %v1009_v22  ;;  %v1564_v15 = vpop.eup %1563  ;;  %1451 = vmatprep.subr.bf16.mxu0 (%p148_p0), %v1567_v23  ;;  %1491 = vmatprep.subr.bf16.mxu1 (%p148_p0), %v1567_v23 }
 0x1a8   : > { %v1014_v17 = vmul.f32 0.5, %v1013_v24  ;;  %v1018_v21 = vadd.f32 1.0, %v1564_v15  ;;  %v1568_v24 = vld [vmem:[%s2684_s2] sm:$0xff] (%p148_p0)  }
 0x1a9   : > { %v1021_v10 = vmul.f32 %v1562_v5, %v1010_v19  ;;  %1452 = vmatpush3.bf16.msra.mxu0 (%p148_p0), %v1568_v24  ;;  %1499 = vmatpush3.bf16.msra.mxu1 (%p148_p0), %v1568_v24 }
 0x1aa   : > { %v1020_v2 = vmul.f32 %v3042_v3, %v1014_v17  ;;  %v1019_v9 = vmul.f32 0.5, %v1018_v21  ;;  %1453 = vmatprep.subr.bf16.mxu0 (%p148_p0), %v1569_v1  ;;  %1492 = vmatprep.subr.bf16.mxu1 (%p148_p0), %v1569_v1 }
 0x1ac   : > { %v1022_v2 = vadd.f32 %v1021_v10, %v1020_v2  }
 0x1ad   :  { %1454 = vmatpush3.bf16.msra.mxu0 (%p148_p0), %v1570_v18  ;;  %1500 = vmatpush3.bf16.msra.mxu1 (%p148_p0), %v1570_v18 }
 0x1ae   : > { %1565 = vtanh.f32 %v1022_v2  ;;  %1455 = vmatprep.subr.bf16.mxu0 (%p148_p0), %v1571_v25  ;;  %1493 = vmatprep.subr.bf16.mxu1 (%p148_p0), %v1571_v25 }
 0x1b1   :  { %1456 = vmatpush3.bf16.msra.mxu0 (%p148_p0), %v1572_v26  ;;  %1501 = vmatpush3.bf16.msra.mxu1 (%p148_p0), %v1572_v26 }
 0x1b2   :  { %1457 = vmatprep.subr.bf16.mxu0 (%p148_p0), %v1573_v27  ;;  %1494 = vmatprep.subr.bf16.mxu1 (%p148_p0), %v1573_v27 }
 0x1b5   :  { %150 = sbr.rel (!%p148_p0) target bundleno = 57 (0x39), region = 47  ;;  %1458 = vmatpush3.bf16.msra.mxu0 (%p148_p0), %v1574_v28  ;;  %1502 = vmatpush3.bf16.msra.mxu1 (%p148_p0), %v1574_v28 }
 0x1b6   :  { %1459 = vmatprep.subr.bf16.mxu0 (%p148_p0), %v1575_v29  ;;  %1495 = vmatprep.subr.bf16.mxu1 (%p148_p0), %v1575_v29 }
 0x1b8   : > { %v1566_v13 = vpop.eup %1565 }
 0x1b9   : > { %v1024_v3 = vmul.f32 %v1566_v13, %v1019_v9   ;;  %1460 = vmatpush3.bf16.msra.mxu0 (%p148_p0), %v1576_v30  ;;  %1503 = vmatpush3.bf16.msra.mxu1 (%p148_p0), %v1576_v30 }
 0x1ba   :  { %1461 = vmatprep.subr.bf16.mxu0 (%p148_p0), %v1577_v31  ;;  %1496 = vmatprep.subr.bf16.mxu1 (%p148_p0), %v1577_v31 }
 0x1bb   : > { %1032 = vst [vmem:[%s1031_s23 + $0x8] sm:$0xff] %v1024_v3 }
 0x1bd   :  { %1462 = vmatpush3.bf16.msra.mxu0 %v1578_v38  ;;  %1504 = vmatpush3.bf16.msra.mxu1 %v1578_v38 }
 0x1be   :  { %1463 = vmatprep.subr.bf16.mxu0 %v1579_v39  ;;  %1497 = vmatprep.subr.bf16.mxu1 %v1579_v39 }
 0x1c1   :  { %1464 = vmatpush3.bf16.msra.mxu0 %v1580_v40  ;;  %1505 = vmatpush3.bf16.msra.mxu1 %v1580_v40 }
 0x1c2   :  { %v1034_v32 = vld [vmem:[#allocation2 + $0x8] sm:$0xff]  ;;  %v1036_v33 = vld [vmem:[#allocation2 + $0x18] sm:$0xff]  ;;  %v1033_v43 = vld [vmem:[#allocation2] sm:$0xff]  ;;  %1465 = vmatprep.subr.bf16.mxu0 %v1581_v41  ;;  %1498 = vmatprep.subr.bf16.mxu1 %v1581_v41 }
 0x1c3   :  { %v1042_v34 = vld [vmem:[#allocation2 + $0x48] sm:$0xff]  ;;  %v1050_v35 = vpack.c.bf16 %v1036_v33, %v1034_v32  ;;  %v1044_v36 = vld [vmem:[#allocation2 + $0x58] sm:$0xff]  ;;  %v1035_v44 = vld [vmem:[#allocation2 + $0x10] sm:$0xff] }
 0x1c4   :  { %v1054_v37 = vpack.c.bf16 %v1044_v36, %v1042_v34  ;;  %v1041_v45 = vld [vmem:[#allocation2 + $0x40] sm:$0xff]  ;;  %v1043_v46 = vld [vmem:[#allocation2 + $0x50] sm:$0xff]  ;;  %v1038_v47 = vld [vmem:[#allocation2 + $0x28] sm:$0xff]  ;;  %v1049_v51 = vpack.c.bf16 %v1035_v44, %v1033_v43 }
 0x1c5   :  { %1224 = vmatprep.mubr.bf16.mxu0 %v1050_v35  ;;  %v1040_v48 = vld [vmem:[#allocation2 + $0x38] sm:$0xff]  ;;  %v1046_v49 = vld [vmem:[#allocation2 + $0x68] sm:$0xff]  ;;  %v1053_v52 = vpack.c.bf16 %v1043_v46, %v1041_v45  ;;  %1466 = vmatpush3.bf16.msra.mxu0 %v1582_v42  ;;  %v1037_v55 = vld [vmem:[#allocation2 + $0x20] sm:$0xff] }
 0x1c6   :  { %1240 = vmatprep.mubr.bf16.mxu1 %v1054_v37  ;;  %v1048_v50 = vld [vmem:[#allocation2 + $0x78] sm:$0xff]  ;;  %1506 = vmatpush3.bf16.msra.mxu1 %v1582_v42  ;;  %v1052_v53 = vpack.c.bf16 %v1040_v48, %v1038_v47  ;;  %v1039_v56 = vld [vmem:[#allocation2 + $0x30] sm:$0xff]  ;;  %v1045_v57 = vld [vmem:[#allocation2 + $0x60] sm:$0xff] }
 0x1c7   :  { %v1056_v54 = vpack.c.bf16 %v1048_v50, %v1046_v49  ;;  %v1047_v58 = vld [vmem:[#allocation2 + $0x70] sm:$0xff]  ;;  %v1051_v59 = vpack.c.bf16 %v1039_v56, %v1037_v55 }
 0x1c8   :  { %1225 = vmatmul.mubr.bf16.vlgmr.msra.gmra.mrb[0].mxu0 %v1049_v51  ;;  %v1055_v60 = vpack.c.bf16 %v1047_v58, %v1045_v57 }
 0x1c9   :  { %1241 = vmatmul.mubr.bf16.vlgmr.msra.gmra.mrb[0].mxu1 %v1053_v52  ;;  %1232 = vmatprep.mubr.bf16.mxu0 %v1052_v53 }
 0x1ca   :  { %1248 = vmatprep.mubr.bf16.mxu1 %v1056_v54 }
 0x1d0   :  { %1233 = vmatmul.mubr.bf16.gmra.mrb[4].mxu0 %v1051_v59 }
 0x1d1   :  { %1249 = vmatmul.mubr.bf16.gmra.mrb[4].mxu1 %v1055_v60 }
 0x29b   :  { %v1467_v61 = vpop.f32.mrb[0].mxu0 }
 0x29c   :  { %v1479_v62 = vpop.f32.mrb[0].mxu1  ;;  %v1468_v7 = vpop.f32.mrb[1].mxu0 }
 0x29d   :  { %v1480_v4 = vpop.f32.mrb[1].mxu1  ;;  %v1469_v0 = vadd.f32 %v1468_v7, %v1467_v61  ;;  %v1470_v12 = vpop.f32.mrb[2].mxu0 }
 0x29e   :  { %v1481_v11 = vadd.f32 %v1480_v4, %v1479_v62  ;;  %v1482_v14 = vpop.f32.mrb[2].mxu1  ;;  %v1471_v8 = vpop.f32.mrb[3].mxu0 }
 0x29f   :  { %v1483_v16 = vpop.f32.mrb[3].mxu1  ;;  %v1227_v6 = vadd.f32 %v1469_v0, %v1430_v63  ;;  %v1472_v22 = vadd.f32 %v1471_v8, %v1470_v12 }
 0x2a0   :  { %v1243_v20 = vadd.f32 %v1481_v11, %v1430_v63  ;;  %v1484_v5 = vadd.f32 %v1483_v16, %v1482_v14 }
 0x2a1   :  { %1257 = vst [vmem:[%s2686_s4] sm:$0xff] %v1227_v6  ;;  %v1230_v19 = vadd.f32 %v1472_v22, %v1430_v63 }
 0x2a2   :  { %1261 = vst [vmem:[%s2686_s4 + $0x20] sm:$0xff] %v1243_v20  ;;  %v1246_v17 = vadd.f32 %v1484_v5, %v1430_v63 }
 0x2a3   :  { %1258 = vst [vmem:[%s2686_s4 + $0x8] sm:$0xff] %v1230_v19  ;;  %v1473_v10 = vpop.f32.mrb[4].mxu0 }
 0x2a4   :  { %1262 = vst [vmem:[%s2686_s4 + $0x28] sm:$0xff] %v1246_v17  ;;  %v1485_v3 = vpop.f32.mrb[4].mxu1  ;;  %v1474_v2 = vpop.f32.mrb[5].mxu0 }
 0x2a5   :  { %v1486_v15 = vpop.f32.mrb[5].mxu1  ;;  %v1475_v21 = vadd.f32 %v1474_v2, %v1473_v10  ;;  %v1476_v13 = vpop.f32.mrb[6].mxu0 }
 0x2a6   :  { %v1487_v9 = vadd.f32 %v1486_v15, %v1485_v3  ;;  %v1488_v23 = vpop.f32.mrb[6].mxu1  ;;  %v1477_v24 = vpop.f32.mrb[7].mxu0 }
 0x2a7   :  { %v1489_v1 = vpop.f32.mrb[7].mxu1  ;;  %v1235_v18 = vadd.f32 %v1475_v21, %v1430_v63  ;;  %v1478_v26 = vadd.f32 %v1477_v24, %v1476_v13 }
 0x2a8   :  { %v1251_v25 = vadd.f32 %v1487_v9, %v1430_v63  ;;  %v1490_v27 = vadd.f32 %v1489_v1, %v1488_v23 }
 0x2a9   :  { %1259 = vst [vmem:[%s2686_s4 + $0x10] sm:$0xff] %v1235_v18  ;;  %v1238_v28 = vadd.f32 %v1478_v26, %v1430_v63 }
 0x2aa   :  { %1263 = vst [vmem:[%s2686_s4 + $0x30] sm:$0xff] %v1251_v25  ;;  %v1254_v29 = vadd.f32 %v1490_v27, %v1430_v63 }
 0x2ab   :  { %1260 = vst [vmem:[%s2686_s4 + $0x18] sm:$0xff] %v1238_v28 }
 0x2ac   :  { %1264 = vst [vmem:[%s2686_s4 + $0x38] sm:$0xff] %v1254_v29 }

// kernel: my_ner_forward.3
= control target key start
LH: loop header
LB: loop body
LE: loop exit
PB: predicated region body
PF: predicated region fallthrough
CT: control target
= control target key end

     0   :  { %10 = vsyncpa [#allocation4], 0  ;;  %s16457_s0 = inlined_call_operand.vmem [shape: bf16[8,8,1024], index: 0, kind: input, shape index: {}]   ;;  %s16458_s1 = inlined_call_operand.hbm [shape: bf16[1024,2176], index: 1, kind: input, shape index: {}]   ;;  %s16459_s2 = inlined_call_operand.hbm [shape: f32[1,384], index: 2, kind: input, shape index: {}]   ;;  %s16460_s3 = inlined_call_operand.hbm [shape: bf16[384,1024], index: 3, kind: input, shape index: {}]   ;;  %s16461_s4 = inlined_call_operand.hbm [shape: f32[1,1024], index: 4, kind: input, shape index: {}]   ;;  %s16462_s5 = inlined_call_operand.vmem [shape: bf16[8,8,1024], index: 5, kind: output, shape index: {}]  }
   0x1   :  { %11 = vsyncpa [#allocation6], 0 }
   0x2   :  { %12 = vsyncpa [#allocation9], 0  ;;  %s15259_s18 = smov [#allocation5]   ;;  %s15260_s20 = smov [#allocation3]  }
   0x3   :  { %s33_s19 = sshll.u32 %s15259_s18, 4  ;;  %s20_s21 = sshll.u32 %s15260_s20, 4  ;;  %s34_s19 = int_to_ptr.vmem [resolvable:$true] %s33_s19  ;;  %s15298_s21 = int_to_ptr.vmem [resolvable:$true] %s20_s21 }
   0x4   :  { %s15165_s24 = scalar_lea.hbm %s16459_s2, 48 }
   0x5   :  { %p15166_p0 = scmp.ne.s32.totalorder %s16459_s2, %s15165_s24  ;;  %p15169_p1 = scmp.lt.u32.totalorder %s15165_s24, %s16459_s2 }
   0x7   :  { %p15171_p2 = pnand %p15169_p1, %p15166_p0 }
   0x9   :  { %15174 = shalt.err (!%p15171_p2)
}
   0xa   :  { %s15175_s29 = scalar_lea.vmem %s34_s19, 48  ;;  %s15179_s30 = scalar_lea.vmem %s34_s19, 64 }
   0xb   :  { %p15176_p3 = scmp.ne.s32.totalorder %s34_s19, %s15175_s29  ;;  %p15180_p4 = scmp.lt.s32.totalorder %s34_s19, %s34_s19 }
   0xc   :  { %p15181_p5 = scmp.lt.s32.totalorder %s15179_s30, %s15175_s29 }
   0xe   :  { %p15182_p6 = por %p15181_p5, %p15180_p4 }
  0x10   :  { %p15183_p7 = pnand %p15182_p6, %p15176_p3 }
  0x12   :  { %15186 = shalt.err (!%p15183_p7)
}
  0x13   :  { %36 = dma.hbm_to_vmem [thread:$0]  %s16459_s2, 48, %s34_s19, [#allocation6]  }
  0x14   :  { %s15187_s10 = scalar_lea.hbm %s16458_s1, 139264 }
  0x15   :  { %p15188_p8 = scmp.ne.s32.totalorder %s16458_s1, %s15187_s10  ;;  %p15191_p9 = scmp.lt.u32.totalorder %s15187_s10, %s16458_s1 }
  0x17   :  { %p15193_p10 = pnand %p15191_p9, %p15188_p8 }
  0x19   :  { %15196 = shalt.err (!%p15193_p10)
}
  0x1a   :  { %s15197_s15 = scalar_lea.vmem %s15298_s21, 139264  ;;  %p15202_p12 = scmp.lt.s32.totalorder %s15298_s21, %s15298_s21 }
  0x1b   :  { %p15198_p11 = scmp.ne.s32.totalorder %s15298_s21, %s15197_s15  ;;  %p15203_p13 = scmp.lt.s32.totalorder %s15197_s15, %s15197_s15 }
  0x1d   :  { %p15204_p0 = por %p15203_p13, %p15202_p12 }
  0x1f   :  { %p15205_p1 = pnand %p15204_p0, %p15198_p11 }
  0x21   :  { %15208 = shalt.err (!%p15205_p1)
}
  0x22   :  { %s15261_s2 = smov 1088   ;;  %s15262_s16 = smov 68  }
  0x23   :  { %26 = dma.hbm_to_vmem [thread:$0]  %s16458_s1, 139264, %s15298_s21, [#allocation4], %s15261_s2, %s15261_s2, %s15262_s16  }
  0x24   :  { %s15263_s19 = smov [#allocation7]   ;;  %s15209_s24 = scalar_lea.hbm %s16460_s3, 24576 }
  0x25   :  { %s42_s20 = sshll.u32 %s15263_s19, 4  ;;  %p15210_p2 = scmp.ne.s32.totalorder %s16460_s3, %s15209_s24  ;;  %s43_s20 = int_to_ptr.vmem [resolvable:$true] %s42_s20 }
  0x26   :  { %p15213_p3 = scmp.lt.u32.totalorder %s15209_s24, %s16460_s3 }
  0x28   :  { %p15215_p4 = pnand %p15213_p3, %p15210_p2 }
  0x2a   :  { %15218 = shalt.err (!%p15215_p4)
}
  0x2b   :  { %s15219_s29 = scalar_lea.vmem %s43_s20, 24576  ;;  %p15224_p6 = scmp.lt.s32.totalorder %s43_s20, %s43_s20 }
  0x2c   :  { %p15220_p5 = scmp.ne.s32.totalorder %s43_s20, %s15219_s29  ;;  %p15225_p7 = scmp.lt.s32.totalorder %s15219_s29, %s15219_s29 }
  0x2e   :  { %p15226_p8 = por %p15225_p7, %p15224_p6 }
  0x30   :  { %p15227_p9 = pnand %p15226_p8, %p15220_p5 }
  0x32   :  { %15230 = shalt.err (!%p15227_p9)
}
  0x33   :  { %s15264_s1 = smov 512   ;;  %s15265_s21 = smov 32  }
  0x34   :  { %48 = dma.hbm_to_vmem [thread:$0]  %s16460_s3, 24576, %s43_s20, [#allocation6], %s15264_s1, %s15264_s1, %s15265_s21  }
  0x35   :  { %s15266_s7 = smov [#allocation8]   ;;  %s15231_s11 = scalar_lea.hbm %s16461_s4, 128 }
  0x36   :  { %s55_s8 = sshll.u32 %s15266_s7, 4  ;;  %p15232_p10 = scmp.ne.s32.totalorder %s16461_s4, %s15231_s11  ;;  %s56_s8 = int_to_ptr.vmem [resolvable:$true] %s55_s8 }
  0x37   :  { %p15235_p11 = scmp.lt.u32.totalorder %s15231_s11, %s16461_s4 }
  0x39   :  { %p15237_p12 = pnand %p15235_p11, %p15232_p10 }
  0x3b   :  { %15240 = shalt.err (!%p15237_p12)
}
  0x3c   :  { %s15241_s2 = scalar_lea.vmem %s56_s8, 128  ;;  %p15246_p0 = scmp.lt.s32.totalorder %s56_s8, %s56_s8 }
  0x3d   :  { %p15242_p13 = scmp.ne.s32.totalorder %s56_s8, %s15241_s2  ;;  %p15247_p1 = scmp.lt.s32.totalorder %s15241_s2, %s15241_s2 }
  0x3f   :  { %p15248_p2 = por %p15247_p1, %p15246_p0 }
  0x41   :  { %p15249_p3 = pnand %p15248_p2, %p15242_p13 }
  0x43   :  { %15252 = shalt.err (!%p15249_p3)
}
  0x44   :  { %58 = dma.hbm_to_vmem [thread:$0]  %s16461_s4, 128, %s56_s8, [#allocation9]  }
  0x45   :  { %15253 = dma.done.wait [#allocation4], 139264  }
  0x46   :  { %15254 = vsyncadd [#allocation4], 4294828032 }
  0x47   :  { %15255 = dma.done.wait [#allocation6], 24624  }
  0x48   :  { %15256 = vsyncadd [#allocation6], 4294942672 }
  0x49   :  { %15257 = dma.done.wait [#allocation9], 128  }
  0x4a   :  { %15258 = vsyncadd [#allocation9], 4294967168  ;;  %v13563_v0 = vld [vmem:[#allocation3 + $0x4] ss:$68 sps:$4 sm:$0xff]   ;;  %v13565_v1 = vld [vmem:[#allocation3 + $0xc] ss:$68 sps:$4 sm:$0xff]  }
  0x4b   :  { %6856 = vmatprep.subr.bf16.mxu0 %v13563_v0  ;;  %v13567_v2 = vld [vmem:[#allocation3] ss:$68 sps:$4 sm:$0xff]   ;;  %v13568_v3 = vld [vmem:[#allocation3 + $0x8] ss:$68 sps:$4 sm:$0xff]   ;;  %7136 = vmatprep.subr.bf16.mxu1 %v13565_v1  ;;  %v13571_v5 = vld [vmem:[#allocation3 + $0x94] ss:$68 sps:$4 sm:$0xff]  }
  0x4c   :  { %v13569_v4 = vld [vmem:[#allocation3 + $0x8c] ss:$68 sps:$4 sm:$0xff]   ;;  %6857 = vmatpush1.bf16.msra.mxu0 %v13567_v2  ;;  %7137 = vmatpush1.bf16.msra.mxu1 %v13568_v3  ;;  %v13575_v8 = vld [vmem:[#allocation3 + $0x114] ss:$68 sps:$4 sm:$0xff]   ;;  %v13577_v9 = vld [vmem:[#allocation3 + $0x11c] ss:$68 sps:$4 sm:$0xff]  }
  0x4d   :  { %v13573_v6 = vld [vmem:[#allocation3 + $0x88] ss:$68 sps:$4 sm:$0xff]   ;;  %6858 = vmatprep.subr.bf16.mxu0 %v13569_v4  ;;  %v13574_v7 = vld [vmem:[#allocation3 + $0x90] ss:$68 sps:$4 sm:$0xff]   ;;  %7138 = vmatprep.subr.bf16.mxu1 %v13571_v5  ;;  %v13580_v11 = vld [vmem:[#allocation3 + $0x118] ss:$68 sps:$4 sm:$0xff]  }
  0x4e   :  { %v13579_v10 = vld [vmem:[#allocation3 + $0x110] ss:$68 sps:$4 sm:$0xff]   ;;  %v13581_v12 = vld [vmem:[#allocation3 + $0x19c] ss:$68 sps:$4 sm:$0xff]   ;;  %v13583_v13 = vld [vmem:[#allocation3 + $0x1a4] ss:$68 sps:$4 sm:$0xff]  }
  0x4f   :  { %v13585_v14 = vld [vmem:[#allocation3 + $0x198] ss:$68 sps:$4 sm:$0xff]   ;;  %v13586_v15 = vld [vmem:[#allocation3 + $0x1a0] ss:$68 sps:$4 sm:$0xff]   ;;  %v13589_v17 = vld [vmem:[#allocation3 + $0x22c] ss:$68 sps:$4 sm:$0xff]  }
  0x50   :  { %6859 = vmatpush1.bf16.msra.mxu0 %v13573_v6  ;;  %7139 = vmatpush1.bf16.msra.mxu1 %v13574_v7  ;;  %v13587_v16 = vld [vmem:[#allocation3 + $0x224] ss:$68 sps:$4 sm:$0xff]   ;;  %v13593_v20 = vld [vmem:[#allocation3 + $0x2ac] ss:$68 sps:$4 sm:$0xff]   ;;  %v13595_v21 = vld [vmem:[#allocation3 + $0x2b4] ss:$68 sps:$4 sm:$0xff]  }
  0x51   :  { %6860 = vmatprep.subr.bf16.mxu0 %v13575_v8  ;;  %7140 = vmatprep.subr.bf16.mxu1 %v13577_v9  ;;  %v13591_v18 = vld [vmem:[#allocation3 + $0x220] ss:$68 sps:$4 sm:$0xff]   ;;  %v13592_v19 = vld [vmem:[#allocation3 + $0x228] ss:$68 sps:$4 sm:$0xff]   ;;  %v13598_v23 = vld [vmem:[#allocation3 + $0x2b0] ss:$68 sps:$4 sm:$0xff]  }
  0x52   :  { %v13597_v22 = vld [vmem:[#allocation3 + $0x2a8] ss:$68 sps:$4 sm:$0xff]   ;;  %v13599_v24 = vld [vmem:[#allocation3 + $0x334] ss:$68 sps:$4 sm:$0xff]   ;;  %v13601_v25 = vld [vmem:[#allocation3 + $0x33c] ss:$68 sps:$4 sm:$0xff]  }
  0x53   :  { %v13603_v26 = vld [vmem:[#allocation3 + $0x330] ss:$68 sps:$4 sm:$0xff]   ;;  %v13604_v27 = vld [vmem:[#allocation3 + $0x338] ss:$68 sps:$4 sm:$0xff]   ;;  %v13607_v29 = vld [vmem:[#allocation3 + $0x3c4] ss:$68 sps:$4 sm:$0xff]  }
  0x54   :  { %6861 = vmatpush1.bf16.msra.mxu0 %v13579_v10  ;;  %7141 = vmatpush1.bf16.msra.mxu1 %v13580_v11  ;;  %v13605_v28 = vld [vmem:[#allocation3 + $0x3bc] ss:$68 sps:$4 sm:$0xff]   ;;  %v13611_v32 = vld [vmem:[#allocation3 + $0x444] ss:$68 sps:$4 sm:$0xff]   ;;  %v13613_v33 = vld [vmem:[#allocation3 + $0x44c] ss:$68 sps:$4 sm:$0xff]  }
  0x55   :  { %6862 = vmatprep.subr.bf16.mxu0 %v13581_v12  ;;  %7142 = vmatprep.subr.bf16.mxu1 %v13583_v13  ;;  %v13609_v30 = vld [vmem:[#allocation3 + $0x3b8] ss:$68 sps:$4 sm:$0xff]   ;;  %v13610_v31 = vld [vmem:[#allocation3 + $0x3c0] ss:$68 sps:$4 sm:$0xff]   ;;  %v13616_v35 = vld [vmem:[#allocation3 + $0x448] ss:$68 sps:$4 sm:$0xff]  }
  0x56   :  { %v13615_v34 = vld [vmem:[#allocation3 + $0x440] ss:$68 sps:$4 sm:$0xff]   ;;  %v13617_v36 = vld [vmem:[#allocation3 + $0x4cc] ss:$68 sps:$4 sm:$0xff]   ;;  %v13619_v37 = vld [vmem:[#allocation3 + $0x4d4] ss:$68 sps:$4 sm:$0xff]  }
  0x57   :  { %v13621_v38 = vld [vmem:[#allocation3 + $0x4c8] ss:$68 sps:$4 sm:$0xff]   ;;  %v13622_v39 = vld [vmem:[#allocation3 + $0x4d0] ss:$68 sps:$4 sm:$0xff]   ;;  %v13625_v41 = vld [vmem:[#allocation3 + $0x55c] ss:$68 sps:$4 sm:$0xff]  }
  0x58   :  { %6863 = vmatpush1.bf16.msra.mxu0 %v13585_v14  ;;  %7143 = vmatpush1.bf16.msra.mxu1 %v13586_v15  ;;  %v13623_v40 = vld [vmem:[#allocation3 + $0x554] ss:$68 sps:$4 sm:$0xff]   ;;  %v13629_v44 = vld [vmem:[#allocation3 + $0x5dc] ss:$68 sps:$4 sm:$0xff]   ;;  %v13631_v45 = vld [vmem:[#allocation3 + $0x5e4] ss:$68 sps:$4 sm:$0xff]  }
  0x59   :  { %6864 = vmatprep.subr.bf16.mxu0 %v13587_v16  ;;  %7144 = vmatprep.subr.bf16.mxu1 %v13589_v17  ;;  %v13627_v42 = vld [vmem:[#allocation3 + $0x550] ss:$68 sps:$4 sm:$0xff]   ;;  %v13628_v43 = vld [vmem:[#allocation3 + $0x558] ss:$68 sps:$4 sm:$0xff]   ;;  %v72_v46 = vld [vmem:[%s16457_s0] sm:$0xff] }
  0x5a   :  { %v76_v47 = vld [vmem:[%s16457_s0 + $0x20] sm:$0xff]  ;;  %v13633_v48 = vld [vmem:[#allocation3 + $0x5d8] ss:$68 sps:$4 sm:$0xff]   ;;  %v13637_v52 = vld [vmem:[#allocation3 + $0x66c] ss:$68 sps:$4 sm:$0xff]  }
  0x5b   :  { %v13634_v49 = vld [vmem:[#allocation3 + $0x5e0] ss:$68 sps:$4 sm:$0xff]   ;;  %v15359_v50 = vcombine.high %v72_v46, %v76_v47  ;;  %v13640_v54 = vld [vmem:[#allocation3 + $0x668] ss:$68 sps:$4 sm:$0xff]   ;;  %v13643_v56 = vld [vmem:[#allocation3 + $0x6f4] ss:$68 sps:$4 sm:$0xff]   ;;  %v15363_v5 = vcombine.low %v72_v46, %v76_v47 }
  0x5c   :  { %6865 = vmatpush1.bf16.msra.mxu0 %v13591_v18  ;;  %7145 = vmatpush1.bf16.msra.mxu1 %v13592_v19  ;;  %v13635_v51 = vld [vmem:[#allocation3 + $0x664] ss:$68 sps:$4 sm:$0xff]   ;;  %v13641_v55 = vld [vmem:[#allocation3 + $0x6ec] ss:$68 sps:$4 sm:$0xff]   ;;  %v13647_v59 = vld [vmem:[#allocation3 + $0x774] ss:$68 sps:$4 sm:$0xff]  }
  0x5d   :  { %6866 = vmatprep.subr.bf16.mxu0 %v13593_v20  ;;  %7146 = vmatprep.subr.bf16.mxu1 %v13595_v21  ;;  %v13639_v53 = vld [vmem:[#allocation3 + $0x660] ss:$68 sps:$4 sm:$0xff]   ;;  %v13645_v57 = vld [vmem:[#allocation3 + $0x6e8] ss:$68 sps:$4 sm:$0xff]   ;;  %v13646_v58 = vld [vmem:[#allocation3 + $0x6f0] ss:$68 sps:$4 sm:$0xff]  }
  0x5e   :  { %6888 = vmatprep.mubr.bf16.mxu0 %v15359_v50  ;;  %7168 = vmatprep.mubr.bf16.mxu1 %v15359_v50  ;;  %v13649_v60 = vld [vmem:[#allocation3 + $0x77c] ss:$68 sps:$4 sm:$0xff]   ;;  %v13651_v61 = vld [vmem:[#allocation3 + $0x770] ss:$68 sps:$4 sm:$0xff]   ;;  %v13655_v0 = vld [vmem:[#allocation3 + $0x804] ss:$68 sps:$4 sm:$0xff]  }
  0x5f   :  { %v13652_v62 = vld [vmem:[#allocation3 + $0x778] ss:$68 sps:$4 sm:$0xff]   ;;  %v13658_v2 = vld [vmem:[#allocation3 + $0x800] ss:$68 sps:$4 sm:$0xff]   ;;  %v13664_v4 = vld [vmem:[#allocation3 + $0x88c] ss:$68 sps:$4 sm:$0xff]  }
  0x60   :  { %6867 = vmatpush1.bf16.msra.mxu0 %v13597_v22  ;;  %7147 = vmatpush1.bf16.msra.mxu1 %v13598_v23  ;;  %v13653_v63 = vld [vmem:[#allocation3 + $0x7fc] ss:$68 sps:$4 sm:$0xff]   ;;  %v13661_v3 = vld [vmem:[#allocation3 + $0x884] ss:$68 sps:$4 sm:$0xff]   ;;  %v13667_v8 = vld [vmem:[#allocation3 + $0x90c] ss:$68 sps:$4 sm:$0xff]  }
  0x61   :  { %6868 = vmatprep.subr.bf16.mxu0 %v13599_v24  ;;  %7148 = vmatprep.subr.bf16.mxu1 %v13601_v25  ;;  %v13657_v1 = vld [vmem:[#allocation3 + $0x7f8] ss:$68 sps:$4 sm:$0xff]   ;;  %v13659_v6 = vld [vmem:[#allocation3 + $0x880] ss:$68 sps:$4 sm:$0xff]   ;;  %v13662_v7 = vld [vmem:[#allocation3 + $0x888] ss:$68 sps:$4 sm:$0xff]  }
  0x62   :  { %v13670_v9 = vld [vmem:[#allocation3 + $0x914] ss:$68 sps:$4 sm:$0xff]   ;;  %v13665_v10 = vld [vmem:[#allocation3 + $0x908] ss:$68 sps:$4 sm:$0xff]   ;;  %v13676_v13 = vld [vmem:[#allocation3 + $0x99c] ss:$68 sps:$4 sm:$0xff]  }
  0x63   :  { %v13668_v11 = vld [vmem:[#allocation3 + $0x910] ss:$68 sps:$4 sm:$0xff]   ;;  %v80_v14 = vld [vmem:[%s16457_s0 + $0x40] sm:$0xff]  ;;  %v13674_v17 = vld [vmem:[#allocation3 + $0x998] ss:$68 sps:$4 sm:$0xff]  }
  0x64   :  { %6869 = vmatpush1.bf16.msra.mxu0 %v13603_v26  ;;  %7149 = vmatpush1.bf16.msra.mxu1 %v13604_v27  ;;  %v13673_v12 = vld [vmem:[#allocation3 + $0x994] ss:$68 sps:$4 sm:$0xff]   ;;  %v84_v15 = vld [vmem:[%s16457_s0 + $0x60] sm:$0xff]  ;;  %v13688_v27 = vld [vmem:[#allocation3 + $0xaac] ss:$68 sps:$4 sm:$0xff]  }
  0x65   :  { %6870 = vmatprep.subr.bf16.mxu0 %v13605_v28  ;;  %7150 = vmatprep.subr.bf16.mxu1 %v13607_v29  ;;  %v13671_v16 = vld [vmem:[#allocation3 + $0x990] ss:$68 sps:$4 sm:$0xff]   ;;  %v15373_v18 = vcombine.high %v80_v14, %v84_v15  ;;  %v15375_v19 = vcombine.low %v80_v14, %v84_v15  ;;  %v13679_v20 = vld [vmem:[#allocation3 + $0xa1c] ss:$68 sps:$4 sm:$0xff]   ;;  %v13682_v21 = vld [vmem:[#allocation3 + $0xa24] ss:$68 sps:$4 sm:$0xff]  }
  0x66   :  { %v13677_v22 = vld [vmem:[#allocation3 + $0xa18] ss:$68 sps:$4 sm:$0xff]   ;;  %v13680_v23 = vld [vmem:[#allocation3 + $0xa20] ss:$68 sps:$4 sm:$0xff]   ;;  %v13743_v15 = vld [vmem:[#allocation3 + $0xff0] ss:$68 sps:$4 sm:$0xff]  }
  0x67   :  { %v88_v24 = vld [vmem:[%s16457_s0 + $0x80] sm:$0xff] }
  0x68   :  { %6871 = vmatpush1.bf16.msra.mxu0 %v13609_v30  ;;  %7151 = vmatpush1.bf16.msra.mxu1 %v13610_v31  ;;  %v92_v25 = vld [vmem:[%s16457_s0 + $0xa0] sm:$0xff]  ;;  %v13686_v31 = vld [vmem:[#allocation3 + $0xaa8] ss:$68 sps:$4 sm:$0xff]  }
  0x69   :  { %6872 = vmatprep.subr.bf16.mxu0 %v13611_v32  ;;  %7152 = vmatprep.subr.bf16.mxu1 %v13613_v33  ;;  %v13685_v26 = vld [vmem:[#allocation3 + $0xaa4] ss:$68 sps:$4 sm:$0xff]   ;;  %v15387_v28 = vcombine.high %v88_v24, %v92_v25  ;;  %v15390_v29 = vcombine.low %v88_v24, %v92_v25  ;;  %v13691_v32 = vld [vmem:[#allocation3 + $0xb2c] ss:$68 sps:$4 sm:$0xff]   ;;  %v13694_v33 = vld [vmem:[#allocation3 + $0xb34] ss:$68 sps:$4 sm:$0xff]  }
  0x6a   :  { %v13683_v30 = vld [vmem:[#allocation3 + $0xaa0] ss:$68 sps:$4 sm:$0xff]   ;;  %v13760_v24 = vld [vmem:[#allocation3 + $0x110c] ss:$68 sps:$4 sm:$0xff]  }
  0x6b   :  { %v13703_v46 = vld [vmem:[#allocation3 + $0xc3c] ss:$68 sps:$4 sm:$0xff]   ;;  %v13706_v47 = vld [vmem:[#allocation3 + $0xc44] ss:$68 sps:$4 sm:$0xff]  }
  0x6c   :  { %6873 = vmatpush1.bf16.msra.mxu0 %v13615_v34  ;;  %7153 = vmatpush1.bf16.msra.mxu1 %v13616_v35  ;;  %v96_v34 = vld [vmem:[%s16457_s0 + $0xc0] sm:$0xff] }
  0x6d   :  { %6874 = vmatprep.subr.bf16.mxu0 %v13617_v36  ;;  %7154 = vmatprep.subr.bf16.mxu1 %v13619_v37  ;;  %v100_v35 = vld [vmem:[%s16457_s0 + $0xe0] sm:$0xff]  ;;  %v13689_v36 = vld [vmem:[#allocation3 + $0xb28] ss:$68 sps:$4 sm:$0xff]   ;;  %v13692_v37 = vld [vmem:[#allocation3 + $0xb30] ss:$68 sps:$4 sm:$0xff]  }
  0x6e   :  { %v13748_v14 = vld [vmem:[#allocation3 + $0xffc] ss:$68 sps:$4 sm:$0xff]  }
  0x6f   :  { %v13755_v25 = vld [vmem:[#allocation3 + $0x1100] ss:$68 sps:$4 sm:$0xff]  }
  0x70   :  { %6875 = vmatpush1.bf16.msra.mxu0 %v13621_v38  ;;  %7155 = vmatpush1.bf16.msra.mxu1 %v13622_v39  ;;  %v15401_v38 = vcombine.high %v96_v34, %v100_v35  ;;  %v13697_v39 = vld [vmem:[#allocation3 + $0xbb4] ss:$68 sps:$4 sm:$0xff]  }
  0x71   :  { %6876 = vmatprep.subr.bf16.mxu0 %v13623_v40  ;;  %7156 = vmatprep.subr.bf16.mxu1 %v13625_v41  ;;  %v13700_v40 = vld [vmem:[#allocation3 + $0xbbc] ss:$68 sps:$4 sm:$0xff]   ;;  %v13695_v41 = vld [vmem:[#allocation3 + $0xbb0] ss:$68 sps:$4 sm:$0xff]  }
  0x74   :  { %6877 = vmatpush1.bf16.msra.mxu0 %v13627_v42  ;;  %7157 = vmatpush1.bf16.msra.mxu1 %v13628_v43  ;;  %v13698_v42 = vld [vmem:[#allocation3 + $0xbb8] ss:$68 sps:$4 sm:$0xff]   ;;  %v15405_v43 = vcombine.low %v96_v34, %v100_v35  ;;  %v13761_v35 = vld [vmem:[#allocation3 + $0x1188] ss:$68 sps:$4 sm:$0xff]  }
  0x75   :  { %6878 = vmatprep.subr.bf16.mxu0 %v13629_v44  ;;  %7158 = vmatprep.subr.bf16.mxu1 %v13631_v45  ;;  %v15410_v44 = vld [vmem:[%s16457_s0 + $0x8] sm:$0xff] }
  0x76   :  { %v15415_v45 = vld [vmem:[%s16457_s0 + $0x28] sm:$0xff] }
  0x78   :  { %6879 = vmatpush1.bf16.msra.mxu0 %v13633_v48  ;;  %7159 = vmatpush1.bf16.msra.mxu1 %v13634_v49  ;;  %v15419_v48 = vcombine.high %v15410_v44, %v15415_v45  ;;  %v13701_v49 = vld [vmem:[#allocation3 + $0xc38] ss:$68 sps:$4 sm:$0xff]  }
  0x79   :  { %6880 = vmatprep.subr.bf16.mxu0 %v13635_v51  ;;  %7160 = vmatprep.subr.bf16.mxu1 %v13637_v52  ;;  %v13704_v51 = vld [vmem:[#allocation3 + $0xc40] ss:$68 sps:$4 sm:$0xff]  }
  0x7a   :  { %v13709_v52 = vld [vmem:[#allocation3 + $0xcc4] ss:$68 sps:$4 sm:$0xff]  }
  0x7c   :  { %6881 = vmatpush1.bf16.msra.mxu0 %v13639_v53  ;;  %7161 = vmatpush1.bf16.msra.mxu1 %v13640_v54  ;;  %v13712_v53 = vld [vmem:[#allocation3 + $0xccc] ss:$68 sps:$4 sm:$0xff]   ;;  %v13707_v54 = vld [vmem:[#allocation3 + $0xcc0] ss:$68 sps:$4 sm:$0xff]  }
  0x7d   :  { %6882 = vmatprep.subr.bf16.mxu0 %v13641_v55  ;;  %7162 = vmatprep.subr.bf16.mxu1 %v13643_v56  ;;  %v13710_v55 = vld [vmem:[#allocation3 + $0xcc8] ss:$68 sps:$4 sm:$0xff]  }
  0x7e   :  { %v13715_v56 = vld [vmem:[#allocation3 + $0xd4c] ss:$68 sps:$4 sm:$0xff]  }
  0x80   :  { %6883 = vmatpush1.bf16.msra.mxu0 %v13645_v57  ;;  %7163 = vmatpush1.bf16.msra.mxu1 %v13646_v58  ;;  %v13718_v57 = vld [vmem:[#allocation3 + $0xd54] ss:$68 sps:$4 sm:$0xff]   ;;  %v13713_v58 = vld [vmem:[#allocation3 + $0xd48] ss:$68 sps:$4 sm:$0xff]  }
  0x81   :  { %6884 = vmatprep.subr.bf16.mxu0 %v13647_v59  ;;  %7164 = vmatprep.subr.bf16.mxu1 %v13649_v60  ;;  %v13716_v59 = vld [vmem:[#allocation3 + $0xd50] ss:$68 sps:$4 sm:$0xff]  }
  0x82   :  { %v13721_v60 = vld [vmem:[#allocation3 + $0xdd4] ss:$68 sps:$4 sm:$0xff]  }
  0x84   :  { %6885 = vmatpush1.bf16.msra.mxu0 %v13651_v61  ;;  %7165 = vmatpush1.bf16.msra.mxu1 %v13652_v62  ;;  %v13724_v61 = vld [vmem:[#allocation3 + $0xddc] ss:$68 sps:$4 sm:$0xff]   ;;  %v13719_v62 = vld [vmem:[#allocation3 + $0xdd0] ss:$68 sps:$4 sm:$0xff]  }
  0x85   :  { %6886 = vmatprep.subr.bf16.mxu0 %v13653_v63  ;;  %7166 = vmatprep.subr.bf16.mxu1 %v13655_v0  ;;  %v13722_v63 = vld [vmem:[#allocation3 + $0xdd8] ss:$68 sps:$4 sm:$0xff]  }
  0x86   :  { %v13727_v0 = vld [vmem:[#allocation3 + $0xe5c] ss:$68 sps:$4 sm:$0xff]  }
  0x88   :  { %6887 = vmatpush1.bf16.msra.mxu0 %v13657_v1  ;;  %7167 = vmatpush1.bf16.msra.mxu1 %v13658_v2  ;;  %v13730_v1 = vld [vmem:[#allocation3 + $0xe64] ss:$68 sps:$4 sm:$0xff]   ;;  %v13725_v2 = vld [vmem:[#allocation3 + $0xe58] ss:$68 sps:$4 sm:$0xff]  }
  0x89   :  { %6926 = vmatprep.subr.bf16.mxu0 %v13661_v3  ;;  %7203 = vmatprep.subr.bf16.mxu1 %v13664_v4  ;;  %v13728_v3 = vld [vmem:[#allocation3 + $0xe60] ss:$68 sps:$4 sm:$0xff]  }
  0x8a   :  { %v13733_v4 = vld [vmem:[#allocation3 + $0xee4] ss:$68 sps:$4 sm:$0xff]  }
  0x8b   :  { %6889 = vmatmul.mubr.bf16.vlgmr.msra.gmra.mrb[0].mxu0 %v15363_v5  ;;  %7169 = vmatmul.mubr.bf16.vlgmr.msra.gmra.mrb[0].mxu1 %v15363_v5 }
  0x8c   :  { %6927 = vmatpush1.bf16.msra.mxu0 %v13659_v6  ;;  %7204 = vmatpush1.bf16.msra.mxu1 %v13662_v7  ;;  %v13736_v6 = vld [vmem:[#allocation3 + $0xeec] ss:$68 sps:$4 sm:$0xff]   ;;  %v13731_v7 = vld [vmem:[#allocation3 + $0xee0] ss:$68 sps:$4 sm:$0xff]  }
  0x8d   :  { %6928 = vmatprep.subr.bf16.mxu0 %v13667_v8  ;;  %7205 = vmatprep.subr.bf16.mxu1 %v13670_v9  ;;  %v13734_v8 = vld [vmem:[#allocation3 + $0xee8] ss:$68 sps:$4 sm:$0xff]  }
  0x8e   :  { %7178 = vmatprep.mubr.bf16.mxu1 %v15373_v18  ;;  %6898 = vmatprep.mubr.bf16.mxu0 %v15373_v18  ;;  %v13739_v9 = vld [vmem:[#allocation3 + $0xf6c] ss:$68 sps:$4 sm:$0xff]  }
  0x90   :  { %6929 = vmatpush1.bf16.msra.mxu0 %v13665_v10  ;;  %7206 = vmatpush1.bf16.msra.mxu1 %v13668_v11  ;;  %v13742_v10 = vld [vmem:[#allocation3 + $0xf74] ss:$68 sps:$4 sm:$0xff]   ;;  %v13737_v11 = vld [vmem:[#allocation3 + $0xf68] ss:$68 sps:$4 sm:$0xff]  }
  0x91   :  { %6930 = vmatprep.subr.bf16.mxu0 %v13673_v12  ;;  %7207 = vmatprep.subr.bf16.mxu1 %v13676_v13  ;;  %v13740_v12 = vld [vmem:[#allocation3 + $0xf70] ss:$68 sps:$4 sm:$0xff]  }
  0x92   :  { %v13745_v13 = vld [vmem:[#allocation3 + $0xff4] ss:$68 sps:$4 sm:$0xff]  }
  0x93   :  { %7179 = vmatmul.mubr.bf16.gmra.mrb[4].mxu1 %v15375_v19  ;;  %6899 = vmatmul.mubr.bf16.gmra.mrb[4].mxu0 %v15375_v19 }
  0x94   :  { %6931 = vmatpush1.bf16.msra.mxu0 %v13671_v16  ;;  %7208 = vmatpush1.bf16.msra.mxu1 %v13674_v17  ;;  %v13746_v16 = vld [vmem:[#allocation3 + $0xff8] ss:$68 sps:$4 sm:$0xff]  }
  0x95   :  { %6932 = vmatprep.subr.bf16.mxu0 %v13679_v20  ;;  %7209 = vmatprep.subr.bf16.mxu1 %v13682_v21  ;;  %v13751_v17 = vld [vmem:[#allocation3 + $0x107c] ss:$68 sps:$4 sm:$0xff]   ;;  %v13754_v20 = vld [vmem:[#allocation3 + $0x1084] ss:$68 sps:$4 sm:$0xff]  }
  0x96   :  { %7186 = vmatprep.mubr.bf16.mxu1 %v15387_v28  ;;  %6908 = vmatprep.mubr.bf16.mxu0 %v15387_v28  ;;  %v13749_v21 = vld [vmem:[#allocation3 + $0x1078] ss:$68 sps:$4 sm:$0xff]  }
  0x98   :  { %6933 = vmatpush1.bf16.msra.mxu0 %v13677_v22  ;;  %7210 = vmatpush1.bf16.msra.mxu1 %v13680_v23  ;;  %v13752_v22 = vld [vmem:[#allocation3 + $0x1080] ss:$68 sps:$4 sm:$0xff]  }
  0x99   :  { %6934 = vmatprep.subr.bf16.mxu0 %v13685_v26  ;;  %7211 = vmatprep.subr.bf16.mxu1 %v13688_v27  ;;  %v13757_v23 = vld [vmem:[#allocation3 + $0x1104] ss:$68 sps:$4 sm:$0xff]   ;;  %v15427_v27 = vcombine.low %v15410_v44, %v15415_v45  ;;  %v13767_v44 = vld [vmem:[#allocation3 + $0x1210] ss:$68 sps:$4 sm:$0xff]   ;;  %v13770_v45 = vld [vmem:[#allocation3 + $0x1218] ss:$68 sps:$4 sm:$0xff]  }
  0x9a   :  { %v13758_v26 = vld [vmem:[#allocation3 + $0x1108] ss:$68 sps:$4 sm:$0xff]  }
  0x9b   :  { %7187 = vmatmul.mubr.bf16.gmra.mrb[8].mxu1 %v15390_v29  ;;  %6909 = vmatmul.mubr.bf16.gmra.mrb[8].mxu0 %v15390_v29 }
  0x9c   :  { %6935 = vmatpush1.bf16.msra.mxu0 %v13683_v30  ;;  %7212 = vmatpush1.bf16.msra.mxu1 %v13686_v31  ;;  %v81_v30 = vld [vmem:[%s16457_s0 + $0x48] sm:$0xff] }
  0x9d   :  { %6936 = vmatprep.subr.bf16.mxu0 %v13691_v32  ;;  %7213 = vmatprep.subr.bf16.mxu1 %v13694_v33  ;;  %v85_v31 = vld [vmem:[%s16457_s0 + $0x68] sm:$0xff]  ;;  %v13766_v33 = vld [vmem:[#allocation3 + $0x1194] ss:$68 sps:$4 sm:$0xff]  }
  0x9e   :  { %7194 = vmatprep.mubr.bf16.mxu1 %v15401_v38  ;;  %6918 = vmatprep.mubr.bf16.mxu0 %v15401_v38  ;;  %v13763_v32 = vld [vmem:[#allocation3 + $0x118c] ss:$68 sps:$4 sm:$0xff]   ;;  %v15435_v34 = vcombine.high %v81_v30, %v85_v31 }
  0xa0   :  { %6937 = vmatpush1.bf16.msra.mxu0 %v13689_v36  ;;  %7214 = vmatpush1.bf16.msra.mxu1 %v13692_v37  ;;  %v13764_v36 = vld [vmem:[#allocation3 + $0x1190] ss:$68 sps:$4 sm:$0xff]  }
  0xa1   :  { %6938 = vmatprep.subr.bf16.mxu0 %v13697_v39  ;;  %7215 = vmatprep.subr.bf16.mxu1 %v13700_v40  ;;  %v13769_v37 = vld [vmem:[#allocation3 + $0x1214] ss:$68 sps:$4 sm:$0xff]   ;;  %v13772_v39 = vld [vmem:[#allocation3 + $0x121c] ss:$68 sps:$4 sm:$0xff]   ;;  %v89_v40 = vld [vmem:[%s16457_s0 + $0x88] sm:$0xff] }
  0xa3   :  { %7195 = vmatmul.mubr.bf16.gmra.mrb[12].mxu1 %v15405_v43  ;;  %6919 = vmatmul.mubr.bf16.gmra.mrb[12].mxu0 %v15405_v43 }
  0xa4   :  { %6939 = vmatpush1.bf16.msra.mxu0 %v13695_v41  ;;  %7216 = vmatpush1.bf16.msra.mxu1 %v13698_v42  ;;  %v15444_v41 = vcombine.low %v81_v30, %v85_v31  ;;  %v93_v42 = vld [vmem:[%s16457_s0 + $0xa8] sm:$0xff]  ;;  %v13818_v30 = vld [vmem:[#allocation3 + $0x1658] ss:$68 sps:$4 sm:$0xff]  }
  0xa5   :  { %6940 = vmatprep.subr.bf16.mxu0 %v13703_v46  ;;  %7217 = vmatprep.subr.bf16.mxu1 %v13706_v47  ;;  %v13775_v46 = vld [vmem:[#allocation3 + $0x129c] ss:$68 sps:$4 sm:$0xff]   ;;  %v13778_v47 = vld [vmem:[#allocation3 + $0x12a4] ss:$68 sps:$4 sm:$0xff]  }
  0xa6   :  { %7235 = vmatprep.mubr.bf16.mxu1 %v15419_v48  ;;  %6958 = vmatprep.mubr.bf16.mxu0 %v15419_v48  ;;  %v13823_v31 = vld [vmem:[#allocation3 + $0x16dc] ss:$68 sps:$4 sm:$0xff]  }
  0xa8   :  { %6941 = vmatpush1.bf16.msra.mxu0 %v13701_v49  ;;  %7218 = vmatpush1.bf16.msra.mxu1 %v13704_v51  ;;  %v15449_v49 = vcombine.high %v89_v40, %v93_v42  ;;  %v13773_v51 = vld [vmem:[#allocation3 + $0x1298] ss:$68 sps:$4 sm:$0xff]  }
  0xa9   :  { %6942 = vmatprep.subr.bf16.mxu0 %v13709_v52  ;;  %7219 = vmatprep.subr.bf16.mxu1 %v13712_v53  ;;  %v13776_v52 = vld [vmem:[#allocation3 + $0x12a0] ss:$68 sps:$4 sm:$0xff]  }
  0xaa   :  { %v13781_v53 = vld [vmem:[#allocation3 + $0x1324] ss:$68 sps:$4 sm:$0xff]  }
  0xac   :  { %6943 = vmatpush1.bf16.msra.mxu0 %v13707_v54  ;;  %7220 = vmatpush1.bf16.msra.mxu1 %v13710_v55  ;;  %v13784_v54 = vld [vmem:[#allocation3 + $0x132c] ss:$68 sps:$4 sm:$0xff]   ;;  %v13779_v55 = vld [vmem:[#allocation3 + $0x1320] ss:$68 sps:$4 sm:$0xff]  }
  0xad   :  { %6944 = vmatprep.subr.bf16.mxu0 %v13715_v56  ;;  %7221 = vmatprep.subr.bf16.mxu1 %v13718_v57  ;;  %v15455_v56 = vcombine.low %v89_v40, %v93_v42  ;;  %v97_v57 = vld [vmem:[%s16457_s0 + $0xc8] sm:$0xff] }
  0xae   :  { %v13830_v40 = vld [vmem:[#allocation3 + $0x1768] ss:$68 sps:$4 sm:$0xff]  }
  0xaf   :  { %v13835_v42 = vld [vmem:[#allocation3 + $0x17ec] ss:$68 sps:$4 sm:$0xff]  }
  0xb0   :  { %6945 = vmatpush1.bf16.msra.mxu0 %v13713_v58  ;;  %7222 = vmatpush1.bf16.msra.mxu1 %v13716_v59  ;;  %v101_v58 = vld [vmem:[%s16457_s0 + $0xe8] sm:$0xff] }
  0xb1   :  { %6946 = vmatprep.subr.bf16.mxu0 %v13721_v60  ;;  %7223 = vmatprep.subr.bf16.mxu1 %v13724_v61  ;;  %v13782_v59 = vld [vmem:[#allocation3 + $0x1328] ss:$68 sps:$4 sm:$0xff]   ;;  %v13790_v61 = vld [vmem:[#allocation3 + $0x13b4] ss:$68 sps:$4 sm:$0xff]  }
  0xb2   :  { %v13787_v60 = vld [vmem:[#allocation3 + $0x13ac] ss:$68 sps:$4 sm:$0xff]  }
  0xb4   :  { %6947 = vmatpush1.bf16.msra.mxu0 %v13719_v62  ;;  %7224 = vmatpush1.bf16.msra.mxu1 %v13722_v63  ;;  %v15463_v62 = vcombine.high %v97_v57, %v101_v58  ;;  %v13785_v63 = vld [vmem:[#allocation3 + $0x13a8] ss:$68 sps:$4 sm:$0xff]  }
  0xb5   :  { %6948 = vmatprep.subr.bf16.mxu0 %v13727_v0  ;;  %7225 = vmatprep.subr.bf16.mxu1 %v13730_v1  ;;  %v13788_v0 = vld [vmem:[#allocation3 + $0x13b0] ss:$68 sps:$4 sm:$0xff]  }
  0xb6   :  { %v13793_v1 = vld [vmem:[#allocation3 + $0x1434] ss:$68 sps:$4 sm:$0xff]  }
  0xb8   :  { %6949 = vmatpush1.bf16.msra.mxu0 %v13725_v2  ;;  %7226 = vmatpush1.bf16.msra.mxu1 %v13728_v3  ;;  %v13796_v2 = vld [vmem:[#allocation3 + $0x143c] ss:$68 sps:$4 sm:$0xff]   ;;  %v13791_v3 = vld [vmem:[#allocation3 + $0x1430] ss:$68 sps:$4 sm:$0xff]  }
  0xb9   :  { %6950 = vmatprep.subr.bf16.mxu0 %v13733_v4  ;;  %7227 = vmatprep.subr.bf16.mxu1 %v13736_v6  ;;  %v15469_v4 = vcombine.low %v97_v57, %v101_v58  ;;  %v13794_v6 = vld [vmem:[#allocation3 + $0x1438] ss:$68 sps:$4 sm:$0xff]   ;;  %v13848_v58 = vld [vmem:[#allocation3 + $0x1900] ss:$68 sps:$4 sm:$0xff]  }
  0xba   :  { %v13845_v57 = vld [vmem:[#allocation3 + $0x18f8] ss:$68 sps:$4 sm:$0xff]  }
  0xbc   :  { %6951 = vmatpush1.bf16.msra.mxu0 %v13731_v7  ;;  %7228 = vmatpush1.bf16.msra.mxu1 %v13734_v8  ;;  %v15474_v7 = vld [vmem:[%s16457_s0 + $0x10] sm:$0xff] }
  0xbd   :  { %6952 = vmatprep.subr.bf16.mxu0 %v13739_v9  ;;  %7229 = vmatprep.subr.bf16.mxu1 %v13742_v10  ;;  %v15479_v8 = vld [vmem:[%s16457_s0 + $0x30] sm:$0xff]  ;;  %v13799_v9 = vld [vmem:[#allocation3 + $0x14bc] ss:$68 sps:$4 sm:$0xff]   ;;  %v13802_v10 = vld [vmem:[#allocation3 + $0x14c4] ss:$68 sps:$4 sm:$0xff]  }
  0xc0   :  { %6953 = vmatpush1.bf16.msra.mxu0 %v13737_v11  ;;  %7230 = vmatpush1.bf16.msra.mxu1 %v13740_v12  ;;  %v15483_v11 = vcombine.high %v15474_v7, %v15479_v8  ;;  %v13797_v12 = vld [vmem:[#allocation3 + $0x14b8] ss:$68 sps:$4 sm:$0xff]  }
  0xc1   :  { %6954 = vmatprep.subr.bf16.mxu0 %v13745_v13  ;;  %7231 = vmatprep.subr.bf16.mxu1 %v13748_v14  ;;  %v13800_v13 = vld [vmem:[#allocation3 + $0x14c0] ss:$68 sps:$4 sm:$0xff]  }
  0xc2   :  { %v13805_v14 = vld [vmem:[#allocation3 + $0x1544] ss:$68 sps:$4 sm:$0xff]  }
  0xc4   :  { %6955 = vmatpush1.bf16.msra.mxu0 %v13743_v15  ;;  %7232 = vmatpush1.bf16.msra.mxu1 %v13746_v16  ;;  %v13808_v15 = vld [vmem:[#allocation3 + $0x154c] ss:$68 sps:$4 sm:$0xff]   ;;  %v13803_v16 = vld [vmem:[#allocation3 + $0x1540] ss:$68 sps:$4 sm:$0xff]  }
  0xc5   :  { %6956 = vmatprep.subr.bf16.mxu0 %v13751_v17  ;;  %7233 = vmatprep.subr.bf16.mxu1 %v13754_v20  ;;  %v13806_v17 = vld [vmem:[#allocation3 + $0x1548] ss:$68 sps:$4 sm:$0xff]  }
  0xc6   :  { %v13811_v20 = vld [vmem:[#allocation3 + $0x15cc] ss:$68 sps:$4 sm:$0xff]  }
  0xc8   :  { %6957 = vmatpush1.bf16.msra.mxu0 %v13749_v21  ;;  %7234 = vmatpush1.bf16.msra.mxu1 %v13752_v22  ;;  %v13814_v21 = vld [vmem:[#allocation3 + $0x15d4] ss:$68 sps:$4 sm:$0xff]   ;;  %v13809_v22 = vld [vmem:[#allocation3 + $0x15c8] ss:$68 sps:$4 sm:$0xff]  }
  0xc9   :  { %6996 = vmatprep.subr.bf16.mxu0 %v13757_v23  ;;  %7270 = vmatprep.subr.bf16.mxu1 %v13760_v24  ;;  %v13812_v23 = vld [vmem:[#allocation3 + $0x15d0] ss:$68 sps:$4 sm:$0xff]  }
  0xca   :  { %v13817_v24 = vld [vmem:[#allocation3 + $0x1654] ss:$68 sps:$4 sm:$0xff]  }
  0xcb   :  { %7236 = vmatmul.mubr.bf16.vlgmr.msra.gmra.mrb[0].mxu1 %v15427_v27  ;;  %6959 = vmatmul.mubr.bf16.vlgmr.msra.gmra.mrb[0].mxu0 %v15427_v27 }
  0xcc   :  { %6997 = vmatpush1.bf16.msra.mxu0 %v13755_v25  ;;  %7271 = vmatpush1.bf16.msra.mxu1 %v13758_v26  ;;  %v13820_v25 = vld [vmem:[#allocation3 + $0x165c] ss:$68 sps:$4 sm:$0xff]   ;;  %v13815_v26 = vld [vmem:[#allocation3 + $0x1650] ss:$68 sps:$4 sm:$0xff]  }
  0xcd   :  { %6998 = vmatprep.subr.bf16.mxu0 %v13763_v32  ;;  %7272 = vmatprep.subr.bf16.mxu1 %v13766_v33  ;;  %v13826_v32 = vld [vmem:[#allocation3 + $0x16e4] ss:$68 sps:$4 sm:$0xff]   ;;  %v13821_v33 = vld [vmem:[#allocation3 + $0x16d8] ss:$68 sps:$4 sm:$0xff]  }
  0xce   :  { %7245 = vmatprep.mubr.bf16.mxu1 %v15435_v34  ;;  %6968 = vmatprep.mubr.bf16.mxu0 %v15435_v34 }
  0xd0   :  { %6999 = vmatpush1.bf16.msra.mxu0 %v13761_v35  ;;  %7273 = vmatpush1.bf16.msra.mxu1 %v13764_v36  ;;  %v13824_v35 = vld [vmem:[#allocation3 + $0x16e0] ss:$68 sps:$4 sm:$0xff]  }
  0xd1   :  { %7000 = vmatprep.subr.bf16.mxu0 %v13769_v37  ;;  %7274 = vmatprep.subr.bf16.mxu1 %v13772_v39  ;;  %v13829_v36 = vld [vmem:[#allocation3 + $0x1764] ss:$68 sps:$4 sm:$0xff]   ;;  %v13832_v37 = vld [vmem:[#allocation3 + $0x176c] ss:$68 sps:$4 sm:$0xff]  }
  0xd2   :  { %v13827_v39 = vld [vmem:[#allocation3 + $0x1760] ss:$68 sps:$4 sm:$0xff]  }
  0xd3   :  { %7246 = vmatmul.mubr.bf16.gmra.mrb[16].mxu1 %v15444_v41  ;;  %6969 = vmatmul.mubr.bf16.gmra.mrb[4].mxu0 %v15444_v41 }
  0xd4   :  { %7001 = vmatpush1.bf16.msra.mxu0 %v13767_v44  ;;  %7275 = vmatpush1.bf16.msra.mxu1 %v13770_v45  ;;  %v13838_v44 = vld [vmem:[#allocation3 + $0x17f4] ss:$68 sps:$4 sm:$0xff]   ;;  %v13833_v45 = vld [vmem:[#allocation3 + $0x17e8] ss:$68 sps:$4 sm:$0xff]  }
  0xd5   :  { %7002 = vmatprep.subr.bf16.mxu0 %v13775_v46  ;;  %7276 = vmatprep.subr.bf16.mxu1 %v13778_v47  ;;  %v13836_v46 = vld [vmem:[#allocation3 + $0x17f0] ss:$68 sps:$4 sm:$0xff]  }
  0xd6   :  { %7253 = vmatprep.mubr.bf16.mxu1 %v15449_v49  ;;  %6978 = vmatprep.mubr.bf16.mxu0 %v15449_v49  ;;  %v13841_v47 = vld [vmem:[#allocation3 + $0x1874] ss:$68 sps:$4 sm:$0xff]  }
  0xd8   :  { %7003 = vmatpush1.bf16.msra.mxu0 %v13773_v51  ;;  %7277 = vmatpush1.bf16.msra.mxu1 %v13776_v52  ;;  %v13844_v51 = vld [vmem:[#allocation3 + $0x187c] ss:$68 sps:$4 sm:$0xff]   ;;  %v13839_v52 = vld [vmem:[#allocation3 + $0x1870] ss:$68 sps:$4 sm:$0xff]  }
  0xd9   :  { %7004 = vmatprep.subr.bf16.mxu0 %v13781_v53  ;;  %7278 = vmatprep.subr.bf16.mxu1 %v13784_v54  ;;  %v13842_v53 = vld [vmem:[#allocation3 + $0x1878] ss:$68 sps:$4 sm:$0xff]  }
  0xda   :  { %v13847_v54 = vld [vmem:[#allocation3 + $0x18fc] ss:$68 sps:$4 sm:$0xff]  }
  0xdb   :  { %7254 = vmatmul.mubr.bf16.gmra.mrb[20].mxu1 %v15455_v56  ;;  %6979 = vmatmul.mubr.bf16.gmra.mrb[8].mxu0 %v15455_v56 }
  0xdc   :  { %7005 = vmatpush1.bf16.msra.mxu0 %v13779_v55  ;;  %7279 = vmatpush1.bf16.msra.mxu1 %v13782_v59  ;;  %v13850_v55 = vld [vmem:[#allocation3 + $0x1904] ss:$68 sps:$4 sm:$0xff]  }
  0xdd   :  { %7006 = vmatprep.subr.bf16.mxu0 %v13787_v60  ;;  %7280 = vmatprep.subr.bf16.mxu1 %v13790_v61  ;;  %v13853_v59 = vld [vmem:[#allocation3 + $0x1984] ss:$68 sps:$4 sm:$0xff]   ;;  %v13856_v60 = vld [vmem:[#allocation3 + $0x198c] ss:$68 sps:$4 sm:$0xff]  }
  0xde   :  { %7261 = vmatprep.mubr.bf16.mxu1 %v15463_v62  ;;  %6988 = vmatprep.mubr.bf16.mxu0 %v15463_v62  ;;  %v82_v61 = vld [vmem:[%s16457_s0 + $0x50] sm:$0xff] }
  0xe0   :  { %7007 = vmatpush1.bf16.msra.mxu0 %v13785_v63  ;;  %7281 = vmatpush1.bf16.msra.mxu1 %v13788_v0  ;;  %v15494_v63 = vcombine.low %v15474_v7, %v15479_v8  ;;  %v86_v0 = vld [vmem:[%s16457_s0 + $0x70] sm:$0xff]  ;;  %v13857_v7 = vld [vmem:[#allocation3 + $0x1a08] ss:$68 sps:$4 sm:$0xff]  }
  0xe1   :  { %7008 = vmatprep.subr.bf16.mxu0 %v13793_v1  ;;  %7282 = vmatprep.subr.bf16.mxu1 %v13796_v2  ;;  %v13851_v1 = vld [vmem:[#allocation3 + $0x1980] ss:$68 sps:$4 sm:$0xff]   ;;  %v13854_v2 = vld [vmem:[#allocation3 + $0x1988] ss:$68 sps:$4 sm:$0xff]   ;;  %v13860_v8 = vld [vmem:[#allocation3 + $0x1a10] ss:$68 sps:$4 sm:$0xff]  }
  0xe3   :  { %7262 = vmatmul.mubr.bf16.gmra.mrb[24].mxu1 %v15469_v4  ;;  %6989 = vmatmul.mubr.bf16.gmra.mrb[12].mxu0 %v15469_v4 }
  0xe4   :  { %7009 = vmatpush1.bf16.msra.mxu0 %v13791_v3  ;;  %7283 = vmatpush1.bf16.msra.mxu1 %v13794_v6  ;;  %v13859_v3 = vld [vmem:[#allocation3 + $0x1a0c] ss:$68 sps:$4 sm:$0xff]   ;;  %v13862_v6 = vld [vmem:[#allocation3 + $0x1a14] ss:$68 sps:$4 sm:$0xff]  }
  0xe5   :  { %7010 = vmatprep.subr.bf16.mxu0 %v13799_v9  ;;  %7284 = vmatprep.subr.bf16.mxu1 %v13802_v10  ;;  %v15499_v9 = vcombine.high %v82_v61, %v86_v0  ;;  %v13865_v10 = vld [vmem:[#allocation3 + $0x1a94] ss:$68 sps:$4 sm:$0xff]  }
  0xe6   :  { %7302 = vmatprep.mubr.bf16.mxu1 %v15483_v11  ;;  %7028 = vmatprep.mubr.bf16.mxu0 %v15483_v11 }
  0xe8   :  { %7011 = vmatpush1.bf16.msra.mxu0 %v13797_v12  ;;  %7285 = vmatpush1.bf16.msra.mxu1 %v13800_v13  ;;  %v13868_v12 = vld [vmem:[#allocation3 + $0x1a9c] ss:$68 sps:$4 sm:$0xff]   ;;  %v13863_v13 = vld [vmem:[#allocation3 + $0x1a90] ss:$68 sps:$4 sm:$0xff]  }
  0xe9   :  { %7012 = vmatprep.subr.bf16.mxu0 %v13805_v14  ;;  %7286 = vmatprep.subr.bf16.mxu1 %v13808_v15  ;;  %v13866_v14 = vld [vmem:[#allocation3 + $0x1a98] ss:$68 sps:$4 sm:$0xff]   ;;  %v15505_v15 = vcombine.low %v82_v61, %v86_v0  ;;  %v13904_v61 = vld [vmem:[#allocation3 + $0x1dcc] ss:$68 sps:$4 sm:$0xff]   ;;  %v13899_v0 = vld [vmem:[#allocation3 + $0x1dc0] ss:$68 sps:$4 sm:$0xff]  }
  0xec   :  { %7013 = vmatpush1.bf16.msra.mxu0 %v13803_v16  ;;  %7287 = vmatpush1.bf16.msra.mxu1 %v13806_v17  ;;  %v90_v16 = vld [vmem:[%s16457_s0 + $0x90] sm:$0xff] }
  0xed   :  { %7014 = vmatprep.subr.bf16.mxu0 %v13811_v20  ;;  %7288 = vmatprep.subr.bf16.mxu1 %v13814_v21  ;;  %v94_v17 = vld [vmem:[%s16457_s0 + $0xb0] sm:$0xff]  ;;  %v13871_v20 = vld [vmem:[#allocation3 + $0x1b1c] ss:$68 sps:$4 sm:$0xff]   ;;  %v13874_v21 = vld [vmem:[#allocation3 + $0x1b24] ss:$68 sps:$4 sm:$0xff]  }
  0xf0   :  { %7015 = vmatpush1.bf16.msra.mxu0 %v13809_v22  ;;  %7289 = vmatpush1.bf16.msra.mxu1 %v13812_v23  ;;  %v15513_v22 = vcombine.high %v90_v16, %v94_v17  ;;  %v13869_v23 = vld [vmem:[#allocation3 + $0x1b18] ss:$68 sps:$4 sm:$0xff]  }
  0xf1   :  { %7016 = vmatprep.subr.bf16.mxu0 %v13817_v24  ;;  %7290 = vmatprep.subr.bf16.mxu1 %v13820_v25  ;;  %v13872_v24 = vld [vmem:[#allocation3 + $0x1b20] ss:$68 sps:$4 sm:$0xff]  }
  0xf2   :  { %v13877_v25 = vld [vmem:[#allocation3 + $0x1ba4] ss:$68 sps:$4 sm:$0xff]  }
  0xf4   :  { %7017 = vmatpush1.bf16.msra.mxu0 %v13815_v26  ;;  %7291 = vmatpush1.bf16.msra.mxu1 %v13818_v30  ;;  %v13880_v26 = vld [vmem:[#allocation3 + $0x1bac] ss:$68 sps:$4 sm:$0xff]   ;;  %v13875_v30 = vld [vmem:[#allocation3 + $0x1ba0] ss:$68 sps:$4 sm:$0xff]  }
  0xf5   :  { %7018 = vmatprep.subr.bf16.mxu0 %v13823_v31  ;;  %7292 = vmatprep.subr.bf16.mxu1 %v13826_v32  ;;  %v13878_v31 = vld [vmem:[#allocation3 + $0x1ba8] ss:$68 sps:$4 sm:$0xff]   ;;  %v15519_v32 = vcombine.low %v90_v16, %v94_v17  ;;  %v13917_v17 = vld [vmem:[#allocation3 + $0x1f58] ss:$68 sps:$4 sm:$0xff]  }
  0xf6   :  { %v13922_v16 = vld [vmem:[#allocation3 + $0x1f64] ss:$68 sps:$4 sm:$0xff]  }
  0xf8   :  { %7019 = vmatpush1.bf16.msra.mxu0 %v13821_v33  ;;  %7293 = vmatpush1.bf16.msra.mxu1 %v13824_v35  ;;  %v98_v33 = vld [vmem:[%s16457_s0 + $0xd0] sm:$0xff] }
  0xf9   :  { %7020 = vmatprep.subr.bf16.mxu0 %v13829_v36  ;;  %7294 = vmatprep.subr.bf16.mxu1 %v13832_v37  ;;  %v102_v35 = vld [vmem:[%s16457_s0 + $0xf0] sm:$0xff] }
  0xfa   :  { %v13883_v36 = vld [vmem:[#allocation3 + $0x1c2c] ss:$68 sps:$4 sm:$0xff]   ;;  %v13886_v37 = vld [vmem:[#allocation3 + $0x1c34] ss:$68 sps:$4 sm:$0xff]  }
  0xfc   :  { %7021 = vmatpush1.bf16.msra.mxu0 %v13827_v39  ;;  %7295 = vmatpush1.bf16.msra.mxu1 %v13830_v40  ;;  %v15527_v39 = vcombine.high %v98_v33, %v102_v35  ;;  %v13881_v40 = vld [vmem:[#allocation3 + $0x1c28] ss:$68 sps:$4 sm:$0xff]  }
  0xfd   :  { %7022 = vmatprep.subr.bf16.mxu0 %v13835_v42  ;;  %7296 = vmatprep.subr.bf16.mxu1 %v13838_v44  ;;  %v13884_v42 = vld [vmem:[#allocation3 + $0x1c30] ss:$68 sps:$4 sm:$0xff]  }
  0xfe   :  { %v13889_v44 = vld [vmem:[#allocation3 + $0x1cb4] ss:$68 sps:$4 sm:$0xff]  }
 0x100   :  { %7023 = vmatpush1.bf16.msra.mxu0 %v13833_v45  ;;  %7297 = vmatpush1.bf16.msra.mxu1 %v13836_v46  ;;  %v13892_v45 = vld [vmem:[#allocation3 + $0x1cbc] ss:$68 sps:$4 sm:$0xff]   ;;  %v13887_v46 = vld [vmem:[#allocation3 + $0x1cb0] ss:$68 sps:$4 sm:$0xff]  }
 0x101   :  { %7024 = vmatprep.subr.bf16.mxu0 %v13841_v47  ;;  %7298 = vmatprep.subr.bf16.mxu1 %v13844_v51  ;;  %v13890_v47 = vld [vmem:[#allocation3 + $0x1cb8] ss:$68 sps:$4 sm:$0xff]   ;;  %v15533_v51 = vcombine.low %v98_v33, %v102_v35  ;;  %v13932_v33 = vld [vmem:[#allocation3 + $0x2070] ss:$68 sps:$4 sm:$0xff]  }
 0x102   :  { %v13937_v35 = vld [vmem:[#allocation3 + $0x20f4] ss:$68 sps:$4 sm:$0xff]  }
 0x104   :  { %7025 = vmatpush1.bf16.msra.mxu0 %v13839_v52  ;;  %7299 = vmatpush1.bf16.msra.mxu1 %v13842_v53  ;;  %v15538_v52 = vld [vmem:[%s16457_s0 + $0x18] sm:$0xff] }
 0x105   :  { %7026 = vmatprep.subr.bf16.mxu0 %v13847_v54  ;;  %7300 = vmatprep.subr.bf16.mxu1 %v13850_v55  ;;  %v15543_v53 = vld [vmem:[%s16457_s0 + $0x38] sm:$0xff]  ;;  %v13898_v55 = vld [vmem:[#allocation3 + $0x1d44] ss:$68 sps:$4 sm:$0xff]  }
 0x106   :  { %v13895_v54 = vld [vmem:[#allocation3 + $0x1d3c] ss:$68 sps:$4 sm:$0xff]  }
 0x108   :  { %7027 = vmatpush1.bf16.msra.mxu0 %v13845_v57  ;;  %7301 = vmatpush1.bf16.msra.mxu1 %v13848_v58  ;;  %v15547_v57 = vcombine.high %v15538_v52, %v15543_v53  ;;  %v13893_v58 = vld [vmem:[#allocation3 + $0x1d38] ss:$68 sps:$4 sm:$0xff]  }
 0x109   :  { %7066 = vmatprep.subr.bf16.mxu0 %v13853_v59  ;;  %7337 = vmatprep.subr.bf16.mxu1 %v13856_v60  ;;  %v13896_v59 = vld [vmem:[#allocation3 + $0x1d40] ss:$68 sps:$4 sm:$0xff]  }
 0x10a   :  { %v13901_v60 = vld [vmem:[#allocation3 + $0x1dc4] ss:$68 sps:$4 sm:$0xff]  }
 0x10b   :  { %7303 = vmatmul.mubr.bf16.vlgmr.msra.gmra.mrb[0].mxu1 %v15494_v63  ;;  %7029 = vmatmul.mubr.bf16.vlgmr.msra.gmra.mrb[0].mxu0 %v15494_v63 }
 0x10c   :  { %7067 = vmatpush1.bf16.msra.mxu0 %v13851_v1  ;;  %7338 = vmatpush1.bf16.msra.mxu1 %v13854_v2  ;;  %v13902_v1 = vld [vmem:[#allocation3 + $0x1dc8] ss:$68 sps:$4 sm:$0xff]  }
 0x10d   :  { %7068 = vmatprep.subr.bf16.mxu0 %v13859_v3  ;;  %7339 = vmatprep.subr.bf16.mxu1 %v13862_v6  ;;  %v13907_v2 = vld [vmem:[#allocation3 + $0x1e4c] ss:$68 sps:$4 sm:$0xff]   ;;  %v13910_v3 = vld [vmem:[#allocation3 + $0x1e54] ss:$68 sps:$4 sm:$0xff]  }
 0x10e   :  { %7312 = vmatprep.mubr.bf16.mxu1 %v15499_v9  ;;  %7038 = vmatprep.mubr.bf16.mxu0 %v15499_v9  ;;  %v13905_v6 = vld [vmem:[#allocation3 + $0x1e48] ss:$68 sps:$4 sm:$0xff]  }
 0x110   :  { %7069 = vmatpush1.bf16.msra.mxu0 %v13857_v7  ;;  %7340 = vmatpush1.bf16.msra.mxu1 %v13860_v8  ;;  %v13908_v7 = vld [vmem:[#allocation3 + $0x1e50] ss:$68 sps:$4 sm:$0xff]  }
 0x111   :  { %7070 = vmatprep.subr.bf16.mxu0 %v13865_v10  ;;  %7341 = vmatprep.subr.bf16.mxu1 %v13868_v12  ;;  %v13913_v8 = vld [vmem:[#allocation3 + $0x1ed4] ss:$68 sps:$4 sm:$0xff]   ;;  %v13916_v10 = vld [vmem:[#allocation3 + $0x1edc] ss:$68 sps:$4 sm:$0xff]  }
 0x112   :  { %v13911_v12 = vld [vmem:[#allocation3 + $0x1ed0] ss:$68 sps:$4 sm:$0xff]  }
 0x113   :  { %7313 = vmatmul.mubr.bf16.gmra.mrb[28].mxu1 %v15505_v15  ;;  %7039 = vmatmul.mubr.bf16.gmra.mrb[4].mxu0 %v15505_v15 }
 0x114   :  { %7071 = vmatpush1.bf16.msra.mxu0 %v13863_v13  ;;  %7342 = vmatpush1.bf16.msra.mxu1 %v13866_v14  ;;  %v13914_v13 = vld [vmem:[#allocation3 + $0x1ed8] ss:$68 sps:$4 sm:$0xff]  }
 0x115   :  { %7072 = vmatprep.subr.bf16.mxu0 %v13871_v20  ;;  %7343 = vmatprep.subr.bf16.mxu1 %v13874_v21  ;;  %v13919_v14 = vld [vmem:[#allocation3 + $0x1f5c] ss:$68 sps:$4 sm:$0xff]   ;;  %v13925_v21 = vld [vmem:[#allocation3 + $0x1fe4] ss:$68 sps:$4 sm:$0xff]  }
 0x116   :  { %7320 = vmatprep.mubr.bf16.mxu1 %v15513_v22  ;;  %7048 = vmatprep.mubr.bf16.mxu0 %v15513_v22  ;;  %v13920_v20 = vld [vmem:[#allocation3 + $0x1f60] ss:$68 sps:$4 sm:$0xff]  }
 0x118   :  { %7073 = vmatpush1.bf16.msra.mxu0 %v13869_v23  ;;  %7344 = vmatpush1.bf16.msra.mxu1 %v13872_v24  ;;  %v13928_v23 = vld [vmem:[#allocation3 + $0x1fec] ss:$68 sps:$4 sm:$0xff]   ;;  %v13923_v24 = vld [vmem:[#allocation3 + $0x1fe0] ss:$68 sps:$4 sm:$0xff]  }
 0x119   :  { %7074 = vmatprep.subr.bf16.mxu0 %v13877_v25  ;;  %7345 = vmatprep.subr.bf16.mxu1 %v13880_v26  ;;  %v13926_v25 = vld [vmem:[#allocation3 + $0x1fe8] ss:$68 sps:$4 sm:$0xff]  }
 0x11a   :  { %v13931_v26 = vld [vmem:[#allocation3 + $0x206c] ss:$68 sps:$4 sm:$0xff]  }
 0x11b   :  { %7321 = vmatmul.mubr.bf16.gmra.mrb[32].mxu1 %v15519_v32  ;;  %7049 = vmatmul.mubr.bf16.gmra.mrb[8].mxu0 %v15519_v32 }
 0x11c   :  { %7075 = vmatpush1.bf16.msra.mxu0 %v13875_v30  ;;  %7346 = vmatpush1.bf16.msra.mxu1 %v13878_v31  ;;  %v13934_v30 = vld [vmem:[#allocation3 + $0x2074] ss:$68 sps:$4 sm:$0xff]   ;;  %v13929_v31 = vld [vmem:[#allocation3 + $0x2068] ss:$68 sps:$4 sm:$0xff]  }
 0x11d   :  { %7076 = vmatprep.subr.bf16.mxu0 %v13883_v36  ;;  %7347 = vmatprep.subr.bf16.mxu1 %v13886_v37  ;;  %v13940_v36 = vld [vmem:[#allocation3 + $0x20fc] ss:$68 sps:$4 sm:$0xff]   ;;  %v13935_v37 = vld [vmem:[#allocation3 + $0x20f0] ss:$68 sps:$4 sm:$0xff]  }
 0x11e   :  { %7328 = vmatprep.mubr.bf16.mxu1 %v15527_v39  ;;  %7058 = vmatprep.mubr.bf16.mxu0 %v15527_v39 }
 0x120   :  { %7077 = vmatpush1.bf16.msra.mxu0 %v13881_v40  ;;  %7348 = vmatpush1.bf16.msra.mxu1 %v13884_v42  ;;  %v13938_v40 = vld [vmem:[#allocation3 + $0x20f8] ss:$68 sps:$4 sm:$0xff]  }
 0x121   :  { %7078 = vmatprep.subr.bf16.mxu0 %v13889_v44  ;;  %7349 = vmatprep.subr.bf16.mxu1 %v13892_v45  ;;  %v13943_v42 = vld [vmem:[#allocation3 + $0x217c] ss:$68 sps:$4 sm:$0xff]   ;;  %v13946_v44 = vld [vmem:[#allocation3 + $0x2184] ss:$68 sps:$4 sm:$0xff]  }
 0x122   :  { %v13941_v45 = vld [vmem:[#allocation3 + $0x2178] ss:$68 sps:$4 sm:$0xff]  }
 0x123   :  { %7329 = vmatmul.mubr.bf16.gmra.mrb[36].mxu1 %v15533_v51  ;;  %7059 = vmatmul.mubr.bf16.gmra.mrb[12].mxu0 %v15533_v51 }
 0x124   :  { %7079 = vmatpush1.bf16.msra.mxu0 %v13887_v46  ;;  %7350 = vmatpush1.bf16.msra.mxu1 %v13890_v47  ;;  %v13944_v46 = vld [vmem:[#allocation3 + $0x2180] ss:$68 sps:$4 sm:$0xff]   ;;  %v13949_v47 = vld [vmem:[#allocation3 + $0x14] ss:$68 sps:$4 sm:$0xff]  }
 0x125   :  { %7080 = vmatprep.subr.bf16.mxu0 %v13895_v54  ;;  %7351 = vmatprep.subr.bf16.mxu1 %v13898_v55  ;;  %v13952_v54 = vld [vmem:[#allocation3 + $0x1c] ss:$68 sps:$4 sm:$0xff]   ;;  %v13947_v55 = vld [vmem:[#allocation3 + $0x10] ss:$68 sps:$4 sm:$0xff]  }
 0x126   :  { %7098 = vmatprep.mubr.bf16.mxu0 %v15547_v57  ;;  %7369 = vmatprep.mubr.bf16.mxu1 %v15547_v57 }
 0x128   :  { %7081 = vmatpush1.bf16.msra.mxu0 %v13893_v58  ;;  %7352 = vmatpush1.bf16.msra.mxu1 %v13896_v59  ;;  %v13950_v58 = vld [vmem:[#allocation3 + $0x18] ss:$68 sps:$4 sm:$0xff]   ;;  %v15555_v59 = vcombine.low %v15538_v52, %v15543_v53  ;;  %v13956_v53 = vld [vmem:[#allocation3 + $0xa0] ss:$68 sps:$4 sm:$0xff]  }
 0x129   :  { %7082 = vmatprep.subr.bf16.mxu0 %v13901_v60  ;;  %7353 = vmatprep.subr.bf16.mxu1 %v13904_v61  ;;  %v83_v60 = vld [vmem:[%s16457_s0 + $0x58] sm:$0xff] }
 0x12a   :  { %v87_v61 = vld [vmem:[%s16457_s0 + $0x78] sm:$0xff] }
 0x12b   :  { %v13953_v52 = vld [vmem:[#allocation3 + $0x98] ss:$68 sps:$4 sm:$0xff]  }
 0x12c   :  { %7083 = vmatpush1.bf16.msra.mxu0 %v13899_v0  ;;  %7354 = vmatpush1.bf16.msra.mxu1 %v13902_v1  ;;  %v13955_v0 = vld [vmem:[#allocation3 + $0x9c] ss:$68 sps:$4 sm:$0xff]   ;;  %v13958_v1 = vld [vmem:[#allocation3 + $0xa4] ss:$68 sps:$4 sm:$0xff]  }
 0x12d   :  { %7084 = vmatprep.subr.bf16.mxu0 %v13907_v2  ;;  %7355 = vmatprep.subr.bf16.mxu1 %v13910_v3  ;;  %v15563_v2 = vcombine.high %v83_v60, %v87_v61  ;;  %v13961_v3 = vld [vmem:[#allocation3 + $0x124] ss:$68 sps:$4 sm:$0xff]  }
 0x130   :  { %7085 = vmatpush1.bf16.msra.mxu0 %v13905_v6  ;;  %7356 = vmatpush1.bf16.msra.mxu1 %v13908_v7  ;;  %v13964_v6 = vld [vmem:[#allocation3 + $0x12c] ss:$68 sps:$4 sm:$0xff]   ;;  %v13959_v7 = vld [vmem:[#allocation3 + $0x120] ss:$68 sps:$4 sm:$0xff]  }
 0x131   :  { %7086 = vmatprep.subr.bf16.mxu0 %v13913_v8  ;;  %7357 = vmatprep.subr.bf16.mxu1 %v13916_v10  ;;  %v13962_v8 = vld [vmem:[#allocation3 + $0x128] ss:$68 sps:$4 sm:$0xff]   ;;  %v15569_v10 = vcombine.low %v83_v60, %v87_v61  ;;  %v13992_v61 = vld [vmem:[#allocation3 + $0x3d0] ss:$68 sps:$4 sm:$0xff]  }
 0x132   :  { %v13989_v60 = vld [vmem:[#allocation3 + $0x3c8] ss:$68 sps:$4 sm:$0xff]  }
 0x134   :  { %7087 = vmatpush1.bf16.msra.mxu0 %v13911_v12  ;;  %7358 = vmatpush1.bf16.msra.mxu1 %v13914_v13  ;;  %v91_v12 = vld [vmem:[%s16457_s0 + $0x98] sm:$0xff] }
 0x135   :  { %7088 = vmatprep.subr.bf16.mxu0 %v13919_v14  ;;  %7359 = vmatprep.subr.bf16.mxu1 %v13922_v16  ;;  %v95_v13 = vld [vmem:[%s16457_s0 + $0xb8] sm:$0xff]  ;;  %v13967_v14 = vld [vmem:[#allocation3 + $0x1ac] ss:$68 sps:$4 sm:$0xff]  }
 0x136   :  { %v13970_v16 = vld [vmem:[#allocation3 + $0x1b4] ss:$68 sps:$4 sm:$0xff]  }
 0x138   :  { %7089 = vmatpush1.bf16.msra.mxu0 %v13917_v17  ;;  %7360 = vmatpush1.bf16.msra.mxu1 %v13920_v20  ;;  %v15577_v17 = vcombine.high %v91_v12, %v95_v13  ;;  %v13965_v20 = vld [vmem:[#allocation3 + $0x1a8] ss:$68 sps:$4 sm:$0xff]  }
 0x139   :  { %7090 = vmatprep.subr.bf16.mxu0 %v13925_v21  ;;  %7361 = vmatprep.subr.bf16.mxu1 %v13928_v23  ;;  %v13968_v21 = vld [vmem:[#allocation3 + $0x1b0] ss:$68 sps:$4 sm:$0xff]  }
 0x13a   :  { %v13973_v23 = vld [vmem:[#allocation3 + $0x234] ss:$68 sps:$4 sm:$0xff]  }
 0x13c   :  { %7091 = vmatpush1.bf16.msra.mxu0 %v13923_v24  ;;  %7362 = vmatpush1.bf16.msra.mxu1 %v13926_v25  ;;  %v13976_v24 = vld [vmem:[#allocation3 + $0x23c] ss:$68 sps:$4 sm:$0xff]   ;;  %v13971_v25 = vld [vmem:[#allocation3 + $0x230] ss:$68 sps:$4 sm:$0xff]  }
 0x13d   :  { %7092 = vmatprep.subr.bf16.mxu0 %v13931_v26  ;;  %7363 = vmatprep.subr.bf16.mxu1 %v13934_v30  ;;  %v13974_v26 = vld [vmem:[#allocation3 + $0x238] ss:$68 sps:$4 sm:$0xff]   ;;  %v15583_v30 = vcombine.low %v91_v12, %v95_v13  ;;  %v14006_v12 = vld [vmem:[#allocation3 + $0x4e4] ss:$68 sps:$4 sm:$0xff]  }
 0x140   :  { %7093 = vmatpush1.bf16.msra.mxu0 %v13929_v31  ;;  %7364 = vmatpush1.bf16.msra.mxu1 %v13932_v33  ;;  %v99_v31 = vld [vmem:[%s16457_s0 + $0xd8] sm:$0xff] }
 0x141   :  { %7094 = vmatprep.subr.bf16.mxu0 %v13937_v35  ;;  %7365 = vmatprep.subr.bf16.mxu1 %v13940_v36  ;;  %v103_v33 = vld [vmem:[%s16457_s0 + $0xf8] sm:$0xff]  ;;  %v13982_v36 = vld [vmem:[#allocation3 + $0x2c4] ss:$68 sps:$4 sm:$0xff]  }
 0x142   :  { %v13979_v35 = vld [vmem:[#allocation3 + $0x2bc] ss:$68 sps:$4 sm:$0xff]  }
 0x144   :  { %7095 = vmatpush1.bf16.msra.mxu0 %v13935_v37  ;;  %7366 = vmatpush1.bf16.msra.mxu1 %v13938_v40  ;;  %v15591_v37 = vcombine.high %v99_v31, %v103_v33  ;;  %v13977_v40 = vld [vmem:[#allocation3 + $0x2b8] ss:$68 sps:$4 sm:$0xff]  }
 0x145   :  { %7096 = vmatprep.subr.bf16.mxu0 %v13943_v42  ;;  %7367 = vmatprep.subr.bf16.mxu1 %v13946_v44  ;;  %v13980_v42 = vld [vmem:[#allocation3 + $0x2c0] ss:$68 sps:$4 sm:$0xff]  }
 0x146   :  { %v13985_v44 = vld [vmem:[#allocation3 + $0x344] ss:$68 sps:$4 sm:$0xff]  }
 0x148   :  { %7097 = vmatpush1.bf16.msra.mxu0 %v13941_v45  ;;  %7368 = vmatpush1.bf16.msra.mxu1 %v13944_v46  ;;  %v13988_v45 = vld [vmem:[#allocation3 + $0x34c] ss:$68 sps:$4 sm:$0xff]   ;;  %v15597_v46 = vcombine.low %v99_v31, %v103_v33 }
 0x149   :  { %7404 = vmatprep.subr.bf16.mxu0 %v13949_v47  ;;  %7684 = vmatprep.subr.bf16.mxu1 %v13952_v54  ;;  %v13983_v47 = vld [vmem:[#allocation3 + $0x340] ss:$68 sps:$4 sm:$0xff]   ;;  %v13986_v54 = vld [vmem:[#allocation3 + $0x348] ss:$68 sps:$4 sm:$0xff]  }
 0x14a   :  { %v14015_v33 = vld [vmem:[#allocation3 + $0x5ec] ss:$68 sps:$4 sm:$0xff]  }
 0x14b   :  { %7099 = vmatmul.mubr.bf16.vlgmr.msra.gmra.mrb[0].mxu0 %v15555_v59  ;;  %7370 = vmatmul.mubr.bf16.vlgmr.msra.gmra.mrb[0].mxu1 %v15555_v59 }
 0x14c   :  { %7405 = vmatpush1.bf16.msra.mxu0 %v13947_v55  ;;  %7685 = vmatpush1.bf16.msra.mxu1 %v13950_v58  ;;  %v13991_v55 = vld [vmem:[#allocation3 + $0x3cc] ss:$68 sps:$4 sm:$0xff]   ;;  %v13994_v58 = vld [vmem:[#allocation3 + $0x3d4] ss:$68 sps:$4 sm:$0xff]  }
 0x14d   :  { %7406 = vmatprep.subr.bf16.mxu0 %v13955_v0  ;;  %7686 = vmatprep.subr.bf16.mxu1 %v13958_v1  ;;  %v13997_v0 = vld [vmem:[#allocation3 + $0x454] ss:$68 sps:$4 sm:$0xff]   ;;  %v14000_v1 = vld [vmem:[#allocation3 + $0x45c] ss:$68 sps:$4 sm:$0xff]  }
 0x14e   :  { %7108 = vmatprep.mubr.bf16.mxu0 %v15563_v2  ;;  %7379 = vmatprep.mubr.bf16.mxu1 %v15563_v2 }
 0x150   :  { %7407 = vmatpush1.bf16.msra.mxu0 %v13953_v52  ;;  %7687 = vmatpush1.bf16.msra.mxu1 %v13956_v53  ;;  %v13995_v53 = vld [vmem:[#allocation3 + $0x450] ss:$68 sps:$4 sm:$0xff]  }
 0x151   :  { %7408 = vmatprep.subr.bf16.mxu0 %v13961_v3  ;;  %7688 = vmatprep.subr.bf16.mxu1 %v13964_v6  ;;  %v13998_v3 = vld [vmem:[#allocation3 + $0x458] ss:$68 sps:$4 sm:$0xff]  }
 0x153   :  { %7109 = vmatmul.mubr.bf16.gmra.mrb[4].mxu0 %v15569_v10  ;;  %7380 = vmatmul.mubr.bf16.gmra.mrb[40].mxu1 %v15569_v10 }
 0x154   :  { %7409 = vmatpush1.bf16.msra.mxu0 %v13959_v7  ;;  %7689 = vmatpush1.bf16.msra.mxu1 %v13962_v8  ;;  %v14003_v8 = vld [vmem:[#allocation3 + $0x4dc] ss:$68 sps:$4 sm:$0xff]  }
 0x155   :  { %7410 = vmatprep.subr.bf16.mxu0 %v13967_v14  ;;  %7690 = vmatprep.subr.bf16.mxu1 %v13970_v16  ;;  %v14001_v14 = vld [vmem:[#allocation3 + $0x4d8] ss:$68 sps:$4 sm:$0xff]   ;;  %v14004_v16 = vld [vmem:[#allocation3 + $0x4e0] ss:$68 sps:$4 sm:$0xff]  }
 0x156   :  { %7118 = vmatprep.mubr.bf16.mxu0 %v15577_v17  ;;  %7387 = vmatprep.mubr.bf16.mxu1 %v15577_v17 }
 0x158   :  { %7411 = vmatpush1.bf16.msra.mxu0 %v13965_v20  ;;  %7691 = vmatpush1.bf16.msra.mxu1 %v13968_v21  ;;  %v14009_v20 = vld [vmem:[#allocation3 + $0x564] ss:$68 sps:$4 sm:$0xff]   ;;  %v14012_v21 = vld [vmem:[#allocation3 + $0x56c] ss:$68 sps:$4 sm:$0xff]  }
 0x159   :  { %7412 = vmatprep.subr.bf16.mxu0 %v13973_v23  ;;  %7692 = vmatprep.subr.bf16.mxu1 %v13976_v24  ;;  %v14007_v23 = vld [vmem:[#allocation3 + $0x560] ss:$68 sps:$4 sm:$0xff]   ;;  %v14010_v24 = vld [vmem:[#allocation3 + $0x568] ss:$68 sps:$4 sm:$0xff]  }
 0x15b   :  { %7119 = vmatmul.mubr.bf16.gmra.mrb[8].mxu0 %v15583_v30  ;;  %7388 = vmatmul.mubr.bf16.gmra.mrb[44].mxu1 %v15583_v30 }
 0x15c   :  { %7413 = vmatpush1.bf16.msra.mxu0 %v13971_v25  ;;  %7693 = vmatpush1.bf16.msra.mxu1 %v13974_v26 }
 0x15d   :  { %7414 = vmatprep.subr.bf16.mxu0 %v13979_v35  ;;  %7694 = vmatprep.subr.bf16.mxu1 %v13982_v36  ;;  %v14018_v35 = vld [vmem:[#allocation3 + $0x5f4] ss:$68 sps:$4 sm:$0xff]  }
 0x15e   :  { %7128 = vmatprep.mubr.bf16.mxu0 %v15591_v37  ;;  %7395 = vmatprep.mubr.bf16.mxu1 %v15591_v37 }
 0x160   :  { %7415 = vmatpush1.bf16.msra.mxu0 %v13977_v40  ;;  %7695 = vmatpush1.bf16.msra.mxu1 %v13980_v42  ;;  %v14013_v40 = vld [vmem:[#allocation3 + $0x5e8] ss:$68 sps:$4 sm:$0xff]   ;;  %v14016_v42 = vld [vmem:[#allocation3 + $0x5f0] ss:$68 sps:$4 sm:$0xff]  }
 0x161   :  { %7416 = vmatprep.subr.bf16.mxu0 %v13985_v44  ;;  %7696 = vmatprep.subr.bf16.mxu1 %v13988_v45  ;;  %v14021_v44 = vld [vmem:[#allocation3 + $0x674] ss:$68 sps:$4 sm:$0xff]   ;;  %v14024_v45 = vld [vmem:[#allocation3 + $0x67c] ss:$68 sps:$4 sm:$0xff]  }
 0x163   :  { %7129 = vmatmul.mubr.bf16.gmra.mrb[12].mxu0 %v15597_v46  ;;  %7396 = vmatmul.mubr.bf16.gmra.mrb[48].mxu1 %v15597_v46 }
 0x164   :  { %7417 = vmatpush1.bf16.msra.mxu0 %v13983_v47  ;;  %7697 = vmatpush1.bf16.msra.mxu1 %v13986_v54  ;;  %v14019_v47 = vld [vmem:[#allocation3 + $0x670] ss:$68 sps:$4 sm:$0xff]   ;;  %v14022_v54 = vld [vmem:[#allocation3 + $0x678] ss:$68 sps:$4 sm:$0xff]  }
 0x165   :  { %7418 = vmatprep.subr.bf16.mxu0 %v13991_v55  ;;  %7698 = vmatprep.subr.bf16.mxu1 %v13994_v58 }
 0x166   :  { %v15601_v52 = vpop.f32.mrb[4].mxu1  ;;  %7436 = vmatprep.mubr.bf16.mxu0 %v15359_v50  ;;  %7716 = vmatprep.mubr.bf16.mxu1 %v15359_v50 }
 0x167   :  { %v7182_v6 = vpop.f32.mrb[5].mxu1 }
 0x168   :  { %7419 = vmatpush1.bf16.msra.mxu0 %v13989_v60  ;;  %7699 = vmatpush1.bf16.msra.mxu1 %v13992_v61  ;;  %v15605_v7 = vpop.f32.mrb[6].mxu1  ;;  %v14027_v61 = vld [vmem:[#allocation3 + $0x6fc] ss:$68 sps:$4 sm:$0xff]   ;;  %v14033_v6 = vld [vmem:[#allocation3 + $0x784] ss:$68 sps:$4 sm:$0xff]  }
 0x169   :  { %7420 = vmatprep.subr.bf16.mxu0 %v13997_v0  ;;  %7700 = vmatprep.subr.bf16.mxu1 %v14000_v1  ;;  %v7185_v13 = vpop.f32.mrb[7].mxu1  ;;  %v14030_v0 = vld [vmem:[#allocation3 + $0x704] ss:$68 sps:$4 sm:$0xff]  }
 0x16a   :  { %v14034_v13 = vld [vmem:[#allocation3 + $0x788] ss:$68 sps:$4 sm:$0xff]  }
 0x16c   :  { %7421 = vmatpush1.bf16.msra.mxu0 %v13995_v53  ;;  %7701 = vmatpush1.bf16.msra.mxu1 %v13998_v3  ;;  %v14025_v53 = vld [vmem:[#allocation3 + $0x6f8] ss:$68 sps:$4 sm:$0xff]   ;;  %v14028_v3 = vld [vmem:[#allocation3 + $0x700] ss:$68 sps:$4 sm:$0xff]  }
 0x16d   :  { %7422 = vmatprep.subr.bf16.mxu0 %v14003_v8  ;;  %7702 = vmatprep.subr.bf16.mxu1 %v14006_v12  ;;  %v14036_v8 = vld [vmem:[#allocation3 + $0x78c] ss:$68 sps:$4 sm:$0xff]   ;;  %v14031_v12 = vld [vmem:[#allocation3 + $0x780] ss:$68 sps:$4 sm:$0xff]  }
 0x16e   :  { %v15607_v25 = vpop.f32.mrb[8].mxu1 }
 0x16f   :  { %v7190_v26 = vpop.f32.mrb[9].mxu1 }
 0x170   :  { %7423 = vmatpush1.bf16.msra.mxu0 %v14001_v14  ;;  %7703 = vmatpush1.bf16.msra.mxu1 %v14004_v16  ;;  %v15609_v31 = vpop.f32.mrb[10].mxu1  ;;  %v14039_v14 = vld [vmem:[#allocation3 + $0x80c] ss:$68 sps:$4 sm:$0xff]   ;;  %v14042_v16 = vld [vmem:[#allocation3 + $0x814] ss:$68 sps:$4 sm:$0xff]  }
 0x171   :  { %7424 = vmatprep.subr.bf16.mxu0 %v14009_v20  ;;  %7704 = vmatprep.subr.bf16.mxu1 %v14012_v21  ;;  %v7193_v36 = vpop.f32.mrb[11].mxu1  ;;  %v14037_v20 = vld [vmem:[#allocation3 + $0x808] ss:$68 sps:$4 sm:$0xff]   ;;  %v14040_v21 = vld [vmem:[#allocation3 + $0x810] ss:$68 sps:$4 sm:$0xff]  }
 0x172   :  { %v14043_v26 = vld [vmem:[#allocation3 + $0x890] ss:$68 sps:$4 sm:$0xff]   ;;  %v14054_v36 = vld [vmem:[#allocation3 + $0x924] ss:$68 sps:$4 sm:$0xff]  }
 0x174   :  { %7425 = vmatpush1.bf16.msra.mxu0 %v14007_v23  ;;  %7705 = vmatpush1.bf16.msra.mxu1 %v14010_v24  ;;  %v14045_v23 = vld [vmem:[#allocation3 + $0x894] ss:$68 sps:$4 sm:$0xff]   ;;  %v14048_v24 = vld [vmem:[#allocation3 + $0x89c] ss:$68 sps:$4 sm:$0xff]  }
 0x175   :  { %7426 = vmatprep.subr.bf16.mxu0 %v14015_v33  ;;  %7706 = vmatprep.subr.bf16.mxu1 %v14018_v35  ;;  %v14046_v33 = vld [vmem:[#allocation3 + $0x898] ss:$68 sps:$4 sm:$0xff]  }
 0x176   :  { %v15611_v55 = vpop.f32.mrb[12].mxu1  ;;  %v14051_v35 = vld [vmem:[#allocation3 + $0x91c] ss:$68 sps:$4 sm:$0xff]  }
 0x177   :  { %v7198_v58 = vpop.f32.mrb[13].mxu1 }
 0x178   :  { %7427 = vmatpush1.bf16.msra.mxu0 %v14013_v40  ;;  %7707 = vmatpush1.bf16.msra.mxu1 %v14016_v42  ;;  %v15613_v60 = vpop.f32.mrb[14].mxu1  ;;  %v14049_v40 = vld [vmem:[#allocation3 + $0x918] ss:$68 sps:$4 sm:$0xff]   ;;  %v14052_v42 = vld [vmem:[#allocation3 + $0x920] ss:$68 sps:$4 sm:$0xff]  }
 0x179   :  { %7428 = vmatprep.subr.bf16.mxu0 %v14021_v44  ;;  %7708 = vmatprep.subr.bf16.mxu1 %v14024_v45  ;;  %v7201_v1 = vpop.f32.mrb[15].mxu1  ;;  %v14057_v44 = vld [vmem:[#allocation3 + $0x9a4] ss:$68 sps:$4 sm:$0xff]   ;;  %v14060_v45 = vld [vmem:[#allocation3 + $0x9ac] ss:$68 sps:$4 sm:$0xff]  }
 0x17a   :  { %v14063_v58 = vld [vmem:[#allocation3 + $0xa2c] ss:$68 sps:$4 sm:$0xff]  }
 0x17b   :  { %v14064_v1 = vld [vmem:[#allocation3 + $0xa30] ss:$68 sps:$4 sm:$0xff]  }
 0x17c   :  { %7429 = vmatpush1.bf16.msra.mxu0 %v14019_v47  ;;  %7709 = vmatpush1.bf16.msra.mxu1 %v14022_v54  ;;  %v14055_v47 = vld [vmem:[#allocation3 + $0x9a0] ss:$68 sps:$4 sm:$0xff]   ;;  %v14058_v54 = vld [vmem:[#allocation3 + $0x9a8] ss:$68 sps:$4 sm:$0xff]  }
 0x17d   :  { %7430 = vmatprep.subr.bf16.mxu0 %v14027_v61  ;;  %7710 = vmatprep.subr.bf16.mxu1 %v14030_v0  ;;  %v14066_v61 = vld [vmem:[#allocation3 + $0xa34] ss:$68 sps:$4 sm:$0xff]   ;;  %v14061_v0 = vld [vmem:[#allocation3 + $0xa28] ss:$68 sps:$4 sm:$0xff]  }
 0x180   :  { %7431 = vmatpush1.bf16.msra.mxu0 %v14025_v53  ;;  %7711 = vmatpush1.bf16.msra.mxu1 %v14028_v3  ;;  %v14069_v53 = vld [vmem:[#allocation3 + $0xab4] ss:$68 sps:$4 sm:$0xff]   ;;  %v14072_v3 = vld [vmem:[#allocation3 + $0xabc] ss:$68 sps:$4 sm:$0xff]  }
 0x181   :  { %7432 = vmatprep.subr.bf16.mxu0 %v14033_v6  ;;  %7712 = vmatprep.subr.bf16.mxu1 %v14036_v8  ;;  %v14067_v6 = vld [vmem:[#allocation3 + $0xab0] ss:$68 sps:$4 sm:$0xff]   ;;  %v14070_v8 = vld [vmem:[#allocation3 + $0xab8] ss:$68 sps:$4 sm:$0xff]  }
 0x184   :  { %7433 = vmatpush1.bf16.msra.mxu0 %v14031_v12  ;;  %7713 = vmatpush1.bf16.msra.mxu1 %v14034_v13  ;;  %v14075_v12 = vld [vmem:[#allocation3 + $0xb3c] ss:$68 sps:$4 sm:$0xff]   ;;  %v14078_v13 = vld [vmem:[#allocation3 + $0xb44] ss:$68 sps:$4 sm:$0xff]  }
 0x185   :  { %7434 = vmatprep.subr.bf16.mxu0 %v14039_v14  ;;  %7714 = vmatprep.subr.bf16.mxu1 %v14042_v16  ;;  %v14073_v14 = vld [vmem:[#allocation3 + $0xb38] ss:$68 sps:$4 sm:$0xff]   ;;  %v14076_v16 = vld [vmem:[#allocation3 + $0xb40] ss:$68 sps:$4 sm:$0xff]  }
 0x188   :  { %7435 = vmatpush1.bf16.msra.mxu0 %v14037_v20  ;;  %7715 = vmatpush1.bf16.msra.mxu1 %v14040_v21  ;;  %v14081_v20 = vld [vmem:[#allocation3 + $0xbc4] ss:$68 sps:$4 sm:$0xff]   ;;  %v14084_v21 = vld [vmem:[#allocation3 + $0xbcc] ss:$68 sps:$4 sm:$0xff]  }
 0x189   :  { %7474 = vmatprep.subr.bf16.mxu0 %v14045_v23  ;;  %7744 = vmatprep.subr.bf16.mxu1 %v14048_v24  ;;  %v14079_v23 = vld [vmem:[#allocation3 + $0xbc0] ss:$68 sps:$4 sm:$0xff]   ;;  %v14082_v24 = vld [vmem:[#allocation3 + $0xbc8] ss:$68 sps:$4 sm:$0xff]  }
 0x18b   :  { %7437 = vmatmul.mubr.bf16.vlgmr.msra.gmra.mrb[16].mxu0 %v15363_v5  ;;  %7717 = vmatmul.mubr.bf16.vlgmr.msra.gmra.mrb[52].mxu1 %v15363_v5 }
 0x18c   :  { %7475 = vmatpush1.bf16.msra.mxu0 %v14043_v26  ;;  %7745 = vmatpush1.bf16.msra.mxu1 %v14046_v33  ;;  %v14087_v26 = vld [vmem:[#allocation3 + $0xc4c] ss:$68 sps:$4 sm:$0xff]   ;;  %v14090_v33 = vld [vmem:[#allocation3 + $0xc54] ss:$68 sps:$4 sm:$0xff]  }
 0x18d   :  { %7476 = vmatprep.subr.bf16.mxu0 %v14051_v35  ;;  %7746 = vmatprep.subr.bf16.mxu1 %v14054_v36  ;;  %v14085_v35 = vld [vmem:[#allocation3 + $0xc48] ss:$68 sps:$4 sm:$0xff]   ;;  %v14088_v36 = vld [vmem:[#allocation3 + $0xc50] ss:$68 sps:$4 sm:$0xff]  }
 0x18e   :  { %7446 = vmatprep.mubr.bf16.mxu0 %v15373_v18  ;;  %7724 = vmatprep.mubr.bf16.mxu1 %v15373_v18 }
 0x190   :  { %7477 = vmatpush1.bf16.msra.mxu0 %v14049_v40  ;;  %7747 = vmatpush1.bf16.msra.mxu1 %v14052_v42  ;;  %v14093_v40 = vld [vmem:[#allocation3 + $0xcd4] ss:$68 sps:$4 sm:$0xff]   ;;  %v14096_v42 = vld [vmem:[#allocation3 + $0xcdc] ss:$68 sps:$4 sm:$0xff]  }
 0x191   :  { %7478 = vmatprep.subr.bf16.mxu0 %v14057_v44  ;;  %7748 = vmatprep.subr.bf16.mxu1 %v14060_v45  ;;  %v14091_v45 = vld [vmem:[#allocation3 + $0xcd0] ss:$68 sps:$4 sm:$0xff]  }
 0x193   :  { %7447 = vmatmul.mubr.bf16.gmra.mrb[20].mxu0 %v15375_v19  ;;  %7725 = vmatmul.mubr.bf16.gmra.mrb[56].mxu1 %v15375_v19 }
 0x194   :  { %7479 = vmatpush1.bf16.msra.mxu0 %v14055_v47  ;;  %7749 = vmatpush1.bf16.msra.mxu1 %v14058_v54  ;;  %v14094_v47 = vld [vmem:[#allocation3 + $0xcd8] ss:$68 sps:$4 sm:$0xff]  }
 0x195   :  { %7480 = vmatprep.subr.bf16.mxu0 %v14063_v58  ;;  %7750 = vmatprep.subr.bf16.mxu1 %v14066_v61 }
 0x196   :  { %7456 = vmatprep.mubr.bf16.mxu0 %v15387_v28  ;;  %7731 = vmatprep.mubr.bf16.mxu1 %v15387_v28 }
 0x198   :  { %7481 = vmatpush1.bf16.msra.mxu0 %v14061_v0  ;;  %7751 = vmatpush1.bf16.msra.mxu1 %v14064_v1 }
 0x199   :  { %7482 = vmatprep.subr.bf16.mxu0 %v14069_v53  ;;  %7752 = vmatprep.subr.bf16.mxu1 %v14072_v3  ;;  %v14099_v53 = vld [vmem:[#allocation3 + $0xd5c] ss:$68 sps:$4 sm:$0xff]   ;;  %v14102_v3 = vld [vmem:[#allocation3 + $0xd64] ss:$68 sps:$4 sm:$0xff]  }
 0x19b   :  { %7457 = vmatmul.mubr.bf16.gmra.mrb[24].mxu0 %v15390_v29  ;;  %7732 = vmatmul.mubr.bf16.gmra.mrb[60].mxu1 %v15390_v29 }
 0x19c   :  { %7483 = vmatpush1.bf16.msra.mxu0 %v14067_v6  ;;  %7753 = vmatpush1.bf16.msra.mxu1 %v14070_v8  ;;  %v14097_v6 = vld [vmem:[#allocation3 + $0xd58] ss:$68 sps:$4 sm:$0xff]   ;;  %v14100_v8 = vld [vmem:[#allocation3 + $0xd60] ss:$68 sps:$4 sm:$0xff]  }
 0x19d   :  { %7484 = vmatprep.subr.bf16.mxu0 %v14075_v12  ;;  %7754 = vmatprep.subr.bf16.mxu1 %v14078_v13  ;;  %v14108_v12 = vld [vmem:[#allocation3 + $0xdec] ss:$68 sps:$4 sm:$0xff]  }
 0x19e   :  { %7465 = vmatprep.mubr.bf16.mxu0 %v15401_v38  ;;  %7737 = vmatprep.mubr.bf16.mxu1 %v15401_v38 }
 0x1a0   :  { %7485 = vmatpush1.bf16.msra.mxu0 %v14073_v14  ;;  %7755 = vmatpush1.bf16.msra.mxu1 %v14076_v16  ;;  %v14103_v14 = vld [vmem:[#allocation3 + $0xde0] ss:$68 sps:$4 sm:$0xff]   ;;  %v14106_v16 = vld [vmem:[#allocation3 + $0xde8] ss:$68 sps:$4 sm:$0xff]  }
 0x1a1   :  { %7486 = vmatprep.subr.bf16.mxu0 %v14081_v20  ;;  %7756 = vmatprep.subr.bf16.mxu1 %v14084_v21 }
 0x1a3   :  { %7466 = vmatmul.mubr.bf16.gmra.mrb[28].mxu0 %v15405_v43  ;;  %7738 = vmatmul.mubr.bf16.gmra.mrb[64].mxu1 %v15405_v43 }
 0x1a4   :  { %7487 = vmatpush1.bf16.msra.mxu0 %v14079_v23  ;;  %7757 = vmatpush1.bf16.msra.mxu1 %v14082_v24 }
 0x1a5   :  { %7488 = vmatprep.subr.bf16.mxu0 %v14087_v26  ;;  %7758 = vmatprep.subr.bf16.mxu1 %v14090_v33  ;;  %v14111_v26 = vld [vmem:[#allocation3 + $0xe6c] ss:$68 sps:$4 sm:$0xff]   ;;  %v14114_v33 = vld [vmem:[#allocation3 + $0xe74] ss:$68 sps:$4 sm:$0xff]  }
 0x1a6   :  { %v7247_v44 = vpop.f32.mrb[16].mxu1  ;;  %7506 = vmatprep.mubr.bf16.mxu0 %v15419_v48  ;;  %7776 = vmatprep.mubr.bf16.mxu1 %v15419_v48 }
 0x1a7   :  { %v15632_v54 = vadd.f32 %v7247_v44, %v15601_v52  ;;  %v7249_v58 = vpop.f32.mrb[17].mxu1  ;;  %v14105_v52 = vld [vmem:[#allocation3 + $0xde4] ss:$68 sps:$4 sm:$0xff]   ;;  %v14115_v44 = vld [vmem:[#allocation3 + $0xef0] ss:$68 sps:$4 sm:$0xff]  }
 0x1a8   :  { %v7250_v61 = vpop.f32.mrb[18].mxu1  ;;  %7489 = vmatpush1.bf16.msra.mxu0 %v14085_v35  ;;  %7759 = vmatpush1.bf16.msra.mxu1 %v14088_v36  ;;  %v14109_v35 = vld [vmem:[#allocation3 + $0xe68] ss:$68 sps:$4 sm:$0xff]   ;;  %v14112_v36 = vld [vmem:[#allocation3 + $0xe70] ss:$68 sps:$4 sm:$0xff]  }
 0x1a9   :  { %v15635_v0 = vadd.f32 %v7250_v61, %v15605_v7  ;;  %7490 = vmatprep.subr.bf16.mxu0 %v14093_v40  ;;  %7760 = vmatprep.subr.bf16.mxu1 %v14096_v42  ;;  %v7252_v1 = vpop.f32.mrb[19].mxu1  ;;  %v14120_v40 = vld [vmem:[#allocation3 + $0xefc] ss:$68 sps:$4 sm:$0xff]  }
 0x1aa   :  { %v14123_v1 = vld [vmem:[#allocation3 + $0xf7c] ss:$68 sps:$4 sm:$0xff]  }
 0x1ac   :  { %7491 = vmatpush1.bf16.msra.mxu0 %v14091_v45  ;;  %7761 = vmatpush1.bf16.msra.mxu1 %v14094_v47  ;;  %v14118_v45 = vld [vmem:[#allocation3 + $0xef8] ss:$68 sps:$4 sm:$0xff]  }
 0x1ad   :  { %7492 = vmatprep.subr.bf16.mxu0 %v14099_v53  ;;  %7762 = vmatprep.subr.bf16.mxu1 %v14102_v3  ;;  %v14126_v53 = vld [vmem:[#allocation3 + $0xf84] ss:$68 sps:$4 sm:$0xff]  }
 0x1ae   :  { %v7255_v13 = vpop.f32.mrb[20].mxu1 }
 0x1af   :  { %v15638_v20 = vadd.f32 %v7255_v13, %v15607_v25  ;;  %v7257_v7 = vpop.f32.mrb[21].mxu1  ;;  %v14117_v25 = vld [vmem:[#allocation3 + $0xef4] ss:$68 sps:$4 sm:$0xff]   ;;  %v14130_v13 = vld [vmem:[#allocation3 + $0x1008] ss:$68 sps:$4 sm:$0xff]  }
 0x1b0   :  { %v7258_v21 = vpop.f32.mrb[22].mxu1  ;;  %7493 = vmatpush1.bf16.msra.mxu0 %v14097_v6  ;;  %7763 = vmatpush1.bf16.msra.mxu1 %v14100_v8  ;;  %v14121_v6 = vld [vmem:[#allocation3 + $0xf78] ss:$68 sps:$4 sm:$0xff]   ;;  %v14124_v8 = vld [vmem:[#allocation3 + $0xf80] ss:$68 sps:$4 sm:$0xff]  }
 0x1b1   :  { %v15641_v23 = vadd.f32 %v7258_v21, %v15609_v31  ;;  %7494 = vmatprep.subr.bf16.mxu0 %v14105_v52  ;;  %7764 = vmatprep.subr.bf16.mxu1 %v14108_v12  ;;  %v7260_v24 = vpop.f32.mrb[23].mxu1  ;;  %v14132_v52 = vld [vmem:[#allocation3 + $0x100c] ss:$68 sps:$4 sm:$0xff]   ;;  %v14127_v12 = vld [vmem:[#allocation3 + $0x1000] ss:$68 sps:$4 sm:$0xff]  }
 0x1b2   :  { %v14136_v7 = vld [vmem:[#allocation3 + $0x1090] ss:$68 sps:$4 sm:$0xff]   ;;  %v14144_v24 = vld [vmem:[#allocation3 + $0x111c] ss:$68 sps:$4 sm:$0xff]  }
 0x1b3   :  { %v14141_v21 = vld [vmem:[#allocation3 + $0x1114] ss:$68 sps:$4 sm:$0xff]  }
 0x1b4   :  { %7495 = vmatpush1.bf16.msra.mxu0 %v14103_v14  ;;  %7765 = vmatpush1.bf16.msra.mxu1 %v14106_v16  ;;  %v14138_v14 = vld [vmem:[#allocation3 + $0x1094] ss:$68 sps:$4 sm:$0xff]   ;;  %v14133_v16 = vld [vmem:[#allocation3 + $0x1088] ss:$68 sps:$4 sm:$0xff]  }
 0x1b5   :  { %7496 = vmatprep.subr.bf16.mxu0 %v14111_v26  ;;  %7766 = vmatprep.subr.bf16.mxu1 %v14114_v33  ;;  %v14139_v26 = vld [vmem:[#allocation3 + $0x1110] ss:$68 sps:$4 sm:$0xff]   ;;  %v14142_v33 = vld [vmem:[#allocation3 + $0x1118] ss:$68 sps:$4 sm:$0xff]  }
 0x1b6   :  { %v7263_v42 = vpop.f32.mrb[24].mxu1 }
 0x1b7   :  { %v15644_v47 = vadd.f32 %v7263_v42, %v15611_v55  ;;  %v7265_v31 = vpop.f32.mrb[25].mxu1  ;;  %v14129_v55 = vld [vmem:[#allocation3 + $0x1004] ss:$68 sps:$4 sm:$0xff]  }
 0x1b8   :  { %v7266_v58 = vpop.f32.mrb[26].mxu1  ;;  %7497 = vmatpush1.bf16.msra.mxu0 %v14109_v35  ;;  %7767 = vmatpush1.bf16.msra.mxu1 %v14112_v36  ;;  %v14147_v35 = vld [vmem:[#allocation3 + $0x119c] ss:$68 sps:$4 sm:$0xff]   ;;  %v14150_v36 = vld [vmem:[#allocation3 + $0x11a4] ss:$68 sps:$4 sm:$0xff]  }
 0x1b9   :  { %v15647_v61 = vadd.f32 %v7266_v58, %v15613_v60  ;;  %7498 = vmatprep.subr.bf16.mxu0 %v14117_v25  ;;  %7768 = vmatprep.subr.bf16.mxu1 %v14120_v40  ;;  %v7268_v3 = vpop.f32.mrb[27].mxu1  ;;  %v14135_v60 = vld [vmem:[#allocation3 + $0x108c] ss:$68 sps:$4 sm:$0xff]   ;;  %v14145_v25 = vld [vmem:[#allocation3 + $0x1198] ss:$68 sps:$4 sm:$0xff]  }
 0x1ba   :  { %v14148_v40 = vld [vmem:[#allocation3 + $0x11a0] ss:$68 sps:$4 sm:$0xff]   ;;  %v14154_v31 = vld [vmem:[#allocation3 + $0x1228] ss:$68 sps:$4 sm:$0xff]   ;;  %v14160_v3 = vld [vmem:[#allocation3 + $0x12b0] ss:$68 sps:$4 sm:$0xff]  }
 0x1bb   :  { %v14153_v42 = vld [vmem:[#allocation3 + $0x1224] ss:$68 sps:$4 sm:$0xff]   ;;  %v14159_v58 = vld [vmem:[#allocation3 + $0x12ac] ss:$68 sps:$4 sm:$0xff]  }
 0x1bc   :  { %7499 = vmatpush1.bf16.msra.mxu0 %v14115_v44  ;;  %7769 = vmatpush1.bf16.msra.mxu1 %v14118_v45  ;;  %v14156_v44 = vld [vmem:[#allocation3 + $0x122c] ss:$68 sps:$4 sm:$0xff]   ;;  %v14151_v45 = vld [vmem:[#allocation3 + $0x1220] ss:$68 sps:$4 sm:$0xff]  }
 0x1bd   :  { %7500 = vmatprep.subr.bf16.mxu0 %v14123_v1  ;;  %7770 = vmatprep.subr.bf16.mxu1 %v14126_v53  ;;  %v14162_v1 = vld [vmem:[#allocation3 + $0x12b4] ss:$68 sps:$4 sm:$0xff]   ;;  %v14157_v53 = vld [vmem:[#allocation3 + $0x12a8] ss:$68 sps:$4 sm:$0xff]  }
 0x1c0   :  { %7501 = vmatpush1.bf16.msra.mxu0 %v14121_v6  ;;  %7771 = vmatpush1.bf16.msra.mxu1 %v14124_v8  ;;  %v14165_v6 = vld [vmem:[#allocation3 + $0x1334] ss:$68 sps:$4 sm:$0xff]   ;;  %v14168_v8 = vld [vmem:[#allocation3 + $0x133c] ss:$68 sps:$4 sm:$0xff]  }
 0x1c1   :  { %7502 = vmatprep.subr.bf16.mxu0 %v14129_v55  ;;  %7772 = vmatprep.subr.bf16.mxu1 %v14132_v52  ;;  %v14163_v55 = vld [vmem:[#allocation3 + $0x1330] ss:$68 sps:$4 sm:$0xff]   ;;  %v14166_v52 = vld [vmem:[#allocation3 + $0x1338] ss:$68 sps:$4 sm:$0xff]  }
 0x1c4   :  { %7503 = vmatpush1.bf16.msra.mxu0 %v14127_v12  ;;  %7773 = vmatpush1.bf16.msra.mxu1 %v14130_v13  ;;  %v14171_v12 = vld [vmem:[#allocation3 + $0x13bc] ss:$68 sps:$4 sm:$0xff]   ;;  %v14174_v13 = vld [vmem:[#allocation3 + $0x13c4] ss:$68 sps:$4 sm:$0xff]  }
 0x1c5   :  { %7504 = vmatprep.subr.bf16.mxu0 %v14135_v60  ;;  %7774 = vmatprep.subr.bf16.mxu1 %v14138_v14  ;;  %v14169_v60 = vld [vmem:[#allocation3 + $0x13b8] ss:$68 sps:$4 sm:$0xff]   ;;  %v14172_v14 = vld [vmem:[#allocation3 + $0x13c0] ss:$68 sps:$4 sm:$0xff]  }
 0x1c8   :  { %7505 = vmatpush1.bf16.msra.mxu0 %v14133_v16  ;;  %7775 = vmatpush1.bf16.msra.mxu1 %v14136_v7  ;;  %v14177_v16 = vld [vmem:[#allocation3 + $0x1444] ss:$68 sps:$4 sm:$0xff]   ;;  %v14180_v7 = vld [vmem:[#allocation3 + $0x144c] ss:$68 sps:$4 sm:$0xff]  }
 0x1c9   :  { %7544 = vmatprep.subr.bf16.mxu0 %v14141_v21  ;;  %7804 = vmatprep.subr.bf16.mxu1 %v14144_v24  ;;  %v14175_v21 = vld [vmem:[#allocation3 + $0x1440] ss:$68 sps:$4 sm:$0xff]   ;;  %v14178_v24 = vld [vmem:[#allocation3 + $0x1448] ss:$68 sps:$4 sm:$0xff]  }
 0x1cb   :  { %7507 = vmatmul.mubr.bf16.vlgmr.msra.gmra.mrb[16].mxu0 %v15427_v27  ;;  %7777 = vmatmul.mubr.bf16.vlgmr.msra.gmra.mrb[52].mxu1 %v15427_v27 }
 0x1cc   :  { %7545 = vmatpush1.bf16.msra.mxu0 %v14139_v26  ;;  %7805 = vmatpush1.bf16.msra.mxu1 %v14142_v33  ;;  %v14183_v26 = vld [vmem:[#allocation3 + $0x14cc] ss:$68 sps:$4 sm:$0xff]   ;;  %v14186_v33 = vld [vmem:[#allocation3 + $0x14d4] ss:$68 sps:$4 sm:$0xff]  }
 0x1cd   :  { %7546 = vmatprep.subr.bf16.mxu0 %v14147_v35  ;;  %7806 = vmatprep.subr.bf16.mxu1 %v14150_v36  ;;  %v14181_v35 = vld [vmem:[#allocation3 + $0x14c8] ss:$68 sps:$4 sm:$0xff]   ;;  %v14184_v36 = vld [vmem:[#allocation3 + $0x14d0] ss:$68 sps:$4 sm:$0xff]  }
 0x1ce   :  { %7516 = vmatprep.mubr.bf16.mxu0 %v15435_v34  ;;  %7784 = vmatprep.mubr.bf16.mxu1 %v15435_v34 }
 0x1d0   :  { %7547 = vmatpush1.bf16.msra.mxu0 %v14145_v25  ;;  %7807 = vmatpush1.bf16.msra.mxu1 %v14148_v40  ;;  %v14189_v25 = vld [vmem:[#allocation3 + $0x1554] ss:$68 sps:$4 sm:$0xff]   ;;  %v14192_v40 = vld [vmem:[#allocation3 + $0x155c] ss:$68 sps:$4 sm:$0xff]  }
 0x1d1   :  { %7548 = vmatprep.subr.bf16.mxu0 %v14153_v42  ;;  %7808 = vmatprep.subr.bf16.mxu1 %v14156_v44 }
 0x1d3   :  { %7517 = vmatmul.mubr.bf16.gmra.mrb[20].mxu0 %v15444_v41  ;;  %7785 = vmatmul.mubr.bf16.gmra.mrb[56].mxu1 %v15444_v41 }
 0x1d4   :  { %7549 = vmatpush1.bf16.msra.mxu0 %v14151_v45  ;;  %7809 = vmatpush1.bf16.msra.mxu1 %v14154_v31 }
 0x1d5   :  { %7550 = vmatprep.subr.bf16.mxu0 %v14159_v58  ;;  %7810 = vmatprep.subr.bf16.mxu1 %v14162_v1  ;;  %v14187_v58 = vld [vmem:[#allocation3 + $0x1550] ss:$68 sps:$4 sm:$0xff]   ;;  %v14190_v1 = vld [vmem:[#allocation3 + $0x1558] ss:$68 sps:$4 sm:$0xff]  }
 0x1d6   :  { %7526 = vmatprep.mubr.bf16.mxu0 %v15449_v49  ;;  %7791 = vmatprep.mubr.bf16.mxu1 %v15449_v49 }
 0x1d8   :  { %7551 = vmatpush1.bf16.msra.mxu0 %v14157_v53  ;;  %7811 = vmatpush1.bf16.msra.mxu1 %v14160_v3 }
 0x1d9   :  { %7552 = vmatprep.subr.bf16.mxu0 %v14165_v6  ;;  %7812 = vmatprep.subr.bf16.mxu1 %v14168_v8  ;;  %v14195_v6 = vld [vmem:[#allocation3 + $0x15dc] ss:$68 sps:$4 sm:$0xff]   ;;  %v14198_v8 = vld [vmem:[#allocation3 + $0x15e4] ss:$68 sps:$4 sm:$0xff]  }
 0x1db   :  { %7527 = vmatmul.mubr.bf16.gmra.mrb[24].mxu0 %v15455_v56  ;;  %7792 = vmatmul.mubr.bf16.gmra.mrb[68].mxu1 %v15455_v56 }
 0x1dc   :  { %7553 = vmatpush1.bf16.msra.mxu0 %v14163_v55  ;;  %7813 = vmatpush1.bf16.msra.mxu1 %v14166_v52  ;;  %v14193_v55 = vld [vmem:[#allocation3 + $0x15d8] ss:$68 sps:$4 sm:$0xff]   ;;  %v14196_v52 = vld [vmem:[#allocation3 + $0x15e0] ss:$68 sps:$4 sm:$0xff]  }
 0x1dd   :  { %7554 = vmatprep.subr.bf16.mxu0 %v14171_v12  ;;  %7814 = vmatprep.subr.bf16.mxu1 %v14174_v13  ;;  %v14204_v12 = vld [vmem:[#allocation3 + $0x166c] ss:$68 sps:$4 sm:$0xff]  }
 0x1de   :  { %7535 = vmatprep.mubr.bf16.mxu0 %v15463_v62  ;;  %7797 = vmatprep.mubr.bf16.mxu1 %v15463_v62 }
 0x1e0   :  { %7555 = vmatpush1.bf16.msra.mxu0 %v14169_v60  ;;  %7815 = vmatpush1.bf16.msra.mxu1 %v14172_v14 }
 0x1e1   :  { %7556 = vmatprep.subr.bf16.mxu0 %v14177_v16  ;;  %7816 = vmatprep.subr.bf16.mxu1 %v14180_v7  ;;  %v14199_v16 = vld [vmem:[#allocation3 + $0x1660] ss:$68 sps:$4 sm:$0xff]   ;;  %v14202_v7 = vld [vmem:[#allocation3 + $0x1668] ss:$68 sps:$4 sm:$0xff]  }
 0x1e3   :  { %7536 = vmatmul.mubr.bf16.gmra.mrb[32].mxu0 %v15469_v4  ;;  %7798 = vmatmul.mubr.bf16.gmra.mrb[72].mxu1 %v15469_v4 }
 0x1e4   :  { %7557 = vmatpush1.bf16.msra.mxu0 %v14175_v21  ;;  %7817 = vmatpush1.bf16.msra.mxu1 %v14178_v24 }
 0x1e5   :  { %7558 = vmatprep.subr.bf16.mxu0 %v14183_v26  ;;  %7818 = vmatprep.subr.bf16.mxu1 %v14186_v33  ;;  %v14207_v26 = vld [vmem:[#allocation3 + $0x16ec] ss:$68 sps:$4 sm:$0xff]   ;;  %v14210_v33 = vld [vmem:[#allocation3 + $0x16f4] ss:$68 sps:$4 sm:$0xff]  }
 0x1e6   :  { %v7314_v42 = vpop.f32.mrb[28].mxu1  ;;  %7576 = vmatprep.mubr.bf16.mxu0 %v15483_v11  ;;  %7836 = vmatprep.mubr.bf16.mxu1 %v15483_v11 }
 0x1e7   :  { %v15666_v44 = vadd.f32 %v7314_v42, %v15632_v54  ;;  %v7316_v45 = vpop.f32.mrb[29].mxu1  ;;  %v14201_v54 = vld [vmem:[#allocation3 + $0x1664] ss:$68 sps:$4 sm:$0xff]  }
 0x1e8   :  { %v7317_v31 = vpop.f32.mrb[30].mxu1  ;;  %7559 = vmatpush1.bf16.msra.mxu0 %v14181_v35  ;;  %7819 = vmatpush1.bf16.msra.mxu1 %v14184_v36  ;;  %v14205_v35 = vld [vmem:[#allocation3 + $0x16e8] ss:$68 sps:$4 sm:$0xff]   ;;  %v14208_v36 = vld [vmem:[#allocation3 + $0x16f0] ss:$68 sps:$4 sm:$0xff]  }
 0x1e9   :  { %v15669_v53 = vadd.f32 %v7317_v31, %v15635_v0  ;;  %7560 = vmatprep.subr.bf16.mxu0 %v14189_v25  ;;  %7820 = vmatprep.subr.bf16.mxu1 %v14192_v40  ;;  %v7319_v3 = vpop.f32.mrb[31].mxu1  ;;  %v14216_v25 = vld [vmem:[#allocation3 + $0x177c] ss:$68 sps:$4 sm:$0xff]   ;;  %v14211_v31 = vld [vmem:[#allocation3 + $0x1770] ss:$68 sps:$4 sm:$0xff]  }
 0x1ea   :  { %v14219_v3 = vld [vmem:[#allocation3 + $0x17fc] ss:$68 sps:$4 sm:$0xff]  }
 0x1ec   :  { %7561 = vmatpush1.bf16.msra.mxu0 %v14187_v58  ;;  %7821 = vmatpush1.bf16.msra.mxu1 %v14190_v1  ;;  %v14214_v58 = vld [vmem:[#allocation3 + $0x1778] ss:$68 sps:$4 sm:$0xff]  }
 0x1ed   :  { %7562 = vmatprep.subr.bf16.mxu0 %v14195_v6  ;;  %7822 = vmatprep.subr.bf16.mxu1 %v14198_v8  ;;  %v14222_v6 = vld [vmem:[#allocation3 + $0x1804] ss:$68 sps:$4 sm:$0xff]  }
 0x1ee   :  { %v7322_v13 = vpop.f32.mrb[32].mxu1 }
 0x1ef   :  { %v15672_v60 = vadd.f32 %v7322_v13, %v15638_v20  ;;  %v7324_v14 = vpop.f32.mrb[33].mxu1  ;;  %v14213_v20 = vld [vmem:[#allocation3 + $0x1774] ss:$68 sps:$4 sm:$0xff]   ;;  %v14226_v13 = vld [vmem:[#allocation3 + $0x1888] ss:$68 sps:$4 sm:$0xff]  }
 0x1f0   :  { %v7325_v0 = vpop.f32.mrb[34].mxu1  ;;  %7563 = vmatpush1.bf16.msra.mxu0 %v14193_v55  ;;  %7823 = vmatpush1.bf16.msra.mxu1 %v14196_v52  ;;  %v14217_v55 = vld [vmem:[#allocation3 + $0x17f8] ss:$68 sps:$4 sm:$0xff]   ;;  %v14220_v52 = vld [vmem:[#allocation3 + $0x1800] ss:$68 sps:$4 sm:$0xff]  }
 0x1f1   :  { %v15675_v21 = vadd.f32 %v7325_v0, %v15641_v23  ;;  %7564 = vmatprep.subr.bf16.mxu0 %v14201_v54  ;;  %7824 = vmatprep.subr.bf16.mxu1 %v14204_v12  ;;  %v7327_v24 = vpop.f32.mrb[35].mxu1  ;;  %v14228_v54 = vld [vmem:[#allocation3 + $0x188c] ss:$68 sps:$4 sm:$0xff]   ;;  %v14223_v12 = vld [vmem:[#allocation3 + $0x1880] ss:$68 sps:$4 sm:$0xff]  }
 0x1f2   :  { %v14234_v14 = vld [vmem:[#allocation3 + $0x1914] ss:$68 sps:$4 sm:$0xff]   ;;  %v14229_v0 = vld [vmem:[#allocation3 + $0x1908] ss:$68 sps:$4 sm:$0xff]   ;;  %v14240_v24 = vld [vmem:[#allocation3 + $0x199c] ss:$68 sps:$4 sm:$0xff]  }
 0x1f4   :  { %7565 = vmatpush1.bf16.msra.mxu0 %v14199_v16  ;;  %7825 = vmatpush1.bf16.msra.mxu1 %v14202_v7  ;;  %v14232_v16 = vld [vmem:[#allocation3 + $0x1910] ss:$68 sps:$4 sm:$0xff]  }
 0x1f5   :  { %7566 = vmatprep.subr.bf16.mxu0 %v14207_v26  ;;  %7826 = vmatprep.subr.bf16.mxu1 %v14210_v33  ;;  %v14237_v7 = vld [vmem:[#allocation3 + $0x1994] ss:$68 sps:$4 sm:$0xff]  }
 0x1f6   :  { %v7330_v40 = vpop.f32.mrb[36].mxu1  ;;  %v14235_v26 = vld [vmem:[#allocation3 + $0x1990] ss:$68 sps:$4 sm:$0xff]   ;;  %v14238_v33 = vld [vmem:[#allocation3 + $0x1998] ss:$68 sps:$4 sm:$0xff]  }
 0x1f7   :  { %v15678_v42 = vadd.f32 %v7330_v40, %v15644_v47  ;;  %v7332_v45 = vpop.f32.mrb[37].mxu1  ;;  %v14225_v47 = vld [vmem:[#allocation3 + $0x1884] ss:$68 sps:$4 sm:$0xff]  }
 0x1f8   :  { %v7333_v23 = vpop.f32.mrb[38].mxu1  ;;  %7567 = vmatpush1.bf16.msra.mxu0 %v14205_v35  ;;  %7827 = vmatpush1.bf16.msra.mxu1 %v14208_v36  ;;  %v14243_v35 = vld [vmem:[#allocation3 + $0x1a1c] ss:$68 sps:$4 sm:$0xff]   ;;  %v14246_v36 = vld [vmem:[#allocation3 + $0x1a24] ss:$68 sps:$4 sm:$0xff]  }
 0x1f9   :  { %v15681_v1 = vadd.f32 %v7333_v23, %v15647_v61  ;;  %7568 = vmatprep.subr.bf16.mxu0 %v14213_v20  ;;  %7828 = vmatprep.subr.bf16.mxu1 %v14216_v25  ;;  %v7335_v8 = vpop.f32.mrb[39].mxu1  ;;  %v14231_v61 = vld [vmem:[#allocation3 + $0x190c] ss:$68 sps:$4 sm:$0xff]   ;;  %v14241_v20 = vld [vmem:[#allocation3 + $0x1a18] ss:$68 sps:$4 sm:$0xff]  }
 0x1fa   :  { %v14244_v25 = vld [vmem:[#allocation3 + $0x1a20] ss:$68 sps:$4 sm:$0xff]   ;;  %v14252_v45 = vld [vmem:[#allocation3 + $0x1aac] ss:$68 sps:$4 sm:$0xff]  }
 0x1fb   :  { %v14249_v40 = vld [vmem:[#allocation3 + $0x1aa4] ss:$68 sps:$4 sm:$0xff]  }
 0x1fc   :  { %7569 = vmatpush1.bf16.msra.mxu0 %v14211_v31  ;;  %7829 = vmatpush1.bf16.msra.mxu1 %v14214_v58  ;;  %v14247_v23 = vld [vmem:[#allocation3 + $0x1aa0] ss:$68 sps:$4 sm:$0xff]   ;;  %v14250_v31 = vld [vmem:[#allocation3 + $0x1aa8] ss:$68 sps:$4 sm:$0xff]  }
 0x1fd   :  { %7570 = vmatprep.subr.bf16.mxu0 %v14219_v3  ;;  %7830 = vmatprep.subr.bf16.mxu1 %v14222_v6  ;;  %v14255_v58 = vld [vmem:[#allocation3 + $0x1b2c] ss:$68 sps:$4 sm:$0xff]   ;;  %v14258_v3 = vld [vmem:[#allocation3 + $0x1b34] ss:$68 sps:$4 sm:$0xff]   ;;  %v9390_v6 = vlaneseq }
 0x1fe   :  { %v14253_v8 = vld [vmem:[#allocation3 + $0x1b28] ss:$68 sps:$4 sm:$0xff]  }
 0x200   :  { %7571 = vmatpush1.bf16.msra.mxu0 %v14217_v55  ;;  %7831 = vmatpush1.bf16.msra.mxu1 %v14220_v52  ;;  %v14256_v55 = vld [vmem:[#allocation3 + $0x1b30] ss:$68 sps:$4 sm:$0xff]  }
 0x201   :  { %7572 = vmatprep.subr.bf16.mxu0 %v14225_v47  ;;  %7832 = vmatprep.subr.bf16.mxu1 %v14228_v54  ;;  %v14261_v52 = vld [vmem:[#allocation3 + $0x1bb4] ss:$68 sps:$4 sm:$0xff]   ;;  %v14264_v47 = vld [vmem:[#allocation3 + $0x1bbc] ss:$68 sps:$4 sm:$0xff]   ;;  %v15691_v54 = vshrl.u32 %v9390_v6, 7 }
 0x204   :  { %7573 = vmatpush1.bf16.msra.mxu0 %v14223_v12  ;;  %7833 = vmatpush1.bf16.msra.mxu1 %v14226_v13  ;;  %v14259_v12 = vld [vmem:[#allocation3 + $0x1bb0] ss:$68 sps:$4 sm:$0xff]   ;;  %v14262_v13 = vld [vmem:[#allocation3 + $0x1bb8] ss:$68 sps:$4 sm:$0xff]  }
 0x205   :  { %7574 = vmatprep.subr.bf16.mxu0 %v14231_v61  ;;  %7834 = vmatprep.subr.bf16.mxu1 %v14234_v14  ;;  %v14267_v61 = vld [vmem:[#allocation3 + $0x1c3c] ss:$68 sps:$4 sm:$0xff]   ;;  %v14270_v14 = vld [vmem:[#allocation3 + $0x1c44] ss:$68 sps:$4 sm:$0xff]  }
 0x208   :  { %7575 = vmatpush1.bf16.msra.mxu0 %v14229_v0  ;;  %7835 = vmatpush1.bf16.msra.mxu1 %v14232_v16  ;;  %v9388_v0 = vld [vmem:[#allocation5] sm:$0x7]  ;;  %v16463_v16 = vsub.s32 0, %v15691_v54 }
 0x209   :  { %7614 = vmatprep.subr.bf16.mxu0 %v14237_v7  ;;  %7864 = vmatprep.subr.bf16.mxu1 %v14240_v24  ;;  %v14265_v7 = vld [vmem:[#allocation3 + $0x1c38] ss:$68 sps:$4 sm:$0xff]   ;;  %v14268_v24 = vld [vmem:[#allocation3 + $0x1c40] ss:$68 sps:$4 sm:$0xff]  }
 0x20b   :  { %7577 = vmatmul.mubr.bf16.vlgmr.msra.gmra.mrb[16].mxu0 %v15494_v63  ;;  %7837 = vmatmul.mubr.bf16.vlgmr.msra.gmra.mrb[52].mxu1 %v15494_v63 }
 0x20c   :  { %7615 = vmatpush1.bf16.msra.mxu0 %v14235_v26  ;;  %7865 = vmatpush1.bf16.msra.mxu1 %v14238_v33  ;;  %v14273_v26 = vld [vmem:[#allocation3 + $0x1cc4] ss:$68 sps:$4 sm:$0xff]   ;;  %v14276_v33 = vld [vmem:[#allocation3 + $0x1ccc] ss:$68 sps:$4 sm:$0xff]  }
 0x20d   :  { %7616 = vmatprep.subr.bf16.mxu0 %v14243_v35  ;;  %7866 = vmatprep.subr.bf16.mxu1 %v14246_v36 }
 0x20e   :  { %7586 = vmatprep.mubr.bf16.mxu0 %v15499_v9  ;;  %7844 = vmatprep.mubr.bf16.mxu1 %v15499_v9 }
 0x210   :  { %7617 = vmatpush1.bf16.msra.mxu0 %v14241_v20  ;;  %7867 = vmatpush1.bf16.msra.mxu1 %v14244_v25  ;;  %v15700_v20 = vrot.slane %v9388_v0, %v16463_v16  ;;  %v14291_v16 = vld [vmem:[#allocation3 + $0x1e5c] ss:$68 sps:$4 sm:$0xff]  }
 0x211   :  { %7618 = vmatprep.subr.bf16.mxu0 %v14249_v40  ;;  %7868 = vmatprep.subr.bf16.mxu1 %v14252_v45 }
 0x213   :  { %7587 = vmatmul.mubr.bf16.gmra.mrb[20].mxu0 %v15505_v15  ;;  %7845 = vmatmul.mubr.bf16.gmra.mrb[56].mxu1 %v15505_v15 }
 0x214   :  { %7619 = vmatpush1.bf16.msra.mxu0 %v14247_v23  ;;  %7869 = vmatpush1.bf16.msra.mxu1 %v14250_v31  ;;  %v14271_v31 = vld [vmem:[#allocation3 + $0x1cc0] ss:$68 sps:$4 sm:$0xff]  }
 0x215   :  { %7620 = vmatprep.subr.bf16.mxu0 %v14255_v58  ;;  %7870 = vmatprep.subr.bf16.mxu1 %v14258_v3  ;;  %v14274_v58 = vld [vmem:[#allocation3 + $0x1cc8] ss:$68 sps:$4 sm:$0xff]  }
 0x216   :  { %7596 = vmatprep.mubr.bf16.mxu0 %v15513_v22  ;;  %7851 = vmatprep.mubr.bf16.mxu1 %v15513_v22 }
 0x218   :  { %7621 = vmatpush1.bf16.msra.mxu0 %v14253_v8  ;;  %7871 = vmatpush1.bf16.msra.mxu1 %v14256_v55  ;;  %v14279_v55 = vld [vmem:[#allocation3 + $0x1d4c] ss:$68 sps:$4 sm:$0xff]  }
 0x219   :  { %7622 = vmatprep.subr.bf16.mxu0 %v14261_v52  ;;  %7872 = vmatprep.subr.bf16.mxu1 %v14264_v47  ;;  %v14282_v52 = vld [vmem:[#allocation3 + $0x1d54] ss:$68 sps:$4 sm:$0xff]  }
 0x21b   :  { %7597 = vmatmul.mubr.bf16.gmra.mrb[24].mxu0 %v15519_v32  ;;  %7852 = vmatmul.mubr.bf16.gmra.mrb[76].mxu1 %v15519_v32 }
 0x21c   :  { %7623 = vmatpush1.bf16.msra.mxu0 %v14259_v12  ;;  %7873 = vmatpush1.bf16.msra.mxu1 %v14262_v13 }
 0x21d   :  { %7624 = vmatprep.subr.bf16.mxu0 %v14267_v61  ;;  %7874 = vmatprep.subr.bf16.mxu1 %v14270_v14  ;;  %v14277_v61 = vld [vmem:[#allocation3 + $0x1d48] ss:$68 sps:$4 sm:$0xff]   ;;  %v14280_v14 = vld [vmem:[#allocation3 + $0x1d50] ss:$68 sps:$4 sm:$0xff]  }
 0x21e   :  { %v7100_v35 = vpop.f32.mrb[0].mxu0  ;;  %v7371_v36 = vpop.f32.mrb[0].mxu1  ;;  %7605 = vmatprep.mubr.bf16.mxu0 %v15527_v39  ;;  %7857 = vmatprep.mubr.bf16.mxu1 %v15527_v39 }
 0x21f   :  { %v7102_v25 = vpop.f32.mrb[1].mxu0  ;;  %v15702_v40 = vpop.f32.mrb[1].mxu1  ;;  %v9405_v12 = vadd.f32 %v15700_v20, %v7371_v36 }
 0x220   :  { %v7104_v45 = vpop.f32.mrb[2].mxu0  ;;  %v7375_v23 = vpop.f32.mrb[2].mxu1  ;;  %7625 = vmatpush1.bf16.msra.mxu0 %v14265_v7  ;;  %7875 = vmatpush1.bf16.msra.mxu1 %v14268_v24  ;;  %v14285_v7 = vld [vmem:[#allocation3 + $0x1dd4] ss:$68 sps:$4 sm:$0xff]   ;;  %v14288_v24 = vld [vmem:[#allocation3 + $0x1ddc] ss:$68 sps:$4 sm:$0xff]  }
 0x221   :  { %v9360_v3 = vadd.f32 %v7375_v23, %v7102_v25  ;;  %v7106_v6 = vpop.f32.mrb[3].mxu0  ;;  %v15704_v8 = vpop.f32.mrb[3].mxu1  ;;  %7626 = vmatprep.subr.bf16.mxu0 %v14273_v26  ;;  %7876 = vmatprep.subr.bf16.mxu1 %v14276_v33 }
 0x222   :  { %16472 = vst [vmem:[#allocation13_spill] sm:$0xff] %v15704_v8  ;;  %v9353_v47 = vadd.f32 %v7106_v6, %v7100_v35  ;;  %v14286_v6 = vld [vmem:[#allocation3 + $0x1dd8] ss:$68 sps:$4 sm:$0xff]  }
 0x223   :  { %v9408_v13 = vadd.f32 %v15700_v20, %v9360_v3  ;;  %7606 = vmatmul.mubr.bf16.gmra.mrb[36].mxu0 %v15533_v51  ;;  %7858 = vmatmul.mubr.bf16.gmra.mrb[80].mxu1 %v15533_v51  ;;  %v14283_v3 = vld [vmem:[#allocation3 + $0x1dd0] ss:$68 sps:$4 sm:$0xff]  }
 0x224   :  { %7627 = vmatpush1.bf16.msra.mxu0 %v14271_v31  ;;  %7877 = vmatpush1.bf16.msra.mxu1 %v14274_v58 }
 0x225   :  { %v15710_v0 = vpack.c.bf16 %v9408_v13, %v9405_v12  ;;  %7628 = vmatprep.subr.bf16.mxu0 %v14279_v55  ;;  %7878 = vmatprep.subr.bf16.mxu1 %v14282_v52 }
 0x226   :  { %v7110_v26 = vpop.f32.mrb[4].mxu0  ;;  %v7381_v33 = vpop.f32.mrb[40].mxu1  ;;  %7646 = vmatprep.mubr.bf16.mxu0 %v15547_v57  ;;  %7896 = vmatprep.mubr.bf16.mxu1 %v15547_v57 }
 0x227   :  { %16473 = vst [vmem:[#allocation14_spill] sm:$0xff] %v15710_v0  ;;  %v7382_v35 = vadd.f32 %v7381_v33, %v15666_v44  ;;  %v7112_v36 = vpop.f32.mrb[5].mxu0  ;;  %v7383_v25 = vpop.f32.mrb[41].mxu1  ;;  %v14294_v0 = vld [vmem:[#allocation3 + $0x1e64] ss:$68 sps:$4 sm:$0xff]  }
 0x228   :  { %v9354_v23 = vadd.f32 %v7112_v36, %v7104_v45  ;;  %v7114_v31 = vpop.f32.mrb[6].mxu0  ;;  %v7384_v58 = vpop.f32.mrb[42].mxu1  ;;  %7629 = vmatpush1.bf16.msra.mxu0 %v14277_v61  ;;  %7879 = vmatpush1.bf16.msra.mxu1 %v14280_v14  ;;  %v14289_v45 = vld [vmem:[#allocation3 + $0x1e58] ss:$68 sps:$4 sm:$0xff]   ;;  %v14292_v33 = vld [vmem:[#allocation3 + $0x1e60] ss:$68 sps:$4 sm:$0xff]  }
 0x229   :  { %v9361_v55 = vadd.f32 %v9353_v47, %v7382_v35  ;;  %v7385_v52 = vadd.f32 %v7384_v58, %v15669_v53  ;;  %v7116_v12 = vpop.f32.mrb[7].mxu0  ;;  %7630 = vmatprep.subr.bf16.mxu0 %v14285_v7  ;;  %7880 = vmatprep.subr.bf16.mxu1 %v14288_v24  ;;  %v7386_v13 = vpop.f32.mrb[43].mxu1  ;;  %v14297_v47 = vld [vmem:[#allocation3 + $0x1ee4] ss:$68 sps:$4 sm:$0xff]   ;;  %v14300_v53 = vld [vmem:[#allocation3 + $0x1eec] ss:$68 sps:$4 sm:$0xff]  }
 0x22a   :  { %v9355_v8 = vadd.f32 %v7116_v12, %v7110_v26  ;;  %v14303_v13 = vld [vmem:[#allocation3 + $0x1f6c] ss:$68 sps:$4 sm:$0xff]  }
 0x22b   :  { %v9362_v44 = vadd.f32 %v9354_v23, %v7385_v52  ;;  %v9411_v61 = vadd.f32 %v15700_v20, %v9361_v55  ;;  %v14298_v55 = vld [vmem:[#allocation3 + $0x1ee8] ss:$68 sps:$4 sm:$0xff]  }
 0x22c   :  { %7631 = vmatpush1.bf16.msra.mxu0 %v14283_v3  ;;  %7881 = vmatpush1.bf16.msra.mxu1 %v14286_v6  ;;  %v14295_v6 = vld [vmem:[#allocation3 + $0x1ee0] ss:$68 sps:$4 sm:$0xff]  }
 0x22d   :  { %v9414_v14 = vadd.f32 %v15700_v20, %v9362_v44  ;;  %7632 = vmatprep.subr.bf16.mxu0 %v14291_v16  ;;  %7882 = vmatprep.subr.bf16.mxu1 %v14294_v0  ;;  %v14306_v44 = vld [vmem:[#allocation3 + $0x1f74] ss:$68 sps:$4 sm:$0xff]  }
 0x22e   :  { %v7120_v35 = vpop.f32.mrb[8].mxu0  ;;  %v7389_v7 = vpop.f32.mrb[44].mxu1 }
 0x22f   :  { %v15718_v24 = vpack.c.bf16 %v9414_v14, %v9411_v61  ;;  %v7390_v36 = vadd.f32 %v7389_v7, %v15672_v60  ;;  %v7122_v26 = vpop.f32.mrb[9].mxu0  ;;  %v7391_v25 = vpop.f32.mrb[45].mxu1  ;;  %v14301_v60 = vld [vmem:[#allocation3 + $0x1f68] ss:$68 sps:$4 sm:$0xff]   ;;  %v14304_v14 = vld [vmem:[#allocation3 + $0x1f70] ss:$68 sps:$4 sm:$0xff]  }
 0x230   :  { %v9356_v23 = vadd.f32 %v7122_v26, %v7114_v31  ;;  %v7124_v58 = vpop.f32.mrb[10].mxu0  ;;  %v7392_v3 = vpop.f32.mrb[46].mxu1  ;;  %7633 = vmatpush1.bf16.msra.mxu0 %v14289_v45  ;;  %7883 = vmatpush1.bf16.msra.mxu1 %v14292_v33 }
 0x231   :  { %16474 = vst [vmem:[#allocation15_spill] sm:$0xff] %v15718_v24  ;;  %v9363_v52 = vadd.f32 %v9355_v8, %v7390_v36  ;;  %v7393_v16 = vadd.f32 %v7392_v3, %v15675_v21  ;;  %v7126_v0 = vpop.f32.mrb[11].mxu0  ;;  %7634 = vmatprep.subr.bf16.mxu0 %v14297_v47  ;;  %7884 = vmatprep.subr.bf16.mxu1 %v14300_v53  ;;  %v7394_v12 = vpop.f32.mrb[47].mxu1  ;;  %v14309_v8 = vld [vmem:[#allocation3 + $0x1ff4] ss:$68 sps:$4 sm:$0xff]  }
 0x232   :  { %v9357_v61 = vadd.f32 %v7126_v0, %v7120_v35  ;;  %v14312_v21 = vld [vmem:[#allocation3 + $0x1ffc] ss:$68 sps:$4 sm:$0xff]   ;;  %v14307_v53 = vld [vmem:[#allocation3 + $0x1ff0] ss:$68 sps:$4 sm:$0xff]  }
 0x233   :  { %v9364_v7 = vadd.f32 %v9356_v23, %v7393_v16  ;;  %v9417_v31 = vadd.f32 %v15700_v20, %v9363_v52  ;;  %v14310_v36 = vld [vmem:[#allocation3 + $0x1ff8] ss:$68 sps:$4 sm:$0xff]  }
 0x234   :  { %7635 = vmatpush1.bf16.msra.mxu0 %v14295_v6  ;;  %7885 = vmatpush1.bf16.msra.mxu1 %v14298_v55  ;;  %v14315_v12 = vld [vmem:[#allocation3 + $0x207c] ss:$68 sps:$4 sm:$0xff]  }
 0x235   :  { %v9420_v45 = vadd.f32 %v15700_v20, %v9364_v7  ;;  %7636 = vmatprep.subr.bf16.mxu0 %v14303_v13  ;;  %7886 = vmatprep.subr.bf16.mxu1 %v14306_v44  ;;  %v14318_v13 = vld [vmem:[#allocation3 + $0x2084] ss:$68 sps:$4 sm:$0xff]  }
 0x236   :  { %v7130_v33 = vpop.f32.mrb[12].mxu0  ;;  %v7397_v47 = vpop.f32.mrb[48].mxu1 }
 0x237   :  { %v15724_v26 = vpack.c.bf16 %v9420_v45, %v9417_v31  ;;  %v7398_v35 = vadd.f32 %v7397_v47, %v15678_v42  ;;  %v7131_v25 = vpop.f32.mrb[13].mxu0  ;;  %v7399_v23 = vpop.f32.mrb[49].mxu1  ;;  %v14313_v42 = vld [vmem:[#allocation3 + $0x2078] ss:$68 sps:$4 sm:$0xff]   ;;  %v14316_v31 = vld [vmem:[#allocation3 + $0x2080] ss:$68 sps:$4 sm:$0xff]  }
 0x238   :  { %v9358_v3 = vadd.f32 %v7131_v25, %v7124_v58  ;;  %v7133_v6 = vpop.f32.mrb[14].mxu0  ;;  %v7400_v55 = vpop.f32.mrb[50].mxu1  ;;  %7637 = vmatpush1.bf16.msra.mxu0 %v14301_v60  ;;  %7887 = vmatpush1.bf16.msra.mxu1 %v14304_v14  ;;  %v14324_v60 = vld [vmem:[#allocation3 + $0x210c] ss:$68 sps:$4 sm:$0xff]   ;;  %v14319_v14 = vld [vmem:[#allocation3 + $0x2100] ss:$68 sps:$4 sm:$0xff]  }
 0x239   :  { %16475 = vst [vmem:[#allocation16_spill] sm:$0xff] %v15724_v26  ;;  %v9365_v52 = vadd.f32 %v9357_v61, %v7398_v35  ;;  %v7401_v16 = vadd.f32 %v7400_v55, %v15681_v1  ;;  %v7134_v0 = vpop.f32.mrb[15].mxu0  ;;  %7638 = vmatprep.subr.bf16.mxu0 %v14309_v8  ;;  %7888 = vmatprep.subr.bf16.mxu1 %v14312_v21  ;;  %v7402_v44 = vpop.f32.mrb[51].mxu1  ;;  %v14321_v61 = vld [vmem:[#allocation3 + $0x2104] ss:$68 sps:$4 sm:$0xff]  }
 0x23a   :  { %v14322_v8 = vld [vmem:[#allocation3 + $0x2108] ss:$68 sps:$4 sm:$0xff]   ;;  %v14330_v33 = vld [vmem:[#allocation3 + $0x2194] ss:$68 sps:$4 sm:$0xff]   ;;  %v14331_v35 = vld [vmem:[#allocation3 + $0x20] ss:$68 sps:$4 sm:$0xff]  }
 0x23b   :  { %v9366_v7 = vadd.f32 %v9358_v3, %v7401_v16  ;;  %v9423_v58 = vadd.f32 %v15700_v20, %v9365_v52  ;;  %v14327_v21 = vld [vmem:[#allocation3 + $0x218c] ss:$68 sps:$4 sm:$0xff]   ;;  %v14342_v3 = vld [vmem:[#allocation3 + $0xb4] ss:$68 sps:$4 sm:$0xff]   ;;  %v14348_v16 = vld [vmem:[#allocation3 + $0x13c] ss:$68 sps:$4 sm:$0xff]  }
 0x23c   :  { %7639 = vmatpush1.bf16.msra.mxu0 %v14307_v53  ;;  %7889 = vmatpush1.bf16.msra.mxu1 %v14310_v36  ;;  %v14325_v47 = vld [vmem:[#allocation3 + $0x2188] ss:$68 sps:$4 sm:$0xff]   ;;  %v14328_v53 = vld [vmem:[#allocation3 + $0x2190] ss:$68 sps:$4 sm:$0xff]  }
 0x23d   :  { %v9426_v45 = vadd.f32 %v15700_v20, %v9366_v7  ;;  %7640 = vmatprep.subr.bf16.mxu0 %v14315_v12  ;;  %7890 = vmatprep.subr.bf16.mxu1 %v14318_v13  ;;  %v14333_v20 = vld [vmem:[#allocation3 + $0x24] ss:$68 sps:$4 sm:$0xff]   ;;  %v14336_v36 = vld [vmem:[#allocation3 + $0x2c] ss:$68 sps:$4 sm:$0xff]   ;;  %v14345_v52 = vld [vmem:[#allocation3 + $0x134] ss:$68 sps:$4 sm:$0xff]  }
 0x23e   :  { %v14334_v25 = vld [vmem:[#allocation3 + $0x28] ss:$68 sps:$4 sm:$0xff]   ;;  %v14340_v55 = vld [vmem:[#allocation3 + $0xb0] ss:$68 sps:$4 sm:$0xff]   ;;  %v14346_v12 = vld [vmem:[#allocation3 + $0x138] ss:$68 sps:$4 sm:$0xff]  }
 0x23f   :  { %v15730_v1 = vpack.c.bf16 %v9426_v45, %v9423_v58  ;;  %v14339_v23 = vld [vmem:[#allocation3 + $0xac] ss:$68 sps:$4 sm:$0xff]   ;;  %v14351_v13 = vld [vmem:[#allocation3 + $0x1bc] ss:$68 sps:$4 sm:$0xff]   ;;  %v14354_v44 = vld [vmem:[#allocation3 + $0x1c4] ss:$68 sps:$4 sm:$0xff]  }
 0x240   :  { %7641 = vmatpush1.bf16.msra.mxu0 %v14313_v42  ;;  %7891 = vmatpush1.bf16.msra.mxu1 %v14316_v31  ;;  %v14337_v6 = vld [vmem:[#allocation3 + $0xa8] ss:$68 sps:$4 sm:$0xff]   ;;  %v14343_v0 = vld [vmem:[#allocation3 + $0x130] ss:$68 sps:$4 sm:$0xff]   ;;  %v14349_v7 = vld [vmem:[#allocation3 + $0x1b8] ss:$68 sps:$4 sm:$0xff]  }
 0x241   :  { %16476 = vst [vmem:[#allocation17_spill] sm:$0xff] %v15730_v1  ;;  %7642 = vmatprep.subr.bf16.mxu0 %v14321_v61  ;;  %7892 = vmatprep.subr.bf16.mxu1 %v14324_v60  ;;  %v14352_v42 = vld [vmem:[#allocation3 + $0x1c0] ss:$68 sps:$4 sm:$0xff]   ;;  %v14360_v58 = vld [vmem:[#allocation3 + $0x24c] ss:$68 sps:$4 sm:$0xff]  }
 0x242   :  { %v14357_v31 = vld [vmem:[#allocation3 + $0x244] ss:$68 sps:$4 sm:$0xff]   ;;  %v14363_v60 = vld [vmem:[#allocation3 + $0x2cc] ss:$68 sps:$4 sm:$0xff]  }
 0x243   :  { %v14355_v45 = vld [vmem:[#allocation3 + $0x240] ss:$68 sps:$4 sm:$0xff]   ;;  %v14358_v61 = vld [vmem:[#allocation3 + $0x248] ss:$68 sps:$4 sm:$0xff]  }
 0x244   :  { %7643 = vmatpush1.bf16.msra.mxu0 %v14319_v14  ;;  %7893 = vmatpush1.bf16.msra.mxu1 %v14322_v8  ;;  %v14366_v14 = vld [vmem:[#allocation3 + $0x2d4] ss:$68 sps:$4 sm:$0xff]   ;;  %v14361_v8 = vld [vmem:[#allocation3 + $0x2c8] ss:$68 sps:$4 sm:$0xff]  }
 0x245   :  { %7644 = vmatprep.subr.bf16.mxu0 %v14327_v21  ;;  %7894 = vmatprep.subr.bf16.mxu1 %v14330_v33  ;;  %v14364_v21 = vld [vmem:[#allocation3 + $0x2d0] ss:$68 sps:$4 sm:$0xff]  }
 0x246   :  { %v14369_v33 = vld [vmem:[#allocation3 + $0x354] ss:$68 sps:$4 sm:$0xff]  }
 0x248   :  { %7645 = vmatpush1.bf16.msra.mxu0 %v14325_v47  ;;  %7895 = vmatpush1.bf16.msra.mxu1 %v14328_v53  ;;  %v14372_v47 = vld [vmem:[#allocation3 + $0x35c] ss:$68 sps:$4 sm:$0xff]   ;;  %v14367_v53 = vld [vmem:[#allocation3 + $0x350] ss:$68 sps:$4 sm:$0xff]  }
 0x249   :  { %7924 = vmatprep.subr.bf16.mxu0 %v14333_v20  ;;  %8216 = vmatprep.subr.bf16.mxu1 %v14336_v36  ;;  %v14370_v20 = vld [vmem:[#allocation3 + $0x358] ss:$68 sps:$4 sm:$0xff]  }
 0x24a   :  { %v14375_v36 = vld [vmem:[#allocation3 + $0x3dc] ss:$68 sps:$4 sm:$0xff]  }
 0x24b   :  { %7647 = vmatmul.mubr.bf16.vlgmr.msra.gmra.mrb[16].mxu0 %v15555_v59  ;;  %7897 = vmatmul.mubr.bf16.vlgmr.msra.gmra.mrb[52].mxu1 %v15555_v59 }
 0x24c   :  { %7925 = vmatpush1.bf16.msra.mxu0 %v14331_v35  ;;  %8217 = vmatpush1.bf16.msra.mxu1 %v14334_v25  ;;  %v14378_v35 = vld [vmem:[#allocation3 + $0x3e4] ss:$68 sps:$4 sm:$0xff]   ;;  %v14373_v25 = vld [vmem:[#allocation3 + $0x3d8] ss:$68 sps:$4 sm:$0xff]  }
 0x24d   :  { %7926 = vmatprep.subr.bf16.mxu0 %v14339_v23  ;;  %8218 = vmatprep.subr.bf16.mxu1 %v14342_v3  ;;  %v14376_v23 = vld [vmem:[#allocation3 + $0x3e0] ss:$68 sps:$4 sm:$0xff]  }
 0x24e   :  { %7656 = vmatprep.mubr.bf16.mxu0 %v15563_v2  ;;  %7904 = vmatprep.mubr.bf16.mxu1 %v15563_v2  ;;  %v14381_v3 = vld [vmem:[#allocation3 + $0x464] ss:$68 sps:$4 sm:$0xff]  }
 0x250   :  { %7927 = vmatpush1.bf16.msra.mxu0 %v14337_v6  ;;  %8219 = vmatpush1.bf16.msra.mxu1 %v14340_v55  ;;  %v14384_v6 = vld [vmem:[#allocation3 + $0x46c] ss:$68 sps:$4 sm:$0xff]   ;;  %v14379_v55 = vld [vmem:[#allocation3 + $0x460] ss:$68 sps:$4 sm:$0xff]  }
 0x251   :  { %7928 = vmatprep.subr.bf16.mxu0 %v14345_v52  ;;  %8220 = vmatprep.subr.bf16.mxu1 %v14348_v16  ;;  %v14382_v52 = vld [vmem:[#allocation3 + $0x468] ss:$68 sps:$4 sm:$0xff]  }
 0x252   :  { %v14387_v16 = vld [vmem:[#allocation3 + $0x4ec] ss:$68 sps:$4 sm:$0xff]  }
 0x253   :  { %7657 = vmatmul.mubr.bf16.gmra.mrb[20].mxu0 %v15569_v10  ;;  %7905 = vmatmul.mubr.bf16.gmra.mrb[56].mxu1 %v15569_v10 }
 0x254   :  { %7929 = vmatpush1.bf16.msra.mxu0 %v14343_v0  ;;  %8221 = vmatpush1.bf16.msra.mxu1 %v14346_v12  ;;  %v14390_v0 = vld [vmem:[#allocation3 + $0x4f4] ss:$68 sps:$4 sm:$0xff]   ;;  %v14385_v12 = vld [vmem:[#allocation3 + $0x4e8] ss:$68 sps:$4 sm:$0xff]  }
 0x255   :  { %7930 = vmatprep.subr.bf16.mxu0 %v14351_v13  ;;  %8222 = vmatprep.subr.bf16.mxu1 %v14354_v44  ;;  %v14388_v13 = vld [vmem:[#allocation3 + $0x4f0] ss:$68 sps:$4 sm:$0xff]  }
 0x256   :  { %7666 = vmatprep.mubr.bf16.mxu0 %v15577_v17  ;;  %7911 = vmatprep.mubr.bf16.mxu1 %v15577_v17  ;;  %v14393_v44 = vld [vmem:[#allocation3 + $0x574] ss:$68 sps:$4 sm:$0xff]  }
 0x258   :  { %7931 = vmatpush1.bf16.msra.mxu0 %v14349_v7  ;;  %8223 = vmatpush1.bf16.msra.mxu1 %v14352_v42  ;;  %v14396_v7 = vld [vmem:[#allocation3 + $0x57c] ss:$68 sps:$4 sm:$0xff]  }
 0x259   :  { %7932 = vmatprep.subr.bf16.mxu0 %v14357_v31  ;;  %8224 = vmatprep.subr.bf16.mxu1 %v14360_v58  ;;  %v14391_v58 = vld [vmem:[#allocation3 + $0x570] ss:$68 sps:$4 sm:$0xff]  }
 0x25b   :  { %7667 = vmatmul.mubr.bf16.gmra.mrb[24].mxu0 %v15583_v30  ;;  %7912 = vmatmul.mubr.bf16.gmra.mrb[84].mxu1 %v15583_v30 }
 0x25c   :  { %7933 = vmatpush1.bf16.msra.mxu0 %v14355_v45  ;;  %8225 = vmatpush1.bf16.msra.mxu1 %v14358_v61  ;;  %v14394_v45 = vld [vmem:[#allocation3 + $0x578] ss:$68 sps:$4 sm:$0xff]  }
 0x25d   :  { %7934 = vmatprep.subr.bf16.mxu0 %v14363_v60  ;;  %8226 = vmatprep.subr.bf16.mxu1 %v14366_v14  ;;  %v14399_v60 = vld [vmem:[#allocation3 + $0x5fc] ss:$68 sps:$4 sm:$0xff]   ;;  %v14402_v14 = vld [vmem:[#allocation3 + $0x604] ss:$68 sps:$4 sm:$0xff]  }
 0x25e   :  { %7675 = vmatprep.mubr.bf16.mxu0 %v15591_v37  ;;  %7917 = vmatprep.mubr.bf16.mxu1 %v15591_v37 }
 0x260   :  { %7935 = vmatpush1.bf16.msra.mxu0 %v14361_v8  ;;  %8227 = vmatpush1.bf16.msra.mxu1 %v14364_v21  ;;  %v14397_v21 = vld [vmem:[#allocation3 + $0x5f8] ss:$68 sps:$4 sm:$0xff]  }
 0x261   :  { %7936 = vmatprep.subr.bf16.mxu0 %v14369_v33  ;;  %8228 = vmatprep.subr.bf16.mxu1 %v14372_v47  ;;  %v14400_v33 = vld [vmem:[#allocation3 + $0x600] ss:$68 sps:$4 sm:$0xff]  }
 0x262   :  { %v14405_v47 = vld [vmem:[#allocation3 + $0x684] ss:$68 sps:$4 sm:$0xff]  }
 0x263   :  { %7676 = vmatmul.mubr.bf16.gmra.mrb[40].mxu0 %v15597_v46  ;;  %7918 = vmatmul.mubr.bf16.gmra.mrb[88].mxu1 %v15597_v46 }
 0x264   :  { %7937 = vmatpush1.bf16.msra.mxu0 %v14367_v53  ;;  %8229 = vmatpush1.bf16.msra.mxu1 %v14370_v20  ;;  %v14408_v53 = vld [vmem:[#allocation3 + $0x68c] ss:$68 sps:$4 sm:$0xff]   ;;  %v14403_v20 = vld [vmem:[#allocation3 + $0x680] ss:$68 sps:$4 sm:$0xff]  }
 0x265   :  { %7938 = vmatprep.subr.bf16.mxu0 %v14375_v36  ;;  %8230 = vmatprep.subr.bf16.mxu1 %v14378_v35  ;;  %v14406_v36 = vld [vmem:[#allocation3 + $0x688] ss:$68 sps:$4 sm:$0xff]  }
 0x266   :  { %7956 = vmatprep.mubr.bf16.mxu0 %v15359_v50  ;;  %8248 = vmatprep.mubr.bf16.mxu1 %v15359_v50 }
 0x268   :  { %7939 = vmatpush1.bf16.msra.mxu0 %v14373_v25  ;;  %8231 = vmatpush1.bf16.msra.mxu1 %v14376_v23 }
 0x269   :  { %7940 = vmatprep.subr.bf16.mxu0 %v14381_v3  ;;  %8232 = vmatprep.subr.bf16.mxu1 %v14384_v6 }
 0x26c   :  { %7941 = vmatpush1.bf16.msra.mxu0 %v14379_v55  ;;  %8233 = vmatpush1.bf16.msra.mxu1 %v14382_v52  ;;  %v14411_v52 = vld [vmem:[#allocation3 + $0x70c] ss:$68 sps:$4 sm:$0xff]  }
 0x26d   :  { %7942 = vmatprep.subr.bf16.mxu0 %v14387_v16  ;;  %8234 = vmatprep.subr.bf16.mxu1 %v14390_v0  ;;  %v14414_v16 = vld [vmem:[#allocation3 + $0x714] ss:$68 sps:$4 sm:$0xff]  }
 0x26e   :  { %v7733_v42 = vpop.f32.mrb[60].mxu1 }
 0x26f   :  { %v7734_v31 = vpop.f32.mrb[61].mxu1  ;;  %v14420_v42 = vld [vmem:[#allocation3 + $0x79c] ss:$68 sps:$4 sm:$0xff]  }
 0x270   :  { %7943 = vmatpush1.bf16.msra.mxu0 %v14385_v12  ;;  %8235 = vmatpush1.bf16.msra.mxu1 %v14388_v13  ;;  %v7735_v61 = vpop.f32.mrb[62].mxu1  ;;  %v14409_v13 = vld [vmem:[#allocation3 + $0x708] ss:$68 sps:$4 sm:$0xff]   ;;  %v14415_v31 = vld [vmem:[#allocation3 + $0x790] ss:$68 sps:$4 sm:$0xff]  }
 0x271   :  { %7944 = vmatprep.subr.bf16.mxu0 %v14393_v44  ;;  %8236 = vmatprep.subr.bf16.mxu1 %v14396_v7  ;;  %v7736_v8 = vpop.f32.mrb[63].mxu1  ;;  %v14412_v44 = vld [vmem:[#allocation3 + $0x710] ss:$68 sps:$4 sm:$0xff]   ;;  %v14426_v61 = vld [vmem:[#allocation3 + $0x824] ss:$68 sps:$4 sm:$0xff]  }
 0x272   :  { %v14417_v7 = vld [vmem:[#allocation3 + $0x794] ss:$68 sps:$4 sm:$0xff]   ;;  %v14429_v8 = vld [vmem:[#allocation3 + $0x8a4] ss:$68 sps:$4 sm:$0xff]  }
 0x274   :  { %7945 = vmatpush1.bf16.msra.mxu0 %v14391_v58  ;;  %8237 = vmatpush1.bf16.msra.mxu1 %v14394_v45  ;;  %v14418_v58 = vld [vmem:[#allocation3 + $0x798] ss:$68 sps:$4 sm:$0xff]  }
 0x275   :  { %7946 = vmatprep.subr.bf16.mxu0 %v14399_v60  ;;  %8238 = vmatprep.subr.bf16.mxu1 %v14402_v14  ;;  %v14423_v45 = vld [vmem:[#allocation3 + $0x81c] ss:$68 sps:$4 sm:$0xff]  }
 0x276   :  { %v7467_v35 = vpop.f32.mrb[28].mxu0  ;;  %v7739_v25 = vpop.f32.mrb[64].mxu1  ;;  %v14421_v60 = vld [vmem:[#allocation3 + $0x818] ss:$68 sps:$4 sm:$0xff]   ;;  %v14424_v14 = vld [vmem:[#allocation3 + $0x820] ss:$68 sps:$4 sm:$0xff]  }
 0x277   :  { %v15748_v23 = vpop.f32.mrb[29].mxu0  ;;  %v7740_v3 = vpop.f32.mrb[65].mxu1  ;;  %v14436_v35 = vld [vmem:[#allocation3 + $0x930] ss:$68 sps:$4 sm:$0xff]  }
 0x278   :  { %7947 = vmatpush1.bf16.msra.mxu0 %v14397_v21  ;;  %8239 = vmatpush1.bf16.msra.mxu1 %v14400_v33  ;;  %v7470_v6 = vpop.f32.mrb[30].mxu0  ;;  %v7741_v55 = vpop.f32.mrb[66].mxu1  ;;  %v14432_v21 = vld [vmem:[#allocation3 + $0x8ac] ss:$68 sps:$4 sm:$0xff]   ;;  %v14427_v33 = vld [vmem:[#allocation3 + $0x8a0] ss:$68 sps:$4 sm:$0xff]  }
 0x279   :  { %7948 = vmatprep.subr.bf16.mxu0 %v14405_v47  ;;  %8240 = vmatprep.subr.bf16.mxu1 %v14408_v53  ;;  %v15750_v0 = vpop.f32.mrb[31].mxu0  ;;  %v7742_v12 = vpop.f32.mrb[67].mxu1  ;;  %v14430_v47 = vld [vmem:[#allocation3 + $0x8a8] ss:$68 sps:$4 sm:$0xff]   ;;  %v14441_v25 = vld [vmem:[#allocation3 + $0x9b4] ss:$68 sps:$4 sm:$0xff]  }
 0x27a   :  { %v14435_v53 = vld [vmem:[#allocation3 + $0x92c] ss:$68 sps:$4 sm:$0xff]   ;;  %v14444_v3 = vld [vmem:[#allocation3 + $0x9bc] ss:$68 sps:$4 sm:$0xff]  }
 0x27b   :  { %v14439_v6 = vld [vmem:[#allocation3 + $0x9b0] ss:$68 sps:$4 sm:$0xff]   ;;  %v14442_v55 = vld [vmem:[#allocation3 + $0x9b8] ss:$68 sps:$4 sm:$0xff]  }
 0x27c   :  { %7949 = vmatpush1.bf16.msra.mxu0 %v14403_v20  ;;  %8241 = vmatpush1.bf16.msra.mxu1 %v14406_v36  ;;  %v14438_v20 = vld [vmem:[#allocation3 + $0x934] ss:$68 sps:$4 sm:$0xff]   ;;  %v14433_v36 = vld [vmem:[#allocation3 + $0x928] ss:$68 sps:$4 sm:$0xff]  }
 0x27d   :  { %7950 = vmatprep.subr.bf16.mxu0 %v14411_v52  ;;  %8242 = vmatprep.subr.bf16.mxu1 %v14414_v16  ;;  %v14447_v52 = vld [vmem:[#allocation3 + $0xa3c] ss:$68 sps:$4 sm:$0xff]   ;;  %v14450_v16 = vld [vmem:[#allocation3 + $0xa44] ss:$68 sps:$4 sm:$0xff]  }
 0x27e   :  { %v14445_v12 = vld [vmem:[#allocation3 + $0xa38] ss:$68 sps:$4 sm:$0xff]  }
 0x280   :  { %7951 = vmatpush1.bf16.msra.mxu0 %v14409_v13  ;;  %8243 = vmatpush1.bf16.msra.mxu1 %v14412_v44  ;;  %v14448_v13 = vld [vmem:[#allocation3 + $0xa40] ss:$68 sps:$4 sm:$0xff]  }
 0x281   :  { %7952 = vmatprep.subr.bf16.mxu0 %v14417_v7  ;;  %8244 = vmatprep.subr.bf16.mxu1 %v14420_v42  ;;  %v14453_v44 = vld [vmem:[#allocation3 + $0xac4] ss:$68 sps:$4 sm:$0xff]   ;;  %v14456_v7 = vld [vmem:[#allocation3 + $0xacc] ss:$68 sps:$4 sm:$0xff]  }
 0x282   :  { %v14451_v42 = vld [vmem:[#allocation3 + $0xac0] ss:$68 sps:$4 sm:$0xff]  }
 0x284   :  { %7953 = vmatpush1.bf16.msra.mxu0 %v14415_v31  ;;  %8245 = vmatpush1.bf16.msra.mxu1 %v14418_v58  ;;  %v14454_v31 = vld [vmem:[#allocation3 + $0xac8] ss:$68 sps:$4 sm:$0xff]  }
 0x285   :  { %7954 = vmatprep.subr.bf16.mxu0 %v14423_v45  ;;  %8246 = vmatprep.subr.bf16.mxu1 %v14426_v61  ;;  %v14459_v58 = vld [vmem:[#allocation3 + $0xb4c] ss:$68 sps:$4 sm:$0xff]   ;;  %v14462_v45 = vld [vmem:[#allocation3 + $0xb54] ss:$68 sps:$4 sm:$0xff]  }
 0x286   :  { %v14457_v61 = vld [vmem:[#allocation3 + $0xb48] ss:$68 sps:$4 sm:$0xff]  }
 0x288   :  { %7955 = vmatpush1.bf16.msra.mxu0 %v14421_v60  ;;  %8247 = vmatpush1.bf16.msra.mxu1 %v14424_v14  ;;  %v14460_v60 = vld [vmem:[#allocation3 + $0xb50] ss:$68 sps:$4 sm:$0xff]  }
 0x289   :  { %7997 = vmatprep.subr.bf16.mxu0 %v14429_v8  ;;  %8289 = vmatprep.subr.bf16.mxu1 %v14432_v21  ;;  %v14465_v14 = vld [vmem:[#allocation3 + $0xbd4] ss:$68 sps:$4 sm:$0xff]   ;;  %v14468_v8 = vld [vmem:[#allocation3 + $0xbdc] ss:$68 sps:$4 sm:$0xff]  }
 0x28a   :  { %v14463_v21 = vld [vmem:[#allocation3 + $0xbd0] ss:$68 sps:$4 sm:$0xff]  }
 0x28b   :  { %7957 = vmatmul.mubr.bf16.vlgmr.msra.gmra.mrb[44].mxu0 %v15363_v5  ;;  %8249 = vmatmul.mubr.bf16.vlgmr.msra.gmra.mrb[92].mxu1 %v15363_v5 }
 0x28c   :  { %7998 = vmatpush1.bf16.msra.mxu0 %v14427_v33  ;;  %8290 = vmatpush1.bf16.msra.mxu1 %v14430_v47  ;;  %v14466_v33 = vld [vmem:[#allocation3 + $0xbd8] ss:$68 sps:$4 sm:$0xff]  }
 0x28d   :  { %7999 = vmatprep.subr.bf16.mxu0 %v14435_v53  ;;  %8291 = vmatprep.subr.bf16.mxu1 %v14438_v20  ;;  %v14471_v47 = vld [vmem:[#allocation3 + $0xc5c] ss:$68 sps:$4 sm:$0xff]   ;;  %v14474_v53 = vld [vmem:[#allocation3 + $0xc64] ss:$68 sps:$4 sm:$0xff]  }
 0x28e   :  { %7966 = vmatprep.mubr.bf16.mxu0 %v15373_v18  ;;  %8258 = vmatprep.mubr.bf16.mxu1 %v15373_v18  ;;  %v14469_v20 = vld [vmem:[#allocation3 + $0xc58] ss:$68 sps:$4 sm:$0xff]  }
 0x290   :  { %8000 = vmatpush1.bf16.msra.mxu0 %v14433_v36  ;;  %8292 = vmatpush1.bf16.msra.mxu1 %v14436_v35  ;;  %v14472_v36 = vld [vmem:[#allocation3 + $0xc60] ss:$68 sps:$4 sm:$0xff]  }
 0x291   :  { %8001 = vmatprep.subr.bf16.mxu0 %v14441_v25  ;;  %8293 = vmatprep.subr.bf16.mxu1 %v14444_v3  ;;  %v14477_v35 = vld [vmem:[#allocation3 + $0xce4] ss:$68 sps:$4 sm:$0xff]   ;;  %v14480_v25 = vld [vmem:[#allocation3 + $0xcec] ss:$68 sps:$4 sm:$0xff]  }
 0x292   :  { %v14475_v3 = vld [vmem:[#allocation3 + $0xce0] ss:$68 sps:$4 sm:$0xff]  }
 0x293   :  { %7967 = vmatmul.mubr.bf16.gmra.mrb[48].mxu0 %v15375_v19  ;;  %8259 = vmatmul.mubr.bf16.gmra.mrb[96].mxu1 %v15375_v19 }
 0x294   :  { %8002 = vmatpush1.bf16.msra.mxu0 %v14439_v6  ;;  %8294 = vmatpush1.bf16.msra.mxu1 %v14442_v55  ;;  %v14478_v6 = vld [vmem:[#allocation3 + $0xce8] ss:$68 sps:$4 sm:$0xff]  }
 0x295   :  { %8003 = vmatprep.subr.bf16.mxu0 %v14447_v52  ;;  %8295 = vmatprep.subr.bf16.mxu1 %v14450_v16  ;;  %v14483_v55 = vld [vmem:[#allocation3 + $0xd6c] ss:$68 sps:$4 sm:$0xff]   ;;  %v14486_v52 = vld [vmem:[#allocation3 + $0xd74] ss:$68 sps:$4 sm:$0xff]  }
 0x296   :  { %7976 = vmatprep.mubr.bf16.mxu0 %v15387_v28  ;;  %8268 = vmatprep.mubr.bf16.mxu1 %v15387_v28  ;;  %v14481_v16 = vld [vmem:[#allocation3 + $0xd68] ss:$68 sps:$4 sm:$0xff]  }
 0x298   :  { %8004 = vmatpush1.bf16.msra.mxu0 %v14445_v12  ;;  %8296 = vmatpush1.bf16.msra.mxu1 %v14448_v13  ;;  %v14484_v12 = vld [vmem:[#allocation3 + $0xd70] ss:$68 sps:$4 sm:$0xff]  }
 0x299   :  { %8005 = vmatprep.subr.bf16.mxu0 %v14453_v44  ;;  %8297 = vmatprep.subr.bf16.mxu1 %v14456_v7  ;;  %v14489_v13 = vld [vmem:[#allocation3 + $0xdf4] ss:$68 sps:$4 sm:$0xff]   ;;  %v14492_v44 = vld [vmem:[#allocation3 + $0xdfc] ss:$68 sps:$4 sm:$0xff]  }
 0x29a   :  { %v14487_v7 = vld [vmem:[#allocation3 + $0xdf0] ss:$68 sps:$4 sm:$0xff]  }
 0x29b   :  { %7977 = vmatmul.mubr.bf16.gmra.mrb[52].mxu0 %v15390_v29  ;;  %8269 = vmatmul.mubr.bf16.gmra.mrb[100].mxu1 %v15390_v29 }
 0x29c   :  { %8006 = vmatpush1.bf16.msra.mxu0 %v14451_v42  ;;  %8298 = vmatpush1.bf16.msra.mxu1 %v14454_v31  ;;  %v14490_v42 = vld [vmem:[#allocation3 + $0xdf8] ss:$68 sps:$4 sm:$0xff]  }
 0x29d   :  { %8007 = vmatprep.subr.bf16.mxu0 %v14459_v58  ;;  %8299 = vmatprep.subr.bf16.mxu1 %v14462_v45 }
 0x29e   :  { %7986 = vmatprep.mubr.bf16.mxu0 %v15401_v38  ;;  %8278 = vmatprep.mubr.bf16.mxu1 %v15401_v38 }
 0x2a0   :  { %8008 = vmatpush1.bf16.msra.mxu0 %v14457_v61  ;;  %8300 = vmatpush1.bf16.msra.mxu1 %v14460_v60  ;;  %v14495_v61 = vld [vmem:[#allocation3 + $0xe7c] ss:$68 sps:$4 sm:$0xff]   ;;  %v14498_v60 = vld [vmem:[#allocation3 + $0xe84] ss:$68 sps:$4 sm:$0xff]  }
 0x2a1   :  { %8009 = vmatprep.subr.bf16.mxu0 %v14465_v14  ;;  %8301 = vmatprep.subr.bf16.mxu1 %v14468_v8  ;;  %v14493_v8 = vld [vmem:[#allocation3 + $0xe78] ss:$68 sps:$4 sm:$0xff]  }
 0x2a3   :  { %7987 = vmatmul.mubr.bf16.gmra.mrb[56].mxu0 %v15405_v43  ;;  %8279 = vmatmul.mubr.bf16.gmra.mrb[104].mxu1 %v15405_v43 }
 0x2a4   :  { %8010 = vmatpush1.bf16.msra.mxu0 %v14463_v21  ;;  %8302 = vmatpush1.bf16.msra.mxu1 %v14466_v33  ;;  %v14496_v21 = vld [vmem:[#allocation3 + $0xe80] ss:$68 sps:$4 sm:$0xff]  }
 0x2a5   :  { %8011 = vmatprep.subr.bf16.mxu0 %v14471_v47  ;;  %8303 = vmatprep.subr.bf16.mxu1 %v14474_v53  ;;  %v14501_v33 = vld [vmem:[#allocation3 + $0xf04] ss:$68 sps:$4 sm:$0xff]   ;;  %v14504_v47 = vld [vmem:[#allocation3 + $0xf0c] ss:$68 sps:$4 sm:$0xff]  }
 0x2a6   :  { %8029 = vmatprep.mubr.bf16.mxu0 %v15419_v48  ;;  %8321 = vmatprep.mubr.bf16.mxu1 %v15419_v48 }
 0x2a8   :  { %8012 = vmatpush1.bf16.msra.mxu0 %v14469_v20  ;;  %8304 = vmatpush1.bf16.msra.mxu1 %v14472_v36  ;;  %v14499_v20 = vld [vmem:[#allocation3 + $0xf00] ss:$68 sps:$4 sm:$0xff]   ;;  %v14502_v36 = vld [vmem:[#allocation3 + $0xf08] ss:$68 sps:$4 sm:$0xff]  }
 0x2a9   :  { %8013 = vmatprep.subr.bf16.mxu0 %v14477_v35  ;;  %8305 = vmatprep.subr.bf16.mxu1 %v14480_v25 }
 0x2ac   :  { %8014 = vmatpush1.bf16.msra.mxu0 %v14475_v3  ;;  %8306 = vmatpush1.bf16.msra.mxu1 %v14478_v6 }
 0x2ad   :  { %8015 = vmatprep.subr.bf16.mxu0 %v14483_v55  ;;  %8307 = vmatprep.subr.bf16.mxu1 %v14486_v52 }
 0x2ae   :  { %v7793_v31 = vpop.f32.mrb[68].mxu1 }
 0x2af   :  { %v7794_v58 = vpop.f32.mrb[69].mxu1  ;;  %v14508_v31 = vld [vmem:[#allocation3 + $0xf90] ss:$68 sps:$4 sm:$0xff]  }
 0x2b0   :  { %8016 = vmatpush1.bf16.msra.mxu0 %v14481_v16  ;;  %8308 = vmatpush1.bf16.msra.mxu1 %v14484_v12  ;;  %v7795_v45 = vpop.f32.mrb[70].mxu1  ;;  %v14507_v12 = vld [vmem:[#allocation3 + $0xf8c] ss:$68 sps:$4 sm:$0xff]   ;;  %v14516_v58 = vld [vmem:[#allocation3 + $0x101c] ss:$68 sps:$4 sm:$0xff]  }
 0x2b1   :  { %8017 = vmatprep.subr.bf16.mxu0 %v14489_v13  ;;  %8309 = vmatprep.subr.bf16.mxu1 %v14492_v44  ;;  %v7796_v14 = vpop.f32.mrb[71].mxu1  ;;  %v14510_v13 = vld [vmem:[#allocation3 + $0xf94] ss:$68 sps:$4 sm:$0xff]  }
 0x2b2   :  { %v14511_v45 = vld [vmem:[#allocation3 + $0x1010] ss:$68 sps:$4 sm:$0xff]   ;;  %v14522_v14 = vld [vmem:[#allocation3 + $0x10a4] ss:$68 sps:$4 sm:$0xff]  }
 0x2b4   :  { %8018 = vmatpush1.bf16.msra.mxu0 %v14487_v7  ;;  %8310 = vmatpush1.bf16.msra.mxu1 %v14490_v42  ;;  %v14505_v42 = vld [vmem:[#allocation3 + $0xf88] ss:$68 sps:$4 sm:$0xff]  }
 0x2b5   :  { %8019 = vmatprep.subr.bf16.mxu0 %v14495_v61  ;;  %8311 = vmatprep.subr.bf16.mxu1 %v14498_v60  ;;  %v14514_v61 = vld [vmem:[#allocation3 + $0x1018] ss:$68 sps:$4 sm:$0xff]  }
 0x2b6   :  { %v7537_v53 = vpop.f32.mrb[32].mxu0  ;;  %v7799_v35 = vpop.f32.mrb[72].mxu1  ;;  %v14519_v60 = vld [vmem:[#allocation3 + $0x109c] ss:$68 sps:$4 sm:$0xff]  }
 0x2b7   :  { %v7538_v25 = vpop.f32.mrb[33].mxu0  ;;  %v7800_v3 = vpop.f32.mrb[73].mxu1  ;;  %v14526_v53 = vld [vmem:[#allocation3 + $0x1128] ss:$68 sps:$4 sm:$0xff]  }
 0x2b8   :  { %v15769_v6 = vadd.f32 %v7538_v25, %v15748_v23  ;;  %v7540_v55 = vpop.f32.mrb[34].mxu0  ;;  %8020 = vmatpush1.bf16.msra.mxu0 %v14493_v8  ;;  %8312 = vmatpush1.bf16.msra.mxu1 %v14496_v21  ;;  %v7801_v52 = vpop.f32.mrb[74].mxu1  ;;  %v14513_v23 = vld [vmem:[#allocation3 + $0x1014] ss:$68 sps:$4 sm:$0xff]   ;;  %v14520_v8 = vld [vmem:[#allocation3 + $0x10a0] ss:$68 sps:$4 sm:$0xff]  }
 0x2b9   :  { %v7541_v16 = vpop.f32.mrb[35].mxu0  ;;  %8021 = vmatprep.subr.bf16.mxu0 %v14501_v33  ;;  %8313 = vmatprep.subr.bf16.mxu1 %v14504_v47  ;;  %v7802_v44 = vpop.f32.mrb[75].mxu1  ;;  %v14525_v21 = vld [vmem:[#allocation3 + $0x1124] ss:$68 sps:$4 sm:$0xff]   ;;  %v14528_v33 = vld [vmem:[#allocation3 + $0x112c] ss:$68 sps:$4 sm:$0xff]  }
 0x2ba   :  { %v15772_v7 = vadd.f32 %v7541_v16, %v15750_v0  ;;  %v14517_v0 = vld [vmem:[#allocation3 + $0x1098] ss:$68 sps:$4 sm:$0xff]   ;;  %v14523_v47 = vld [vmem:[#allocation3 + $0x1120] ss:$68 sps:$4 sm:$0xff]   ;;  %v14529_v35 = vld [vmem:[#allocation3 + $0x11a8] ss:$68 sps:$4 sm:$0xff]  }
 0x2bb   :  { %v14532_v25 = vld [vmem:[#allocation3 + $0x11b0] ss:$68 sps:$4 sm:$0xff]   ;;  %v14540_v55 = vld [vmem:[#allocation3 + $0x123c] ss:$68 sps:$4 sm:$0xff]  }
 0x2bc   :  { %8022 = vmatpush1.bf16.msra.mxu0 %v14499_v20  ;;  %8314 = vmatpush1.bf16.msra.mxu1 %v14502_v36  ;;  %v14531_v20 = vld [vmem:[#allocation3 + $0x11ac] ss:$68 sps:$4 sm:$0xff]   ;;  %v14534_v36 = vld [vmem:[#allocation3 + $0x11b4] ss:$68 sps:$4 sm:$0xff]  }
 0x2bd   :  { %8023 = vmatprep.subr.bf16.mxu0 %v14507_v12  ;;  %8315 = vmatprep.subr.bf16.mxu1 %v14510_v13  ;;  %v14537_v3 = vld [vmem:[#allocation3 + $0x1234] ss:$68 sps:$4 sm:$0xff]   ;;  %v14543_v12 = vld [vmem:[#allocation3 + $0x12bc] ss:$68 sps:$4 sm:$0xff]   ;;  %v14546_v13 = vld [vmem:[#allocation3 + $0x12c4] ss:$68 sps:$4 sm:$0xff]  }
 0x2be   :  { %v14535_v52 = vld [vmem:[#allocation3 + $0x1230] ss:$68 sps:$4 sm:$0xff]   ;;  %v14538_v16 = vld [vmem:[#allocation3 + $0x1238] ss:$68 sps:$4 sm:$0xff]  }
 0x2bf   :  { %v14541_v44 = vld [vmem:[#allocation3 + $0x12b8] ss:$68 sps:$4 sm:$0xff]  }
 0x2c0   :  { %8024 = vmatpush1.bf16.msra.mxu0 %v14505_v42  ;;  %8316 = vmatpush1.bf16.msra.mxu1 %v14508_v31  ;;  %v14544_v42 = vld [vmem:[#allocation3 + $0x12c0] ss:$68 sps:$4 sm:$0xff]  }
 0x2c1   :  { %8025 = vmatprep.subr.bf16.mxu0 %v14513_v23  ;;  %8317 = vmatprep.subr.bf16.mxu1 %v14516_v58  ;;  %v14549_v31 = vld [vmem:[#allocation3 + $0x1344] ss:$68 sps:$4 sm:$0xff]   ;;  %v14552_v23 = vld [vmem:[#allocation3 + $0x134c] ss:$68 sps:$4 sm:$0xff]  }
 0x2c2   :  { %v14547_v58 = vld [vmem:[#allocation3 + $0x1340] ss:$68 sps:$4 sm:$0xff]  }
 0x2c4   :  { %8026 = vmatpush1.bf16.msra.mxu0 %v14511_v45  ;;  %8318 = vmatpush1.bf16.msra.mxu1 %v14514_v61  ;;  %v14550_v45 = vld [vmem:[#allocation3 + $0x1348] ss:$68 sps:$4 sm:$0xff]  }
 0x2c5   :  { %8027 = vmatprep.subr.bf16.mxu0 %v14519_v60  ;;  %8319 = vmatprep.subr.bf16.mxu1 %v14522_v14  ;;  %v14555_v61 = vld [vmem:[#allocation3 + $0x13cc] ss:$68 sps:$4 sm:$0xff]   ;;  %v14558_v60 = vld [vmem:[#allocation3 + $0x13d4] ss:$68 sps:$4 sm:$0xff]  }
 0x2c6   :  { %v14553_v14 = vld [vmem:[#allocation3 + $0x13c8] ss:$68 sps:$4 sm:$0xff]  }
 0x2c8   :  { %8028 = vmatpush1.bf16.msra.mxu0 %v14517_v0  ;;  %8320 = vmatpush1.bf16.msra.mxu1 %v14520_v8  ;;  %v14556_v0 = vld [vmem:[#allocation3 + $0x13d0] ss:$68 sps:$4 sm:$0xff]  }
 0x2c9   :  { %8070 = vmatprep.subr.bf16.mxu0 %v14525_v21  ;;  %8362 = vmatprep.subr.bf16.mxu1 %v14528_v33  ;;  %v14561_v8 = vld [vmem:[#allocation3 + $0x1454] ss:$68 sps:$4 sm:$0xff]   ;;  %v14564_v21 = vld [vmem:[#allocation3 + $0x145c] ss:$68 sps:$4 sm:$0xff]  }
 0x2ca   :  { %v14559_v33 = vld [vmem:[#allocation3 + $0x1450] ss:$68 sps:$4 sm:$0xff]  }
 0x2cb   :  { %8030 = vmatmul.mubr.bf16.vlgmr.msra.gmra.mrb[44].mxu0 %v15427_v27  ;;  %8322 = vmatmul.mubr.bf16.vlgmr.msra.gmra.mrb[92].mxu1 %v15427_v27 }
 0x2cc   :  { %8071 = vmatpush1.bf16.msra.mxu0 %v14523_v47  ;;  %8363 = vmatpush1.bf16.msra.mxu1 %v14526_v53  ;;  %v14562_v47 = vld [vmem:[#allocation3 + $0x1458] ss:$68 sps:$4 sm:$0xff]  }
 0x2cd   :  { %8072 = vmatprep.subr.bf16.mxu0 %v14531_v20  ;;  %8364 = vmatprep.subr.bf16.mxu1 %v14534_v36  ;;  %v14567_v53 = vld [vmem:[#allocation3 + $0x14dc] ss:$68 sps:$4 sm:$0xff]   ;;  %v14570_v20 = vld [vmem:[#allocation3 + $0x14e4] ss:$68 sps:$4 sm:$0xff]  }
 0x2ce   :  { %8039 = vmatprep.mubr.bf16.mxu0 %v15435_v34  ;;  %8331 = vmatprep.mubr.bf16.mxu1 %v15435_v34  ;;  %v14565_v36 = vld [vmem:[#allocation3 + $0x14d8] ss:$68 sps:$4 sm:$0xff]  }
 0x2d0   :  { %8073 = vmatpush1.bf16.msra.mxu0 %v14529_v35  ;;  %8365 = vmatpush1.bf16.msra.mxu1 %v14532_v25  ;;  %v14568_v35 = vld [vmem:[#allocation3 + $0x14e0] ss:$68 sps:$4 sm:$0xff]  }
 0x2d1   :  { %8074 = vmatprep.subr.bf16.mxu0 %v14537_v3  ;;  %8366 = vmatprep.subr.bf16.mxu1 %v14540_v55  ;;  %v14573_v25 = vld [vmem:[#allocation3 + $0x1564] ss:$68 sps:$4 sm:$0xff]   ;;  %v14576_v3 = vld [vmem:[#allocation3 + $0x156c] ss:$68 sps:$4 sm:$0xff]  }
 0x2d2   :  { %v14571_v55 = vld [vmem:[#allocation3 + $0x1560] ss:$68 sps:$4 sm:$0xff]  }
 0x2d3   :  { %8040 = vmatmul.mubr.bf16.gmra.mrb[48].mxu0 %v15444_v41  ;;  %8332 = vmatmul.mubr.bf16.gmra.mrb[96].mxu1 %v15444_v41 }
 0x2d4   :  { %8075 = vmatpush1.bf16.msra.mxu0 %v14535_v52  ;;  %8367 = vmatpush1.bf16.msra.mxu1 %v14538_v16  ;;  %v14574_v52 = vld [vmem:[#allocation3 + $0x1568] ss:$68 sps:$4 sm:$0xff]  }
 0x2d5   :  { %8076 = vmatprep.subr.bf16.mxu0 %v14543_v12  ;;  %8368 = vmatprep.subr.bf16.mxu1 %v14546_v13  ;;  %v14579_v16 = vld [vmem:[#allocation3 + $0x15ec] ss:$68 sps:$4 sm:$0xff]   ;;  %v14582_v12 = vld [vmem:[#allocation3 + $0x15f4] ss:$68 sps:$4 sm:$0xff]  }
 0x2d6   :  { %8049 = vmatprep.mubr.bf16.mxu0 %v15449_v49  ;;  %8341 = vmatprep.mubr.bf16.mxu1 %v15449_v49  ;;  %v14577_v13 = vld [vmem:[#allocation3 + $0x15e8] ss:$68 sps:$4 sm:$0xff]  }
 0x2d8   :  { %8077 = vmatpush1.bf16.msra.mxu0 %v14541_v44  ;;  %8369 = vmatpush1.bf16.msra.mxu1 %v14544_v42  ;;  %v14580_v44 = vld [vmem:[#allocation3 + $0x15f0] ss:$68 sps:$4 sm:$0xff]  }
 0x2d9   :  { %8078 = vmatprep.subr.bf16.mxu0 %v14549_v31  ;;  %8370 = vmatprep.subr.bf16.mxu1 %v14552_v23  ;;  %v14585_v42 = vld [vmem:[#allocation3 + $0x1674] ss:$68 sps:$4 sm:$0xff]   ;;  %v14588_v31 = vld [vmem:[#allocation3 + $0x167c] ss:$68 sps:$4 sm:$0xff]  }
 0x2db   :  { %8050 = vmatmul.mubr.bf16.gmra.mrb[52].mxu0 %v15455_v56  ;;  %8342 = vmatmul.mubr.bf16.gmra.mrb[100].mxu1 %v15455_v56 }
 0x2dc   :  { %8079 = vmatpush1.bf16.msra.mxu0 %v14547_v58  ;;  %8371 = vmatpush1.bf16.msra.mxu1 %v14550_v45  ;;  %v14583_v45 = vld [vmem:[#allocation3 + $0x1670] ss:$68 sps:$4 sm:$0xff]  }
 0x2dd   :  { %8080 = vmatprep.subr.bf16.mxu0 %v14555_v61  ;;  %8372 = vmatprep.subr.bf16.mxu1 %v14558_v60  ;;  %v14586_v61 = vld [vmem:[#allocation3 + $0x1678] ss:$68 sps:$4 sm:$0xff]  }
 0x2de   :  { %8059 = vmatprep.mubr.bf16.mxu0 %v15463_v62  ;;  %8351 = vmatprep.mubr.bf16.mxu1 %v15463_v62 }
 0x2e0   :  { %8081 = vmatpush1.bf16.msra.mxu0 %v14553_v14  ;;  %8373 = vmatpush1.bf16.msra.mxu1 %v14556_v0  ;;  %v14591_v14 = vld [vmem:[#allocation3 + $0x16fc] ss:$68 sps:$4 sm:$0xff]   ;;  %v14594_v0 = vld [vmem:[#allocation3 + $0x1704] ss:$68 sps:$4 sm:$0xff]  }
 0x2e1   :  { %8082 = vmatprep.subr.bf16.mxu0 %v14561_v8  ;;  %8374 = vmatprep.subr.bf16.mxu1 %v14564_v21  ;;  %v14589_v21 = vld [vmem:[#allocation3 + $0x16f8] ss:$68 sps:$4 sm:$0xff]  }
 0x2e3   :  { %8060 = vmatmul.mubr.bf16.gmra.mrb[56].mxu0 %v15469_v4  ;;  %8352 = vmatmul.mubr.bf16.gmra.mrb[104].mxu1 %v15469_v4 }
 0x2e4   :  { %8083 = vmatpush1.bf16.msra.mxu0 %v14559_v33  ;;  %8375 = vmatpush1.bf16.msra.mxu1 %v14562_v47  ;;  %v14592_v33 = vld [vmem:[#allocation3 + $0x1700] ss:$68 sps:$4 sm:$0xff]  }
 0x2e5   :  { %8084 = vmatprep.subr.bf16.mxu0 %v14567_v53  ;;  %8376 = vmatprep.subr.bf16.mxu1 %v14570_v20  ;;  %v14597_v47 = vld [vmem:[#allocation3 + $0x1784] ss:$68 sps:$4 sm:$0xff]   ;;  %v14600_v53 = vld [vmem:[#allocation3 + $0x178c] ss:$68 sps:$4 sm:$0xff]  }
 0x2e6   :  { %8102 = vmatprep.mubr.bf16.mxu0 %v15483_v11  ;;  %8394 = vmatprep.mubr.bf16.mxu1 %v15483_v11 }
 0x2e8   :  { %8085 = vmatpush1.bf16.msra.mxu0 %v14565_v36  ;;  %8377 = vmatpush1.bf16.msra.mxu1 %v14568_v35 }
 0x2e9   :  { %8086 = vmatprep.subr.bf16.mxu0 %v14573_v25  ;;  %8378 = vmatprep.subr.bf16.mxu1 %v14576_v3 }
 0x2ec   :  { %8087 = vmatpush1.bf16.msra.mxu0 %v14571_v55  ;;  %8379 = vmatpush1.bf16.msra.mxu1 %v14574_v52  ;;  %v14595_v52 = vld [vmem:[#allocation3 + $0x1780] ss:$68 sps:$4 sm:$0xff]  }
 0x2ed   :  { %8088 = vmatprep.subr.bf16.mxu0 %v14579_v16  ;;  %8380 = vmatprep.subr.bf16.mxu1 %v14582_v12  ;;  %v14598_v16 = vld [vmem:[#allocation3 + $0x1788] ss:$68 sps:$4 sm:$0xff]  }
 0x2ee   :  { %v7853_v23 = vpop.f32.mrb[76].mxu1 }
 0x2ef   :  { %v7854_v58 = vpop.f32.mrb[77].mxu1 }
 0x2f0   :  { %8089 = vmatpush1.bf16.msra.mxu0 %v14577_v13  ;;  %8381 = vmatpush1.bf16.msra.mxu1 %v14580_v44  ;;  %v7855_v60 = vpop.f32.mrb[78].mxu1  ;;  %v14603_v44 = vld [vmem:[#allocation3 + $0x180c] ss:$68 sps:$4 sm:$0xff]  }
 0x2f1   :  { %8090 = vmatprep.subr.bf16.mxu0 %v14585_v42  ;;  %8382 = vmatprep.subr.bf16.mxu1 %v14588_v31  ;;  %v7856_v8 = vpop.f32.mrb[79].mxu1  ;;  %v14606_v42 = vld [vmem:[#allocation3 + $0x1814] ss:$68 sps:$4 sm:$0xff]   ;;  %v14601_v58 = vld [vmem:[#allocation3 + $0x1808] ss:$68 sps:$4 sm:$0xff]  }
 0x2f2   :  { %v14607_v60 = vld [vmem:[#allocation3 + $0x1890] ss:$68 sps:$4 sm:$0xff]   ;;  %v14618_v8 = vld [vmem:[#allocation3 + $0x1924] ss:$68 sps:$4 sm:$0xff]  }
 0x2f4   :  { %8091 = vmatpush1.bf16.msra.mxu0 %v14583_v45  ;;  %8383 = vmatpush1.bf16.msra.mxu1 %v14586_v61  ;;  %v14609_v45 = vld [vmem:[#allocation3 + $0x1894] ss:$68 sps:$4 sm:$0xff]   ;;  %v14612_v61 = vld [vmem:[#allocation3 + $0x189c] ss:$68 sps:$4 sm:$0xff]  }
 0x2f5   :  { %8092 = vmatprep.subr.bf16.mxu0 %v14591_v14  ;;  %8384 = vmatprep.subr.bf16.mxu1 %v14594_v0  ;;  %v14610_v14 = vld [vmem:[#allocation3 + $0x1898] ss:$68 sps:$4 sm:$0xff]  }
 0x2f6   :  { %v7607_v20 = vpop.f32.mrb[36].mxu0  ;;  %v7859_v36 = vpop.f32.mrb[80].mxu1  ;;  %v14615_v0 = vld [vmem:[#allocation3 + $0x191c] ss:$68 sps:$4 sm:$0xff]  }
 0x2f7   :  { %v7608_v35 = vpop.f32.mrb[37].mxu0  ;;  %v7860_v25 = vpop.f32.mrb[81].mxu1  ;;  %v14622_v20 = vld [vmem:[#allocation3 + $0x19a8] ss:$68 sps:$4 sm:$0xff]  }
 0x2f8   :  { %v15791_v3 = vadd.f32 %v7608_v35, %v15769_v6  ;;  %v7610_v55 = vpop.f32.mrb[38].mxu0  ;;  %8093 = vmatpush1.bf16.msra.mxu0 %v14589_v21  ;;  %8385 = vmatpush1.bf16.msra.mxu1 %v14592_v33  ;;  %v7861_v12 = vpop.f32.mrb[82].mxu1  ;;  %v14604_v6 = vld [vmem:[#allocation3 + $0x1810] ss:$68 sps:$4 sm:$0xff]   ;;  %v14616_v21 = vld [vmem:[#allocation3 + $0x1920] ss:$68 sps:$4 sm:$0xff]  }
 0x2f9   :  { %v7611_v13 = vpop.f32.mrb[39].mxu0  ;;  %8094 = vmatprep.subr.bf16.mxu0 %v14597_v47  ;;  %8386 = vmatprep.subr.bf16.mxu1 %v14600_v53  ;;  %v7862_v31 = vpop.f32.mrb[83].mxu1  ;;  %v14621_v33 = vld [vmem:[#allocation3 + $0x19a4] ss:$68 sps:$4 sm:$0xff]   ;;  %v14624_v47 = vld [vmem:[#allocation3 + $0x19ac] ss:$68 sps:$4 sm:$0xff]  }
 0x2fa   :  { %v15794_v23 = vadd.f32 %v7611_v13, %v15772_v7  ;;  %v14613_v7 = vld [vmem:[#allocation3 + $0x1918] ss:$68 sps:$4 sm:$0xff]   ;;  %v14619_v53 = vld [vmem:[#allocation3 + $0x19a0] ss:$68 sps:$4 sm:$0xff]   ;;  %v14627_v36 = vld [vmem:[#allocation3 + $0x1a2c] ss:$68 sps:$4 sm:$0xff]  }
 0x2fb   :  { %v14630_v35 = vld [vmem:[#allocation3 + $0x1a34] ss:$68 sps:$4 sm:$0xff]   ;;  %v14625_v25 = vld [vmem:[#allocation3 + $0x1a28] ss:$68 sps:$4 sm:$0xff]  }
 0x2fc   :  { %8095 = vmatpush1.bf16.msra.mxu0 %v14595_v52  ;;  %8387 = vmatpush1.bf16.msra.mxu1 %v14598_v16  ;;  %v14628_v55 = vld [vmem:[#allocation3 + $0x1a30] ss:$68 sps:$4 sm:$0xff]   ;;  %v14636_v16 = vld [vmem:[#allocation3 + $0x1abc] ss:$68 sps:$4 sm:$0xff]  }
 0x2fd   :  { %8096 = vmatprep.subr.bf16.mxu0 %v14603_v44  ;;  %8388 = vmatprep.subr.bf16.mxu1 %v14606_v42  ;;  %v14633_v52 = vld [vmem:[#allocation3 + $0x1ab4] ss:$68 sps:$4 sm:$0xff]   ;;  %v14639_v44 = vld [vmem:[#allocation3 + $0x1b3c] ss:$68 sps:$4 sm:$0xff]   ;;  %v14642_v42 = vld [vmem:[#allocation3 + $0x1b44] ss:$68 sps:$4 sm:$0xff]  }
 0x2fe   :  { %v14631_v12 = vld [vmem:[#allocation3 + $0x1ab0] ss:$68 sps:$4 sm:$0xff]   ;;  %v14634_v13 = vld [vmem:[#allocation3 + $0x1ab8] ss:$68 sps:$4 sm:$0xff]  }
 0x2ff   :  { %v14637_v31 = vld [vmem:[#allocation3 + $0x1b38] ss:$68 sps:$4 sm:$0xff]  }
 0x300   :  { %8097 = vmatpush1.bf16.msra.mxu0 %v14601_v58  ;;  %8389 = vmatpush1.bf16.msra.mxu1 %v14604_v6  ;;  %v14640_v58 = vld [vmem:[#allocation3 + $0x1b40] ss:$68 sps:$4 sm:$0xff]  }
 0x301   :  { %8098 = vmatprep.subr.bf16.mxu0 %v14609_v45  ;;  %8390 = vmatprep.subr.bf16.mxu1 %v14612_v61  ;;  %v14645_v6 = vld [vmem:[#allocation3 + $0x1bc4] ss:$68 sps:$4 sm:$0xff]   ;;  %v14648_v45 = vld [vmem:[#allocation3 + $0x1bcc] ss:$68 sps:$4 sm:$0xff]  }
 0x302   :  { %v14643_v61 = vld [vmem:[#allocation3 + $0x1bc0] ss:$68 sps:$4 sm:$0xff]  }
 0x304   :  { %8099 = vmatpush1.bf16.msra.mxu0 %v14607_v60  ;;  %8391 = vmatpush1.bf16.msra.mxu1 %v14610_v14  ;;  %v14646_v60 = vld [vmem:[#allocation3 + $0x1bc8] ss:$68 sps:$4 sm:$0xff]  }
 0x305   :  { %8100 = vmatprep.subr.bf16.mxu0 %v14615_v0  ;;  %8392 = vmatprep.subr.bf16.mxu1 %v14618_v8  ;;  %v14651_v14 = vld [vmem:[#allocation3 + $0x1c4c] ss:$68 sps:$4 sm:$0xff]   ;;  %v14654_v0 = vld [vmem:[#allocation3 + $0x1c54] ss:$68 sps:$4 sm:$0xff]   ;;  %v16465_v8 = vsub.s32 1, %v15691_v54 }
 0x308   :  { %8101 = vmatpush1.bf16.msra.mxu0 %v14613_v7  ;;  %8393 = vmatpush1.bf16.msra.mxu1 %v14616_v21  ;;  %v14649_v7 = vld [vmem:[#allocation3 + $0x1c48] ss:$68 sps:$4 sm:$0xff]   ;;  %v14652_v21 = vld [vmem:[#allocation3 + $0x1c50] ss:$68 sps:$4 sm:$0xff]  }
 0x309   :  { %8143 = vmatprep.subr.bf16.mxu0 %v14621_v33  ;;  %8435 = vmatprep.subr.bf16.mxu1 %v14624_v47  ;;  %v14657_v33 = vld [vmem:[#allocation3 + $0x1cd4] ss:$68 sps:$4 sm:$0xff]   ;;  %v14660_v47 = vld [vmem:[#allocation3 + $0x1cdc] ss:$68 sps:$4 sm:$0xff]  }
 0x30b   :  { %8103 = vmatmul.mubr.bf16.vlgmr.msra.gmra.mrb[44].mxu0 %v15494_v63  ;;  %8395 = vmatmul.mubr.bf16.vlgmr.msra.gmra.mrb[92].mxu1 %v15494_v63 }
 0x30c   :  { %8144 = vmatpush1.bf16.msra.mxu0 %v14619_v53  ;;  %8436 = vmatpush1.bf16.msra.mxu1 %v14622_v20 }
 0x30d   :  { %8145 = vmatprep.subr.bf16.mxu0 %v14627_v36  ;;  %8437 = vmatprep.subr.bf16.mxu1 %v14630_v35  ;;  %v15163_v36 = vld [vmem:[#allocation5] sm:$0x7] }
 0x30e   :  { %8112 = vmatprep.mubr.bf16.mxu0 %v15499_v9  ;;  %8404 = vmatprep.mubr.bf16.mxu1 %v15499_v9  ;;  %v15809_v35 = vrot.slane %v15163_v36, %v16465_v8 }
 0x310   :  { %8146 = vmatpush1.bf16.msra.mxu0 %v14625_v25  ;;  %8438 = vmatpush1.bf16.msra.mxu1 %v14628_v55 }
 0x311   :  { %8147 = vmatprep.subr.bf16.mxu0 %v14633_v52  ;;  %8439 = vmatprep.subr.bf16.mxu1 %v14636_v16 }
 0x313   :  { %8113 = vmatmul.mubr.bf16.gmra.mrb[48].mxu0 %v15505_v15  ;;  %8405 = vmatmul.mubr.bf16.gmra.mrb[96].mxu1 %v15505_v15 }
 0x314   :  { %8148 = vmatpush1.bf16.msra.mxu0 %v14631_v12  ;;  %8440 = vmatpush1.bf16.msra.mxu1 %v14634_v13  ;;  %v14655_v12 = vld [vmem:[#allocation3 + $0x1cd0] ss:$68 sps:$4 sm:$0xff]   ;;  %v14658_v13 = vld [vmem:[#allocation3 + $0x1cd8] ss:$68 sps:$4 sm:$0xff]  }
 0x315   :  { %8149 = vmatprep.subr.bf16.mxu0 %v14639_v44  ;;  %8441 = vmatprep.subr.bf16.mxu1 %v14642_v42 }
 0x316   :  { %8122 = vmatprep.mubr.bf16.mxu0 %v15513_v22  ;;  %8414 = vmatprep.mubr.bf16.mxu1 %v15513_v22 }
 0x318   :  { %8150 = vmatpush1.bf16.msra.mxu0 %v14637_v31  ;;  %8442 = vmatpush1.bf16.msra.mxu1 %v14640_v58  ;;  %v14663_v31 = vld [vmem:[#allocation3 + $0x1d5c] ss:$68 sps:$4 sm:$0xff]   ;;  %v14666_v58 = vld [vmem:[#allocation3 + $0x1d64] ss:$68 sps:$4 sm:$0xff]  }
 0x319   :  { %8151 = vmatprep.subr.bf16.mxu0 %v14645_v6  ;;  %8443 = vmatprep.subr.bf16.mxu1 %v14648_v45 }
 0x31b   :  { %8123 = vmatmul.mubr.bf16.gmra.mrb[52].mxu0 %v15519_v32  ;;  %8415 = vmatmul.mubr.bf16.gmra.mrb[100].mxu1 %v15519_v32 }
 0x31c   :  { %8152 = vmatpush1.bf16.msra.mxu0 %v14643_v61  ;;  %8444 = vmatpush1.bf16.msra.mxu1 %v14646_v60  ;;  %v14661_v60 = vld [vmem:[#allocation3 + $0x1d58] ss:$68 sps:$4 sm:$0xff]  }
 0x31d   :  { %8153 = vmatprep.subr.bf16.mxu0 %v14651_v14  ;;  %8445 = vmatprep.subr.bf16.mxu1 %v14654_v0  ;;  %v14664_v14 = vld [vmem:[#allocation3 + $0x1d60] ss:$68 sps:$4 sm:$0xff]  }
 0x31e   :  { %v7648_v53 = vpop.f32.mrb[16].mxu0  ;;  %v7898_v20 = vpop.f32.mrb[52].mxu1  ;;  %8132 = vmatprep.mubr.bf16.mxu0 %v15527_v39  ;;  %8424 = vmatprep.mubr.bf16.mxu1 %v15527_v39  ;;  %v14669_v0 = vld [vmem:[#allocation3 + $0x1de4] ss:$68 sps:$4 sm:$0xff]  }
 0x31f   :  { %v7650_v25 = vpop.f32.mrb[17].mxu0  ;;  %v15813_v55 = vpop.f32.mrb[53].mxu1 }
 0x320   :  { %v7652_v52 = vpop.f32.mrb[18].mxu0  ;;  %v7901_v16 = vpop.f32.mrb[54].mxu1  ;;  %8154 = vmatpush1.bf16.msra.mxu0 %v14649_v7  ;;  %8446 = vmatpush1.bf16.msra.mxu1 %v14652_v21  ;;  %v9406_v6 = vadd.f32 %v15809_v35, %v7650_v25  ;;  %v14672_v7 = vld [vmem:[#allocation3 + $0x1dec] ss:$68 sps:$4 sm:$0xff]  }
 0x321   :  { %v7654_v44 = vpop.f32.mrb[19].mxu0  ;;  %v15815_v42 = vpop.f32.mrb[55].mxu1  ;;  %8155 = vmatprep.subr.bf16.mxu0 %v14657_v33  ;;  %8447 = vmatprep.subr.bf16.mxu1 %v14660_v47  ;;  %v14667_v16 = vld [vmem:[#allocation3 + $0x1de0] ss:$68 sps:$4 sm:$0xff]  }
 0x322   :  { %v9409_v45 = vadd.f32 %v15809_v35, %v7654_v44 }
 0x323   :  { %8133 = vmatmul.mubr.bf16.gmra.mrb[56].mxu0 %v15533_v51  ;;  %8425 = vmatmul.mubr.bf16.gmra.mrb[104].mxu1 %v15533_v51 }
 0x324   :  { %v15821_v61 = vpack.c.bf16 %v9409_v45, %v9406_v6  ;;  %8156 = vmatpush1.bf16.msra.mxu0 %v14655_v12  ;;  %8448 = vmatpush1.bf16.msra.mxu1 %v14658_v13  ;;  %v14670_v12 = vld [vmem:[#allocation3 + $0x1de8] ss:$68 sps:$4 sm:$0xff]   ;;  %v14678_v6 = vld [vmem:[#allocation3 + $0x1e74] ss:$68 sps:$4 sm:$0xff]  }
 0x325   :  { %8157 = vmatprep.subr.bf16.mxu0 %v14663_v31  ;;  %8449 = vmatprep.subr.bf16.mxu1 %v14666_v58  ;;  %v14675_v58 = vld [vmem:[#allocation3 + $0x1e6c] ss:$68 sps:$4 sm:$0xff]  }
 0x326   :  { %v7658_v21 = vpop.f32.mrb[20].mxu0  ;;  %v7906_v33 = vpop.f32.mrb[56].mxu1  ;;  %8175 = vmatprep.mubr.bf16.mxu0 %v15547_v57  ;;  %8467 = vmatprep.mubr.bf16.mxu1 %v15547_v57 }
 0x327   :  { %v7660_v47 = vpop.f32.mrb[21].mxu0  ;;  %v15825_v20 = vpop.f32.mrb[57].mxu1 }
 0x328   :  { %v7662_v36 = vpop.f32.mrb[22].mxu0  ;;  %v7909_v25 = vpop.f32.mrb[58].mxu1  ;;  %8158 = vmatpush1.bf16.msra.mxu0 %v14661_v60  ;;  %8450 = vmatpush1.bf16.msra.mxu1 %v14664_v14  ;;  %v9412_v33 = vadd.f32 %v15809_v35, %v7660_v47  ;;  %v14673_v60 = vld [vmem:[#allocation3 + $0x1e68] ss:$68 sps:$4 sm:$0xff]   ;;  %v14676_v14 = vld [vmem:[#allocation3 + $0x1e70] ss:$68 sps:$4 sm:$0xff]  }
 0x329   :  { %v15828_v13 = vadd.f32 %v7662_v36, %v15702_v40  ;;  %v7664_v44 = vpop.f32.mrb[23].mxu0  ;;  %v7910_v31 = vpop.f32.mrb[59].mxu1  ;;  %8159 = vmatprep.subr.bf16.mxu0 %v14669_v0  ;;  %8451 = vmatprep.subr.bf16.mxu1 %v14672_v7  ;;  %v14681_v25 = vld [vmem:[#allocation3 + $0x1ef4] ss:$68 sps:$4 sm:$0xff]   ;;  %v14684_v40 = vld [vmem:[#allocation3 + $0x1efc] ss:$68 sps:$4 sm:$0xff]  }
 0x32a   :  { %v9375_v45 = vadd.f32 %v7664_v44, %v7648_v53  ;;  %v16477_v7 = vld [vmem:[#allocation13_spill] sm:$0xff] }
 0x32c   :  { %v9415_v8 = vadd.f32 %v15809_v35, %v9375_v45  ;;  %8160 = vmatpush1.bf16.msra.mxu0 %v14667_v16  ;;  %8452 = vmatpush1.bf16.msra.mxu1 %v14670_v12  ;;  %v14679_v16 = vld [vmem:[#allocation3 + $0x1ef0] ss:$68 sps:$4 sm:$0xff]   ;;  %v14682_v12 = vld [vmem:[#allocation3 + $0x1ef8] ss:$68 sps:$4 sm:$0xff]  }
 0x32d   :  { %8161 = vmatprep.subr.bf16.mxu0 %v14675_v58  ;;  %8453 = vmatprep.subr.bf16.mxu1 %v14678_v6  ;;  %v14687_v58 = vld [vmem:[#allocation3 + $0x1f7c] ss:$68 sps:$4 sm:$0xff]   ;;  %v14690_v6 = vld [vmem:[#allocation3 + $0x1f84] ss:$68 sps:$4 sm:$0xff]  }
 0x32e   :  { %v15832_v36 = vpack.c.bf16 %v9415_v8, %v9412_v33  ;;  %v7668_v31 = vpop.f32.mrb[24].mxu0  ;;  %v7913_v0 = vpop.f32.mrb[84].mxu1 }
 0x32f   :  { %v9371_v1 = vadd.f32 %v7668_v31, %v16477_v7  ;;  %v7670_v26 = vpop.f32.mrb[25].mxu0  ;;  %v7914_v53 = vpop.f32.mrb[85].mxu1 }
 0x330   :  { %v9376_v44 = vadd.f32 %v7670_v26, %v7652_v52  ;;  %v7672_v47 = vpop.f32.mrb[26].mxu0  ;;  %8162 = vmatpush1.bf16.msra.mxu0 %v14673_v60  ;;  %8454 = vmatpush1.bf16.msra.mxu1 %v14676_v14  ;;  %v7915_v45 = vpop.f32.mrb[86].mxu1  ;;  %v14685_v26 = vld [vmem:[#allocation3 + $0x1f78] ss:$68 sps:$4 sm:$0xff]   ;;  %v14688_v52 = vld [vmem:[#allocation3 + $0x1f80] ss:$68 sps:$4 sm:$0xff]  }
 0x331   :  { %v7673_v24 = vpop.f32.mrb[27].mxu0  ;;  %8163 = vmatprep.subr.bf16.mxu0 %v14681_v25  ;;  %8455 = vmatprep.subr.bf16.mxu1 %v14684_v40  ;;  %v7916_v8 = vpop.f32.mrb[87].mxu1  ;;  %v14693_v60 = vld [vmem:[#allocation3 + $0x2004] ss:$68 sps:$4 sm:$0xff]   ;;  %v14696_v14 = vld [vmem:[#allocation3 + $0x200c] ss:$68 sps:$4 sm:$0xff]  }
 0x332   :  { %v9377_v33 = vadd.f32 %v7673_v24, %v7658_v21  ;;  %v9418_v0 = vadd.f32 %v15809_v35, %v9376_v44  ;;  %v14691_v44 = vld [vmem:[#allocation3 + $0x2000] ss:$68 sps:$4 sm:$0xff]  }
 0x334   :  { %v9421_v31 = vadd.f32 %v15809_v35, %v9377_v33  ;;  %8164 = vmatpush1.bf16.msra.mxu0 %v14679_v16  ;;  %8456 = vmatpush1.bf16.msra.mxu1 %v14682_v12  ;;  %v14694_v16 = vld [vmem:[#allocation3 + $0x2008] ss:$68 sps:$4 sm:$0xff]  }
 0x335   :  { %8165 = vmatprep.subr.bf16.mxu0 %v14687_v58  ;;  %8457 = vmatprep.subr.bf16.mxu1 %v14690_v6  ;;  %v14699_v58 = vld [vmem:[#allocation3 + $0x208c] ss:$68 sps:$4 sm:$0xff]   ;;  %v14702_v6 = vld [vmem:[#allocation3 + $0x2094] ss:$68 sps:$4 sm:$0xff]  }
 0x336   :  { %v15837_v7 = vpack.c.bf16 %v9421_v31, %v9418_v0  ;;  %v7677_v25 = vpop.f32.mrb[40].mxu0  ;;  %v7919_v40 = vpop.f32.mrb[88].mxu1 }
 0x337   :  { %v7678_v53 = vpop.f32.mrb[41].mxu0  ;;  %v7920_v47 = vpop.f32.mrb[89].mxu1  ;;  %v14700_v25 = vld [vmem:[#allocation3 + $0x2090] ss:$68 sps:$4 sm:$0xff]  }
 0x338   :  { %v7679_v24 = vadd.f32 %v7678_v53, %v15791_v3  ;;  %v7680_v21 = vpop.f32.mrb[42].mxu0  ;;  %8166 = vmatpush1.bf16.msra.mxu0 %v14685_v26  ;;  %8458 = vmatpush1.bf16.msra.mxu1 %v14688_v52  ;;  %v7921_v12 = vpop.f32.mrb[90].mxu1  ;;  %v14697_v3 = vld [vmem:[#allocation3 + $0x2088] ss:$68 sps:$4 sm:$0xff]   ;;  %v14705_v26 = vld [vmem:[#allocation3 + $0x2114] ss:$68 sps:$4 sm:$0xff]  }
 0x339   :  { %v7681_v45 = vpop.f32.mrb[43].mxu0  ;;  %8167 = vmatprep.subr.bf16.mxu0 %v14693_v60  ;;  %8459 = vmatprep.subr.bf16.mxu1 %v14696_v14  ;;  %v7922_v8 = vpop.f32.mrb[91].mxu1  ;;  %v14708_v52 = vld [vmem:[#allocation3 + $0x211c] ss:$68 sps:$4 sm:$0xff]   ;;  %v14717_v21 = vld [vmem:[#allocation3 + $0x34] ss:$68 sps:$4 sm:$0xff]  }
 0x33a   :  { %v9378_v33 = vadd.f32 %v15828_v13, %v7679_v24  ;;  %v7682_v0 = vadd.f32 %v7681_v45, %v15794_v23  ;;  %v14703_v13 = vld [vmem:[#allocation3 + $0x2110] ss:$68 sps:$4 sm:$0xff]   ;;  %v14706_v53 = vld [vmem:[#allocation3 + $0x2118] ss:$68 sps:$4 sm:$0xff]   ;;  %v14714_v23 = vld [vmem:[#allocation3 + $0x21a4] ss:$68 sps:$4 sm:$0xff]  }
 0x33b   :  { %v14709_v47 = vld [vmem:[#allocation3 + $0x2198] ss:$68 sps:$4 sm:$0xff]   ;;  %v14712_v24 = vld [vmem:[#allocation3 + $0x21a0] ss:$68 sps:$4 sm:$0xff]  }
 0x33c   :  { %v9379_v31 = vadd.f32 %v9371_v1, %v7682_v0  ;;  %8168 = vmatpush1.bf16.msra.mxu0 %v14691_v44  ;;  %8460 = vmatpush1.bf16.msra.mxu1 %v14694_v16  ;;  %v9424_v40 = vadd.f32 %v15809_v35, %v9378_v33  ;;  %v14711_v1 = vld [vmem:[#allocation3 + $0x219c] ss:$68 sps:$4 sm:$0xff]   ;;  %v14726_v45 = vld [vmem:[#allocation3 + $0xc4] ss:$68 sps:$4 sm:$0xff]   ;;  %v14732_v33 = vld [vmem:[#allocation3 + $0x14c] ss:$68 sps:$4 sm:$0xff]  }
 0x33d   :  { %8169 = vmatprep.subr.bf16.mxu0 %v14699_v58  ;;  %8461 = vmatprep.subr.bf16.mxu1 %v14702_v6  ;;  %v14720_v44 = vld [vmem:[#allocation3 + $0x3c] ss:$68 sps:$4 sm:$0xff]   ;;  %v14729_v8 = vld [vmem:[#allocation3 + $0x144] ss:$68 sps:$4 sm:$0xff]  }
 0x33e   :  { %v9427_v60 = vadd.f32 %v15809_v35, %v9379_v31  ;;  %v14715_v35 = vld [vmem:[#allocation3 + $0x30] ss:$68 sps:$4 sm:$0xff]   ;;  %v14718_v16 = vld [vmem:[#allocation3 + $0x38] ss:$68 sps:$4 sm:$0xff]   ;;  %v14724_v6 = vld [vmem:[#allocation3 + $0xc0] ss:$68 sps:$4 sm:$0xff]  }
 0x33f   :  { %v14723_v12 = vld [vmem:[#allocation3 + $0xbc] ss:$68 sps:$4 sm:$0xff]   ;;  %v14730_v31 = vld [vmem:[#allocation3 + $0x148] ss:$68 sps:$4 sm:$0xff]  }
 0x340   :  { %v15844_v14 = vpack.c.bf16 %v9427_v60, %v9424_v40  ;;  %8170 = vmatpush1.bf16.msra.mxu0 %v14697_v3  ;;  %8462 = vmatpush1.bf16.msra.mxu1 %v14700_v25  ;;  %v14721_v58 = vld [vmem:[#allocation3 + $0xb8] ss:$68 sps:$4 sm:$0xff]   ;;  %v14727_v0 = vld [vmem:[#allocation3 + $0x140] ss:$68 sps:$4 sm:$0xff]   ;;  %v14735_v3 = vld [vmem:[#allocation3 + $0x1cc] ss:$68 sps:$4 sm:$0xff]  }
 0x341   :  { %8171 = vmatprep.subr.bf16.mxu0 %v14705_v26  ;;  %8463 = vmatprep.subr.bf16.mxu1 %v14708_v52  ;;  %v14738_v25 = vld [vmem:[#allocation3 + $0x1d4] ss:$68 sps:$4 sm:$0xff]   ;;  %v14733_v26 = vld [vmem:[#allocation3 + $0x1c8] ss:$68 sps:$4 sm:$0xff]   ;;  %v14744_v60 = vld [vmem:[#allocation3 + $0x25c] ss:$68 sps:$4 sm:$0xff]  }
 0x342   :  { %v14736_v52 = vld [vmem:[#allocation3 + $0x1d0] ss:$68 sps:$4 sm:$0xff]  }
 0x343   :  { %v14741_v40 = vld [vmem:[#allocation3 + $0x254] ss:$68 sps:$4 sm:$0xff]  }
 0x344   :  { %8172 = vmatpush1.bf16.msra.mxu0 %v14703_v13  ;;  %8464 = vmatpush1.bf16.msra.mxu1 %v14706_v53  ;;  %v14739_v13 = vld [vmem:[#allocation3 + $0x250] ss:$68 sps:$4 sm:$0xff]   ;;  %v14742_v53 = vld [vmem:[#allocation3 + $0x258] ss:$68 sps:$4 sm:$0xff]  }
 0x345   :  { %8173 = vmatprep.subr.bf16.mxu0 %v14711_v1  ;;  %8465 = vmatprep.subr.bf16.mxu1 %v14714_v23  ;;  %v14747_v1 = vld [vmem:[#allocation3 + $0x2dc] ss:$68 sps:$4 sm:$0xff]   ;;  %v14750_v23 = vld [vmem:[#allocation3 + $0x2e4] ss:$68 sps:$4 sm:$0xff]  }
 0x348   :  { %8174 = vmatpush1.bf16.msra.mxu0 %v14709_v47  ;;  %8466 = vmatpush1.bf16.msra.mxu1 %v14712_v24  ;;  %v14745_v47 = vld [vmem:[#allocation3 + $0x2d8] ss:$68 sps:$4 sm:$0xff]   ;;  %v14748_v24 = vld [vmem:[#allocation3 + $0x2e0] ss:$68 sps:$4 sm:$0xff]  }
 0x349   :  { %8508 = vmatprep.subr.bf16.mxu0 %v14717_v21  ;;  %8800 = vmatprep.subr.bf16.mxu1 %v14720_v44  ;;  %v14753_v21 = vld [vmem:[#allocation3 + $0x364] ss:$68 sps:$4 sm:$0xff]   ;;  %v14756_v44 = vld [vmem:[#allocation3 + $0x36c] ss:$68 sps:$4 sm:$0xff]  }
 0x34b   :  { %8176 = vmatmul.mubr.bf16.vlgmr.msra.gmra.mrb[44].mxu0 %v15555_v59  ;;  %8468 = vmatmul.mubr.bf16.vlgmr.msra.gmra.mrb[92].mxu1 %v15555_v59 }
 0x34c   :  { %8509 = vmatpush1.bf16.msra.mxu0 %v14715_v35  ;;  %8801 = vmatpush1.bf16.msra.mxu1 %v14718_v16  ;;  %v14751_v35 = vld [vmem:[#allocation3 + $0x360] ss:$68 sps:$4 sm:$0xff]   ;;  %v14754_v16 = vld [vmem:[#allocation3 + $0x368] ss:$68 sps:$4 sm:$0xff]  }
 0x34d   :  { %8510 = vmatprep.subr.bf16.mxu0 %v14723_v12  ;;  %8802 = vmatprep.subr.bf16.mxu1 %v14726_v45  ;;  %v14759_v12 = vld [vmem:[#allocation3 + $0x3ec] ss:$68 sps:$4 sm:$0xff]   ;;  %v14762_v45 = vld [vmem:[#allocation3 + $0x3f4] ss:$68 sps:$4 sm:$0xff]  }
 0x34e   :  { %8185 = vmatprep.mubr.bf16.mxu0 %v15563_v2  ;;  %8477 = vmatprep.mubr.bf16.mxu1 %v15563_v2 }
 0x350   :  { %8511 = vmatpush1.bf16.msra.mxu0 %v14721_v58  ;;  %8803 = vmatpush1.bf16.msra.mxu1 %v14724_v6  ;;  %v14757_v58 = vld [vmem:[#allocation3 + $0x3e8] ss:$68 sps:$4 sm:$0xff]   ;;  %v14760_v6 = vld [vmem:[#allocation3 + $0x3f0] ss:$68 sps:$4 sm:$0xff]  }
 0x351   :  { %8512 = vmatprep.subr.bf16.mxu0 %v14729_v8  ;;  %8804 = vmatprep.subr.bf16.mxu1 %v14732_v33  ;;  %v14765_v8 = vld [vmem:[#allocation3 + $0x474] ss:$68 sps:$4 sm:$0xff]   ;;  %v14768_v33 = vld [vmem:[#allocation3 + $0x47c] ss:$68 sps:$4 sm:$0xff]  }
 0x353   :  { %8186 = vmatmul.mubr.bf16.gmra.mrb[48].mxu0 %v15569_v10  ;;  %8478 = vmatmul.mubr.bf16.gmra.mrb[96].mxu1 %v15569_v10 }
 0x354   :  { %8513 = vmatpush1.bf16.msra.mxu0 %v14727_v0  ;;  %8805 = vmatpush1.bf16.msra.mxu1 %v14730_v31  ;;  %v14763_v0 = vld [vmem:[#allocation3 + $0x470] ss:$68 sps:$4 sm:$0xff]   ;;  %v14766_v31 = vld [vmem:[#allocation3 + $0x478] ss:$68 sps:$4 sm:$0xff]  }
 0x355   :  { %8514 = vmatprep.subr.bf16.mxu0 %v14735_v3  ;;  %8806 = vmatprep.subr.bf16.mxu1 %v14738_v25  ;;  %v14771_v3 = vld [vmem:[#allocation3 + $0x4fc] ss:$68 sps:$4 sm:$0xff]   ;;  %v14774_v25 = vld [vmem:[#allocation3 + $0x504] ss:$68 sps:$4 sm:$0xff]  }
 0x356   :  { %8195 = vmatprep.mubr.bf16.mxu0 %v15577_v17  ;;  %8487 = vmatprep.mubr.bf16.mxu1 %v15577_v17 }
 0x358   :  { %8515 = vmatpush1.bf16.msra.mxu0 %v14733_v26  ;;  %8807 = vmatpush1.bf16.msra.mxu1 %v14736_v52  ;;  %v14769_v26 = vld [vmem:[#allocation3 + $0x4f8] ss:$68 sps:$4 sm:$0xff]   ;;  %v14772_v52 = vld [vmem:[#allocation3 + $0x500] ss:$68 sps:$4 sm:$0xff]  }
 0x359   :  { %8516 = vmatprep.subr.bf16.mxu0 %v14741_v40  ;;  %8808 = vmatprep.subr.bf16.mxu1 %v14744_v60  ;;  %v14777_v40 = vld [vmem:[#allocation3 + $0x584] ss:$68 sps:$4 sm:$0xff]   ;;  %v14780_v60 = vld [vmem:[#allocation3 + $0x58c] ss:$68 sps:$4 sm:$0xff]  }
 0x35b   :  { %8196 = vmatmul.mubr.bf16.gmra.mrb[52].mxu0 %v15583_v30  ;;  %8488 = vmatmul.mubr.bf16.gmra.mrb[100].mxu1 %v15583_v30 }
 0x35c   :  { %8517 = vmatpush1.bf16.msra.mxu0 %v14739_v13  ;;  %8809 = vmatpush1.bf16.msra.mxu1 %v14742_v53  ;;  %v14775_v13 = vld [vmem:[#allocation3 + $0x580] ss:$68 sps:$4 sm:$0xff]   ;;  %v14778_v53 = vld [vmem:[#allocation3 + $0x588] ss:$68 sps:$4 sm:$0xff]  }
 0x35d   :  { %8518 = vmatprep.subr.bf16.mxu0 %v14747_v1  ;;  %8810 = vmatprep.subr.bf16.mxu1 %v14750_v23  ;;  %v14783_v1 = vld [vmem:[#allocation3 + $0x60c] ss:$68 sps:$4 sm:$0xff]   ;;  %v14786_v23 = vld [vmem:[#allocation3 + $0x614] ss:$68 sps:$4 sm:$0xff]  }
 0x35e   :  { %8205 = vmatprep.mubr.bf16.mxu0 %v15591_v37  ;;  %8497 = vmatprep.mubr.bf16.mxu1 %v15591_v37 }
 0x360   :  { %8519 = vmatpush1.bf16.msra.mxu0 %v14745_v47  ;;  %8811 = vmatpush1.bf16.msra.mxu1 %v14748_v24  ;;  %v14781_v47 = vld [vmem:[#allocation3 + $0x608] ss:$68 sps:$4 sm:$0xff]   ;;  %v14784_v24 = vld [vmem:[#allocation3 + $0x610] ss:$68 sps:$4 sm:$0xff]  }
 0x361   :  { %8520 = vmatprep.subr.bf16.mxu0 %v14753_v21  ;;  %8812 = vmatprep.subr.bf16.mxu1 %v14756_v44  ;;  %v14789_v21 = vld [vmem:[#allocation3 + $0x694] ss:$68 sps:$4 sm:$0xff]   ;;  %v14792_v44 = vld [vmem:[#allocation3 + $0x69c] ss:$68 sps:$4 sm:$0xff]  }
 0x363   :  { %8206 = vmatmul.mubr.bf16.gmra.mrb[56].mxu0 %v15597_v46  ;;  %8498 = vmatmul.mubr.bf16.gmra.mrb[104].mxu1 %v15597_v46 }
 0x364   :  { %8521 = vmatpush1.bf16.msra.mxu0 %v14751_v35  ;;  %8813 = vmatpush1.bf16.msra.mxu1 %v14754_v16  ;;  %v14787_v35 = vld [vmem:[#allocation3 + $0x690] ss:$68 sps:$4 sm:$0xff]   ;;  %v14790_v16 = vld [vmem:[#allocation3 + $0x698] ss:$68 sps:$4 sm:$0xff]  }
 0x365   :  { %8522 = vmatprep.subr.bf16.mxu0 %v14759_v12  ;;  %8814 = vmatprep.subr.bf16.mxu1 %v14762_v45  ;;  %v14795_v12 = vld [vmem:[#allocation3 + $0x71c] ss:$68 sps:$4 sm:$0xff]   ;;  %v14798_v45 = vld [vmem:[#allocation3 + $0x724] ss:$68 sps:$4 sm:$0xff]  }
 0x366   :  { %8540 = vmatprep.mubr.bf16.mxu0 %v15359_v50  ;;  %8832 = vmatprep.mubr.bf16.mxu1 %v15359_v50 }
 0x368   :  { %8523 = vmatpush1.bf16.msra.mxu0 %v14757_v58  ;;  %8815 = vmatpush1.bf16.msra.mxu1 %v14760_v6  ;;  %v14793_v58 = vld [vmem:[#allocation3 + $0x718] ss:$68 sps:$4 sm:$0xff]   ;;  %v14796_v6 = vld [vmem:[#allocation3 + $0x720] ss:$68 sps:$4 sm:$0xff]  }
 0x369   :  { %8524 = vmatprep.subr.bf16.mxu0 %v14765_v8  ;;  %8816 = vmatprep.subr.bf16.mxu1 %v14768_v33  ;;  %v14801_v8 = vld [vmem:[#allocation3 + $0x7a4] ss:$68 sps:$4 sm:$0xff]   ;;  %v14804_v33 = vld [vmem:[#allocation3 + $0x7ac] ss:$68 sps:$4 sm:$0xff]  }
 0x36c   :  { %8525 = vmatpush1.bf16.msra.mxu0 %v14763_v0  ;;  %8817 = vmatpush1.bf16.msra.mxu1 %v14766_v31  ;;  %v14799_v0 = vld [vmem:[#allocation3 + $0x7a0] ss:$68 sps:$4 sm:$0xff]   ;;  %v14802_v31 = vld [vmem:[#allocation3 + $0x7a8] ss:$68 sps:$4 sm:$0xff]  }
 0x36d   :  { %8526 = vmatprep.subr.bf16.mxu0 %v14771_v3  ;;  %8818 = vmatprep.subr.bf16.mxu1 %v14774_v25  ;;  %v14807_v3 = vld [vmem:[#allocation3 + $0x82c] ss:$68 sps:$4 sm:$0xff]   ;;  %v14810_v25 = vld [vmem:[#allocation3 + $0x834] ss:$68 sps:$4 sm:$0xff]  }
 0x370   :  { %8527 = vmatpush1.bf16.msra.mxu0 %v14769_v26  ;;  %8819 = vmatpush1.bf16.msra.mxu1 %v14772_v52  ;;  %v14805_v26 = vld [vmem:[#allocation3 + $0x828] ss:$68 sps:$4 sm:$0xff]   ;;  %v14808_v52 = vld [vmem:[#allocation3 + $0x830] ss:$68 sps:$4 sm:$0xff]  }
 0x371   :  { %8528 = vmatprep.subr.bf16.mxu0 %v14777_v40  ;;  %8820 = vmatprep.subr.bf16.mxu1 %v14780_v60  ;;  %v14813_v40 = vld [vmem:[#allocation3 + $0x8b4] ss:$68 sps:$4 sm:$0xff]   ;;  %v14816_v60 = vld [vmem:[#allocation3 + $0x8bc] ss:$68 sps:$4 sm:$0xff]  }
 0x374   :  { %8529 = vmatpush1.bf16.msra.mxu0 %v14775_v13  ;;  %8821 = vmatpush1.bf16.msra.mxu1 %v14778_v53  ;;  %v14811_v13 = vld [vmem:[#allocation3 + $0x8b0] ss:$68 sps:$4 sm:$0xff]   ;;  %v14814_v53 = vld [vmem:[#allocation3 + $0x8b8] ss:$68 sps:$4 sm:$0xff]  }
 0x375   :  { %8530 = vmatprep.subr.bf16.mxu0 %v14783_v1  ;;  %8822 = vmatprep.subr.bf16.mxu1 %v14786_v23  ;;  %v14819_v1 = vld [vmem:[#allocation3 + $0x93c] ss:$68 sps:$4 sm:$0xff]   ;;  %v14822_v23 = vld [vmem:[#allocation3 + $0x944] ss:$68 sps:$4 sm:$0xff]  }
 0x378   :  { %8531 = vmatpush1.bf16.msra.mxu0 %v14781_v47  ;;  %8823 = vmatpush1.bf16.msra.mxu1 %v14784_v24  ;;  %v14817_v47 = vld [vmem:[#allocation3 + $0x938] ss:$68 sps:$4 sm:$0xff]   ;;  %v14820_v24 = vld [vmem:[#allocation3 + $0x940] ss:$68 sps:$4 sm:$0xff]  }
 0x379   :  { %8532 = vmatprep.subr.bf16.mxu0 %v14789_v21  ;;  %8824 = vmatprep.subr.bf16.mxu1 %v14792_v44  ;;  %v14825_v21 = vld [vmem:[#allocation3 + $0x9c4] ss:$68 sps:$4 sm:$0xff]   ;;  %v14828_v44 = vld [vmem:[#allocation3 + $0x9cc] ss:$68 sps:$4 sm:$0xff]  }
 0x37c   :  { %8533 = vmatpush1.bf16.msra.mxu0 %v14787_v35  ;;  %8825 = vmatpush1.bf16.msra.mxu1 %v14790_v16  ;;  %v14823_v35 = vld [vmem:[#allocation3 + $0x9c0] ss:$68 sps:$4 sm:$0xff]   ;;  %v14826_v16 = vld [vmem:[#allocation3 + $0x9c8] ss:$68 sps:$4 sm:$0xff]  }
 0x37d   :  { %8534 = vmatprep.subr.bf16.mxu0 %v14795_v12  ;;  %8826 = vmatprep.subr.bf16.mxu1 %v14798_v45  ;;  %v14831_v12 = vld [vmem:[#allocation3 + $0xa4c] ss:$68 sps:$4 sm:$0xff]   ;;  %v14834_v45 = vld [vmem:[#allocation3 + $0xa54] ss:$68 sps:$4 sm:$0xff]  }
 0x380   :  { %8535 = vmatpush1.bf16.msra.mxu0 %v14793_v58  ;;  %8827 = vmatpush1.bf16.msra.mxu1 %v14796_v6  ;;  %v14829_v58 = vld [vmem:[#allocation3 + $0xa48] ss:$68 sps:$4 sm:$0xff]   ;;  %v14832_v6 = vld [vmem:[#allocation3 + $0xa50] ss:$68 sps:$4 sm:$0xff]  }
 0x381   :  { %8536 = vmatprep.subr.bf16.mxu0 %v14801_v8  ;;  %8828 = vmatprep.subr.bf16.mxu1 %v14804_v33  ;;  %v14837_v8 = vld [vmem:[#allocation3 + $0xad4] ss:$68 sps:$4 sm:$0xff]   ;;  %v14840_v33 = vld [vmem:[#allocation3 + $0xadc] ss:$68 sps:$4 sm:$0xff]  }
 0x384   :  { %8537 = vmatpush1.bf16.msra.mxu0 %v14799_v0  ;;  %8829 = vmatpush1.bf16.msra.mxu1 %v14802_v31  ;;  %v14835_v0 = vld [vmem:[#allocation3 + $0xad0] ss:$68 sps:$4 sm:$0xff]   ;;  %v14838_v31 = vld [vmem:[#allocation3 + $0xad8] ss:$68 sps:$4 sm:$0xff]  }
 0x385   :  { %8538 = vmatprep.subr.bf16.mxu0 %v14807_v3  ;;  %8830 = vmatprep.subr.bf16.mxu1 %v14810_v25  ;;  %v14843_v3 = vld [vmem:[#allocation3 + $0xb5c] ss:$68 sps:$4 sm:$0xff]   ;;  %v14846_v25 = vld [vmem:[#allocation3 + $0xb64] ss:$68 sps:$4 sm:$0xff]  }
 0x388   :  { %8539 = vmatpush1.bf16.msra.mxu0 %v14805_v26  ;;  %8831 = vmatpush1.bf16.msra.mxu1 %v14808_v52  ;;  %v14841_v26 = vld [vmem:[#allocation3 + $0xb58] ss:$68 sps:$4 sm:$0xff]   ;;  %v14844_v52 = vld [vmem:[#allocation3 + $0xb60] ss:$68 sps:$4 sm:$0xff]  }
 0x389   :  { %8581 = vmatprep.subr.bf16.mxu0 %v14813_v40  ;;  %8873 = vmatprep.subr.bf16.mxu1 %v14816_v60  ;;  %v14849_v40 = vld [vmem:[#allocation3 + $0xbe4] ss:$68 sps:$4 sm:$0xff]   ;;  %v14852_v60 = vld [vmem:[#allocation3 + $0xbec] ss:$68 sps:$4 sm:$0xff]  }
 0x38b   :  { %8541 = vmatmul.mubr.bf16.vlgmr.msra.gmra.mrb[60].mxu0 %v15363_v5  ;;  %8833 = vmatmul.mubr.bf16.vlgmr.msra.gmra.mrb[108].mxu1 %v15363_v5 }
 0x38c   :  { %8582 = vmatpush1.bf16.msra.mxu0 %v14811_v13  ;;  %8874 = vmatpush1.bf16.msra.mxu1 %v14814_v53  ;;  %v14847_v13 = vld [vmem:[#allocation3 + $0xbe0] ss:$68 sps:$4 sm:$0xff]   ;;  %v14850_v53 = vld [vmem:[#allocation3 + $0xbe8] ss:$68 sps:$4 sm:$0xff]  }
 0x38d   :  { %8583 = vmatprep.subr.bf16.mxu0 %v14819_v1  ;;  %8875 = vmatprep.subr.bf16.mxu1 %v14822_v23  ;;  %v14855_v1 = vld [vmem:[#allocation3 + $0xc6c] ss:$68 sps:$4 sm:$0xff]   ;;  %v14858_v23 = vld [vmem:[#allocation3 + $0xc74] ss:$68 sps:$4 sm:$0xff]  }
 0x38e   :  { %8550 = vmatprep.mubr.bf16.mxu0 %v15373_v18  ;;  %8842 = vmatprep.mubr.bf16.mxu1 %v15373_v18 }
 0x390   :  { %8584 = vmatpush1.bf16.msra.mxu0 %v14817_v47  ;;  %8876 = vmatpush1.bf16.msra.mxu1 %v14820_v24  ;;  %v14853_v47 = vld [vmem:[#allocation3 + $0xc68] ss:$68 sps:$4 sm:$0xff]   ;;  %v14856_v24 = vld [vmem:[#allocation3 + $0xc70] ss:$68 sps:$4 sm:$0xff]  }
 0x391   :  { %8585 = vmatprep.subr.bf16.mxu0 %v14825_v21  ;;  %8877 = vmatprep.subr.bf16.mxu1 %v14828_v44  ;;  %v14861_v21 = vld [vmem:[#allocation3 + $0xcf4] ss:$68 sps:$4 sm:$0xff]   ;;  %v14864_v44 = vld [vmem:[#allocation3 + $0xcfc] ss:$68 sps:$4 sm:$0xff]  }
 0x393   :  { %8551 = vmatmul.mubr.bf16.gmra.mrb[64].mxu0 %v15375_v19  ;;  %8843 = vmatmul.mubr.bf16.gmra.mrb[112].mxu1 %v15375_v19 }
 0x394   :  { %8586 = vmatpush1.bf16.msra.mxu0 %v14823_v35  ;;  %8878 = vmatpush1.bf16.msra.mxu1 %v14826_v16  ;;  %v14859_v35 = vld [vmem:[#allocation3 + $0xcf0] ss:$68 sps:$4 sm:$0xff]   ;;  %v14862_v16 = vld [vmem:[#allocation3 + $0xcf8] ss:$68 sps:$4 sm:$0xff]  }
 0x395   :  { %8587 = vmatprep.subr.bf16.mxu0 %v14831_v12  ;;  %8879 = vmatprep.subr.bf16.mxu1 %v14834_v45  ;;  %v14867_v12 = vld [vmem:[#allocation3 + $0xd7c] ss:$68 sps:$4 sm:$0xff]   ;;  %v14870_v45 = vld [vmem:[#allocation3 + $0xd84] ss:$68 sps:$4 sm:$0xff]  }
 0x396   :  { %8560 = vmatprep.mubr.bf16.mxu0 %v15387_v28  ;;  %8852 = vmatprep.mubr.bf16.mxu1 %v15387_v28 }
 0x398   :  { %8588 = vmatpush1.bf16.msra.mxu0 %v14829_v58  ;;  %8880 = vmatpush1.bf16.msra.mxu1 %v14832_v6  ;;  %v14865_v58 = vld [vmem:[#allocation3 + $0xd78] ss:$68 sps:$4 sm:$0xff]   ;;  %v14868_v6 = vld [vmem:[#allocation3 + $0xd80] ss:$68 sps:$4 sm:$0xff]  }
 0x399   :  { %8589 = vmatprep.subr.bf16.mxu0 %v14837_v8  ;;  %8881 = vmatprep.subr.bf16.mxu1 %v14840_v33  ;;  %v14873_v8 = vld [vmem:[#allocation3 + $0xe04] ss:$68 sps:$4 sm:$0xff]   ;;  %v14876_v33 = vld [vmem:[#allocation3 + $0xe0c] ss:$68 sps:$4 sm:$0xff]  }
 0x39b   :  { %8561 = vmatmul.mubr.bf16.gmra.mrb[68].mxu0 %v15390_v29  ;;  %8853 = vmatmul.mubr.bf16.gmra.mrb[116].mxu1 %v15390_v29 }
 0x39c   :  { %8590 = vmatpush1.bf16.msra.mxu0 %v14835_v0  ;;  %8882 = vmatpush1.bf16.msra.mxu1 %v14838_v31  ;;  %v14871_v0 = vld [vmem:[#allocation3 + $0xe00] ss:$68 sps:$4 sm:$0xff]   ;;  %v14874_v31 = vld [vmem:[#allocation3 + $0xe08] ss:$68 sps:$4 sm:$0xff]  }
 0x39d   :  { %8591 = vmatprep.subr.bf16.mxu0 %v14843_v3  ;;  %8883 = vmatprep.subr.bf16.mxu1 %v14846_v25  ;;  %v14879_v3 = vld [vmem:[#allocation3 + $0xe8c] ss:$68 sps:$4 sm:$0xff]   ;;  %v14882_v25 = vld [vmem:[#allocation3 + $0xe94] ss:$68 sps:$4 sm:$0xff]  }
 0x39e   :  { %8570 = vmatprep.mubr.bf16.mxu0 %v15401_v38  ;;  %8862 = vmatprep.mubr.bf16.mxu1 %v15401_v38 }
 0x3a0   :  { %8592 = vmatpush1.bf16.msra.mxu0 %v14841_v26  ;;  %8884 = vmatpush1.bf16.msra.mxu1 %v14844_v52  ;;  %v14877_v26 = vld [vmem:[#allocation3 + $0xe88] ss:$68 sps:$4 sm:$0xff]   ;;  %v14880_v52 = vld [vmem:[#allocation3 + $0xe90] ss:$68 sps:$4 sm:$0xff]  }
 0x3a1   :  { %8593 = vmatprep.subr.bf16.mxu0 %v14849_v40  ;;  %8885 = vmatprep.subr.bf16.mxu1 %v14852_v60  ;;  %v14885_v40 = vld [vmem:[#allocation3 + $0xf14] ss:$68 sps:$4 sm:$0xff]   ;;  %v14888_v60 = vld [vmem:[#allocation3 + $0xf1c] ss:$68 sps:$4 sm:$0xff]  }
 0x3a3   :  { %8571 = vmatmul.mubr.bf16.gmra.mrb[72].mxu0 %v15405_v43  ;;  %8863 = vmatmul.mubr.bf16.gmra.mrb[120].mxu1 %v15405_v43 }
 0x3a4   :  { %8594 = vmatpush1.bf16.msra.mxu0 %v14847_v13  ;;  %8886 = vmatpush1.bf16.msra.mxu1 %v14850_v53  ;;  %v14883_v13 = vld [vmem:[#allocation3 + $0xf10] ss:$68 sps:$4 sm:$0xff]   ;;  %v14886_v53 = vld [vmem:[#allocation3 + $0xf18] ss:$68 sps:$4 sm:$0xff]  }
 0x3a5   :  { %8595 = vmatprep.subr.bf16.mxu0 %v14855_v1  ;;  %8887 = vmatprep.subr.bf16.mxu1 %v14858_v23  ;;  %v14891_v1 = vld [vmem:[#allocation3 + $0xf9c] ss:$68 sps:$4 sm:$0xff]   ;;  %v14894_v23 = vld [vmem:[#allocation3 + $0xfa4] ss:$68 sps:$4 sm:$0xff]  }
 0x3a6   :  { %8613 = vmatprep.mubr.bf16.mxu0 %v15419_v48  ;;  %8905 = vmatprep.mubr.bf16.mxu1 %v15419_v48 }
 0x3a8   :  { %8596 = vmatpush1.bf16.msra.mxu0 %v14853_v47  ;;  %8888 = vmatpush1.bf16.msra.mxu1 %v14856_v24  ;;  %v14889_v47 = vld [vmem:[#allocation3 + $0xf98] ss:$68 sps:$4 sm:$0xff]   ;;  %v14892_v24 = vld [vmem:[#allocation3 + $0xfa0] ss:$68 sps:$4 sm:$0xff]  }
 0x3a9   :  { %8597 = vmatprep.subr.bf16.mxu0 %v14861_v21  ;;  %8889 = vmatprep.subr.bf16.mxu1 %v14864_v44  ;;  %v14897_v21 = vld [vmem:[#allocation3 + $0x1024] ss:$68 sps:$4 sm:$0xff]   ;;  %v14900_v44 = vld [vmem:[#allocation3 + $0x102c] ss:$68 sps:$4 sm:$0xff]  }
 0x3ac   :  { %8598 = vmatpush1.bf16.msra.mxu0 %v14859_v35  ;;  %8890 = vmatpush1.bf16.msra.mxu1 %v14862_v16  ;;  %v14895_v35 = vld [vmem:[#allocation3 + $0x1020] ss:$68 sps:$4 sm:$0xff]   ;;  %v14898_v16 = vld [vmem:[#allocation3 + $0x1028] ss:$68 sps:$4 sm:$0xff]  }
 0x3ad   :  { %8599 = vmatprep.subr.bf16.mxu0 %v14867_v12  ;;  %8891 = vmatprep.subr.bf16.mxu1 %v14870_v45  ;;  %v14903_v12 = vld [vmem:[#allocation3 + $0x10ac] ss:$68 sps:$4 sm:$0xff]   ;;  %v14906_v45 = vld [vmem:[#allocation3 + $0x10b4] ss:$68 sps:$4 sm:$0xff]  }
 0x3b0   :  { %8600 = vmatpush1.bf16.msra.mxu0 %v14865_v58  ;;  %8892 = vmatpush1.bf16.msra.mxu1 %v14868_v6  ;;  %v14901_v58 = vld [vmem:[#allocation3 + $0x10a8] ss:$68 sps:$4 sm:$0xff]   ;;  %v14904_v6 = vld [vmem:[#allocation3 + $0x10b0] ss:$68 sps:$4 sm:$0xff]  }
 0x3b1   :  { %8601 = vmatprep.subr.bf16.mxu0 %v14873_v8  ;;  %8893 = vmatprep.subr.bf16.mxu1 %v14876_v33  ;;  %v14909_v8 = vld [vmem:[#allocation3 + $0x1134] ss:$68 sps:$4 sm:$0xff]   ;;  %v14912_v33 = vld [vmem:[#allocation3 + $0x113c] ss:$68 sps:$4 sm:$0xff]  }
 0x3b4   :  { %8602 = vmatpush1.bf16.msra.mxu0 %v14871_v0  ;;  %8894 = vmatpush1.bf16.msra.mxu1 %v14874_v31  ;;  %v14907_v0 = vld [vmem:[#allocation3 + $0x1130] ss:$68 sps:$4 sm:$0xff]   ;;  %v14910_v31 = vld [vmem:[#allocation3 + $0x1138] ss:$68 sps:$4 sm:$0xff]  }
 0x3b5   :  { %8603 = vmatprep.subr.bf16.mxu0 %v14879_v3  ;;  %8895 = vmatprep.subr.bf16.mxu1 %v14882_v25  ;;  %v14915_v3 = vld [vmem:[#allocation3 + $0x11bc] ss:$68 sps:$4 sm:$0xff]   ;;  %v14918_v25 = vld [vmem:[#allocation3 + $0x11c4] ss:$68 sps:$4 sm:$0xff]  }
 0x3b8   :  { %8604 = vmatpush1.bf16.msra.mxu0 %v14877_v26  ;;  %8896 = vmatpush1.bf16.msra.mxu1 %v14880_v52  ;;  %v14913_v26 = vld [vmem:[#allocation3 + $0x11b8] ss:$68 sps:$4 sm:$0xff]   ;;  %v14916_v52 = vld [vmem:[#allocation3 + $0x11c0] ss:$68 sps:$4 sm:$0xff]  }
 0x3b9   :  { %8605 = vmatprep.subr.bf16.mxu0 %v14885_v40  ;;  %8897 = vmatprep.subr.bf16.mxu1 %v14888_v60  ;;  %v14921_v40 = vld [vmem:[#allocation3 + $0x1244] ss:$68 sps:$4 sm:$0xff]   ;;  %v14924_v60 = vld [vmem:[#allocation3 + $0x124c] ss:$68 sps:$4 sm:$0xff]  }
 0x3bc   :  { %8606 = vmatpush1.bf16.msra.mxu0 %v14883_v13  ;;  %8898 = vmatpush1.bf16.msra.mxu1 %v14886_v53  ;;  %v14919_v13 = vld [vmem:[#allocation3 + $0x1240] ss:$68 sps:$4 sm:$0xff]   ;;  %v14922_v53 = vld [vmem:[#allocation3 + $0x1248] ss:$68 sps:$4 sm:$0xff]  }
 0x3bd   :  { %8607 = vmatprep.subr.bf16.mxu0 %v14891_v1  ;;  %8899 = vmatprep.subr.bf16.mxu1 %v14894_v23  ;;  %v14927_v1 = vld [vmem:[#allocation3 + $0x12cc] ss:$68 sps:$4 sm:$0xff]   ;;  %v14930_v23 = vld [vmem:[#allocation3 + $0x12d4] ss:$68 sps:$4 sm:$0xff]  }
 0x3c0   :  { %8608 = vmatpush1.bf16.msra.mxu0 %v14889_v47  ;;  %8900 = vmatpush1.bf16.msra.mxu1 %v14892_v24  ;;  %v14925_v47 = vld [vmem:[#allocation3 + $0x12c8] ss:$68 sps:$4 sm:$0xff]   ;;  %v14928_v24 = vld [vmem:[#allocation3 + $0x12d0] ss:$68 sps:$4 sm:$0xff]  }
 0x3c1   :  { %8609 = vmatprep.subr.bf16.mxu0 %v14897_v21  ;;  %8901 = vmatprep.subr.bf16.mxu1 %v14900_v44  ;;  %v14933_v21 = vld [vmem:[#allocation3 + $0x1354] ss:$68 sps:$4 sm:$0xff]   ;;  %v14936_v44 = vld [vmem:[#allocation3 + $0x135c] ss:$68 sps:$4 sm:$0xff]  }
 0x3c4   :  { %8610 = vmatpush1.bf16.msra.mxu0 %v14895_v35  ;;  %8902 = vmatpush1.bf16.msra.mxu1 %v14898_v16  ;;  %v14931_v35 = vld [vmem:[#allocation3 + $0x1350] ss:$68 sps:$4 sm:$0xff]   ;;  %v14934_v16 = vld [vmem:[#allocation3 + $0x1358] ss:$68 sps:$4 sm:$0xff]  }
 0x3c5   :  { %8611 = vmatprep.subr.bf16.mxu0 %v14903_v12  ;;  %8903 = vmatprep.subr.bf16.mxu1 %v14906_v45  ;;  %v14939_v12 = vld [vmem:[#allocation3 + $0x13dc] ss:$68 sps:$4 sm:$0xff]   ;;  %v14942_v45 = vld [vmem:[#allocation3 + $0x13e4] ss:$68 sps:$4 sm:$0xff]  }
 0x3c8   :  { %8612 = vmatpush1.bf16.msra.mxu0 %v14901_v58  ;;  %8904 = vmatpush1.bf16.msra.mxu1 %v14904_v6  ;;  %v14937_v58 = vld [vmem:[#allocation3 + $0x13d8] ss:$68 sps:$4 sm:$0xff]   ;;  %v14940_v6 = vld [vmem:[#allocation3 + $0x13e0] ss:$68 sps:$4 sm:$0xff]  }
 0x3c9   :  { %8654 = vmatprep.subr.bf16.mxu0 %v14909_v8  ;;  %8946 = vmatprep.subr.bf16.mxu1 %v14912_v33  ;;  %v14945_v8 = vld [vmem:[#allocation3 + $0x1464] ss:$68 sps:$4 sm:$0xff]   ;;  %v14948_v33 = vld [vmem:[#allocation3 + $0x146c] ss:$68 sps:$4 sm:$0xff]  }
 0x3cb   :  { %8614 = vmatmul.mubr.bf16.vlgmr.msra.gmra.mrb[60].mxu0 %v15427_v27  ;;  %8906 = vmatmul.mubr.bf16.vlgmr.msra.gmra.mrb[108].mxu1 %v15427_v27 }
 0x3cc   :  { %8655 = vmatpush1.bf16.msra.mxu0 %v14907_v0  ;;  %8947 = vmatpush1.bf16.msra.mxu1 %v14910_v31  ;;  %v14943_v0 = vld [vmem:[#allocation3 + $0x1460] ss:$68 sps:$4 sm:$0xff]   ;;  %v14946_v31 = vld [vmem:[#allocation3 + $0x1468] ss:$68 sps:$4 sm:$0xff]  }
 0x3cd   :  { %8656 = vmatprep.subr.bf16.mxu0 %v14915_v3  ;;  %8948 = vmatprep.subr.bf16.mxu1 %v14918_v25  ;;  %v14951_v3 = vld [vmem:[#allocation3 + $0x14ec] ss:$68 sps:$4 sm:$0xff]   ;;  %v14954_v25 = vld [vmem:[#allocation3 + $0x14f4] ss:$68 sps:$4 sm:$0xff]  }
 0x3ce   :  { %8623 = vmatprep.mubr.bf16.mxu0 %v15435_v34  ;;  %8915 = vmatprep.mubr.bf16.mxu1 %v15435_v34 }
 0x3d0   :  { %8657 = vmatpush1.bf16.msra.mxu0 %v14913_v26  ;;  %8949 = vmatpush1.bf16.msra.mxu1 %v14916_v52  ;;  %v14949_v26 = vld [vmem:[#allocation3 + $0x14e8] ss:$68 sps:$4 sm:$0xff]   ;;  %v14952_v52 = vld [vmem:[#allocation3 + $0x14f0] ss:$68 sps:$4 sm:$0xff]  }
 0x3d1   :  { %8658 = vmatprep.subr.bf16.mxu0 %v14921_v40  ;;  %8950 = vmatprep.subr.bf16.mxu1 %v14924_v60  ;;  %v14957_v40 = vld [vmem:[#allocation3 + $0x1574] ss:$68 sps:$4 sm:$0xff]   ;;  %v14960_v60 = vld [vmem:[#allocation3 + $0x157c] ss:$68 sps:$4 sm:$0xff]  }
 0x3d3   :  { %8624 = vmatmul.mubr.bf16.gmra.mrb[64].mxu0 %v15444_v41  ;;  %8916 = vmatmul.mubr.bf16.gmra.mrb[112].mxu1 %v15444_v41 }
 0x3d4   :  { %8659 = vmatpush1.bf16.msra.mxu0 %v14919_v13  ;;  %8951 = vmatpush1.bf16.msra.mxu1 %v14922_v53  ;;  %v14955_v13 = vld [vmem:[#allocation3 + $0x1570] ss:$68 sps:$4 sm:$0xff]   ;;  %v14958_v53 = vld [vmem:[#allocation3 + $0x1578] ss:$68 sps:$4 sm:$0xff]  }
 0x3d5   :  { %8660 = vmatprep.subr.bf16.mxu0 %v14927_v1  ;;  %8952 = vmatprep.subr.bf16.mxu1 %v14930_v23  ;;  %v14963_v1 = vld [vmem:[#allocation3 + $0x15fc] ss:$68 sps:$4 sm:$0xff]   ;;  %v14966_v23 = vld [vmem:[#allocation3 + $0x1604] ss:$68 sps:$4 sm:$0xff]  }
 0x3d6   :  { %8633 = vmatprep.mubr.bf16.mxu0 %v15449_v49  ;;  %8925 = vmatprep.mubr.bf16.mxu1 %v15449_v49 }
 0x3d8   :  { %8661 = vmatpush1.bf16.msra.mxu0 %v14925_v47  ;;  %8953 = vmatpush1.bf16.msra.mxu1 %v14928_v24  ;;  %v14961_v47 = vld [vmem:[#allocation3 + $0x15f8] ss:$68 sps:$4 sm:$0xff]   ;;  %v14964_v24 = vld [vmem:[#allocation3 + $0x1600] ss:$68 sps:$4 sm:$0xff]  }
 0x3d9   :  { %8662 = vmatprep.subr.bf16.mxu0 %v14933_v21  ;;  %8954 = vmatprep.subr.bf16.mxu1 %v14936_v44  ;;  %v14969_v21 = vld [vmem:[#allocation3 + $0x1684] ss:$68 sps:$4 sm:$0xff]   ;;  %v14972_v44 = vld [vmem:[#allocation3 + $0x168c] ss:$68 sps:$4 sm:$0xff]  }
 0x3db   :  { %8634 = vmatmul.mubr.bf16.gmra.mrb[68].mxu0 %v15455_v56  ;;  %8926 = vmatmul.mubr.bf16.gmra.mrb[116].mxu1 %v15455_v56 }
 0x3dc   :  { %8663 = vmatpush1.bf16.msra.mxu0 %v14931_v35  ;;  %8955 = vmatpush1.bf16.msra.mxu1 %v14934_v16  ;;  %v14967_v35 = vld [vmem:[#allocation3 + $0x1680] ss:$68 sps:$4 sm:$0xff]   ;;  %v14970_v16 = vld [vmem:[#allocation3 + $0x1688] ss:$68 sps:$4 sm:$0xff]  }
 0x3dd   :  { %8664 = vmatprep.subr.bf16.mxu0 %v14939_v12  ;;  %8956 = vmatprep.subr.bf16.mxu1 %v14942_v45  ;;  %v14975_v12 = vld [vmem:[#allocation3 + $0x170c] ss:$68 sps:$4 sm:$0xff]   ;;  %v14978_v45 = vld [vmem:[#allocation3 + $0x1714] ss:$68 sps:$4 sm:$0xff]  }
 0x3de   :  { %8643 = vmatprep.mubr.bf16.mxu0 %v15463_v62  ;;  %8935 = vmatprep.mubr.bf16.mxu1 %v15463_v62 }
 0x3e0   :  { %8665 = vmatpush1.bf16.msra.mxu0 %v14937_v58  ;;  %8957 = vmatpush1.bf16.msra.mxu1 %v14940_v6  ;;  %v14973_v58 = vld [vmem:[#allocation3 + $0x1708] ss:$68 sps:$4 sm:$0xff]   ;;  %v14976_v6 = vld [vmem:[#allocation3 + $0x1710] ss:$68 sps:$4 sm:$0xff]  }
 0x3e1   :  { %8666 = vmatprep.subr.bf16.mxu0 %v14945_v8  ;;  %8958 = vmatprep.subr.bf16.mxu1 %v14948_v33  ;;  %v14981_v8 = vld [vmem:[#allocation3 + $0x1794] ss:$68 sps:$4 sm:$0xff]   ;;  %v14984_v33 = vld [vmem:[#allocation3 + $0x179c] ss:$68 sps:$4 sm:$0xff]  }
 0x3e3   :  { %8644 = vmatmul.mubr.bf16.gmra.mrb[72].mxu0 %v15469_v4  ;;  %8936 = vmatmul.mubr.bf16.gmra.mrb[120].mxu1 %v15469_v4 }
 0x3e4   :  { %8667 = vmatpush1.bf16.msra.mxu0 %v14943_v0  ;;  %8959 = vmatpush1.bf16.msra.mxu1 %v14946_v31  ;;  %v14979_v0 = vld [vmem:[#allocation3 + $0x1790] ss:$68 sps:$4 sm:$0xff]   ;;  %v14982_v31 = vld [vmem:[#allocation3 + $0x1798] ss:$68 sps:$4 sm:$0xff]  }
 0x3e5   :  { %8668 = vmatprep.subr.bf16.mxu0 %v14951_v3  ;;  %8960 = vmatprep.subr.bf16.mxu1 %v14954_v25  ;;  %v14987_v3 = vld [vmem:[#allocation3 + $0x181c] ss:$68 sps:$4 sm:$0xff]   ;;  %v14990_v25 = vld [vmem:[#allocation3 + $0x1824] ss:$68 sps:$4 sm:$0xff]  }
 0x3e6   :  { %8686 = vmatprep.mubr.bf16.mxu0 %v15483_v11  ;;  %8978 = vmatprep.mubr.bf16.mxu1 %v15483_v11 }
 0x3e8   :  { %8669 = vmatpush1.bf16.msra.mxu0 %v14949_v26  ;;  %8961 = vmatpush1.bf16.msra.mxu1 %v14952_v52  ;;  %v14985_v26 = vld [vmem:[#allocation3 + $0x1818] ss:$68 sps:$4 sm:$0xff]   ;;  %v14988_v52 = vld [vmem:[#allocation3 + $0x1820] ss:$68 sps:$4 sm:$0xff]  }
 0x3e9   :  { %8670 = vmatprep.subr.bf16.mxu0 %v14957_v40  ;;  %8962 = vmatprep.subr.bf16.mxu1 %v14960_v60  ;;  %v14993_v40 = vld [vmem:[#allocation3 + $0x18a4] ss:$68 sps:$4 sm:$0xff]   ;;  %v14996_v60 = vld [vmem:[#allocation3 + $0x18ac] ss:$68 sps:$4 sm:$0xff]  }
 0x3ec   :  { %8671 = vmatpush1.bf16.msra.mxu0 %v14955_v13  ;;  %8963 = vmatpush1.bf16.msra.mxu1 %v14958_v53  ;;  %v14991_v13 = vld [vmem:[#allocation3 + $0x18a0] ss:$68 sps:$4 sm:$0xff]   ;;  %v14994_v53 = vld [vmem:[#allocation3 + $0x18a8] ss:$68 sps:$4 sm:$0xff]  }
 0x3ed   :  { %8672 = vmatprep.subr.bf16.mxu0 %v14963_v1  ;;  %8964 = vmatprep.subr.bf16.mxu1 %v14966_v23  ;;  %v14999_v1 = vld [vmem:[#allocation3 + $0x192c] ss:$68 sps:$4 sm:$0xff]   ;;  %v15002_v23 = vld [vmem:[#allocation3 + $0x1934] ss:$68 sps:$4 sm:$0xff]  }
 0x3f0   :  { %8673 = vmatpush1.bf16.msra.mxu0 %v14961_v47  ;;  %8965 = vmatpush1.bf16.msra.mxu1 %v14964_v24  ;;  %v14997_v47 = vld [vmem:[#allocation3 + $0x1928] ss:$68 sps:$4 sm:$0xff]   ;;  %v15000_v24 = vld [vmem:[#allocation3 + $0x1930] ss:$68 sps:$4 sm:$0xff]  }
 0x3f1   :  { %8674 = vmatprep.subr.bf16.mxu0 %v14969_v21  ;;  %8966 = vmatprep.subr.bf16.mxu1 %v14972_v44  ;;  %v15005_v21 = vld [vmem:[#allocation3 + $0x19b4] ss:$68 sps:$4 sm:$0xff]   ;;  %v15008_v44 = vld [vmem:[#allocation3 + $0x19bc] ss:$68 sps:$4 sm:$0xff]  }
 0x3f4   :  { %8675 = vmatpush1.bf16.msra.mxu0 %v14967_v35  ;;  %8967 = vmatpush1.bf16.msra.mxu1 %v14970_v16  ;;  %v15003_v35 = vld [vmem:[#allocation3 + $0x19b0] ss:$68 sps:$4 sm:$0xff]   ;;  %v15006_v16 = vld [vmem:[#allocation3 + $0x19b8] ss:$68 sps:$4 sm:$0xff]  }
 0x3f5   :  { %8676 = vmatprep.subr.bf16.mxu0 %v14975_v12  ;;  %8968 = vmatprep.subr.bf16.mxu1 %v14978_v45  ;;  %v15011_v12 = vld [vmem:[#allocation3 + $0x1a3c] ss:$68 sps:$4 sm:$0xff]   ;;  %v15014_v45 = vld [vmem:[#allocation3 + $0x1a44] ss:$68 sps:$4 sm:$0xff]  }
 0x3f8   :  { %8677 = vmatpush1.bf16.msra.mxu0 %v14973_v58  ;;  %8969 = vmatpush1.bf16.msra.mxu1 %v14976_v6  ;;  %v15009_v58 = vld [vmem:[#allocation3 + $0x1a38] ss:$68 sps:$4 sm:$0xff]   ;;  %v15012_v6 = vld [vmem:[#allocation3 + $0x1a40] ss:$68 sps:$4 sm:$0xff]  }
 0x3f9   :  { %8678 = vmatprep.subr.bf16.mxu0 %v14981_v8  ;;  %8970 = vmatprep.subr.bf16.mxu1 %v14984_v33  ;;  %v15017_v8 = vld [vmem:[#allocation3 + $0x1ac4] ss:$68 sps:$4 sm:$0xff]   ;;  %v15020_v33 = vld [vmem:[#allocation3 + $0x1acc] ss:$68 sps:$4 sm:$0xff]  }
 0x3fc   :  { %8679 = vmatpush1.bf16.msra.mxu0 %v14979_v0  ;;  %8971 = vmatpush1.bf16.msra.mxu1 %v14982_v31  ;;  %v15015_v0 = vld [vmem:[#allocation3 + $0x1ac0] ss:$68 sps:$4 sm:$0xff]   ;;  %v15018_v31 = vld [vmem:[#allocation3 + $0x1ac8] ss:$68 sps:$4 sm:$0xff]  }
 0x3fd   :  { %8680 = vmatprep.subr.bf16.mxu0 %v14987_v3  ;;  %8972 = vmatprep.subr.bf16.mxu1 %v14990_v25  ;;  %v15023_v3 = vld [vmem:[#allocation3 + $0x1b4c] ss:$68 sps:$4 sm:$0xff]   ;;  %v15026_v25 = vld [vmem:[#allocation3 + $0x1b54] ss:$68 sps:$4 sm:$0xff]  }
 0x400   :  { %8681 = vmatpush1.bf16.msra.mxu0 %v14985_v26  ;;  %8973 = vmatpush1.bf16.msra.mxu1 %v14988_v52  ;;  %v15021_v26 = vld [vmem:[#allocation3 + $0x1b48] ss:$68 sps:$4 sm:$0xff]   ;;  %v15024_v52 = vld [vmem:[#allocation3 + $0x1b50] ss:$68 sps:$4 sm:$0xff]  }
 0x401   :  { %8682 = vmatprep.subr.bf16.mxu0 %v14993_v40  ;;  %8974 = vmatprep.subr.bf16.mxu1 %v14996_v60  ;;  %v15029_v40 = vld [vmem:[#allocation3 + $0x1bd4] ss:$68 sps:$4 sm:$0xff]   ;;  %v15032_v60 = vld [vmem:[#allocation3 + $0x1bdc] ss:$68 sps:$4 sm:$0xff]  }
 0x404   :  { %8683 = vmatpush1.bf16.msra.mxu0 %v14991_v13  ;;  %8975 = vmatpush1.bf16.msra.mxu1 %v14994_v53  ;;  %v15027_v13 = vld [vmem:[#allocation3 + $0x1bd0] ss:$68 sps:$4 sm:$0xff]   ;;  %v15030_v53 = vld [vmem:[#allocation3 + $0x1bd8] ss:$68 sps:$4 sm:$0xff]  }
 0x405   :  { %8684 = vmatprep.subr.bf16.mxu0 %v14999_v1  ;;  %8976 = vmatprep.subr.bf16.mxu1 %v15002_v23  ;;  %v16469_v1 = vsub.s32 2, %v15691_v54  ;;  %v15035_v23 = vld [vmem:[#allocation3 + $0x1c5c] ss:$68 sps:$4 sm:$0xff]  }
 0x408   :  { %8685 = vmatpush1.bf16.msra.mxu0 %v14997_v47  ;;  %8977 = vmatpush1.bf16.msra.mxu1 %v15000_v24  ;;  %v15038_v47 = vld [vmem:[#allocation3 + $0x1c64] ss:$68 sps:$4 sm:$0xff]   ;;  %v15033_v24 = vld [vmem:[#allocation3 + $0x1c58] ss:$68 sps:$4 sm:$0xff]  }
 0x409   :  { %8727 = vmatprep.subr.bf16.mxu0 %v15005_v21  ;;  %9019 = vmatprep.subr.bf16.mxu1 %v15008_v44  ;;  %v15036_v21 = vld [vmem:[#allocation3 + $0x1c60] ss:$68 sps:$4 sm:$0xff]  }
 0x40a   :  { %v15164_v44 = vld [vmem:[#allocation5] sm:$0x7] }
 0x40b   :  { %8687 = vmatmul.mubr.bf16.vlgmr.msra.gmra.mrb[60].mxu0 %v15494_v63  ;;  %8979 = vmatmul.mubr.bf16.vlgmr.msra.gmra.mrb[108].mxu1 %v15494_v63 }
 0x40c   :  { %8728 = vmatpush1.bf16.msra.mxu0 %v15003_v35  ;;  %9020 = vmatpush1.bf16.msra.mxu1 %v15006_v16  ;;  %v15907_v35 = vrot.slane %v15164_v44, %v16469_v1  ;;  %v15041_v16 = vld [vmem:[#allocation3 + $0x1ce4] ss:$68 sps:$4 sm:$0xff]  }
 0x40d   :  { %8729 = vmatprep.subr.bf16.mxu0 %v15011_v12  ;;  %9021 = vmatprep.subr.bf16.mxu1 %v15014_v45  ;;  %v15044_v12 = vld [vmem:[#allocation3 + $0x1cec] ss:$68 sps:$4 sm:$0xff]  }
 0x40e   :  { %8696 = vmatprep.mubr.bf16.mxu0 %v15499_v9  ;;  %8988 = vmatprep.mubr.bf16.mxu1 %v15499_v9 }
 0x410   :  { %8730 = vmatpush1.bf16.msra.mxu0 %v15009_v58  ;;  %9022 = vmatpush1.bf16.msra.mxu1 %v15012_v6 }
 0x411   :  { %8731 = vmatprep.subr.bf16.mxu0 %v15017_v8  ;;  %9023 = vmatprep.subr.bf16.mxu1 %v15020_v33 }
 0x413   :  { %8697 = vmatmul.mubr.bf16.gmra.mrb[64].mxu0 %v15505_v15  ;;  %8989 = vmatmul.mubr.bf16.gmra.mrb[112].mxu1 %v15505_v15 }
 0x414   :  { %8732 = vmatpush1.bf16.msra.mxu0 %v15015_v0  ;;  %9024 = vmatpush1.bf16.msra.mxu1 %v15018_v31  ;;  %v15039_v31 = vld [vmem:[#allocation3 + $0x1ce0] ss:$68 sps:$4 sm:$0xff]  }
 0x415   :  { %8733 = vmatprep.subr.bf16.mxu0 %v15023_v3  ;;  %9025 = vmatprep.subr.bf16.mxu1 %v15026_v25  ;;  %v15042_v3 = vld [vmem:[#allocation3 + $0x1ce8] ss:$68 sps:$4 sm:$0xff]  }
 0x416   :  { %8706 = vmatprep.mubr.bf16.mxu0 %v15513_v22  ;;  %8998 = vmatprep.mubr.bf16.mxu1 %v15513_v22 }
 0x418   :  { %8734 = vmatpush1.bf16.msra.mxu0 %v15021_v26  ;;  %9026 = vmatpush1.bf16.msra.mxu1 %v15024_v52 }
 0x419   :  { %8735 = vmatprep.subr.bf16.mxu0 %v15029_v40  ;;  %9027 = vmatprep.subr.bf16.mxu1 %v15032_v60  ;;  %v15047_v60 = vld [vmem:[#allocation3 + $0x1d6c] ss:$68 sps:$4 sm:$0xff]  }
 0x41b   :  { %8707 = vmatmul.mubr.bf16.gmra.mrb[68].mxu0 %v15519_v32  ;;  %8999 = vmatmul.mubr.bf16.gmra.mrb[116].mxu1 %v15519_v32 }
 0x41c   :  { %8736 = vmatpush1.bf16.msra.mxu0 %v15027_v13  ;;  %9028 = vmatpush1.bf16.msra.mxu1 %v15030_v53  ;;  %v15050_v13 = vld [vmem:[#allocation3 + $0x1d74] ss:$68 sps:$4 sm:$0xff]  }
 0x41d   :  { %8737 = vmatprep.subr.bf16.mxu0 %v15035_v23  ;;  %9029 = vmatprep.subr.bf16.mxu1 %v15038_v47  ;;  %v15045_v23 = vld [vmem:[#allocation3 + $0x1d68] ss:$68 sps:$4 sm:$0xff]   ;;  %v15048_v47 = vld [vmem:[#allocation3 + $0x1d70] ss:$68 sps:$4 sm:$0xff]  }
 0x41e   :  { %v8177_v45 = vpop.f32.mrb[44].mxu0  ;;  %v15909_v58 = vpop.f32.mrb[92].mxu1  ;;  %8716 = vmatprep.mubr.bf16.mxu0 %v15527_v39  ;;  %9008 = vmatprep.mubr.bf16.mxu1 %v15527_v39 }
 0x41f   :  { %v15913_v6 = vpop.f32.mrb[45].mxu0  ;;  %v15915_v8 = vpop.f32.mrb[93].mxu1  ;;  %v9407_v25 = vadd.f32 %v15907_v35, %v8177_v45 }
 0x420   :  { %v8181_v33 = vpop.f32.mrb[46].mxu0  ;;  %v15917_v0 = vpop.f32.mrb[94].mxu1  ;;  %8738 = vmatpush1.bf16.msra.mxu0 %v15033_v24  ;;  %9030 = vmatpush1.bf16.msra.mxu1 %v15036_v21  ;;  %v15053_v24 = vld [vmem:[#allocation3 + $0x1df4] ss:$68 sps:$4 sm:$0xff]   ;;  %v15056_v21 = vld [vmem:[#allocation3 + $0x1dfc] ss:$68 sps:$4 sm:$0xff]  }
 0x421   :  { %16478 = vst [vmem:[#allocation13_spill] sm:$0xff] %v15917_v0  ;;  %v9410_v26 = vadd.f32 %v15907_v35, %v8181_v33  ;;  %v15921_v52 = vpop.f32.mrb[47].mxu0  ;;  %v15923_v40 = vpop.f32.mrb[95].mxu1  ;;  %8739 = vmatprep.subr.bf16.mxu0 %v15041_v16  ;;  %9031 = vmatprep.subr.bf16.mxu1 %v15044_v12 }
 0x423   :  { %v15925_v53 = vpack.c.bf16 %v9410_v26, %v9407_v25  ;;  %8717 = vmatmul.mubr.bf16.gmra.mrb[72].mxu0 %v15533_v51  ;;  %9009 = vmatmul.mubr.bf16.gmra.mrb[120].mxu1 %v15533_v51  ;;  %v15054_v25 = vld [vmem:[#allocation3 + $0x1df8] ss:$68 sps:$4 sm:$0xff]  }
 0x424   :  { %8740 = vmatpush1.bf16.msra.mxu0 %v15039_v31  ;;  %9032 = vmatpush1.bf16.msra.mxu1 %v15042_v3  ;;  %v15051_v3 = vld [vmem:[#allocation3 + $0x1df0] ss:$68 sps:$4 sm:$0xff]  }
 0x425   :  { %8741 = vmatprep.subr.bf16.mxu0 %v15047_v60  ;;  %9033 = vmatprep.subr.bf16.mxu1 %v15050_v13 }
 0x426   :  { %v8187_v44 = vpop.f32.mrb[48].mxu0  ;;  %v15929_v45 = vpop.f32.mrb[96].mxu1  ;;  %8759 = vmatprep.mubr.bf16.mxu0 %v15547_v57  ;;  %9051 = vmatprep.mubr.bf16.mxu1 %v15547_v57 }
 0x427   :  { %16479 = vst [vmem:[#allocation18_spill] sm:$0xff] %v15929_v45  ;;  %v15933_v16 = vpop.f32.mrb[49].mxu0  ;;  %v15935_v12 = vpop.f32.mrb[97].mxu1  ;;  %v9413_v26 = vadd.f32 %v15907_v35, %v8187_v44  ;;  %v15059_v45 = vld [vmem:[#allocation3 + $0x1e7c] ss:$68 sps:$4 sm:$0xff]  }
 0x428   :  { %16480 = vst [vmem:[#allocation19_spill] sm:$0xff] %v15933_v16  ;;  %16481 = vst [vmem:[#allocation20_spill] sm:$0xff] %v15935_v12  ;;  %v8191_v33 = vpop.f32.mrb[50].mxu0  ;;  %v15937_v31 = vpop.f32.mrb[98].mxu1  ;;  %8742 = vmatpush1.bf16.msra.mxu0 %v15045_v23  ;;  %9034 = vmatpush1.bf16.msra.mxu1 %v15048_v47  ;;  %v15062_v16 = vld [vmem:[#allocation3 + $0x1e84] ss:$68 sps:$4 sm:$0xff]  }
 0x429   :  { %16482 = vst [vmem:[#allocation21_spill] sm:$0xff] %v15937_v31  ;;  %v9416_v60 = vadd.f32 %v15907_v35, %v8191_v33  ;;  %v15941_v13 = vpop.f32.mrb[51].mxu0  ;;  %v15943_v1 = vpop.f32.mrb[99].mxu1  ;;  %8743 = vmatprep.subr.bf16.mxu0 %v15053_v24  ;;  %9035 = vmatprep.subr.bf16.mxu1 %v15056_v21  ;;  %v15057_v23 = vld [vmem:[#allocation3 + $0x1e78] ss:$68 sps:$4 sm:$0xff]  }
 0x42a   :  { %16483 = vst [vmem:[#allocation22_spill] sm:$0xff] %v15941_v13  ;;  %16484 = vst [vmem:[#allocation23_spill] sm:$0xff] %v15943_v1  ;;  %v15060_v47 = vld [vmem:[#allocation3 + $0x1e80] ss:$68 sps:$4 sm:$0xff]   ;;  %v15068_v44 = vld [vmem:[#allocation3 + $0x1f0c] ss:$68 sps:$4 sm:$0xff]  }
 0x42b   :  { %v15945_v12 = vpack.c.bf16 %v9416_v60, %v9413_v26  ;;  %v15065_v31 = vld [vmem:[#allocation3 + $0x1f04] ss:$68 sps:$4 sm:$0xff]   ;;  %v15071_v60 = vld [vmem:[#allocation3 + $0x1f8c] ss:$68 sps:$4 sm:$0xff]  }
 0x42c   :  { %8744 = vmatpush1.bf16.msra.mxu0 %v15051_v3  ;;  %9036 = vmatpush1.bf16.msra.mxu1 %v15054_v25  ;;  %v15063_v3 = vld [vmem:[#allocation3 + $0x1f00] ss:$68 sps:$4 sm:$0xff]   ;;  %v15066_v25 = vld [vmem:[#allocation3 + $0x1f08] ss:$68 sps:$4 sm:$0xff]  }
 0x42d   :  { %8745 = vmatprep.subr.bf16.mxu0 %v15059_v45  ;;  %9037 = vmatprep.subr.bf16.mxu1 %v15062_v16 }
 0x42e   :  { %v8197_v0 = vpop.f32.mrb[52].mxu0  ;;  %v15947_v33 = vpop.f32.mrb[100].mxu1 }
 0x42f   :  { %16485 = vst [vmem:[#allocation24_spill] sm:$0xff] %v15947_v33  ;;  %v15949_v13 = vpop.f32.mrb[53].mxu0  ;;  %v15951_v1 = vpop.f32.mrb[101].mxu1  ;;  %v15074_v33 = vld [vmem:[#allocation3 + $0x1f94] ss:$68 sps:$4 sm:$0xff]  }
 0x430   :  { %16486 = vst [vmem:[#allocation25_spill] sm:$0xff] %v15949_v13  ;;  %16487 = vst [vmem:[#allocation26_spill] sm:$0xff] %v15951_v1  ;;  %v8201_v24 = vpop.f32.mrb[54].mxu0  ;;  %v15953_v21 = vpop.f32.mrb[102].mxu1  ;;  %8746 = vmatpush1.bf16.msra.mxu0 %v15057_v23  ;;  %9038 = vmatpush1.bf16.msra.mxu1 %v15060_v47  ;;  %v9419_v13 = vadd.f32 %v15907_v35, %v8197_v0  ;;  %v15069_v23 = vld [vmem:[#allocation3 + $0x1f88] ss:$68 sps:$4 sm:$0xff]  }
 0x431   :  { %16488 = vst [vmem:[#allocation27_spill] sm:$0xff] %v15953_v21  ;;  %v9385_v26 = vadd.f32 %v8201_v24, %v15813_v55  ;;  %v15956_v45 = vpop.f32.mrb[55].mxu0  ;;  %v15958_v16 = vpop.f32.mrb[103].mxu1  ;;  %8747 = vmatprep.subr.bf16.mxu0 %v15065_v31  ;;  %9039 = vmatprep.subr.bf16.mxu1 %v15068_v44  ;;  %v15072_v47 = vld [vmem:[#allocation3 + $0x1f90] ss:$68 sps:$4 sm:$0xff]  }
 0x432   :  { %16489 = vst [vmem:[#allocation28_spill] sm:$0xff] %v15956_v45  ;;  %16490 = vst [vmem:[#allocation29_spill] sm:$0xff] %v15958_v16  ;;  %v15077_v55 = vld [vmem:[#allocation3 + $0x2014] ss:$68 sps:$4 sm:$0xff]   ;;  %v15080_v24 = vld [vmem:[#allocation3 + $0x201c] ss:$68 sps:$4 sm:$0xff]  }
 0x433   :  { %v9422_v1 = vadd.f32 %v15907_v35, %v9385_v26 }
 0x434   :  { %8748 = vmatpush1.bf16.msra.mxu0 %v15063_v3  ;;  %9040 = vmatpush1.bf16.msra.mxu1 %v15066_v25 }
 0x435   :  { %v15962_v21 = vpack.c.bf16 %v9422_v1, %v9419_v13  ;;  %8749 = vmatprep.subr.bf16.mxu0 %v15071_v60  ;;  %9041 = vmatprep.subr.bf16.mxu1 %v15074_v33  ;;  %v15075_v1 = vld [vmem:[#allocation3 + $0x2010] ss:$68 sps:$4 sm:$0xff]   ;;  %v15078_v13 = vld [vmem:[#allocation3 + $0x2018] ss:$68 sps:$4 sm:$0xff]  }
 0x436   :  { %v8207_v45 = vpop.f32.mrb[56].mxu0  ;;  %v15964_v16 = vpop.f32.mrb[104].mxu1 }
 0x437   :  { %16491 = vst [vmem:[#allocation30_spill] sm:$0xff] %v15964_v16  ;;  %v9386_v31 = vadd.f32 %v8207_v45, %v15815_v42  ;;  %v15967_v44 = vpop.f32.mrb[57].mxu0  ;;  %v15969_v0 = vpop.f32.mrb[105].mxu1  ;;  %v15083_v42 = vld [vmem:[#allocation3 + $0x209c] ss:$68 sps:$4 sm:$0xff]  }
 0x438   :  { %16492 = vst [vmem:[#allocation31_spill] sm:$0xff] %v15969_v0  ;;  %v8211_v26 = vpop.f32.mrb[58].mxu0  ;;  %v15971_v3 = vpop.f32.mrb[106].mxu1  ;;  %8750 = vmatpush1.bf16.msra.mxu0 %v15069_v23  ;;  %9042 = vmatpush1.bf16.msra.mxu1 %v15072_v47  ;;  %v15086_v45 = vld [vmem:[#allocation3 + $0x20a4] ss:$68 sps:$4 sm:$0xff]  }
 0x439   :  { %16493 = vst [vmem:[#allocation32_spill] sm:$0xff] %v15971_v3  ;;  %v9387_v33 = vadd.f32 %v8211_v26, %v15825_v20  ;;  %v15974_v25 = vpop.f32.mrb[59].mxu0  ;;  %v15976_v60 = vpop.f32.mrb[107].mxu1  ;;  %8751 = vmatprep.subr.bf16.mxu0 %v15077_v55  ;;  %9043 = vmatprep.subr.bf16.mxu1 %v15080_v24  ;;  %v9425_v16 = vadd.f32 %v15907_v35, %v9386_v31  ;;  %v15081_v23 = vld [vmem:[#allocation3 + $0x2098] ss:$68 sps:$4 sm:$0xff]  }
 0x43a   :  { %16494 = vst [vmem:[#allocation33_spill] sm:$0xff] %v15976_v60  ;;  %v15084_v47 = vld [vmem:[#allocation3 + $0x20a0] ss:$68 sps:$4 sm:$0xff]   ;;  %v15092_v26 = vld [vmem:[#allocation3 + $0x212c] ss:$68 sps:$4 sm:$0xff]  }
 0x43b   :  { %v9428_v0 = vadd.f32 %v15907_v35, %v9387_v33  ;;  %v15089_v20 = vld [vmem:[#allocation3 + $0x2124] ss:$68 sps:$4 sm:$0xff]   ;;  %v15095_v60 = vld [vmem:[#allocation3 + $0x21ac] ss:$68 sps:$4 sm:$0xff]   ;;  %v15098_v31 = vld [vmem:[#allocation3 + $0x21b4] ss:$68 sps:$4 sm:$0xff]  }
 0x43c   :  { %8752 = vmatpush1.bf16.msra.mxu0 %v15075_v1  ;;  %9044 = vmatpush1.bf16.msra.mxu1 %v15078_v13  ;;  %v15087_v55 = vld [vmem:[#allocation3 + $0x2120] ss:$68 sps:$4 sm:$0xff]   ;;  %v15090_v24 = vld [vmem:[#allocation3 + $0x2128] ss:$68 sps:$4 sm:$0xff]   ;;  %v15096_v1 = vld [vmem:[#allocation3 + $0x21b0] ss:$68 sps:$4 sm:$0xff]  }
 0x43d   :  { %v15980_v3 = vpack.c.bf16 %v9428_v0, %v9425_v16  ;;  %8753 = vmatprep.subr.bf16.mxu0 %v15083_v42  ;;  %9045 = vmatprep.subr.bf16.mxu1 %v15086_v45  ;;  %v15093_v35 = vld [vmem:[#allocation3 + $0x21a8] ss:$68 sps:$4 sm:$0xff]   ;;  %v15099_v16 = vld [vmem:[#allocation3 + $0x480] ss:$68 sps:$4 sm:$0xff]  }
 0x43e   :  { %v15100_v0 = vld [vmem:[#allocation3 + $0xd00] ss:$68 sps:$4 sm:$0xff]   ;;  %v15103_v42 = vld [vmem:[#allocation3 + $0x508] ss:$68 sps:$4 sm:$0xff]  }
 0x43f   :  { %v15101_v13 = vld [vmem:[#allocation3 + $0x40] ss:$68 sps:$4 sm:$0xff]   ;;  %v15104_v45 = vld [vmem:[#allocation3 + $0xd88] ss:$68 sps:$4 sm:$0xff]  }
 0x440   :  { %8754 = vmatpush1.bf16.msra.mxu0 %v15081_v23  ;;  %9046 = vmatpush1.bf16.msra.mxu1 %v15084_v47  ;;  %v15102_v33 = vld [vmem:[#allocation3 + $0x8c0] ss:$68 sps:$4 sm:$0xff]   ;;  %v15105_v23 = vld [vmem:[#allocation3 + $0xc8] ss:$68 sps:$4 sm:$0xff]  }
 0x441   :  { %8755 = vmatprep.subr.bf16.mxu0 %v15089_v20  ;;  %9047 = vmatprep.subr.bf16.mxu1 %v15092_v26  ;;  %v15106_v47 = vld [vmem:[#allocation3 + $0x948] ss:$68 sps:$4 sm:$0xff]   ;;  %v15108_v20 = vld [vmem:[#allocation3 + $0xe10] ss:$68 sps:$4 sm:$0xff]  }
 0x442   :  { %v15109_v26 = vld [vmem:[#allocation3 + $0x150] ss:$68 sps:$4 sm:$0xff]  }
 0x444   :  { %8756 = vmatpush1.bf16.msra.mxu0 %v15087_v55  ;;  %9048 = vmatpush1.bf16.msra.mxu1 %v15090_v24  ;;  %v15110_v55 = vld [vmem:[#allocation3 + $0x9d0] ss:$68 sps:$4 sm:$0xff]   ;;  %v15111_v24 = vld [vmem:[#allocation3 + $0x618] ss:$68 sps:$4 sm:$0xff]  }
 0x445   :  { %8757 = vmatprep.subr.bf16.mxu0 %v15095_v60  ;;  %9049 = vmatprep.subr.bf16.mxu1 %v15098_v31  ;;  %v15107_v60 = vld [vmem:[#allocation3 + $0x590] ss:$68 sps:$4 sm:$0xff]   ;;  %v15112_v31 = vld [vmem:[#allocation3 + $0xe98] ss:$68 sps:$4 sm:$0xff]  }
 0x448   :  { %8758 = vmatpush1.bf16.msra.mxu0 %v15093_v35  ;;  %9050 = vmatpush1.bf16.msra.mxu1 %v15096_v1  ;;  %v15113_v35 = vld [vmem:[#allocation3 + $0x1d8] ss:$68 sps:$4 sm:$0xff]  }
 0x449   :  { %13018 = vmatprep.subr.bf16.mxu0 %v15099_v16  ;;  %13058 = vmatprep.subr.bf16.mxu1 %v15100_v0  ;;  %v15114_v1 = vld [vmem:[#allocation3 + $0xa58] ss:$68 sps:$4 sm:$0xff]   ;;  %v15115_v16 = vld [vmem:[#allocation3 + $0x6a0] ss:$68 sps:$4 sm:$0xff]  }
 0x44a   :  { %v15116_v0 = vld [vmem:[#allocation3 + $0xf20] ss:$68 sps:$4 sm:$0xff]  }
 0x44b   :  { %8760 = vmatmul.mubr.bf16.vlgmr.msra.gmra.mrb[60].mxu0 %v15555_v59  ;;  %9052 = vmatmul.mubr.bf16.vlgmr.msra.gmra.mrb[108].mxu1 %v15555_v59 }
 0x44c   :  { %13019 = vmatpush3.bf16.msra.mxu0 %v15101_v13  ;;  %13059 = vmatpush3.bf16.msra.mxu1 %v15102_v33  ;;  %v15117_v13 = vld [vmem:[#allocation3 + $0x260] ss:$68 sps:$4 sm:$0xff]  }
 0x44d   :  { %13020 = vmatprep.subr.bf16.mxu0 %v15103_v42  ;;  %13060 = vmatprep.subr.bf16.mxu1 %v15104_v45  ;;  %v15118_v33 = vld [vmem:[#allocation3 + $0xae0] ss:$68 sps:$4 sm:$0xff]   ;;  %v15119_v42 = vld [vmem:[#allocation3 + $0x728] ss:$68 sps:$4 sm:$0xff]  }
 0x44e   :  { %8769 = vmatprep.mubr.bf16.mxu0 %v15563_v2  ;;  %9061 = vmatprep.mubr.bf16.mxu1 %v15563_v2  ;;  %v15120_v45 = vld [vmem:[#allocation3 + $0xfa8] ss:$68 sps:$4 sm:$0xff]  }
 0x450   :  { %13021 = vmatpush3.bf16.msra.mxu0 %v15105_v23  ;;  %13061 = vmatpush3.bf16.msra.mxu1 %v15106_v47  ;;  %v15121_v23 = vld [vmem:[#allocation3 + $0x2e8] ss:$68 sps:$4 sm:$0xff]  }
 0x451   :  { %13022 = vmatprep.subr.bf16.mxu0 %v15107_v60  ;;  %13062 = vmatprep.subr.bf16.mxu1 %v15108_v20  ;;  %v15122_v47 = vld [vmem:[#allocation3 + $0xb68] ss:$68 sps:$4 sm:$0xff]   ;;  %v15123_v60 = vld [vmem:[#allocation3 + $0x7b0] ss:$68 sps:$4 sm:$0xff]  }
 0x452   :  { %v15124_v20 = vld [vmem:[#allocation3 + $0x1030] ss:$68 sps:$4 sm:$0xff]  }
 0x453   :  { %8770 = vmatmul.mubr.bf16.gmra.mrb[64].mxu0 %v15569_v10  ;;  %9062 = vmatmul.mubr.bf16.gmra.mrb[112].mxu1 %v15569_v10 }
 0x454   :  { %13023 = vmatpush3.bf16.msra.mxu0 %v15109_v26  ;;  %13063 = vmatpush3.bf16.msra.mxu1 %v15110_v55  ;;  %v15125_v26 = vld [vmem:[#allocation3 + $0x370] ss:$68 sps:$4 sm:$0xff]  }
 0x455   :  { %13024 = vmatprep.subr.bf16.mxu0 %v15111_v24  ;;  %13064 = vmatprep.subr.bf16.mxu1 %v15112_v31  ;;  %v15126_v55 = vld [vmem:[#allocation3 + $0xbf0] ss:$68 sps:$4 sm:$0xff]   ;;  %v15127_v24 = vld [vmem:[#allocation3 + $0x838] ss:$68 sps:$4 sm:$0xff]  }
 0x456   :  { %8779 = vmatprep.mubr.bf16.mxu0 %v15577_v17  ;;  %9071 = vmatprep.mubr.bf16.mxu1 %v15577_v17  ;;  %v15128_v31 = vld [vmem:[#allocation3 + $0x10b8] ss:$68 sps:$4 sm:$0xff]  }
 0x458   :  { %13025 = vmatpush3.bf16.msra.mxu0 %v15113_v35  ;;  %13065 = vmatpush3.bf16.msra.mxu1 %v15114_v1  ;;  %v15129_v35 = vld [vmem:[#allocation3 + $0x3f8] ss:$68 sps:$4 sm:$0xff]  }
 0x459   :  { %13026 = vmatprep.subr.bf16.mxu0 %v15115_v16  ;;  %13066 = vmatprep.subr.bf16.mxu1 %v15116_v0  ;;  %v15130_v1 = vld [vmem:[#allocation3 + $0xc78] ss:$68 sps:$4 sm:$0xff]   ;;  %v15131_v16 = vld [vmem:[#allocation3 + $0x1580] ss:$68 sps:$4 sm:$0xff]  }
 0x45a   :  { %v15132_v0 = vld [vmem:[#allocation3 + $0x1e00] ss:$68 sps:$4 sm:$0xff]  }
 0x45b   :  { %8780 = vmatmul.mubr.bf16.gmra.mrb[68].mxu0 %v15583_v30  ;;  %9072 = vmatmul.mubr.bf16.gmra.mrb[116].mxu1 %v15583_v30 }
 0x45c   :  { %13027 = vmatpush3.bf16.msra.mxu0 %v15117_v13  ;;  %13067 = vmatpush3.bf16.msra.mxu1 %v15118_v33  ;;  %v15133_v13 = vld [vmem:[#allocation3 + $0x1140] ss:$68 sps:$4 sm:$0xff]  }
 0x45d   :  { %13028 = vmatprep.subr.bf16.mxu0 %v15119_v42  ;;  %13068 = vmatprep.subr.bf16.mxu1 %v15120_v45  ;;  %v15134_v33 = vld [vmem:[#allocation3 + $0x19c0] ss:$68 sps:$4 sm:$0xff]   ;;  %v15135_v42 = vld [vmem:[#allocation3 + $0x1608] ss:$68 sps:$4 sm:$0xff]  }
 0x45e   :  { %8789 = vmatprep.mubr.bf16.mxu0 %v15591_v37  ;;  %9081 = vmatprep.mubr.bf16.mxu1 %v15591_v37  ;;  %v15136_v45 = vld [vmem:[#allocation3 + $0x1e88] ss:$68 sps:$4 sm:$0xff]  }
 0x460   :  { %13029 = vmatpush3.bf16.msra.mxu0 %v15121_v23  ;;  %13069 = vmatpush3.bf16.msra.mxu1 %v15122_v47  ;;  %v15137_v23 = vld [vmem:[#allocation3 + $0x11c8] ss:$68 sps:$4 sm:$0xff]  }
 0x461   :  { %13030 = vmatprep.subr.bf16.mxu0 %v15123_v60  ;;  %13070 = vmatprep.subr.bf16.mxu1 %v15124_v20  ;;  %v15138_v47 = vld [vmem:[#allocation3 + $0x1a48] ss:$68 sps:$4 sm:$0xff]   ;;  %v15141_v60 = vld [vmem:[#allocation3 + $0x1250] ss:$68 sps:$4 sm:$0xff]  }
 0x462   :  { %v15142_v20 = vld [vmem:[#allocation3 + $0x1ad0] ss:$68 sps:$4 sm:$0xff]  }
 0x463   :  { %8790 = vmatmul.mubr.bf16.gmra.mrb[72].mxu0 %v15597_v46  ;;  %9082 = vmatmul.mubr.bf16.gmra.mrb[120].mxu1 %v15597_v46 }
 0x464   :  { %13031 = vmatpush3.bf16.msra.mxu0 %v15125_v26  ;;  %13071 = vmatpush3.bf16.msra.mxu1 %v15126_v55  ;;  %v15145_v26 = vld [vmem:[#allocation3 + $0x12d8] ss:$68 sps:$4 sm:$0xff]  }
 0x465   :  { %13032 = vmatprep.subr.bf16.mxu0 %v15127_v24  ;;  %13072 = vmatprep.subr.bf16.mxu1 %v15128_v31  ;;  %v15146_v55 = vld [vmem:[#allocation3 + $0x1b58] ss:$68 sps:$4 sm:$0xff]   ;;  %v15149_v24 = vld [vmem:[#allocation3 + $0x1360] ss:$68 sps:$4 sm:$0xff]  }
 0x466   :  { %9124 = vmatprep.mubr.bf16.mxu0 %v15359_v50  ;;  %9189 = vmatprep.mubr.bf16.mxu1 %v15419_v48  ;;  %v15139_v50 = vld [vmem:[#allocation3 + $0x1690] ss:$68 sps:$4 sm:$0xff]   ;;  %v15150_v31 = vld [vmem:[#allocation3 + $0x1be0] ss:$68 sps:$4 sm:$0xff]  }
 0x467   :  { %v15140_v48 = vld [vmem:[#allocation3 + $0x1f10] ss:$68 sps:$4 sm:$0xff]  }
 0x468   :  { %13033 = vmatpush3.bf16.msra.mxu0 %v15129_v35  ;;  %13073 = vmatpush3.bf16.msra.mxu1 %v15130_v1  ;;  %v15153_v35 = vld [vmem:[#allocation3 + $0x13e8] ss:$68 sps:$4 sm:$0xff]  }
 0x469   :  { %13098 = vmatprep.subr.bf16.mxu0 %v15131_v16  ;;  %13138 = vmatprep.subr.bf16.mxu1 %v15132_v0  ;;  %v15154_v1 = vld [vmem:[#allocation3 + $0x1c68] ss:$68 sps:$4 sm:$0xff]   ;;  %v15157_v16 = vld [vmem:[#allocation3 + $0x1470] ss:$68 sps:$4 sm:$0xff]  }
 0x46a   :  { %v15158_v0 = vld [vmem:[#allocation3 + $0x1cf0] ss:$68 sps:$4 sm:$0xff]  }
 0x46b   :  { %9125 = vmatmul.mubr.bf16.vlgmr.msra.gmra.mrb[76].mxu0 %v15363_v5  ;;  %9190 = vmatmul.mubr.bf16.vlgmr.msra.gmra.mrb[124].mxu1 %v15427_v27  ;;  %v15143_v5 = vld [vmem:[#allocation3 + $0x1718] ss:$68 sps:$4 sm:$0xff]  }
 0x46c   :  { %13099 = vmatpush3.bf16.msra.mxu0 %v15133_v13  ;;  %13139 = vmatpush3.bf16.msra.mxu1 %v15134_v33  ;;  %v15144_v27 = vld [vmem:[#allocation3 + $0x1f98] ss:$68 sps:$4 sm:$0xff]   ;;  %v9441_v13 = vld [vmem:[#allocation7] sm:$0xff] }
 0x46d   :  { %13100 = vmatprep.subr.bf16.mxu0 %v15135_v42  ;;  %13140 = vmatprep.subr.bf16.mxu1 %v15136_v45  ;;  %v9445_v33 = vld [vmem:[#allocation7 + $0x20] sm:$0xff]  ;;  %v9442_v42 = vld [vmem:[#allocation7 + $0x8] sm:$0xff] }
 0x46e   :  { %9132 = vmatprep.mubr.bf16.mxu0 %v15373_v18  ;;  %9197 = vmatprep.mubr.bf16.mxu1 %v15435_v34  ;;  %v15147_v18 = vld [vmem:[#allocation3 + $0x17a0] ss:$68 sps:$4 sm:$0xff]   ;;  %v9446_v45 = vld [vmem:[#allocation7 + $0x28] sm:$0xff] }
 0x46f   :  { %v15148_v34 = vld [vmem:[#allocation3 + $0x2020] ss:$68 sps:$4 sm:$0xff]  }
 0x470   :  { %13101 = vmatpush3.bf16.msra.mxu0 %v15137_v23  ;;  %13141 = vmatpush3.bf16.msra.mxu1 %v15138_v47  ;;  %v12763_v23 = vcombine.high %v9441_v13, %v9445_v33  ;;  %v12765_v47 = vcombine.high %v9442_v42, %v9446_v45 }
 0x471   :  { %13102 = vmatprep.subr.bf16.mxu0 %v15139_v50  ;;  %13142 = vmatprep.subr.bf16.mxu1 %v15140_v48  ;;  %v9449_v50 = vld [vmem:[#allocation7 + $0x40] sm:$0xff] }
 0x472   :  { %v9453_v48 = vld [vmem:[#allocation7 + $0x60] sm:$0xff] }
 0x473   :  { %9133 = vmatmul.mubr.bf16.gmra.mrb[80].mxu0 %v15375_v19  ;;  %9198 = vmatmul.mubr.bf16.gmra.mrb[128].mxu1 %v15444_v41  ;;  %v15151_v19 = vld [vmem:[#allocation3 + $0x1828] ss:$68 sps:$4 sm:$0xff]  }
 0x474   :  { %13103 = vmatpush3.bf16.msra.mxu0 %v15141_v60  ;;  %13143 = vmatpush3.bf16.msra.mxu1 %v15142_v20  ;;  %v15152_v41 = vld [vmem:[#allocation3 + $0x20a8] ss:$68 sps:$4 sm:$0xff]  }
 0x475   :  { %13104 = vmatprep.subr.bf16.mxu0 %v15143_v5  ;;  %13144 = vmatprep.subr.bf16.mxu1 %v15144_v27  ;;  %v9450_v60 = vld [vmem:[#allocation7 + $0x48] sm:$0xff]  ;;  %v12771_v5 = vcombine.high %v9449_v50, %v9453_v48 }
 0x476   :  { %9140 = vmatprep.mubr.bf16.mxu0 %v15387_v28  ;;  %9205 = vmatprep.mubr.bf16.mxu1 %v15449_v49  ;;  %v15155_v28 = vld [vmem:[#allocation3 + $0x18b0] ss:$68 sps:$4 sm:$0xff]  }
 0x477   :  { %v15156_v49 = vld [vmem:[#allocation3 + $0x2130] ss:$68 sps:$4 sm:$0xff]  }
 0x478   :  { %13105 = vmatpush3.bf16.msra.mxu0 %v15145_v26  ;;  %13145 = vmatpush3.bf16.msra.mxu1 %v15146_v55  ;;  %v9454_v20 = vld [vmem:[#allocation7 + $0x68] sm:$0xff]  ;;  %v9457_v26 = vld [vmem:[#allocation7 + $0x80] sm:$0xff] }
 0x479   :  { %13106 = vmatprep.subr.bf16.mxu0 %v15147_v18  ;;  %13146 = vmatprep.subr.bf16.mxu1 %v15148_v34  ;;  %v12773_v27 = vcombine.high %v9450_v60, %v9454_v20  ;;  %v9461_v55 = vld [vmem:[#allocation7 + $0xa0] sm:$0xff]  ;;  %v9458_v18 = vld [vmem:[#allocation7 + $0x88] sm:$0xff] }
 0x47a   :  { %v9462_v34 = vld [vmem:[#allocation7 + $0xa8] sm:$0xff] }
 0x47b   :  { %9141 = vmatmul.mubr.bf16.gmra.mrb[84].mxu0 %v15390_v29  ;;  %9206 = vmatmul.mubr.bf16.gmra.mrb[132].mxu1 %v15455_v56  ;;  %v15159_v29 = vld [vmem:[#allocation3 + $0x1938] ss:$68 sps:$4 sm:$0xff]  }
 0x47c   :  { %13107 = vmatpush3.bf16.msra.mxu0 %v15149_v24  ;;  %13147 = vmatpush3.bf16.msra.mxu1 %v15150_v31  ;;  %v15160_v56 = vld [vmem:[#allocation3 + $0x21b8] ss:$68 sps:$4 sm:$0xff]   ;;  %v12779_v24 = vcombine.high %v9457_v26, %v9461_v55  ;;  %v12781_v31 = vcombine.high %v9458_v18, %v9462_v34 }
 0x47d   :  { %13108 = vmatprep.subr.bf16.mxu0 %v15151_v19  ;;  %13148 = vmatprep.subr.bf16.mxu1 %v15152_v41  ;;  %v9465_v19 = vld [vmem:[#allocation7 + $0xc0] sm:$0xff] }
 0x47e   :  { %9148 = vmatprep.mubr.bf16.mxu0 %v15401_v38  ;;  %9213 = vmatprep.mubr.bf16.mxu1 %v15463_v62  ;;  %v15161_v38 = vld [vmem:[#allocation3 + $0x14f8] ss:$68 sps:$4 sm:$0xff]   ;;  %v9469_v41 = vld [vmem:[#allocation7 + $0xe0] sm:$0xff] }
 0x47f   :  { %v15162_v62 = vld [vmem:[#allocation3 + $0x1d78] ss:$68 sps:$4 sm:$0xff]  }
 0x480   :  { %13109 = vmatpush3.bf16.msra.mxu0 %v15153_v35  ;;  %13149 = vmatpush3.bf16.msra.mxu1 %v15154_v1  ;;  %v9466_v35 = vld [vmem:[#allocation7 + $0xc8] sm:$0xff] }
 0x481   :  { %13110 = vmatprep.subr.bf16.mxu0 %v15155_v28  ;;  %13150 = vmatprep.subr.bf16.mxu1 %v15156_v49  ;;  %v9470_v1 = vld [vmem:[#allocation7 + $0xe8] sm:$0xff]  ;;  %v12787_v28 = vcombine.high %v9465_v19, %v9469_v41 }
 0x482   :  { %v12789_v49 = vcombine.high %v9466_v35, %v9470_v1 }
 0x483   :  { %9149 = vmatmul.mubr.bf16.gmra.mrb[88].mxu0 %v15405_v43  ;;  %9214 = vmatmul.mubr.bf16.gmra.mrb[136].mxu1 %v15469_v4  ;;  %v12762_v43 = vcombine.low %v9441_v13, %v9445_v33  ;;  %v12764_v4 = vcombine.low %v9442_v42, %v9446_v45  ;;  %v9481_v42 = vld [vmem:[#allocation7 + $0x140] sm:$0xff] }
 0x484   :  { %13111 = vmatpush3.bf16.msra.mxu0 %v15157_v16  ;;  %13151 = vmatpush3.bf16.msra.mxu1 %v15158_v0  ;;  %v9473_v16 = vld [vmem:[#allocation7 + $0x100] sm:$0xff] }
 0x485   :  { %13112 = vmatprep.subr.bf16.mxu0 %v15159_v29  ;;  %13152 = vmatprep.subr.bf16.mxu1 %v15160_v56  ;;  %v9477_v0 = vld [vmem:[#allocation7 + $0x120] sm:$0xff]  ;;  %v9474_v29 = vld [vmem:[#allocation7 + $0x108] sm:$0xff] }
 0x486   :  { %9254 = vmatprep.mubr.bf16.mxu0 %v15483_v11  ;;  %9319 = vmatprep.mubr.bf16.mxu1 %v15547_v57  ;;  %v12770_v11 = vcombine.low %v9449_v50, %v9453_v48  ;;  %v12772_v57 = vcombine.low %v9450_v60, %v9454_v20  ;;  %v9478_v56 = vld [vmem:[#allocation7 + $0x128] sm:$0xff]  ;;  %v12795_v13 = vcombine.high %v9473_v16, %v9477_v0  ;;  %v9485_v45 = vld [vmem:[#allocation7 + $0x160] sm:$0xff] }
 0x487   :  { %v12797_v33 = vcombine.high %v9474_v29, %v9478_v56  ;;  %v9489_v50 = vld [vmem:[#allocation7 + $0x180] sm:$0xff]  ;;  %v9490_v60 = vld [vmem:[#allocation7 + $0x188] sm:$0xff] }
 0x488   :  { %13113 = vmatpush3.bf16.msra.mxu0 %v15161_v38  ;;  %13153 = vmatpush3.bf16.msra.mxu1 %v15162_v62  ;;  %v9482_v38 = vld [vmem:[#allocation7 + $0x148] sm:$0xff]  ;;  %v9493_v48 = vld [vmem:[#allocation7 + $0x1a0] sm:$0xff] }
 0x489   :  { %10593 = vmatprep.subr.bf16.mxu0 %v12763_v23  ;;  %10739 = vmatprep.subr.bf16.mxu1 %v12765_v47  ;;  %v9486_v62 = vld [vmem:[#allocation7 + $0x168] sm:$0xff]  ;;  %v12803_v23 = vcombine.high %v9481_v42, %v9485_v45 }
 0x48a   :  { %v12805_v47 = vcombine.high %v9482_v38, %v9486_v62  ;;  %v9494_v20 = vld [vmem:[#allocation7 + $0x1a8] sm:$0xff] }
 0x48b   :  { %9255 = vmatmul.mubr.bf16.vlgmr.msra.gmra.mrb[92].mxu0 %v15494_v63  ;;  %9320 = vmatmul.mubr.bf16.vlgmr.msra.gmra.mrb[140].mxu1 %v15555_v59  ;;  %v12778_v63 = vcombine.low %v9457_v26, %v9461_v55  ;;  %v12780_v59 = vcombine.low %v9458_v18, %v9462_v34  ;;  %v9498_v26 = vld [vmem:[#allocation7 + $0x1c8] sm:$0xff] }
 0x48c   :  { %10594 = vmatpush1.bf16.msra.mxu0 %v12762_v43  ;;  %10740 = vmatpush1.bf16.msra.mxu1 %v12764_v4  ;;  %v12811_v43 = vcombine.high %v9489_v50, %v9493_v48  ;;  %v12813_v4 = vcombine.high %v9490_v60, %v9494_v20  ;;  %v9502_v55 = vld [vmem:[#allocation7 + $0x1e8] sm:$0xff] }
 0x48d   :  { %10595 = vmatprep.subr.bf16.mxu0 %v12771_v5  ;;  %10741 = vmatprep.subr.bf16.mxu1 %v12773_v27  ;;  %v9497_v5 = vld [vmem:[#allocation7 + $0x1c0] sm:$0xff]  ;;  %v12821_v34 = vcombine.high %v9498_v26, %v9502_v55 }
 0x48e   :  { %9262 = vmatprep.mubr.bf16.mxu0 %v15499_v9  ;;  %9327 = vmatprep.mubr.bf16.mxu1 %v15563_v2  ;;  %v12786_v9 = vcombine.low %v9465_v19, %v9469_v41  ;;  %v12788_v2 = vcombine.low %v9466_v35, %v9470_v1  ;;  %v9501_v27 = vld [vmem:[#allocation7 + $0x1e0] sm:$0xff] }
 0x48f   :  { %v12819_v18 = vcombine.high %v9497_v5, %v9501_v27  ;;  %v9513_v35 = vld [vmem:[#allocation7 + $0x240] sm:$0xff] }
 0x490   :  { %10596 = vmatpush1.bf16.msra.mxu0 %v12770_v11  ;;  %10742 = vmatpush1.bf16.msra.mxu1 %v12772_v57  ;;  %v9505_v11 = vld [vmem:[#allocation7 + $0x200] sm:$0xff] }
 0x491   :  { %10597 = vmatprep.subr.bf16.mxu0 %v12779_v24  ;;  %10743 = vmatprep.subr.bf16.mxu1 %v12781_v31  ;;  %v9509_v57 = vld [vmem:[#allocation7 + $0x220] sm:$0xff]  ;;  %v12818_v24 = vcombine.low %v9497_v5, %v9501_v27  ;;  %v12820_v31 = vcombine.low %v9498_v26, %v9502_v55  ;;  %v9546_v26 = vld [vmem:[#allocation7 + $0x348] sm:$0xff] }
 0x492   :  { %v12827_v19 = vcombine.high %v9505_v11, %v9509_v57  ;;  %v9517_v1 = vld [vmem:[#allocation7 + $0x260] sm:$0xff]  ;;  %v9550_v55 = vld [vmem:[#allocation7 + $0x368] sm:$0xff] }
 0x493   :  { %9263 = vmatmul.mubr.bf16.gmra.mrb[96].mxu0 %v15505_v15  ;;  %9328 = vmatmul.mubr.bf16.gmra.mrb[144].mxu1 %v15569_v10  ;;  %v12794_v15 = vcombine.low %v9473_v16, %v9477_v0  ;;  %v12796_v10 = vcombine.low %v9474_v29, %v9478_v56  ;;  %v9521_v16 = vld [vmem:[#allocation7 + $0x280] sm:$0xff]  ;;  %v9522_v29 = vld [vmem:[#allocation7 + $0x288] sm:$0xff] }
 0x494   :  { %10598 = vmatpush1.bf16.msra.mxu0 %v12778_v63  ;;  %10744 = vmatpush1.bf16.msra.mxu1 %v12780_v59  ;;  %v9514_v63 = vld [vmem:[#allocation7 + $0x248] sm:$0xff]  ;;  %v9525_v0 = vld [vmem:[#allocation7 + $0x2a0] sm:$0xff] }
 0x495   :  { %10599 = vmatprep.subr.bf16.mxu0 %v12787_v28  ;;  %10745 = vmatprep.subr.bf16.mxu1 %v12789_v49  ;;  %v12835_v28 = vcombine.high %v9513_v35, %v9517_v1  ;;  %v9526_v56 = vld [vmem:[#allocation7 + $0x2a8] sm:$0xff]  ;;  %v9545_v5 = vld [vmem:[#allocation7 + $0x340] sm:$0xff] }
 0x496   :  { %9270 = vmatprep.mubr.bf16.mxu0 %v15513_v22  ;;  %9335 = vmatprep.mubr.bf16.mxu1 %v15577_v17  ;;  %v12802_v22 = vcombine.low %v9481_v42, %v9485_v45  ;;  %v12804_v17 = vcombine.low %v9482_v38, %v9486_v62  ;;  %v9529_v42 = vld [vmem:[#allocation7 + $0x2c0] sm:$0xff]  ;;  %v9530_v38 = vld [vmem:[#allocation7 + $0x2c8] sm:$0xff] }
 0x497   :  { %v9533_v45 = vld [vmem:[#allocation7 + $0x2e0] sm:$0xff]  ;;  %v9534_v62 = vld [vmem:[#allocation7 + $0x2e8] sm:$0xff] }
 0x498   :  { %10600 = vmatpush1.bf16.msra.mxu0 %v12786_v9  ;;  %10746 = vmatpush1.bf16.msra.mxu1 %v12788_v2  ;;  %v12834_v9 = vcombine.low %v9513_v35, %v9517_v1  ;;  %v9549_v27 = vld [vmem:[#allocation7 + $0x360] sm:$0xff] }
 0x499   :  { %10601 = vmatprep.subr.bf16.mxu0 %v12795_v13  ;;  %10747 = vmatprep.subr.bf16.mxu1 %v12797_v33  ;;  %v12843_v13 = vcombine.high %v9521_v16, %v9525_v0  ;;  %v12845_v33 = vcombine.high %v9522_v29, %v9526_v56  ;;  %v9561_v35 = vld [vmem:[#allocation7 + $0x3c0] sm:$0xff] }
 0x49a   :  { %v9565_v1 = vld [vmem:[#allocation7 + $0x3e0] sm:$0xff] }
 0x49b   :  { %9271 = vmatmul.mubr.bf16.gmra.mrb[100].mxu0 %v15519_v32  ;;  %9336 = vmatmul.mubr.bf16.gmra.mrb[148].mxu1 %v15583_v30  ;;  %v12810_v32 = vcombine.low %v9489_v50, %v9493_v48  ;;  %v12812_v30 = vcombine.low %v9490_v60, %v9494_v20  ;;  %v9537_v50 = vld [vmem:[#allocation7 + $0x300] sm:$0xff]  ;;  %v9538_v60 = vld [vmem:[#allocation7 + $0x308] sm:$0xff] }
 0x49c   :  { %10602 = vmatpush1.bf16.msra.mxu0 %v12794_v15  ;;  %10748 = vmatpush1.bf16.msra.mxu1 %v12796_v10  ;;  %v12842_v15 = vcombine.low %v9521_v16, %v9525_v0  ;;  %v12844_v10 = vcombine.low %v9522_v29, %v9526_v56  ;;  %v9541_v48 = vld [vmem:[#allocation7 + $0x320] sm:$0xff]  ;;  %v9542_v20 = vld [vmem:[#allocation7 + $0x328] sm:$0xff] }
 0x49d   :  { %10603 = vmatprep.subr.bf16.mxu0 %v12803_v23  ;;  %10749 = vmatprep.subr.bf16.mxu1 %v12805_v47  ;;  %v12851_v23 = vcombine.high %v9529_v42, %v9533_v45  ;;  %v12853_v47 = vcombine.high %v9530_v38, %v9534_v62  ;;  %v9569_v16 = vld [vmem:[#allocation7 + $0x400] sm:$0xff]  ;;  %v9570_v29 = vld [vmem:[#allocation7 + $0x408] sm:$0xff] }
 0x49e   :  { %9278 = vmatprep.mubr.bf16.mxu0 %v15527_v39  ;;  %9343 = vmatprep.mubr.bf16.mxu1 %v15591_v37  ;;  %v9506_v39 = vld [vmem:[#allocation7 + $0x208] sm:$0xff]  ;;  %v9573_v0 = vld [vmem:[#allocation7 + $0x420] sm:$0xff] }
 0x49f   :  { %v9510_v37 = vld [vmem:[#allocation7 + $0x228] sm:$0xff] }
 0x4a0   :  { %10604 = vmatpush1.bf16.msra.mxu0 %v12802_v22  ;;  %10750 = vmatpush1.bf16.msra.mxu1 %v12804_v17  ;;  %v12829_v41 = vcombine.high %v9506_v39, %v9510_v37  ;;  %v12828_v59 = vcombine.low %v9506_v39, %v9510_v37  ;;  %v12850_v22 = vcombine.low %v9529_v42, %v9533_v45  ;;  %v9554_v39 = vld [vmem:[#allocation7 + $0x388] sm:$0xff]  ;;  %v9577_v42 = vld [vmem:[#allocation7 + $0x440] sm:$0xff] }
 0x4a1   :  { %10605 = vmatprep.subr.bf16.mxu0 %v12811_v43  ;;  %10751 = vmatprep.subr.bf16.mxu1 %v12813_v4  ;;  %v12852_v17 = vcombine.low %v9530_v38, %v9534_v62  ;;  %v12859_v43 = vcombine.high %v9537_v50, %v9541_v48  ;;  %v12861_v4 = vcombine.high %v9538_v60, %v9542_v20  ;;  %v9558_v37 = vld [vmem:[#allocation7 + $0x3a8] sm:$0xff]  ;;  %v9581_v45 = vld [vmem:[#allocation7 + $0x460] sm:$0xff] }
 0x4a2   :  { %v9574_v56 = vld [vmem:[#allocation7 + $0x428] sm:$0xff] }
 0x4a3   :  { %9279 = vmatmul.mubr.bf16.gmra.mrb[104].mxu0 %v15533_v51  ;;  %9344 = vmatmul.mubr.bf16.gmra.mrb[152].mxu1 %v15597_v46  ;;  %v9518_v51 = vld [vmem:[#allocation7 + $0x268] sm:$0xff]  ;;  %v12826_v46 = vcombine.low %v9505_v11, %v9509_v57  ;;  %v9553_v11 = vld [vmem:[#allocation7 + $0x380] sm:$0xff] }
 0x4a4   :  { %10606 = vmatpush1.bf16.msra.mxu0 %v12810_v32  ;;  %10625 = vmatprep.mubr.bf16.mxu0 %v15821_v61  ;;  %v12837_v49 = vcombine.high %v9514_v63, %v9518_v51  ;;  %v12836_v2 = vcombine.low %v9514_v63, %v9518_v51  ;;  %v12858_v32 = vcombine.low %v9537_v50, %v9541_v48  ;;  %v9557_v57 = vld [vmem:[#allocation7 + $0x3a0] sm:$0xff]  ;;  %v9562_v63 = vld [vmem:[#allocation7 + $0x3c8] sm:$0xff] }
 0x4a5   :  { %10752 = vmatpush1.bf16.msra.mxu1 %v12812_v30  ;;  %10771 = vmatprep.mubr.bf16.mxu1 %v15821_v61  ;;  %v12860_v30 = vcombine.low %v9538_v60, %v9542_v20  ;;  %v9566_v51 = vld [vmem:[#allocation7 + $0x3e8] sm:$0xff]  ;;  %v9585_v48 = vld [vmem:[#allocation7 + $0x480] sm:$0xff] }
 0x4a6   :  { %10607 = vmatprep.subr.bf16.mxu0 %v12819_v18  ;;  %10753 = vmatprep.subr.bf16.mxu1 %v12821_v34  ;;  %v12867_v18 = vcombine.high %v9545_v5, %v9549_v27  ;;  %v12869_v34 = vcombine.high %v9546_v26, %v9550_v55  ;;  %v9578_v38 = vld [vmem:[#allocation7 + $0x448] sm:$0xff]  ;;  %v9589_v60 = vld [vmem:[#allocation7 + $0x4a0] sm:$0xff] }
 0x4a7   :  { %v9582_v62 = vld [vmem:[#allocation7 + $0x468] sm:$0xff] }
 0x4a8   :  { %10608 = vmatpush1.bf16.msra.mxu0 %v12818_v24  ;;  %v12866_v24 = vcombine.low %v9545_v5, %v9549_v27  ;;  %v12901_v50 = vcombine.high %v9578_v38, %v9582_v62  ;;  %v9586_v20 = vld [vmem:[#allocation7 + $0x488] sm:$0xff]  ;;  %v9593_v27 = vld [vmem:[#allocation7 + $0x4c0] sm:$0xff] }
 0x4a9   :  { %10754 = vmatpush1.bf16.msra.mxu1 %v12820_v31  ;;  %10609 = vmatprep.subr.bf16.mxu0 %v12827_v19  ;;  %v12868_v31 = vcombine.low %v9546_v26, %v9550_v55  ;;  %v12875_v19 = vcombine.high %v9553_v11, %v9557_v57  ;;  %v9597_v26 = vld [vmem:[#allocation7 + $0x4e0] sm:$0xff]  ;;  %v9594_v55 = vld [vmem:[#allocation7 + $0x4c8] sm:$0xff] }
 0x4aa   :  { %10755 = vmatprep.subr.bf16.mxu1 %v12829_v41  ;;  %v12877_v41 = vcombine.high %v9554_v39, %v9558_v37 }
 0x4ac   :  { %10610 = vmatpush1.bf16.msra.mxu0 %v12826_v46  ;;  %v12874_v46 = vcombine.low %v9553_v11, %v9557_v57  ;;  %v16496_v11 = vld [vmem:[#allocation15_spill] sm:$0xff] }
 0x4ad   :  { %10756 = vmatpush1.bf16.msra.mxu1 %v12828_v59  ;;  %10611 = vmatprep.subr.bf16.mxu0 %v12835_v28  ;;  %v12876_v59 = vcombine.low %v9554_v39, %v9558_v37  ;;  %v12883_v28 = vcombine.high %v9561_v35, %v9565_v1  ;;  %v9601_v39 = vld [vmem:[#allocation7 + $0x500] sm:$0xff] }
 0x4ae   :  { %10757 = vmatprep.subr.bf16.mxu1 %v12837_v49  ;;  %v12885_v49 = vcombine.high %v9562_v63, %v9566_v51  ;;  %v9605_v37 = vld [vmem:[#allocation7 + $0x520] sm:$0xff] }
 0x4b0   :  { %10612 = vmatpush1.bf16.msra.mxu0 %v12834_v9  ;;  %v12882_v9 = vcombine.low %v9561_v35, %v9565_v1  ;;  %v12923_v35 = vcombine.high %v9601_v39, %v9605_v37 }
 0x4b1   :  { %10758 = vmatpush1.bf16.msra.mxu1 %v12836_v2  ;;  %10613 = vmatprep.subr.bf16.mxu0 %v12843_v13  ;;  %v12884_v2 = vcombine.low %v9562_v63, %v9566_v51  ;;  %v12891_v13 = vcombine.high %v9569_v16, %v9573_v0  ;;  %v9609_v63 = vld [vmem:[#allocation7 + $0x540] sm:$0xff] }
 0x4b2   :  { %10759 = vmatprep.subr.bf16.mxu1 %v12845_v33  ;;  %v12893_v33 = vcombine.high %v9570_v29, %v9574_v56  ;;  %v9613_v51 = vld [vmem:[#allocation7 + $0x560] sm:$0xff] }
 0x4b4   :  { %10614 = vmatpush1.bf16.msra.mxu0 %v12842_v15  ;;  %v12890_v15 = vcombine.low %v9569_v16, %v9573_v0  ;;  %v12931_v16 = vcombine.high %v9609_v63, %v9613_v51  ;;  %v16497_v0 = vld [vmem:[#allocation16_spill] sm:$0xff] }
 0x4b5   :  { %10760 = vmatpush1.bf16.msra.mxu1 %v12844_v10  ;;  %10615 = vmatprep.subr.bf16.mxu0 %v12851_v23  ;;  %v12892_v10 = vcombine.low %v9570_v29, %v9574_v56  ;;  %v12899_v23 = vcombine.high %v9577_v42, %v9581_v45  ;;  %v9617_v56 = vld [vmem:[#allocation7 + $0x580] sm:$0xff] }
 0x4b6   :  { %10761 = vmatprep.subr.bf16.mxu1 %v12853_v47  ;;  %v16495_v47 = vld [vmem:[#allocation14_spill] sm:$0xff] }
 0x4b8   :  { %10616 = vmatpush1.bf16.msra.mxu0 %v12850_v22  ;;  %v9590_v22 = vld [vmem:[#allocation7 + $0x4a8] sm:$0xff] }
 0x4b9   :  { %10762 = vmatpush1.bf16.msra.mxu1 %v12852_v17  ;;  %10617 = vmatprep.subr.bf16.mxu0 %v12859_v43  ;;  %v12898_v17 = vcombine.low %v9577_v42, %v9581_v45  ;;  %v12900_v43 = vcombine.low %v9578_v38, %v9582_v62  ;;  %v12909_v5 = vcombine.high %v9586_v20, %v9590_v22  ;;  %v9625_v62 = vld [vmem:[#allocation7 + $0x5c0] sm:$0xff] }
 0x4ba   :  { %10763 = vmatprep.subr.bf16.mxu1 %v12861_v4  ;;  %v12907_v4 = vcombine.high %v9585_v48, %v9589_v60 }
 0x4bc   :  { %10618 = vmatpush1.bf16.msra.mxu0 %v12858_v32  ;;  %v9598_v32 = vld [vmem:[#allocation7 + $0x4e8] sm:$0xff] }
 0x4bd   :  { %10764 = vmatpush1.bf16.msra.mxu1 %v12860_v30  ;;  %10619 = vmatprep.subr.bf16.mxu0 %v12867_v18  ;;  %v12906_v30 = vcombine.low %v9585_v48, %v9589_v60  ;;  %v12908_v18 = vcombine.low %v9586_v20, %v9590_v22  ;;  %v12917_v57 = vcombine.high %v9594_v55, %v9598_v32  ;;  %v16498_v20 = vld [vmem:[#allocation17_spill] sm:$0xff] }
 0x4be   :  { %10765 = vmatprep.subr.bf16.mxu1 %v12869_v34  ;;  %v12915_v34 = vcombine.high %v9593_v27, %v9597_v26 }
 0x4c0   :  { %10620 = vmatpush1.bf16.msra.mxu0 %v12866_v24  ;;  %v9602_v24 = vld [vmem:[#allocation7 + $0x508] sm:$0xff] }
 0x4c1   :  { %10766 = vmatpush1.bf16.msra.mxu1 %v12868_v31  ;;  %10621 = vmatprep.subr.bf16.mxu0 %v12875_v19  ;;  %v9606_v31 = vld [vmem:[#allocation7 + $0x528] sm:$0xff]  ;;  %v12914_v19 = vcombine.low %v9593_v27, %v9597_v26  ;;  %v9448_v27 = vld [vmem:[#allocation7 + $0x38] sm:$0xff] }
 0x4c2   :  { %10767 = vmatprep.subr.bf16.mxu1 %v12877_v41  ;;  %v12916_v41 = vcombine.low %v9594_v55, %v9598_v32  ;;  %v12925_v1 = vcombine.high %v9602_v24, %v9606_v31 }
 0x4c4   :  { %10622 = vmatpush1.bf16.msra.mxu0 %v12874_v46  ;;  %v9610_v46 = vld [vmem:[#allocation7 + $0x548] sm:$0xff] }
 0x4c5   :  { %10768 = vmatpush1.bf16.msra.mxu1 %v12876_v59  ;;  %10623 = vmatprep.subr.bf16.mxu0 %v12883_v28  ;;  %v9614_v59 = vld [vmem:[#allocation7 + $0x568] sm:$0xff]  ;;  %v12922_v28 = vcombine.low %v9601_v39, %v9605_v37  ;;  %v9456_v39 = vld [vmem:[#allocation7 + $0x78] sm:$0xff] }
 0x4c6   :  { %10769 = vmatprep.subr.bf16.mxu1 %v12885_v49  ;;  %v12924_v49 = vcombine.low %v9602_v24, %v9606_v31  ;;  %v12933_v29 = vcombine.high %v9610_v46, %v9614_v59  ;;  %v12932_v42 = vcombine.low %v9610_v46, %v9614_v59 }
 0x4c8   :  { %10624 = vmatpush1.bf16.msra.mxu0 %v12882_v9  ;;  %v9621_v9 = vld [vmem:[#allocation7 + $0x5a0] sm:$0xff] }
 0x4c9   :  { %10770 = vmatpush1.bf16.msra.mxu1 %v12884_v2  ;;  %10666 = vmatprep.subr.bf16.mxu0 %v12891_v13  ;;  %v9618_v2 = vld [vmem:[#allocation7 + $0x588] sm:$0xff]  ;;  %v12939_v45 = vcombine.high %v9617_v56, %v9621_v9 }
 0x4ca   :  { %10812 = vmatprep.subr.bf16.mxu1 %v12893_v33  ;;  %v9622_v13 = vld [vmem:[#allocation7 + $0x5a8] sm:$0xff]  ;;  %v12930_v33 = vcombine.low %v9609_v63, %v9613_v51  ;;  %v9464_v63 = vld [vmem:[#allocation7 + $0xb8] sm:$0xff] }
 0x4cb   :  { %10626 = vmatmul.mubr.bf16.vlgmr.msra.gmra.mrb[108].mxu0 %v16495_v47  ;;  %v12941_v38 = vcombine.high %v9618_v2, %v9622_v13  ;;  %v12940_v48 = vcombine.low %v9618_v2, %v9622_v13 }
 0x4cc   :  { %10772 = vmatmul.mubr.bf16.vlgmr.msra.gmra.mrb[156].mxu1 %v16495_v47  ;;  %10635 = vmatprep.mubr.bf16.mxu0 %v15832_v36 }
 0x4cd   :  { %10667 = vmatpush1.bf16.msra.mxu0 %v12890_v15  ;;  %10781 = vmatprep.mubr.bf16.mxu1 %v15832_v36  ;;  %v9629_v15 = vld [vmem:[#allocation7 + $0x5e0] sm:$0xff] }
 0x4ce   :  { %10813 = vmatpush1.bf16.msra.mxu1 %v12892_v10  ;;  %10668 = vmatprep.subr.bf16.mxu0 %v12899_v23  ;;  %v9626_v10 = vld [vmem:[#allocation7 + $0x5c8] sm:$0xff]  ;;  %v12947_v60 = vcombine.high %v9625_v62, %v9629_v15  ;;  %v12946_v26 = vcombine.low %v9625_v62, %v9629_v15  ;;  %v9480_v62 = vld [vmem:[#allocation7 + $0x138] sm:$0xff] }
 0x4cf   :  { %10814 = vmatprep.subr.bf16.mxu1 %v12901_v50  ;;  %v9630_v23 = vld [vmem:[#allocation7 + $0x5e8] sm:$0xff]  ;;  %v12938_v50 = vcombine.low %v9617_v56, %v9621_v9  ;;  %v9472_v56 = vld [vmem:[#allocation7 + $0xf8] sm:$0xff] }
 0x4d0   :  { %v12949_v22 = vcombine.high %v9626_v10, %v9630_v23  ;;  %v12948_v55 = vcombine.low %v9626_v10, %v9630_v23 }
 0x4d1   :  { %10669 = vmatpush1.bf16.msra.mxu0 %v12898_v17  ;;  %v9443_v17 = vld [vmem:[#allocation7 + $0x10] sm:$0xff] }
 0x4d2   :  { %10815 = vmatpush1.bf16.msra.mxu1 %v12900_v43  ;;  %10670 = vmatprep.subr.bf16.mxu0 %v12907_v4  ;;  %v9447_v43 = vld [vmem:[#allocation7 + $0x30] sm:$0xff]  ;;  %v16470_v4 = vmov 0  }
 0x4d3   :  { %10636 = vmatmul.mubr.bf16.gmra.mrb[112].mxu0 %v16496_v11  ;;  %10816 = vmatprep.subr.bf16.mxu1 %v12909_v5  ;;  %v9444_v5 = vld [vmem:[#allocation7 + $0x18] sm:$0xff]  ;;  %v12767_v32 = vcombine.high %v9443_v17, %v9447_v43  ;;  %v12766_v37 = vcombine.low %v9443_v17, %v9447_v43 }
 0x4d4   :  { %10782 = vmatmul.mubr.bf16.gmra.mrb[160].mxu1 %v16496_v11  ;;  %10645 = vmatprep.mubr.bf16.mxu0 %v15837_v7  ;;  %v12768_v24 = vcombine.low %v9444_v5, %v9448_v27  ;;  %v9488_v17 = vld [vmem:[#allocation7 + $0x178] sm:$0xff] }
 0x4d5   :  { %10671 = vmatpush1.bf16.msra.mxu0 %v12906_v30  ;;  %10791 = vmatprep.mubr.bf16.mxu1 %v15837_v7  ;;  %v12769_v30 = vcombine.high %v9444_v5, %v9448_v27 }
 0x4d6   :  { %10817 = vmatpush1.bf16.msra.mxu1 %v12908_v18  ;;  %10672 = vmatprep.subr.bf16.mxu0 %v12915_v34  ;;  %v9451_v18 = vld [vmem:[#allocation7 + $0x50] sm:$0xff] }
 0x4d7   :  { %10818 = vmatprep.subr.bf16.mxu1 %v12917_v57  ;;  %v9455_v34 = vld [vmem:[#allocation7 + $0x70] sm:$0xff]  ;;  %v9452_v57 = vld [vmem:[#allocation7 + $0x58] sm:$0xff] }
 0x4d8   :  { %v12775_v31 = vcombine.high %v9451_v18, %v9455_v34  ;;  %v12774_v51 = vcombine.low %v9451_v18, %v9455_v34  ;;  %v12776_v46 = vcombine.low %v9452_v57, %v9456_v39  ;;  %v9496_v18 = vld [vmem:[#allocation7 + $0x1b8] sm:$0xff] }
 0x4d9   :  { %10673 = vmatpush1.bf16.msra.mxu0 %v12914_v19  ;;  %v12777_v19 = vcombine.high %v9452_v57, %v9456_v39 }
 0x4da   :  { %10819 = vmatpush1.bf16.msra.mxu1 %v12916_v41  ;;  %10674 = vmatprep.subr.bf16.mxu0 %v12923_v35  ;;  %v9459_v41 = vld [vmem:[#allocation7 + $0x90] sm:$0xff] }
 0x4db   :  { %10646 = vmatmul.mubr.bf16.gmra.mrb[116].mxu0 %v16497_v0  ;;  %10820 = vmatprep.subr.bf16.mxu1 %v12925_v1  ;;  %v9463_v35 = vld [vmem:[#allocation7 + $0xb0] sm:$0xff]  ;;  %v9460_v1 = vld [vmem:[#allocation7 + $0x98] sm:$0xff] }
 0x4dc   :  { %10792 = vmatmul.mubr.bf16.gmra.mrb[164].mxu1 %v16497_v0  ;;  %10655 = vmatprep.mubr.bf16.mxu0 %v15844_v14  ;;  %v12783_v59 = vcombine.high %v9459_v41, %v9463_v35  ;;  %v12782_v9 = vcombine.low %v9459_v41, %v9463_v35  ;;  %v12784_v2 = vcombine.low %v9460_v1, %v9464_v63  ;;  %v9500_v41 = vld [vmem:[#allocation7 + $0x1d8] sm:$0xff] }
 0x4dd   :  { %10675 = vmatpush1.bf16.msra.mxu0 %v12922_v28  ;;  %10801 = vmatprep.mubr.bf16.mxu1 %v15844_v14  ;;  %v12785_v28 = vcombine.high %v9460_v1, %v9464_v63  ;;  %v9504_v35 = vld [vmem:[#allocation7 + $0x1f8] sm:$0xff] }
 0x4de   :  { %10821 = vmatpush1.bf16.msra.mxu1 %v12924_v49  ;;  %10676 = vmatprep.subr.bf16.mxu0 %v12931_v16  ;;  %v9467_v49 = vld [vmem:[#allocation7 + $0xd0] sm:$0xff] }
 0x4df   :  { %10822 = vmatprep.subr.bf16.mxu1 %v12933_v29  ;;  %v9471_v16 = vld [vmem:[#allocation7 + $0xf0] sm:$0xff]  ;;  %v9468_v29 = vld [vmem:[#allocation7 + $0xd8] sm:$0xff] }
 0x4e0   :  { %v12791_v13 = vcombine.high %v9467_v49, %v9471_v16  ;;  %v12790_v15 = vcombine.low %v9467_v49, %v9471_v16  ;;  %v12792_v10 = vcombine.low %v9468_v29, %v9472_v56  ;;  %v9512_v49 = vld [vmem:[#allocation7 + $0x238] sm:$0xff] }
 0x4e1   :  { %10677 = vmatpush1.bf16.msra.mxu0 %v12930_v33  ;;  %v12793_v33 = vcombine.high %v9468_v29, %v9472_v56  ;;  %v12824_v29 = vcombine.low %v9500_v41, %v9504_v35 }
 0x4e2   :  { %10823 = vmatpush1.bf16.msra.mxu1 %v12932_v42  ;;  %10678 = vmatprep.subr.bf16.mxu0 %v12939_v45  ;;  %v9475_v42 = vld [vmem:[#allocation7 + $0x110] sm:$0xff] }
 0x4e3   :  { %10656 = vmatmul.mubr.bf16.gmra.mrb[120].mxu0 %v16498_v20  ;;  %10824 = vmatprep.subr.bf16.mxu1 %v12941_v38  ;;  %v9479_v45 = vld [vmem:[#allocation7 + $0x130] sm:$0xff]  ;;  %v9476_v38 = vld [vmem:[#allocation7 + $0x118] sm:$0xff] }
 0x4e4   :  { %10802 = vmatmul.mubr.bf16.gmra.mrb[168].mxu1 %v16498_v20  ;;  %10698 = vmatprep.mubr.bf16.mxu0 %v16470_v4  ;;  %v12799_v23 = vcombine.high %v9475_v42, %v9479_v45  ;;  %v12798_v43 = vcombine.low %v9475_v42, %v9479_v45  ;;  %v12800_v5 = vcombine.low %v9476_v38, %v9480_v62  ;;  %v9520_v42 = vld [vmem:[#allocation7 + $0x278] sm:$0xff] }
 0x4e5   :  { %10679 = vmatpush1.bf16.msra.mxu0 %v12938_v50  ;;  %10844 = vmatprep.mubr.bf16.mxu1 %v16470_v4  ;;  %v12801_v50 = vcombine.high %v9476_v38, %v9480_v62 }
 0x4e6   :  { %10825 = vmatpush1.bf16.msra.mxu1 %v12940_v48  ;;  %10680 = vmatprep.subr.bf16.mxu0 %v12947_v60  ;;  %v9483_v48 = vld [vmem:[#allocation7 + $0x150] sm:$0xff] }
 0x4e7   :  { %10826 = vmatprep.subr.bf16.mxu1 %v12949_v22  ;;  %v9487_v60 = vld [vmem:[#allocation7 + $0x170] sm:$0xff]  ;;  %v9484_v22 = vld [vmem:[#allocation7 + $0x158] sm:$0xff] }
 0x4e8   :  { %v12807_v27 = vcombine.high %v9483_v48, %v9487_v60  ;;  %v12806_v34 = vcombine.low %v9483_v48, %v9487_v60  ;;  %v12808_v57 = vcombine.low %v9484_v22, %v9488_v17  ;;  %v9528_v48 = vld [vmem:[#allocation7 + $0x2b8] sm:$0xff] }
 0x4e9   :  { %10681 = vmatpush1.bf16.msra.mxu0 %v12946_v26  ;;  %v12809_v26 = vcombine.high %v9484_v22, %v9488_v17 }
 0x4ea   :  { %10827 = vmatpush1.bf16.msra.mxu1 %v12948_v55  ;;  %10885 = vmatprep.subr.bf16.mxu0 %v12767_v32  ;;  %v9491_v55 = vld [vmem:[#allocation7 + $0x190] sm:$0xff] }
 0x4eb   :  { %11031 = vmatprep.subr.bf16.mxu1 %v12769_v30  ;;  %v9495_v32 = vld [vmem:[#allocation7 + $0x1b0] sm:$0xff]  ;;  %v9492_v30 = vld [vmem:[#allocation7 + $0x198] sm:$0xff] }
 0x4ec   :  { %10699 = vmatmul.mubr.bf16.vlgmr.msra.gmra.mrb[108].mxu0 %v15925_v53  ;;  %v12815_v39 = vcombine.high %v9491_v55, %v9495_v32  ;;  %v12816_v1 = vcombine.low %v9492_v30, %v9496_v18 }
 0x4ed   :  { %10845 = vmatmul.mubr.bf16.vlgmr.msra.gmra.mrb[156].mxu1 %v15925_v53  ;;  %10886 = vmatpush1.bf16.msra.mxu0 %v12766_v37  ;;  %v12817_v37 = vcombine.high %v9492_v30, %v9496_v18 }
 0x4ee   :  { %11032 = vmatpush1.bf16.msra.mxu1 %v12768_v24  ;;  %10887 = vmatprep.subr.bf16.mxu0 %v12775_v31  ;;  %v9499_v24 = vld [vmem:[#allocation7 + $0x1d0] sm:$0xff] }
 0x4ef   :  { %11033 = vmatprep.subr.bf16.mxu1 %v12777_v19  ;;  %10708 = vmatprep.mubr.bf16.mxu0 %v16470_v4  ;;  %v9503_v31 = vld [vmem:[#allocation7 + $0x1f0] sm:$0xff]  ;;  %v12814_v19 = vcombine.low %v9491_v55, %v9495_v32 }
 0x4f0   :  { %10854 = vmatprep.mubr.bf16.mxu1 %v16470_v4  ;;  %v12823_v63 = vcombine.high %v9499_v24, %v9503_v31  ;;  %v12822_v16 = vcombine.low %v9499_v24, %v9503_v31 }
 0x4f1   :  { %10888 = vmatpush1.bf16.msra.mxu0 %v12774_v51  ;;  %v9507_v51 = vld [vmem:[#allocation7 + $0x210] sm:$0xff] }
 0x4f2   :  { %11034 = vmatpush1.bf16.msra.mxu1 %v12776_v46  ;;  %10889 = vmatprep.subr.bf16.mxu0 %v12783_v59  ;;  %v9511_v46 = vld [vmem:[#allocation7 + $0x230] sm:$0xff]  ;;  %v12825_v59 = vcombine.high %v9500_v41, %v9504_v35 }
 0x4f3   :  { %11035 = vmatprep.subr.bf16.mxu1 %v12785_v28  ;;  %v9508_v28 = vld [vmem:[#allocation7 + $0x218] sm:$0xff]  ;;  %v12831_v56 = vcombine.high %v9507_v51, %v9511_v46  ;;  %v12830_v45 = vcombine.low %v9507_v51, %v9511_v46  ;;  %v9547_v35 = vld [vmem:[#allocation7 + $0x350] sm:$0xff] }
 0x4f4   :  { %10709 = vmatmul.mubr.bf16.gmra.mrb[112].mxu0 %v15945_v12  ;;  %v12832_v38 = vcombine.low %v9508_v28, %v9512_v49  ;;  %v9552_v51 = vld [vmem:[#allocation7 + $0x378] sm:$0xff] }
 0x4f5   :  { %10855 = vmatmul.mubr.bf16.gmra.mrb[160].mxu1 %v15945_v12  ;;  %10890 = vmatpush1.bf16.msra.mxu0 %v12782_v9  ;;  %v12833_v9 = vcombine.high %v9508_v28, %v9512_v49 }
 0x4f6   :  { %11036 = vmatpush1.bf16.msra.mxu1 %v12784_v2  ;;  %10891 = vmatprep.subr.bf16.mxu0 %v12791_v13  ;;  %v9515_v2 = vld [vmem:[#allocation7 + $0x250] sm:$0xff] }
 0x4f7   :  { %11037 = vmatprep.subr.bf16.mxu1 %v12793_v33  ;;  %10718 = vmatprep.mubr.bf16.mxu0 %v16470_v4  ;;  %v9519_v13 = vld [vmem:[#allocation7 + $0x270] sm:$0xff]  ;;  %v9516_v33 = vld [vmem:[#allocation7 + $0x258] sm:$0xff] }
 0x4f8   :  { %10864 = vmatprep.mubr.bf16.mxu1 %v16470_v4  ;;  %v12839_v62 = vcombine.high %v9515_v2, %v9519_v13  ;;  %v12840_v60 = vcombine.low %v9516_v33, %v9520_v42 }
 0x4f9   :  { %10892 = vmatpush1.bf16.msra.mxu0 %v12790_v15  ;;  %v12841_v15 = vcombine.high %v9516_v33, %v9520_v42 }
 0x4fa   :  { %11038 = vmatpush1.bf16.msra.mxu1 %v12792_v10  ;;  %10893 = vmatprep.subr.bf16.mxu0 %v12799_v23  ;;  %v9523_v10 = vld [vmem:[#allocation7 + $0x290] sm:$0xff] }
 0x4fb   :  { %11039 = vmatprep.subr.bf16.mxu1 %v12801_v50  ;;  %v9527_v23 = vld [vmem:[#allocation7 + $0x2b0] sm:$0xff]  ;;  %v9524_v50 = vld [vmem:[#allocation7 + $0x298] sm:$0xff] }
 0x4fc   :  { %10719 = vmatmul.mubr.bf16.gmra.mrb[116].mxu0 %v15962_v21  ;;  %v12847_v22 = vcombine.high %v9523_v10, %v9527_v23  ;;  %v12849_v17 = vcombine.high %v9524_v50, %v9528_v48  ;;  %v12846_v55 = vcombine.low %v9523_v10, %v9527_v23  ;;  %v12848_v32 = vcombine.low %v9524_v50, %v9528_v48  ;;  %v9563_v10 = vld [vmem:[#allocation7 + $0x3d0] sm:$0xff] }
 0x4fd   :  { %10865 = vmatmul.mubr.bf16.gmra.mrb[164].mxu1 %v15962_v21  ;;  %10894 = vmatpush1.bf16.msra.mxu0 %v12798_v43  ;;  %v9531_v43 = vld [vmem:[#allocation7 + $0x2d0] sm:$0xff] }
 0x4fe   :  { %11040 = vmatpush1.bf16.msra.mxu1 %v12800_v5  ;;  %10895 = vmatprep.subr.bf16.mxu0 %v12807_v27  ;;  %v9535_v5 = vld [vmem:[#allocation7 + $0x2f0] sm:$0xff]  ;;  %v9532_v27 = vld [vmem:[#allocation7 + $0x2d8] sm:$0xff] }
 0x4ff   :  { %11041 = vmatprep.subr.bf16.mxu1 %v12809_v26  ;;  %10728 = vmatprep.mubr.bf16.mxu0 %v16470_v4  ;;  %v9536_v26 = vld [vmem:[#allocation7 + $0x2f8] sm:$0xff]  ;;  %v12855_v30 = vcombine.high %v9531_v43, %v9535_v5  ;;  %v12854_v24 = vcombine.low %v9531_v43, %v9535_v5  ;;  %v9567_v23 = vld [vmem:[#allocation7 + $0x3f0] sm:$0xff] }
 0x500   :  { %10874 = vmatprep.mubr.bf16.mxu1 %v16470_v4  ;;  %v12857_v18 = vcombine.high %v9532_v27, %v9536_v26  ;;  %v12856_v31 = vcombine.low %v9532_v27, %v9536_v26  ;;  %v12887_v27 = vcombine.high %v9563_v10, %v9567_v23 }
 0x501   :  { %10896 = vmatpush1.bf16.msra.mxu0 %v12806_v34  ;;  %v9539_v34 = vld [vmem:[#allocation7 + $0x310] sm:$0xff] }
 0x502   :  { %11042 = vmatpush1.bf16.msra.mxu1 %v12808_v57  ;;  %10897 = vmatprep.subr.bf16.mxu0 %v12815_v39  ;;  %v9543_v57 = vld [vmem:[#allocation7 + $0x330] sm:$0xff]  ;;  %v9540_v39 = vld [vmem:[#allocation7 + $0x318] sm:$0xff] }
 0x503   :  { %11043 = vmatprep.subr.bf16.mxu1 %v12817_v37  ;;  %v9544_v37 = vld [vmem:[#allocation7 + $0x338] sm:$0xff]  ;;  %v12862_v46 = vcombine.low %v9539_v34, %v9543_v57 }
 0x504   :  { %10729 = vmatmul.mubr.bf16.gmra.mrb[120].mxu0 %v15980_v3  ;;  %v12865_v41 = vcombine.high %v9540_v39, %v9544_v37 }
 0x505   :  { %10875 = vmatmul.mubr.bf16.gmra.mrb[168].mxu1 %v15980_v3  ;;  %10898 = vmatpush1.bf16.msra.mxu0 %v12814_v19  ;;  %v12863_v19 = vcombine.high %v9539_v34, %v9543_v57  ;;  %v12886_v34 = vcombine.low %v9563_v10, %v9567_v23 }
 0x506   :  { %10917 = vmatprep.mubr.bf16.mxu0 %v15821_v61  ;;  %11044 = vmatpush1.bf16.msra.mxu1 %v12816_v1  ;;  %v9551_v1 = vld [vmem:[#allocation7 + $0x370] sm:$0xff] }
 0x507   :  { %11063 = vmatprep.mubr.bf16.mxu1 %v15821_v61  ;;  %10899 = vmatprep.subr.bf16.mxu0 %v12823_v63  ;;  %v12838_v61 = vcombine.low %v9515_v2, %v9519_v13  ;;  %v9548_v63 = vld [vmem:[#allocation7 + $0x358] sm:$0xff]  ;;  %v12871_v28 = vcombine.high %v9547_v35, %v9551_v1  ;;  %v12870_v2 = vcombine.low %v9547_v35, %v9551_v1 }
 0x508   :  { %11045 = vmatprep.subr.bf16.mxu1 %v12825_v59  ;;  %v12864_v59 = vcombine.low %v9540_v39, %v9544_v37  ;;  %v12873_v49 = vcombine.high %v9548_v63, %v9552_v51  ;;  %v12872_v42 = vcombine.low %v9548_v63, %v9552_v51  ;;  %v9579_v63 = vld [vmem:[#allocation7 + $0x450] sm:$0xff] }
 0x509   :  { %10900 = vmatpush1.bf16.msra.mxu0 %v12822_v16  ;;  %v9555_v16 = vld [vmem:[#allocation7 + $0x390] sm:$0xff] }
 0x50a   :  { %11046 = vmatpush1.bf16.msra.mxu1 %v12824_v29  ;;  %10901 = vmatprep.subr.bf16.mxu0 %v12831_v56  ;;  %v9559_v29 = vld [vmem:[#allocation7 + $0x3b0] sm:$0xff]  ;;  %v9556_v56 = vld [vmem:[#allocation7 + $0x398] sm:$0xff] }
 0x50b   :  { %11047 = vmatprep.subr.bf16.mxu1 %v12833_v9  ;;  %v9560_v9 = vld [vmem:[#allocation7 + $0x3b8] sm:$0xff]  ;;  %v12878_v43 = vcombine.low %v9555_v16, %v9559_v29  ;;  %v9583_v51 = vld [vmem:[#allocation7 + $0x470] sm:$0xff] }
 0x50c   :  { %v12880_v5 = vcombine.low %v9556_v56, %v9560_v9 }
 0x50d   :  { %10902 = vmatpush1.bf16.msra.mxu0 %v12830_v45  ;;  %v12879_v45 = vcombine.high %v9555_v16, %v9559_v29 }
 0x50e   :  { %11048 = vmatpush1.bf16.msra.mxu1 %v12832_v38  ;;  %10903 = vmatprep.subr.bf16.mxu0 %v12839_v62 }
 0x50f   :  { %11049 = vmatprep.subr.bf16.mxu1 %v12841_v15  ;;  %v12881_v15 = vcombine.high %v9556_v56, %v9560_v9  ;;  %v12903_v56 = vcombine.high %v9579_v63, %v9583_v51 }
 0x511   :  { %10904 = vmatpush1.bf16.msra.mxu0 %v12838_v61  ;;  %v9564_v61 = vld [vmem:[#allocation7 + $0x3d8] sm:$0xff] }
 0x512   :  { %11050 = vmatpush1.bf16.msra.mxu1 %v12840_v60  ;;  %10905 = vmatprep.subr.bf16.mxu0 %v12847_v22  ;;  %v9568_v60 = vld [vmem:[#allocation7 + $0x3f8] sm:$0xff] }
 0x513   :  { %11051 = vmatprep.subr.bf16.mxu1 %v12849_v17  ;;  %v12889_v26 = vcombine.high %v9564_v61, %v9568_v60  ;;  %v12888_v37 = vcombine.low %v9564_v61, %v9568_v60  ;;  %v12902_v61 = vcombine.low %v9579_v63, %v9583_v51 }
 0x515   :  { %10906 = vmatpush1.bf16.msra.mxu0 %v12846_v55  ;;  %v9571_v55 = vld [vmem:[#allocation7 + $0x410] sm:$0xff] }
 0x516   :  { %11052 = vmatpush1.bf16.msra.mxu1 %v12848_v32  ;;  %10907 = vmatprep.subr.bf16.mxu0 %v12855_v30  ;;  %v9575_v32 = vld [vmem:[#allocation7 + $0x430] sm:$0xff]  ;;  %v9572_v30 = vld [vmem:[#allocation7 + $0x418] sm:$0xff] }
 0x517   :  { %11053 = vmatprep.subr.bf16.mxu1 %v12857_v18  ;;  %v9576_v18 = vld [vmem:[#allocation7 + $0x438] sm:$0xff]  ;;  %v12894_v16 = vcombine.low %v9571_v55, %v9575_v32 }
 0x518   :  { %v12896_v29 = vcombine.low %v9572_v30, %v9576_v18 }
 0x519   :  { %10908 = vmatpush1.bf16.msra.mxu0 %v12854_v24  ;;  %v12895_v24 = vcombine.high %v9571_v55, %v9575_v32  ;;  %v9599_v32 = vld [vmem:[#allocation7 + $0x4f0] sm:$0xff] }
 0x51a   :  { %11054 = vmatpush1.bf16.msra.mxu1 %v12856_v31  ;;  %10909 = vmatprep.subr.bf16.mxu0 %v12863_v19 }
 0x51b   :  { %11055 = vmatprep.subr.bf16.mxu1 %v12865_v41  ;;  %v12897_v41 = vcombine.high %v9572_v30, %v9576_v18 }
 0x51d   :  { %10910 = vmatpush1.bf16.msra.mxu0 %v12862_v46 }
 0x51e   :  { %11056 = vmatpush1.bf16.msra.mxu1 %v12864_v59  ;;  %v16062_v13 = vpop.f32.mrb[60].mxu0  ;;  %v16064_v33 = vpop.f32.mrb[108].mxu1  ;;  %10911 = vmatprep.subr.bf16.mxu0 %v12871_v28  ;;  %v9580_v28 = vld [vmem:[#allocation7 + $0x458] sm:$0xff] }
 0x51f   :  { %v16066_v38 = vpop.f32.mrb[61].mxu0  ;;  %v16068_v62 = vpop.f32.mrb[109].mxu1  ;;  %11057 = vmatprep.subr.bf16.mxu1 %v12873_v49  ;;  %v9584_v49 = vld [vmem:[#allocation7 + $0x478] sm:$0xff] }
 0x520   :  { %v16070_v50 = vpop.f32.mrb[62].mxu0  ;;  %v16072_v48 = vpop.f32.mrb[110].mxu1  ;;  %v12905_v9 = vcombine.high %v9580_v28, %v9584_v49 }
 0x521   :  { %10912 = vmatpush1.bf16.msra.mxu0 %v12870_v2  ;;  %v16074_v22 = vpop.f32.mrb[63].mxu0  ;;  %v16076_v17 = vpop.f32.mrb[111].mxu1  ;;  %v9587_v2 = vld [vmem:[#allocation7 + $0x490] sm:$0xff] }
 0x522   :  { %11058 = vmatpush1.bf16.msra.mxu1 %v12872_v42  ;;  %10913 = vmatprep.subr.bf16.mxu0 %v12879_v45  ;;  %v9591_v42 = vld [vmem:[#allocation7 + $0x4b0] sm:$0xff]  ;;  %v9588_v45 = vld [vmem:[#allocation7 + $0x498] sm:$0xff] }
 0x523   :  { %11059 = vmatprep.subr.bf16.mxu1 %v12881_v15  ;;  %v9592_v15 = vld [vmem:[#allocation7 + $0x4b8] sm:$0xff] }
 0x524   :  { %v12913_v55 = vcombine.high %v9588_v45, %v9592_v15 }
 0x525   :  { %10914 = vmatpush1.bf16.msra.mxu0 %v12878_v43 }
 0x526   :  { %11060 = vmatpush1.bf16.msra.mxu1 %v12880_v5  ;;  %v16078_v57 = vpop.f32.mrb[64].mxu0  ;;  %v16080_v39 = vpop.f32.mrb[112].mxu1  ;;  %10915 = vmatprep.subr.bf16.mxu0 %v12887_v27  ;;  %v12904_v5 = vcombine.low %v9580_v28, %v9584_v49  ;;  %v9603_v28 = vld [vmem:[#allocation7 + $0x510] sm:$0xff] }
 0x527   :  { %v16082_v31 = vpop.f32.mrb[65].mxu0  ;;  %v16084_v19 = vpop.f32.mrb[113].mxu1  ;;  %11061 = vmatprep.subr.bf16.mxu1 %v12889_v26  ;;  %v9607_v49 = vld [vmem:[#allocation7 + $0x530] sm:$0xff] }
 0x528   :  { %v16086_v35 = vpop.f32.mrb[66].mxu0  ;;  %v16088_v1 = vpop.f32.mrb[114].mxu1 }
 0x529   :  { %10916 = vmatpush1.bf16.msra.mxu0 %v12886_v34  ;;  %v16090_v46 = vpop.f32.mrb[67].mxu0  ;;  %v16092_v59 = vpop.f32.mrb[115].mxu1  ;;  %v9596_v34 = vld [vmem:[#allocation7 + $0x4d8] sm:$0xff] }
 0x52a   :  { %11062 = vmatpush1.bf16.msra.mxu1 %v12888_v37  ;;  %10958 = vmatprep.subr.bf16.mxu0 %v12895_v24  ;;  %v9600_v37 = vld [vmem:[#allocation7 + $0x4f8] sm:$0xff]  ;;  %v12910_v24 = vcombine.low %v9587_v2, %v9591_v42 }
 0x52b   :  { %11104 = vmatprep.subr.bf16.mxu1 %v12897_v41  ;;  %v12912_v41 = vcombine.low %v9588_v45, %v9592_v15  ;;  %v12921_v51 = vcombine.high %v9596_v34, %v9600_v37  ;;  %v12920_v15 = vcombine.low %v9596_v34, %v9600_v37 }
 0x52c   :  { %10918 = vmatmul.mubr.bf16.vlgmr.msra.gmra.mrb[124].mxu0 %v16495_v47 }
 0x52d   :  { %11064 = vmatmul.mubr.bf16.vlgmr.msra.gmra.mrb[172].mxu1 %v16495_v47  ;;  %10927 = vmatprep.mubr.bf16.mxu0 %v15832_v36  ;;  %v12911_v47 = vcombine.high %v9587_v2, %v9591_v42 }
 0x52e   :  { %10959 = vmatpush1.bf16.msra.mxu0 %v12894_v16  ;;  %11073 = vmatprep.mubr.bf16.mxu1 %v15832_v36  ;;  %v16098_v10 = vpop.f32.mrb[68].mxu0  ;;  %v16100_v23 = vpop.f32.mrb[116].mxu1  ;;  %v9595_v36 = vld [vmem:[#allocation7 + $0x4d0] sm:$0xff]  ;;  %v9604_v16 = vld [vmem:[#allocation7 + $0x518] sm:$0xff] }
 0x52f   :  { %16499 = vst [vmem:[#allocation14_spill] sm:$0xff] %v16100_v23  ;;  %11105 = vmatpush1.bf16.msra.mxu1 %v12896_v29  ;;  %v16102_v60 = vpop.f32.mrb[69].mxu0  ;;  %v16104_v43 = vpop.f32.mrb[117].mxu1  ;;  %10960 = vmatprep.subr.bf16.mxu0 %v12903_v56  ;;  %v12919_v63 = vcombine.high %v9595_v36, %v9599_v32  ;;  %v9608_v29 = vld [vmem:[#allocation7 + $0x538] sm:$0xff]  ;;  %v12918_v2 = vcombine.low %v9595_v36, %v9599_v32 }
 0x530   :  { %16500 = vst [vmem:[#allocation15_spill] sm:$0xff] %v16104_v43  ;;  %11106 = vmatprep.subr.bf16.mxu1 %v12905_v9  ;;  %v16106_v27 = vpop.f32.mrb[70].mxu0  ;;  %v16108_v26 = vpop.f32.mrb[118].mxu1  ;;  %v9612_v36 = vld [vmem:[#allocation7 + $0x558] sm:$0xff]  ;;  %v12928_v34 = vcombine.low %v9604_v16, %v9608_v29 }
 0x531   :  { %16501 = vst [vmem:[#allocation16_spill] sm:$0xff] %v16108_v26  ;;  %v16110_v30 = vpop.f32.mrb[71].mxu0  ;;  %v16112_v18 = vpop.f32.mrb[119].mxu1  ;;  %v9616_v32 = vld [vmem:[#allocation7 + $0x578] sm:$0xff]  ;;  %v9627_v26 = vld [vmem:[#allocation7 + $0x5d0] sm:$0xff] }
 0x532   :  { %16502 = vst [vmem:[#allocation17_spill] sm:$0xff] %v16110_v30  ;;  %16503 = vst [vmem:[#allocation34_spill] sm:$0xff] %v16112_v18  ;;  %10961 = vmatpush1.bf16.msra.mxu0 %v12902_v61  ;;  %v9631_v18 = vld [vmem:[#allocation7 + $0x5f0] sm:$0xff]  ;;  %v9632_v23 = vld [vmem:[#allocation7 + $0x5f8] sm:$0xff] }
 0x533   :  { %11107 = vmatpush1.bf16.msra.mxu1 %v12904_v5  ;;  %10962 = vmatprep.subr.bf16.mxu0 %v12911_v47  ;;  %v12929_v47 = vcombine.high %v9604_v16, %v9608_v29 }
 0x534   :  { %10928 = vmatmul.mubr.bf16.gmra.mrb[128].mxu0 %v16496_v11  ;;  %11108 = vmatprep.subr.bf16.mxu1 %v12913_v55  ;;  %v9615_v55 = vld [vmem:[#allocation7 + $0x570] sm:$0xff] }
 0x535   :  { %11074 = vmatmul.mubr.bf16.gmra.mrb[176].mxu1 %v16496_v11  ;;  %10937 = vmatprep.mubr.bf16.mxu0 %v15837_v7  ;;  %v12927_v11 = vcombine.high %v9603_v28, %v9607_v49 }
 0x536   :  { %10963 = vmatpush1.bf16.msra.mxu0 %v12910_v24  ;;  %11083 = vmatprep.mubr.bf16.mxu1 %v15837_v7  ;;  %v16118_v56 = vpop.f32.mrb[72].mxu0  ;;  %v16120_v9 = vpop.f32.mrb[120].mxu1  ;;  %v9611_v7 = vld [vmem:[#allocation7 + $0x550] sm:$0xff] }
 0x537   :  { %16504 = vst [vmem:[#allocation35_spill] sm:$0xff] %v16120_v9  ;;  %11109 = vmatpush1.bf16.msra.mxu1 %v12912_v41  ;;  %v16122_v42 = vpop.f32.mrb[73].mxu0  ;;  %v16124_v45 = vpop.f32.mrb[121].mxu1  ;;  %10964 = vmatprep.subr.bf16.mxu0 %v12919_v63  ;;  %v12926_v41 = vcombine.low %v9603_v28, %v9607_v49  ;;  %v12935_v37 = vcombine.high %v9611_v7, %v9615_v55 }
 0x538   :  { %16505 = vst [vmem:[#allocation36_spill] sm:$0xff] %v16122_v42  ;;  %16506 = vst [vmem:[#allocation37_spill] sm:$0xff] %v16124_v45  ;;  %11110 = vmatprep.subr.bf16.mxu1 %v12921_v51  ;;  %v16126_v61 = vpop.f32.mrb[74].mxu0  ;;  %v16128_v5 = vpop.f32.mrb[122].mxu1  ;;  %v12937_v63 = vcombine.high %v9612_v36, %v9616_v32  ;;  %v9619_v51 = vld [vmem:[#allocation7 + $0x590] sm:$0xff] }
 0x539   :  { %16507 = vst [vmem:[#allocation38_spill] sm:$0xff] %v16128_v5  ;;  %v16130_v24 = vpop.f32.mrb[75].mxu0  ;;  %v16132_v4 = vpop.f32.mrb[123].mxu1  ;;  %v9623_v5 = vld [vmem:[#allocation7 + $0x5b0] sm:$0xff] }
 0x53a   :  { %16508 = vst [vmem:[#allocation39_spill] sm:$0xff] %v16130_v24  ;;  %16509 = vst [vmem:[#allocation40_spill] sm:$0xff] %v16132_v4  ;;  %10965 = vmatpush1.bf16.msra.mxu0 %v12918_v2  ;;  %v9620_v24 = vld [vmem:[#allocation7 + $0x598] sm:$0xff]  ;;  %v12934_v2 = vcombine.low %v9611_v7, %v9615_v55 }
 0x53b   :  { %11111 = vmatpush1.bf16.msra.mxu1 %v12920_v15  ;;  %10966 = vmatprep.subr.bf16.mxu0 %v12927_v11  ;;  %v9624_v4 = vld [vmem:[#allocation7 + $0x5b8] sm:$0xff]  ;;  %v12936_v15 = vcombine.low %v9612_v36, %v9616_v32  ;;  %v12943_v11 = vcombine.high %v9619_v51, %v9623_v5  ;;  %v12951_v32 = vcombine.high %v9627_v26, %v9631_v18 }
 0x53c   :  { %10938 = vmatmul.mubr.bf16.gmra.mrb[132].mxu0 %v16497_v0  ;;  %11112 = vmatprep.subr.bf16.mxu1 %v12929_v47  ;;  %v12945_v42 = vcombine.high %v9620_v24, %v9624_v4  ;;  %v12944_v36 = vcombine.low %v9620_v24, %v9624_v4 }
 0x53d   :  { %11084 = vmatmul.mubr.bf16.gmra.mrb[180].mxu1 %v16497_v0  ;;  %10947 = vmatprep.mubr.bf16.mxu0 %v15844_v14 }
 0x53e   :  { %10967 = vmatpush1.bf16.msra.mxu0 %v12926_v41  ;;  %11093 = vmatprep.mubr.bf16.mxu1 %v15844_v14  ;;  %v13034_v28 = vpop.f32.mrb[76].mxu0  ;;  %v13074_v49 = vpop.f32.mrb[124].mxu1  ;;  %v9628_v14 = vld [vmem:[#allocation7 + $0x5d8] sm:$0xff] }
 0x53f   :  { %11113 = vmatpush1.bf16.msra.mxu1 %v12928_v34  ;;  %v13035_v16 = vpop.f32.mrb[77].mxu0  ;;  %v13075_v29 = vpop.f32.mrb[125].mxu1  ;;  %10968 = vmatprep.subr.bf16.mxu0 %v12935_v37  ;;  %v12942_v34 = vcombine.low %v9619_v51, %v9623_v5 }
 0x540   :  { %v13036_v47 = vadd.f32 %v13035_v16, %v13034_v28  ;;  %v13076_v9 = vadd.f32 %v13075_v29, %v13074_v49  ;;  %11114 = vmatprep.subr.bf16.mxu1 %v12937_v63  ;;  %v13037_v0 = vpop.f32.mrb[78].mxu0  ;;  %v13077_v45 = vpop.f32.mrb[126].mxu1  ;;  %v12953_v63 = vcombine.high %v9628_v14, %v9632_v23  ;;  %v16510_v28 = vmov 0  }
 0x541   :  { %v13038_v41 = vpop.f32.mrb[79].mxu0  ;;  %v13078_v30 = vpop.f32.mrb[127].mxu1 }
 0x542   :  { %v16138_v43 = vadd.f32 %v13076_v9, %v13036_v47  ;;  %10969 = vmatpush1.bf16.msra.mxu0 %v12934_v2  ;;  %v13039_v7 = vadd.f32 %v13038_v41, %v13037_v0  ;;  %v13079_v55 = vadd.f32 %v13078_v30, %v13077_v45  ;;  %v12950_v2 = vcombine.low %v9627_v26, %v9631_v18 }
 0x543   :  { %11115 = vmatpush1.bf16.msra.mxu1 %v12936_v15  ;;  %10970 = vmatprep.subr.bf16.mxu0 %v12943_v11  ;;  %v12952_v45 = vcombine.low %v9628_v14, %v9632_v23 }
 0x544   :  { %v16140_v37 = vadd.f32 %v13079_v55, %v13039_v7  ;;  %10948 = vmatmul.mubr.bf16.gmra.mrb[136].mxu0 %v16498_v20  ;;  %11116 = vmatprep.subr.bf16.mxu1 %v12945_v42 }
 0x545   :  { %11094 = vmatmul.mubr.bf16.gmra.mrb[184].mxu1 %v16498_v20  ;;  %10990 = vmatprep.mubr.bf16.mxu0 %v16510_v28 }
 0x546   :  { %10971 = vmatpush1.bf16.msra.mxu0 %v12942_v34  ;;  %v13040_v9 = vpop.f32.mrb[80].mxu0  ;;  %v13080_v49 = vpop.f32.mrb[128].mxu1  ;;  %11136 = vmatprep.mubr.bf16.mxu1 %v16510_v28 }
 0x547   :  { %11117 = vmatpush1.bf16.msra.mxu1 %v12944_v36  ;;  %v13041_v30 = vpop.f32.mrb[81].mxu0  ;;  %v13081_v4 = vpop.f32.mrb[129].mxu1  ;;  %10972 = vmatprep.subr.bf16.mxu0 %v12951_v32 }
 0x548   :  { %v13042_v5 = vadd.f32 %v13041_v30, %v13040_v9  ;;  %v13082_v24 = vadd.f32 %v13081_v4, %v13080_v49  ;;  %11118 = vmatprep.subr.bf16.mxu1 %v12953_v63  ;;  %v13043_v42 = vpop.f32.mrb[82].mxu0  ;;  %v13083_v51 = vpop.f32.mrb[130].mxu1 }
 0x549   :  { %v13044_v16 = vpop.f32.mrb[83].mxu0  ;;  %v13084_v20 = vpop.f32.mrb[131].mxu1 }
 0x54a   :  { %v16146_v29 = vadd.f32 %v13082_v24, %v13042_v5  ;;  %10973 = vmatpush1.bf16.msra.mxu0 %v12950_v2  ;;  %v13045_v15 = vadd.f32 %v13044_v16, %v13043_v42  ;;  %v13085_v11 = vadd.f32 %v13084_v20, %v13083_v51 }
 0x54b   :  { %11119 = vmatpush1.bf16.msra.mxu1 %v12952_v45 }
 0x54c   :  { %v16148_v26 = vadd.f32 %v13085_v11, %v13045_v15 }
 0x54d   :  { %10991 = vmatmul.mubr.bf16.vlgmr.msra.gmra.mrb[124].mxu0 %v15925_v53 }
 0x54e   :  { %11137 = vmatmul.mubr.bf16.vlgmr.msra.gmra.mrb[172].mxu1 %v15925_v53  ;;  %v13046_v23 = vpop.f32.mrb[84].mxu0  ;;  %v13086_v18 = vpop.f32.mrb[132].mxu1  ;;  %11000 = vmatprep.mubr.bf16.mxu0 %v16510_v28 }
 0x54f   :  { %v13047_v47 = vpop.f32.mrb[85].mxu0  ;;  %v13087_v0 = vpop.f32.mrb[133].mxu1  ;;  %11146 = vmatprep.mubr.bf16.mxu1 %v16510_v28 }
 0x550   :  { %v13048_v41 = vadd.f32 %v13047_v47, %v13046_v23  ;;  %v13088_v14 = vadd.f32 %v13087_v0, %v13086_v18  ;;  %v13049_v7 = vpop.f32.mrb[86].mxu0  ;;  %v13089_v55 = vpop.f32.mrb[134].mxu1 }
 0x551   :  { %v13050_v34 = vpop.f32.mrb[87].mxu0  ;;  %v13090_v36 = vpop.f32.mrb[135].mxu1 }
 0x552   :  { %v16154_v32 = vadd.f32 %v13088_v14, %v13048_v41  ;;  %v13051_v63 = vadd.f32 %v13050_v34, %v13049_v7  ;;  %v13091_v9 = vadd.f32 %v13090_v36, %v13089_v55 }
 0x554   :  { %v16156_v49 = vadd.f32 %v13091_v9, %v13051_v63 }
 0x555   :  { %11001 = vmatmul.mubr.bf16.gmra.mrb[128].mxu0 %v15945_v12 }
 0x556   :  { %11147 = vmatmul.mubr.bf16.gmra.mrb[176].mxu1 %v15945_v12  ;;  %v13052_v53 = vpop.f32.mrb[88].mxu0  ;;  %v13092_v2 = vpop.f32.mrb[136].mxu1  ;;  %11010 = vmatprep.mubr.bf16.mxu0 %v16510_v28 }
 0x557   :  { %v13053_v30 = vpop.f32.mrb[89].mxu0  ;;  %v13093_v4 = vpop.f32.mrb[137].mxu1  ;;  %11156 = vmatprep.mubr.bf16.mxu1 %v16510_v28 }
 0x558   :  { %v13054_v45 = vadd.f32 %v13053_v30, %v13052_v53  ;;  %v13094_v5 = vadd.f32 %v13093_v4, %v13092_v2  ;;  %v13055_v24 = vpop.f32.mrb[90].mxu0  ;;  %v13095_v42 = vpop.f32.mrb[138].mxu1 }
 0x559   :  { %v13056_v51 = vpop.f32.mrb[91].mxu0  ;;  %v13096_v16 = vpop.f32.mrb[139].mxu1 }
 0x55a   :  { %v16162_v20 = vadd.f32 %v13094_v5, %v13054_v45  ;;  %v13057_v15 = vadd.f32 %v13056_v51, %v13055_v24  ;;  %v13097_v11 = vadd.f32 %v13096_v16, %v13095_v42 }
 0x55c   :  { %v16164_v23 = vadd.f32 %v13097_v11, %v13057_v15 }
 0x55d   :  { %11011 = vmatmul.mubr.bf16.gmra.mrb[132].mxu0 %v15962_v21 }
 0x55e   :  { %11157 = vmatmul.mubr.bf16.gmra.mrb[180].mxu1 %v15962_v21  ;;  %v13114_v12 = vpop.f32.mrb[92].mxu0  ;;  %v13154_v18 = vpop.f32.mrb[140].mxu1  ;;  %11020 = vmatprep.mubr.bf16.mxu0 %v16510_v28 }
 0x55f   :  { %v13115_v47 = vpop.f32.mrb[93].mxu0  ;;  %v13155_v0 = vpop.f32.mrb[141].mxu1  ;;  %11166 = vmatprep.mubr.bf16.mxu1 %v16510_v28 }
 0x560   :  { %v13116_v41 = vadd.f32 %v13115_v47, %v13114_v12  ;;  %v13156_v14 = vadd.f32 %v13155_v0, %v13154_v18  ;;  %v13117_v7 = vpop.f32.mrb[94].mxu0  ;;  %v13157_v55 = vpop.f32.mrb[142].mxu1 }
 0x561   :  { %v13118_v34 = vpop.f32.mrb[95].mxu0  ;;  %v13158_v36 = vpop.f32.mrb[143].mxu1 }
 0x562   :  { %v9257_v63 = vadd.f32 %v13116_v41, %v16138_v43  ;;  %v13119_v9 = vadd.f32 %v13118_v34, %v13117_v7  ;;  %v13159_v53 = vadd.f32 %v13158_v36, %v13157_v55 }
 0x564   :  { %v9260_v21 = vadd.f32 %v13119_v9, %v16140_v37  ;;  %v16172_v2 = vadd.f32 %v13156_v14, %v9257_v63 }
 0x565   :  { %11021 = vmatmul.mubr.bf16.gmra.mrb[136].mxu0 %v15980_v3 }
 0x566   :  { %11167 = vmatmul.mubr.bf16.gmra.mrb[184].mxu1 %v15980_v3  ;;  %v13120_v30 = vpop.f32.mrb[96].mxu0  ;;  %v13160_v28 = vpop.f32.mrb[144].mxu1  ;;  %v16176_v4 = vadd.f32 %v13159_v53, %v9260_v21 }
 0x567   :  { %v13121_v45 = vpop.f32.mrb[97].mxu0  ;;  %v13161_v5 = vpop.f32.mrb[145].mxu1 }
 0x568   :  { %v13122_v24 = vadd.f32 %v13121_v45, %v13120_v30  ;;  %v13123_v42 = vpop.f32.mrb[98].mxu0  ;;  %v13162_v51 = vadd.f32 %v13161_v5, %v13160_v28  ;;  %v13163_v43 = vpop.f32.mrb[146].mxu1 }
 0x569   :  { %v13124_v16 = vpop.f32.mrb[99].mxu0  ;;  %v13164_v15 = vpop.f32.mrb[147].mxu1 }
 0x56a   :  { %v9265_v37 = vadd.f32 %v13122_v24, %v16146_v29  ;;  %v13125_v11 = vadd.f32 %v13124_v16, %v13123_v42  ;;  %v13165_v12 = vadd.f32 %v13164_v15, %v13163_v43 }
 0x56c   :  { %v9268_v18 = vadd.f32 %v13125_v11, %v16148_v26  ;;  %v16180_v47 = vadd.f32 %v13162_v51, %v9265_v37 }
 0x56e   :  { %v13126_v3 = vpop.f32.mrb[100].mxu0  ;;  %v13166_v0 = vpop.f32.mrb[148].mxu1  ;;  %v16182_v41 = vadd.f32 %v13165_v12, %v9268_v18 }
 0x56f   :  { %v13127_v14 = vpop.f32.mrb[101].mxu0  ;;  %v13167_v7 = vpop.f32.mrb[149].mxu1 }
 0x570   :  { %v13128_v55 = vadd.f32 %v13127_v14, %v13126_v3  ;;  %v13129_v34 = vpop.f32.mrb[102].mxu0  ;;  %v13168_v36 = vadd.f32 %v13167_v7, %v13166_v0  ;;  %v13169_v63 = vpop.f32.mrb[150].mxu1  ;;  %v16196_v7 = vld [vmem:[#allocation8] sm:$0xff] }
 0x571   :  { %v13130_v9 = vpop.f32.mrb[103].mxu0  ;;  %v13170_v53 = vpop.f32.mrb[151].mxu1 }
 0x572   :  { %v9273_v29 = vadd.f32 %v13128_v55, %v16154_v32  ;;  %v13131_v21 = vadd.f32 %v13130_v9, %v13129_v34  ;;  %v13171_v30 = vadd.f32 %v13170_v53, %v13169_v63  ;;  %v11257_v55 = vsub.s32 3, %v15691_v54 }
 0x573   :  { %v16511_v34 = vsub.s32 0, %v15691_v54 }
 0x574   :  { %v9276_v26 = vadd.f32 %v13131_v21, %v16156_v49  ;;  %v16186_v28 = vadd.f32 %v13168_v36, %v9273_v29 }
 0x575   :  { %v16202_v36 = vrot.slane %v16196_v7, %v16511_v34 }
 0x576   :  { %v13132_v45 = vpop.f32.mrb[104].mxu0  ;;  %v13172_v5 = vpop.f32.mrb[152].mxu1  ;;  %v16188_v24 = vadd.f32 %v13171_v30, %v9276_v26  ;;  %v16216_v26 = vrot.slane %v16196_v7, %v11257_v55 }
 0x577   :  { %v13133_v42 = vpop.f32.mrb[105].mxu0  ;;  %v13173_v51 = vpop.f32.mrb[153].mxu1 }
 0x578   :  { %v13134_v43 = vadd.f32 %v13133_v42, %v13132_v45  ;;  %v13135_v16 = vpop.f32.mrb[106].mxu0  ;;  %v13174_v15 = vadd.f32 %v13173_v51, %v13172_v5  ;;  %v13175_v37 = vpop.f32.mrb[154].mxu1 }
 0x579   :  { %v13136_v11 = vpop.f32.mrb[107].mxu0  ;;  %v13176_v12 = vpop.f32.mrb[155].mxu1 }
 0x57a   :  { %v9281_v32 = vadd.f32 %v13134_v43, %v16162_v20  ;;  %v13137_v18 = vadd.f32 %v13136_v11, %v13135_v16  ;;  %v13177_v3 = vadd.f32 %v13176_v12, %v13175_v37  ;;  %v16512_v20 = vsub.s32 2, %v15691_v54 }
 0x57c   :  { %v9284_v49 = vadd.f32 %v13137_v18, %v16164_v23  ;;  %v16192_v0 = vadd.f32 %v13174_v15, %v9281_v32  ;;  %v16207_v9 = vrot.slane %v16196_v7, %v16512_v20  ;;  %v16513_v23 = vsub.s32 1, %v15691_v54  ;;  %v16514_v18 = vld [vmem:[#allocation13_spill] sm:$0xff] }
 0x57e   :  { %v16194_v14 = vadd.f32 %v13177_v3, %v9284_v49  ;;  %v16212_v53 = vrot.slane %v16196_v7, %v16513_v23 }
 0x5bf   :  { %v10700_v63 = vpop.f32.mrb[108].mxu0 }
 0x5c0   :  { %v11177_v29 = vadd.f32 %v10700_v63, %v15913_v6  ;;  %v10846_v21 = vpop.f32.mrb[156].mxu1  ;;  %v10702_v30 = vpop.f32.mrb[109].mxu0 }
 0x5c1   :  { %v11179_v45 = vadd.f32 %v10846_v21, %v15915_v8  ;;  %v11178_v5 = vadd.f32 %v10702_v30, %v15909_v58  ;;  %v10848_v42 = vpop.f32.mrb[157].mxu1  ;;  %v10704_v51 = vpop.f32.mrb[110].mxu0 }
 0x5c2   :  { %v11283_v43 = vadd.f32 %v16202_v36, %v11177_v29  ;;  %v11180_v16 = vadd.f32 %v10848_v42, %v16062_v13  ;;  %v11185_v15 = vadd.f32 %v10704_v51, %v15921_v52  ;;  %v10850_v37 = vpop.f32.mrb[158].mxu1  ;;  %v10706_v11 = vpop.f32.mrb[111].mxu0  ;;  %v16517_v51 = vld [vmem:[#allocation18_spill] sm:$0xff] }
 0x5c3   :  { %v11285_v6 = vadd.f32 %v16207_v9, %v11179_v45  ;;  %v11284_v12 = vadd.f32 %v16212_v53, %v11178_v5  ;;  %v11187_v32 = vadd.f32 %v10850_v37, %v15923_v40  ;;  %v11186_v8 = vadd.f32 %v10706_v11, %v16514_v18  ;;  %v10852_v3 = vpop.f32.mrb[159].mxu1  ;;  %v16516_v5 = vld [vmem:[#allocation20_spill] sm:$0xff] }
 0x5c4   :  { %v11286_v58 = vadd.f32 %v16216_v26, %v11180_v16  ;;  %v11291_v49 = vadd.f32 %v16202_v36, %v11185_v15  ;;  %v11188_v55 = vadd.f32 %v10852_v3, %v16070_v50  ;;  %v16515_v50 = vld [vmem:[#allocation19_spill] sm:$0xff] }
 0x5c5   :  { %v12986_v13 = vpack.c.bf16 %v11284_v12, %v11283_v43  ;;  %v11293_v52 = vadd.f32 %v16207_v9, %v11187_v32  ;;  %v11292_v34 = vadd.f32 %v16212_v53, %v11186_v8 }
 0x5c6   :  { %v12987_v63 = vpack.c.bf16 %v11286_v58, %v11285_v6  ;;  %v11294_v20 = vadd.f32 %v16216_v26, %v11188_v55  ;;  %v16518_v6 = vld [vmem:[#allocation22_spill] sm:$0xff]  ;;  %v16519_v58 = vld [vmem:[#allocation23_spill] sm:$0xff]  ;;  %v16520_v55 = vld [vmem:[#allocation21_spill] sm:$0xff] }
 0x5c7   :  { %11603 = vst [vmem:[%s16462_s5] sm:$0xff] %v12986_v13  ;;  %v12990_v40 = vpack.c.bf16 %v11292_v34, %v11291_v49  ;;  %v10710_v23 = vpop.f32.mrb[112].mxu0 }
 0x5c8   :  { %11604 = vst [vmem:[%s16462_s5 + $0x8] sm:$0xff] %v12987_v63  ;;  %v12991_v29 = vpack.c.bf16 %v11294_v20, %v11293_v52  ;;  %v11193_v21 = vadd.f32 %v10710_v23, %v16515_v50  ;;  %v10856_v30 = vpop.f32.mrb[160].mxu1  ;;  %v10712_v45 = vpop.f32.mrb[113].mxu0 }
 0x5c9   :  { %11607 = vst [vmem:[%s16462_s5 + $0x20] sm:$0xff] %v12990_v40  ;;  %v11195_v42 = vadd.f32 %v10856_v30, %v16516_v5  ;;  %v11194_v43 = vadd.f32 %v10712_v45, %v16517_v51  ;;  %v10858_v16 = vpop.f32.mrb[161].mxu1  ;;  %v10714_v15 = vpop.f32.mrb[114].mxu0 }
 0x5ca   :  { %11608 = vst [vmem:[%s16462_s5 + $0x28] sm:$0xff] %v12991_v29  ;;  %v11299_v37 = vadd.f32 %v16202_v36, %v11193_v21  ;;  %v11196_v11 = vadd.f32 %v10858_v16, %v16078_v57  ;;  %v11201_v12 = vadd.f32 %v10714_v15, %v16518_v6  ;;  %v10860_v32 = vpop.f32.mrb[162].mxu1  ;;  %v10716_v18 = vpop.f32.mrb[115].mxu0  ;;  %v16523_v15 = vld [vmem:[#allocation24_spill] sm:$0xff] }
 0x5cb   :  { %v11301_v8 = vadd.f32 %v16207_v9, %v11195_v42  ;;  %v11300_v3 = vadd.f32 %v16212_v53, %v11194_v43  ;;  %v11203_v49 = vadd.f32 %v10860_v32, %v16519_v58  ;;  %v11202_v13 = vadd.f32 %v10716_v18, %v16520_v55  ;;  %v10862_v52 = vpop.f32.mrb[163].mxu1  ;;  %v16522_v43 = vld [vmem:[#allocation26_spill] sm:$0xff]  ;;  %v16524_v18 = vld [vmem:[#allocation28_spill] sm:$0xff] }
 0x5cc   :  { %v11302_v34 = vadd.f32 %v16216_v26, %v11196_v11  ;;  %v11307_v63 = vadd.f32 %v16202_v36, %v11201_v12  ;;  %v11204_v20 = vadd.f32 %v10862_v52, %v16086_v35  ;;  %v16521_v35 = vld [vmem:[#allocation25_spill] sm:$0xff] }
 0x5cd   :  { %v12994_v57 = vpack.c.bf16 %v11300_v3, %v11299_v37  ;;  %v11309_v40 = vadd.f32 %v16207_v9, %v11203_v49  ;;  %v11308_v23 = vadd.f32 %v16212_v53, %v11202_v13  ;;  %v16525_v13 = vld [vmem:[#allocation29_spill] sm:$0xff] }
 0x5ce   :  { %v12995_v29 = vpack.c.bf16 %v11302_v34, %v11301_v8  ;;  %v11310_v50 = vadd.f32 %v16216_v26, %v11204_v20  ;;  %v16526_v34 = vld [vmem:[#allocation27_spill] sm:$0xff] }
 0x5cf   :  { %11611 = vst [vmem:[%s16462_s5 + $0x40] sm:$0xff] %v12994_v57  ;;  %v12998_v21 = vpack.c.bf16 %v11308_v23, %v11307_v63  ;;  %v10720_v30 = vpop.f32.mrb[116].mxu0 }
 0x5d0   :  { %11612 = vst [vmem:[%s16462_s5 + $0x48] sm:$0xff] %v12995_v29  ;;  %v12999_v45 = vpack.c.bf16 %v11310_v50, %v11309_v40  ;;  %v11209_v5 = vadd.f32 %v10720_v30, %v16521_v35  ;;  %v10866_v42 = vpop.f32.mrb[164].mxu1  ;;  %v10722_v51 = vpop.f32.mrb[117].mxu0 }
 0x5d1   :  { %11615 = vst [vmem:[%s16462_s5 + $0x60] sm:$0xff] %v12998_v21  ;;  %v11211_v16 = vadd.f32 %v10866_v42, %v16522_v43  ;;  %v11210_v37 = vadd.f32 %v10722_v51, %v16523_v15  ;;  %v10868_v11 = vpop.f32.mrb[165].mxu1  ;;  %v10724_v6 = vpop.f32.mrb[118].mxu0  ;;  %v16527_v43 = vld [vmem:[#allocation31_spill] sm:$0xff]  ;;  %v16528_v15 = vld [vmem:[#allocation30_spill] sm:$0xff] }
 0x5d2   :  { %11616 = vst [vmem:[%s16462_s5 + $0x68] sm:$0xff] %v12999_v45  ;;  %v11315_v12 = vadd.f32 %v16202_v36, %v11209_v5  ;;  %v11212_v32 = vadd.f32 %v10868_v11, %v16098_v10  ;;  %v11217_v8 = vadd.f32 %v10724_v6, %v16524_v18  ;;  %v10870_v3 = vpop.f32.mrb[166].mxu1  ;;  %v10726_v58 = vpop.f32.mrb[119].mxu0 }
 0x5d3   :  { %v11317_v49 = vadd.f32 %v16207_v9, %v11211_v16  ;;  %v11316_v55 = vadd.f32 %v16212_v53, %v11210_v37  ;;  %v11219_v52 = vadd.f32 %v10870_v3, %v16525_v13  ;;  %v11218_v63 = vadd.f32 %v10726_v58, %v16526_v34  ;;  %v10872_v20 = vpop.f32.mrb[167].mxu1  ;;  %v16530_v13 = vld [vmem:[#allocation32_spill] sm:$0xff] }
 0x5d4   :  { %v11318_v57 = vadd.f32 %v16216_v26, %v11212_v32  ;;  %v11323_v40 = vadd.f32 %v16202_v36, %v11217_v8  ;;  %v11220_v23 = vadd.f32 %v10872_v20, %v16106_v27 }
 0x5d5   :  { %v13002_v10 = vpack.c.bf16 %v11316_v55, %v11315_v12  ;;  %v11325_v29 = vadd.f32 %v16207_v9, %v11219_v52  ;;  %v11324_v50 = vadd.f32 %v16212_v53, %v11218_v63 }
 0x5d6   :  { %v13003_v21 = vpack.c.bf16 %v11318_v57, %v11317_v49  ;;  %v11326_v30 = vadd.f32 %v16216_v26, %v11220_v23  ;;  %v16529_v49 = vld [vmem:[#allocation33_spill] sm:$0xff] }
 0x5d7   :  { %11619 = vst [vmem:[%s16462_s5 + $0x80] sm:$0xff] %v13002_v10  ;;  %v13006_v45 = vpack.c.bf16 %v11324_v50, %v11323_v40  ;;  %v10730_v35 = vpop.f32.mrb[120].mxu0 }
 0x5d8   :  { %11620 = vst [vmem:[%s16462_s5 + $0x88] sm:$0xff] %v13003_v21  ;;  %v13007_v5 = vpack.c.bf16 %v11326_v30, %v11325_v29  ;;  %v11225_v27 = vadd.f32 %v10730_v35, %v15967_v44  ;;  %v10876_v42 = vpop.f32.mrb[168].mxu1  ;;  %v10732_v51 = vpop.f32.mrb[121].mxu0 }
 0x5d9   :  { %11623 = vst [vmem:[%s16462_s5 + $0xa0] sm:$0xff] %v13006_v45  ;;  %v11227_v16 = vadd.f32 %v10876_v42, %v16527_v43  ;;  %v11226_v37 = vadd.f32 %v10732_v51, %v16528_v15  ;;  %v10878_v11 = vpop.f32.mrb[169].mxu1  ;;  %v10734_v6 = vpop.f32.mrb[122].mxu0 }
 0x5da   :  { %11624 = vst [vmem:[%s16462_s5 + $0xa8] sm:$0xff] %v13007_v5  ;;  %v11331_v12 = vadd.f32 %v16202_v36, %v11225_v27  ;;  %v11228_v44 = vadd.f32 %v10878_v11, %v16118_v56  ;;  %v11233_v32 = vadd.f32 %v10734_v6, %v15974_v25  ;;  %v10880_v18 = vpop.f32.mrb[170].mxu1  ;;  %v10736_v8 = vpop.f32.mrb[123].mxu0 }
 0x5db   :  { %v11333_v3 = vadd.f32 %v16207_v9, %v11227_v16  ;;  %v11332_v58 = vadd.f32 %v16212_v53, %v11226_v37  ;;  %v11235_v55 = vadd.f32 %v10880_v18, %v16529_v49  ;;  %v11234_v52 = vadd.f32 %v10736_v8, %v16530_v13  ;;  %v10882_v34 = vpop.f32.mrb[171].mxu1 }
 0x5dc   :  { %v11334_v63 = vadd.f32 %v16216_v26, %v11228_v44  ;;  %v11339_v20 = vadd.f32 %v16202_v36, %v11233_v32  ;;  %v11236_v57 = vadd.f32 %v10882_v34, %v16126_v61  ;;  %v11261_v61 = vsub.s32 4, %v15691_v54 }
 0x5dd   :  { %v13010_v56 = vpack.c.bf16 %v11332_v58, %v11331_v12  ;;  %v11341_v25 = vadd.f32 %v16207_v9, %v11235_v55  ;;  %v11340_v40 = vadd.f32 %v16212_v53, %v11234_v52  ;;  %v11269_v9 = vsub.s32 6, %v15691_v54 }
 0x5de   :  { %v13011_v23 = vpack.c.bf16 %v11334_v63, %v11333_v3  ;;  %v11342_v10 = vadd.f32 %v16216_v26, %v11236_v57  ;;  %v11265_v53 = vsub.s32 5, %v15691_v54  ;;  %v11273_v26 = vsub.s32 7, %v15691_v54 }
 0x5df   :  { %11627 = vst [vmem:[%s16462_s5 + $0xc0] sm:$0xff] %v13010_v56  ;;  %v13014_v29 = vpack.c.bf16 %v11340_v40, %v11339_v20  ;;  %v16334_v50 = vrot.slane %v16196_v7, %v11261_v61  ;;  %v16337_v30 = vrot.slane %v16196_v7, %v11269_v9 }
 0x5e0   :  { %11628 = vst [vmem:[%s16462_s5 + $0xc8] sm:$0xff] %v13011_v23  ;;  %v13015_v36 = vpack.c.bf16 %v11342_v10, %v11341_v25  ;;  %v16340_v45 = vrot.slane %v16196_v7, %v11265_v53  ;;  %v16344_v42 = vrot.slane %v16196_v7, %v11273_v26 }
 0x5e1   :  { %11631 = vst [vmem:[%s16462_s5 + $0xe0] sm:$0xff] %v13014_v29 }
 0x5e2   :  { %11632 = vst [vmem:[%s16462_s5 + $0xe8] sm:$0xff] %v13015_v36 }
 0x620   :  { %v10992_v21 = vpop.f32.mrb[124].mxu0 }
 0x621   :  { %v11181_v35 = vadd.f32 %v10992_v21, %v16066_v38  ;;  %v11138_v5 = vpop.f32.mrb[172].mxu1  ;;  %v10994_v27 = vpop.f32.mrb[125].mxu0 }
 0x622   :  { %v11183_v51 = vadd.f32 %v11138_v5, %v16068_v62  ;;  %v11182_v54 = vadd.f32 %v10994_v27, %v16064_v33  ;;  %v11140_v43 = vpop.f32.mrb[173].mxu1  ;;  %v10996_v16 = vpop.f32.mrb[126].mxu0 }
 0x623   :  { %v11287_v15 = vadd.f32 %v16334_v50, %v11181_v35  ;;  %v11184_v37 = vadd.f32 %v11140_v43, %v16172_v2  ;;  %v11189_v11 = vadd.f32 %v10996_v16, %v16074_v22  ;;  %v11142_v6 = vpop.f32.mrb[174].mxu1  ;;  %v10998_v12 = vpop.f32.mrb[127].mxu0  ;;  %v16532_v16 = vld [vmem:[#allocation14_spill] sm:$0xff] }
 0x624   :  { %v11289_v38 = vadd.f32 %v16337_v30, %v11183_v51  ;;  %v11288_v44 = vadd.f32 %v16340_v45, %v11182_v54  ;;  %v11191_v7 = vadd.f32 %v11142_v6, %v16076_v17  ;;  %v11190_v62 = vadd.f32 %v10998_v12, %v16072_v48  ;;  %v11144_v32 = vpop.f32.mrb[175].mxu1  ;;  %v16531_v54 = vld [vmem:[#allocation15_spill] sm:$0xff]  ;;  %v16533_v12 = vld [vmem:[#allocation17_spill] sm:$0xff] }
 0x625   :  { %v11290_v33 = vadd.f32 %v16344_v42, %v11184_v37  ;;  %v11295_v18 = vadd.f32 %v16334_v50, %v11189_v11  ;;  %v11192_v8 = vadd.f32 %v11144_v32, %v16176_v4 }
 0x626   :  { %v12988_v2 = vpack.c.bf16 %v11288_v44, %v11287_v15  ;;  %v11297_v22 = vadd.f32 %v16337_v30, %v11191_v7  ;;  %v11296_v3 = vadd.f32 %v16340_v45, %v11190_v62 }
 0x627   :  { %v12989_v58 = vpack.c.bf16 %v11290_v33, %v11289_v38  ;;  %v11298_v49 = vadd.f32 %v16344_v42, %v11192_v8  ;;  %v16534_v33 = vld [vmem:[#allocation34_spill] sm:$0xff]  ;;  %v16535_v8 = vld [vmem:[#allocation16_spill] sm:$0xff] }
 0x628   :  { %11605 = vst [vmem:[%s16462_s5 + $0x10] sm:$0xff] %v12988_v2  ;;  %v12992_v48 = vpack.c.bf16 %v11296_v3, %v11295_v18  ;;  %v11002_v17 = vpop.f32.mrb[128].mxu0 }
 0x629   :  { %11606 = vst [vmem:[%s16462_s5 + $0x18] sm:$0xff] %v12989_v58  ;;  %v12993_v55 = vpack.c.bf16 %v11298_v49, %v11297_v22  ;;  %v11197_v4 = vadd.f32 %v11002_v17, %v16082_v31  ;;  %v11148_v13 = vpop.f32.mrb[176].mxu1  ;;  %v11004_v52 = vpop.f32.mrb[129].mxu0 }
 0x62a   :  { %11609 = vst [vmem:[%s16462_s5 + $0x30] sm:$0xff] %v12992_v48  ;;  %v11199_v34 = vadd.f32 %v11148_v13, %v16084_v19  ;;  %v11198_v63 = vadd.f32 %v11004_v52, %v16080_v39  ;;  %v11150_v20 = vpop.f32.mrb[177].mxu1  ;;  %v11006_v57 = vpop.f32.mrb[130].mxu0 }
 0x62b   :  { %11610 = vst [vmem:[%s16462_s5 + $0x38] sm:$0xff] %v12993_v55  ;;  %v11303_v56 = vadd.f32 %v16334_v50, %v11197_v4  ;;  %v11200_v31 = vadd.f32 %v11150_v20, %v16180_v47  ;;  %v11205_v25 = vadd.f32 %v11006_v57, %v16090_v46  ;;  %v11152_v40 = vpop.f32.mrb[178].mxu1  ;;  %v11008_v23 = vpop.f32.mrb[131].mxu0 }
 0x62c   :  { %v11305_v10 = vadd.f32 %v16337_v30, %v11199_v34  ;;  %v11304_v19 = vadd.f32 %v16340_v45, %v11198_v63  ;;  %v11207_v39 = vadd.f32 %v11152_v40, %v16092_v59  ;;  %v11206_v29 = vadd.f32 %v11008_v23, %v16088_v1  ;;  %v11154_v36 = vpop.f32.mrb[179].mxu1 }
 0x62d   :  { %v11306_v61 = vadd.f32 %v16344_v42, %v11200_v31  ;;  %v11311_v9 = vadd.f32 %v16334_v50, %v11205_v25  ;;  %v11208_v53 = vadd.f32 %v11154_v36, %v16182_v41  ;;  %v16538_v25 = vld [vmem:[#allocation35_spill] sm:$0xff] }
 0x62e   :  { %v12996_v47 = vpack.c.bf16 %v11304_v19, %v11303_v56  ;;  %v11313_v46 = vadd.f32 %v16337_v30, %v11207_v39  ;;  %v11312_v26 = vadd.f32 %v16340_v45, %v11206_v29  ;;  %v16537_v56 = vld [vmem:[#allocation37_spill] sm:$0xff]  ;;  %v16539_v29 = vld [vmem:[#allocation39_spill] sm:$0xff] }
 0x62f   :  { %v12997_v21 = vpack.c.bf16 %v11306_v61, %v11305_v10  ;;  %v11314_v35 = vadd.f32 %v16344_v42, %v11208_v53 }
 0x630   :  { %11613 = vst [vmem:[%s16462_s5 + $0x50] sm:$0xff] %v12996_v47  ;;  %v13000_v1 = vpack.c.bf16 %v11312_v26, %v11311_v9  ;;  %v11012_v59 = vpop.f32.mrb[132].mxu0 }
 0x631   :  { %11614 = vst [vmem:[%s16462_s5 + $0x58] sm:$0xff] %v12997_v21  ;;  %v13001_v5 = vpack.c.bf16 %v11314_v35, %v11313_v46  ;;  %v11213_v41 = vadd.f32 %v11012_v59, %v16102_v60  ;;  %v11158_v27 = vpop.f32.mrb[180].mxu1  ;;  %v11014_v51 = vpop.f32.mrb[133].mxu0  ;;  %v16540_v46 = vld [vmem:[#allocation40_spill] sm:$0xff]  ;;  %v16541_v21 = vld [vmem:[#allocation38_spill] sm:$0xff] }
 0x632   :  { %11617 = vst [vmem:[%s16462_s5 + $0x70] sm:$0xff] %v13000_v1  ;;  %v11215_v43 = vadd.f32 %v11158_v27, %v16531_v54  ;;  %v11214_v15 = vadd.f32 %v11014_v51, %v16532_v16  ;;  %v11160_v37 = vpop.f32.mrb[181].mxu1  ;;  %v11016_v11 = vpop.f32.mrb[134].mxu0 }
 0x633   :  { %11618 = vst [vmem:[%s16462_s5 + $0x78] sm:$0xff] %v13001_v5  ;;  %v11319_v6 = vadd.f32 %v16334_v50, %v11213_v41  ;;  %v11216_v60 = vadd.f32 %v11160_v37, %v16186_v28  ;;  %v11221_v38 = vadd.f32 %v11016_v11, %v16533_v12  ;;  %v11162_v44 = vpop.f32.mrb[182].mxu1  ;;  %v11018_v7 = vpop.f32.mrb[135].mxu0 }
 0x634   :  { %v11321_v62 = vadd.f32 %v16337_v30, %v11215_v43  ;;  %v11320_v32 = vadd.f32 %v16340_v45, %v11214_v15  ;;  %v11223_v18 = vadd.f32 %v11162_v44, %v16534_v33  ;;  %v11222_v2 = vadd.f32 %v11018_v7, %v16535_v8  ;;  %v11164_v22 = vpop.f32.mrb[183].mxu1 }
 0x635   :  { %v11322_v3 = vadd.f32 %v16344_v42, %v11216_v60  ;;  %v11327_v58 = vadd.f32 %v16334_v50, %v11221_v38  ;;  %v11224_v49 = vadd.f32 %v11164_v22, %v16188_v24  ;;  %v16536_v24 = vld [vmem:[#allocation36_spill] sm:$0xff] }
 0x636   :  { %v13004_v28 = vpack.c.bf16 %v11320_v32, %v11319_v6  ;;  %v11329_v48 = vadd.f32 %v16337_v30, %v11223_v18  ;;  %v11328_v17 = vadd.f32 %v16340_v45, %v11222_v2 }
 0x637   :  { %v13005_v55 = vpack.c.bf16 %v11322_v3, %v11321_v62  ;;  %v11330_v4 = vadd.f32 %v16344_v42, %v11224_v49 }
 0x638   :  { %11621 = vst [vmem:[%s16462_s5 + $0x90] sm:$0xff] %v13004_v28  ;;  %v13008_v13 = vpack.c.bf16 %v11328_v17, %v11327_v58  ;;  %v11022_v52 = vpop.f32.mrb[136].mxu0 }
 0x639   :  { %11622 = vst [vmem:[%s16462_s5 + $0x98] sm:$0xff] %v13005_v55  ;;  %v13009_v34 = vpack.c.bf16 %v11330_v4, %v11329_v48  ;;  %v11229_v63 = vadd.f32 %v11022_v52, %v16536_v24  ;;  %v11168_v20 = vpop.f32.mrb[184].mxu1  ;;  %v11024_v57 = vpop.f32.mrb[137].mxu0 }
 0x63a   :  { %11625 = vst [vmem:[%s16462_s5 + $0xb0] sm:$0xff] %v13008_v13  ;;  %v11231_v31 = vadd.f32 %v11168_v20, %v16537_v56  ;;  %v11230_v40 = vadd.f32 %v11024_v57, %v16538_v25  ;;  %v11170_v23 = vpop.f32.mrb[185].mxu1  ;;  %v11026_v10 = vpop.f32.mrb[138].mxu0 }
 0x63b   :  { %11626 = vst [vmem:[%s16462_s5 + $0xb8] sm:$0xff] %v13009_v34  ;;  %v11335_v19 = vadd.f32 %v16334_v50, %v11229_v63  ;;  %v11232_v39 = vadd.f32 %v11170_v23, %v16192_v0  ;;  %v11237_v36 = vadd.f32 %v11026_v10, %v16539_v29  ;;  %v11172_v61 = vpop.f32.mrb[186].mxu1  ;;  %v11028_v9 = vpop.f32.mrb[139].mxu0 }
 0x63c   :  { %v11337_v53 = vadd.f32 %v16337_v30, %v11231_v31  ;;  %v11336_v47 = vadd.f32 %v16340_v45, %v11230_v40  ;;  %v11239_v26 = vadd.f32 %v11172_v61, %v16540_v46  ;;  %v11238_v35 = vadd.f32 %v11028_v9, %v16541_v21  ;;  %v11174_v1 = vpop.f32.mrb[187].mxu1 }
 0x63d   :  { %v11338_v59 = vadd.f32 %v16344_v42, %v11232_v39  ;;  %v11343_v5 = vadd.f32 %v16334_v50, %v11237_v36  ;;  %v11240_v41 = vadd.f32 %v11174_v1, %v16194_v14 }
 0x63e   :  { %v13012_v0 = vpack.c.bf16 %v11336_v47, %v11335_v19  ;;  %v11345_v27 = vadd.f32 %v16337_v30, %v11239_v26  ;;  %v11344_v51 = vadd.f32 %v16340_v45, %v11238_v35 }
 0x63f   :  { %v13013_v54 = vpack.c.bf16 %v11338_v59, %v11337_v53  ;;  %v11346_v43 = vadd.f32 %v16344_v42, %v11240_v41 }
 0x640   :  { %11629 = vst [vmem:[%s16462_s5 + $0xd0] sm:$0xff] %v13012_v0  ;;  %v13016_v16 = vpack.c.bf16 %v11344_v51, %v11343_v5 }
 0x641   :  { %11630 = vst [vmem:[%s16462_s5 + $0xd8] sm:$0xff] %v13013_v54  ;;  %v13017_v50 = vpack.c.bf16 %v11346_v43, %v11345_v27 }
 0x642   :  { %11633 = vst [vmem:[%s16462_s5 + $0xf0] sm:$0xff] %v13016_v16 }
 0x643   :  { %11634 = vst [vmem:[%s16462_s5 + $0xf8] sm:$0xff] %v13017_v50 }
 0x644   :  { %11639 = vsyncpa [#allocation4], 1 }
 0x645   :  { %11640 = vsyncpa [#allocation6], 1 }
 0x646   :  { %11641 = vsyncpa [#allocation9], 1 }

</bundles_post_ra>
